<compile_context>
chip_gen: v7x
topology: tpu7x:2x2x1
jax: 0.10.0
libtpu: 0.0.40
codegen_flags: <defaults>
</compile_context>

<pallas_src>
import functools

import jax
import jax.numpy as jnp
from jax.experimental import pallas as pl
from jax.experimental.pallas import tpu as pltpu

X_DIM = 784
H_DIM = 400
H_PAD = 512           # hidden dim zero-padded to a lane-dense multiple of 128
Z_DIM = 20
ML_DIM = 2 * Z_DIM    # fused mean/lvar head width
N_LABELS = 10
BN_EPS = 1e-3
ALPHA = 0.1


def _round_up(n, m):
    return ((n + m - 1) // m) * m


def _hw_defaults():
    """Return (max batch-tile rows, vmem_limit_bytes) tuned per TPU generation."""
    vmem_cap = None
    try:
        vmem_cap = int(pltpu.get_tpu_info().vmem_capacity_bytes)
    except Exception:
        pass
    if vmem_cap is None:
        try:
            kind = jax.devices()[0].device_kind.lower()
        except Exception:
            kind = ""
        vmem_cap = 64 * 1024 * 1024 if ("v7" in kind or "tpu7" in kind) else 128 * 1024 * 1024
    if vmem_cap <= 64 * 1024 * 1024:
        # v7x-class: 64 MiB VMEM per TC, both TCs share HBM bandwidth.
        return 256, 40 * 1024 * 1024
    # v5e / v6e: 128 MiB VMEM.
    return 512, 64 * 1024 * 1024


def m2_ff_kernel(
    # gridded inputs
    x_ref, y_ref,
    # VMEM-resident params (bf16 weights, f32 biases; BN folded; hidden dim padded to 512)
    w_enc_cls_ref, b_enc_cls_ref,      # (784, 1024), (1, 1024)  fused en0|cl0 layer-0
    w_ml_ref, b_ml_ref,                # (512, 40),   (1, 40)    fused mean|lvar (BN folded)
    w_cl1_ref, b_cl1_ref,              # (512, 10),   (1, 10)
    w_dez_z_ref, w_dez_y_ref, b_dez_ref,   # (20, 512), (10, 512), (1, 512)
    w_de0_ref, b_de0_ref,              # (512, 784),  (1, 784)
    # outputs
    recon_x_ref, probs_ref, ml_ref, loss_ref,
    *, n_valid, tb,
):
    i = pl.program_id(0)
    x_bf = x_ref[...]                         # (TB, 784) bf16, values in [0, 1]
    x = x_bf.astype(jnp.float32)              # f32 copy for the BCE terms
    y = y_ref[...]                            # (TB, 1)   i32 labels

    # ---------------- fused encoder / classifier layer-0 ----------------
    # x_dropout is identity in eval mode.  One (784, 1024) matmul + one bias+ReLU.
    h = jnp.maximum(
        jnp.dot(x_bf, w_enc_cls_ref[...], preferred_element_type=jnp.float32)
        + b_enc_cls_ref[...], 0.0)                                         # (TB, 1024)
    en0 = h[:, :H_PAD].astype(jnp.bfloat16)   # lane-tile-aligned slice     (TB, 512)
    cl0 = h[:, H_PAD:].astype(jnp.bfloat16)                              #  (TB, 512)

    # fused mean/lvar head with eval-mode BatchNorm pre-folded into the weights.
    ml = (jnp.dot(en0, w_ml_ref[...], preferred_element_type=jnp.float32)
          + b_ml_ref[...])                                                 # (TB, 40)
    mean_bn = ml[:, :Z_DIM]                                                # (TB, 20)
    lvar_bn = ml[:, Z_DIM:]                                                # (TB, 20)

    # classifier head
    logits = (jnp.dot(cl0, w_cl1_ref[...], preferred_element_type=jnp.float32)
              + b_cl1_ref[...])                                            # (TB, 10)
    lmax = jnp.max(logits, axis=-1, keepdims=True)
    lexp = jnp.exp(logits - lmax)
    # exact reciprocal: the denominator is only (TB, 1) and feeds returned y_probs + YCE.
    probs = lexp * pl.reciprocal(jnp.sum(lexp, axis=-1, keepdims=True))    # softmax

    # ---------------- sample (eval): z = mean_bn ----------------
    # ---------------- decode ----------------
    # concat([z, onehot(y)]) @ W_dez split into two dots to avoid a lane-axis concat.
    onehot = (jax.lax.broadcasted_iota(jnp.int32, (tb, N_LABELS), 1)
              == y).astype(jnp.float32)                                    # (TB, 10)
    de_pre = (jnp.dot(mean_bn.astype(jnp.bfloat16), w_dez_z_ref[...],
                      preferred_element_type=jnp.float32)
              + jnp.dot(onehot.astype(jnp.bfloat16), w_dez_y_ref[...],
                        preferred_element_type=jnp.float32)
              + b_dez_ref[...])
    de0 = jnp.maximum(de_pre, 0.0).astype(jnp.bfloat16)                    # (TB, 512)
    u = (jnp.dot(de0, w_de0_ref[...], preferred_element_type=jnp.float32)
         + b_de0_ref[...])                                                 # (TB, 784) logits

    # sigmoid + BCE terms from logits, sharing exp(-|u|):
    #   log sigma(u) = -softplus(-u),  log(1 - sigma(u)) = -softplus(u)
    e = jnp.exp(-jnp.abs(u))                       # in (0, 1]
    log1pe = jnp.log(1.0 + e)                      # softplus(-|u|)
    log_rx = jnp.maximum(-(jnp.maximum(-u, 0.0) + log1pe), -100.0)   # torch's -100 clamp
    log_1m = jnp.maximum(-(jnp.maximum(u, 0.0) + log1pe), -100.0)
    inv = pl.reciprocal(1.0 + e, approx=True)      # EUP-only divide (~2^-12 rel error)
    x_recon = jnp.where(u >= 0.0, inv, e * inv)    # sigmoid(u)

    # ---------------- loss (per-tile partial; padded rows masked) ----------------
    rows = i * tb + jax.lax.broadcasted_iota(jnp.int32, (tb, 1), 0)
    valid = (rows < n_valid).astype(jnp.float32)                     # (TB, 1)

    # BCE summed over all elements (size_average=False).
    bce = -jnp.sum(valid * (x * log_rx + (1.0 - x) * log_1m))
    # KLD over batch-normalized mean / logvar (as in the torch module).
    kld = -0.5 * jnp.sum(valid * (1.0 + lvar_bn - mean_bn * mean_bn - jnp.exp(lvar_bn)))
    # F.cross_entropy applied on top of the *probabilities* (exactly as in torch).
    pmax = jnp.max(probs, axis=-1, keepdims=True)
    lse = jnp.log(jnp.sum(jnp.exp(probs - pmax), axis=-1, keepdims=True)) + pmax
    yce = -jnp.sum(valid * onehot * (probs - lse)) / jnp.float32(n_valid)

    partial = (1.0 - ALPHA) * (bce + kld) + ALPHA * yce

    recon_x_ref[...] = x_recon
    probs_ref[...] = probs
    ml_ref[...] = ml
    # Broadcast the tile's scalar loss into its (8, 128) output block (tiling-friendly);
    # the wrapper reads element [0, 0] of each block and sums.
    loss_ref[...] = jnp.broadcast_to(partial, loss_ref.shape)


def init_params(key):
    """Deterministic parameter init (torch nn.Linear-style uniform(-1/sqrt(fan_in), ...))."""
    def linear(k, fan_in, fan_out):
        kw, kb = jax.random.split(k)
        lim = 1.0 / jnp.sqrt(jnp.float32(fan_in))
        w = jax.random.uniform(kw, (fan_in, fan_out), jnp.float32, -lim, lim)
        b = jax.random.uniform(kb, (1, fan_out), jnp.float32, -lim, lim)
        return w, b

    keys = jax.random.split(key, 8)
    p = {}
    p["w_en0"], p["b_en0"] = linear(keys[0], X_DIM, H_DIM)
    p["w_mean"], p["b_mean"] = linear(keys[1], H_DIM, Z_DIM)
    p["w_lvar"], p["b_lvar"] = linear(keys[2], H_DIM, Z_DIM)
    p["w_cl0"], p["b_cl0"] = linear(keys[3], X_DIM, H_DIM)
    p["w_cl1"], p["b_cl1"] = linear(keys[4], H_DIM, N_LABELS)
    w_dez, p["b_dez"] = linear(keys[5], Z_DIM + N_LABELS, H_DIM)
    p["w_dez_z"] = w_dez[:Z_DIM]      # (20, 400)
    p["w_dez_y"] = w_dez[Z_DIM:]      # (10, 400)
    p["w_de0"], p["b_de0"] = linear(keys[6], H_DIM, X_DIM)
    # BatchNorm1d params / running stats (torch defaults), stored as (1, Z_DIM).
    for prefix in ("bnm", "bnl"):
        p[f"{prefix}_g"] = jnp.ones((1, Z_DIM), jnp.float32)
        p[f"{prefix}_b"] = jnp.zeros((1, Z_DIM), jnp.float32)
        p[f"{prefix}_rm"] = jnp.zeros((1, Z_DIM), jnp.float32)
        p[f"{prefix}_rv"] = jnp.ones((1, Z_DIM), jnp.float32)
    return p


def _pad_cols(a, n):
    return jnp.pad(a, ((0, 0), (0, n - a.shape[1])))


def _pad_rows(a, n):
    return jnp.pad(a, ((0, n - a.shape[0]), (0, 0)))


@functools.partial(jax.jit, static_argnames=("single_buffer_weights",))
def _m2_ff_forward_impl(x_nchw, y, params, single_buffer_weights=True):
    batch = x_nchw.shape[0]
    # bf16 x halves the dominant HBM read; it is the MXU operand dtype anyway.
    x = x_nchw.reshape(batch, X_DIM).astype(jnp.bfloat16)   # glue: NCHW -> (B, 784)
    y2d = y.astype(jnp.int32).reshape(batch, 1)

    bf = lambda w: w.astype(jnp.bfloat16)

    # ----- param prep: fold eval-mode BatchNorm into mean/lvar Linear, fuse the two
    # heads into one (H, 40) matmul, fuse en0/cl0 layer-0, and zero-pad H 400 -> 512. -----
    def fold_bn(w, b, g, beta, rm, rv):
        s = g * jax.lax.rsqrt(rv + BN_EPS)          # (1, Z)
        return w * s, (b - rm) * s + beta
    w_mean_f, b_mean_f = fold_bn(params["w_mean"], params["b_mean"], params["bnm_g"],
                                 params["bnm_b"], params["bnm_rm"], params["bnm_rv"])
    w_lvar_f, b_lvar_f = fold_bn(params["w_lvar"], params["b_lvar"], params["bnl_g"],
                                 params["bnl_b"], params["bnl_rm"], params["bnl_rv"])
    w_ml = _pad_rows(jnp.concatenate([w_mean_f, w_lvar_f], axis=1), H_PAD)   # (512, 40)
    b_ml = jnp.concatenate([b_mean_f, b_lvar_f], axis=1)                     # (1, 40)

    # Fused (784, 1024) layer-0 weight: cols [0, 512) encoder, [512, 1024) classifier.
    w_enc_cls = jnp.concatenate(
        [_pad_cols(params["w_en0"], H_PAD), _pad_cols(params["w_cl0"], H_PAD)], axis=1)
    b_enc_cls = jnp.concatenate(
        [_pad_cols(params["b_en0"], H_PAD), _pad_cols(params["b_cl0"], H_PAD)], axis=1)

    w_cl1 = _pad_rows(params["w_cl1"], H_PAD)        # (512, 10)
    w_dez_z = _pad_cols(params["w_dez_z"], H_PAD)    # (20, 512)
    w_dez_y = _pad_cols(params["w_dez_y"], H_PAD)    # (10, 512)
    b_dez = _pad_cols(params["b_dez"], H_PAD)        # (1, 512)
    w_de0 = _pad_rows(params["w_de0"], H_PAD)        # (512, 784)

    ordered_params = [
        bf(w_enc_cls), b_enc_cls,
        bf(w_ml), b_ml,
        bf(w_cl1), params["b_cl1"],
        bf(w_dez_z), bf(w_dez_y), b_dez,
        bf(w_de0), params["b_de0"],
    ]

    # ----- generation-aware batch tiling / VMEM budget -----
    tb_max, vmem_limit = _hw_defaults()
    tb = min(tb_max, _round_up(batch, 8))
    padded = _round_up(batch, tb)
    if padded != batch:
        x = jnp.pad(x, ((0, padded - batch), (0, 0)))
        y2d = jnp.pad(y2d, ((0, padded - batch), (0, 0)))
    num_tiles = padded // tb

    tile_spec = lambda dim: pl.BlockSpec((tb, dim), lambda i: (i, 0))
    if single_buffer_weights:
        # Constant index_map -> never re-fetched; drop the unused second pipeline buffer.
        resident_spec = lambda a: pl.BlockSpec(a.shape, lambda i: (0, 0),
                                               pipeline_mode=pl.Buffered(1))
    else:
        resident_spec = lambda a: pl.BlockSpec(a.shape, lambda i: (0, 0))

    kernel = functools.partial(m2_ff_kernel, n_valid=batch, tb=tb)

    recon_x, probs, ml, loss_tiles = pl.pallas_call(
        kernel,
        grid=(num_tiles,),
        in_specs=[tile_spec(X_DIM), tile_spec(1)]
                 + [resident_spec(a) for a in ordered_params],
        out_specs=(
            tile_spec(X_DIM),
            tile_spec(N_LABELS),
            tile_spec(ML_DIM),
            pl.BlockSpec((8, 128), lambda i: (i, 0)),   # per-tile partial loss block
        ),
        out_shape=(
            jax.ShapeDtypeStruct((padded, X_DIM), jnp.float32),
            jax.ShapeDtypeStruct((padded, N_LABELS), jnp.float32),
            jax.ShapeDtypeStruct((padded, ML_DIM), jnp.float32),
            jax.ShapeDtypeStruct((num_tiles * 8, 128), jnp.float32),
        ),
        compiler_params=pltpu.CompilerParams(
            dimension_semantics=("parallel",),            # v7x megacore; harmless elsewhere
            vmem_limit_bytes=vmem_limit,
        ),
    )(x, y2d, *ordered_params)

    loss = jnp.sum(loss_tiles.reshape(num_tiles, 8, 128)[:, 0, 0])
    recon_x = recon_x[:batch]
    probs = probs[:batch]
    ml = ml[:batch]

    return {
        "x": x_nchw,
        "recon_x": recon_x,
        "loss": loss,
        "y": y,
        "recon_y": jnp.argmax(probs, axis=-1),   # glue
        "y_probs": probs,
        "mean_bn": ml[:, :Z_DIM],
        "lvar_bn": ml[:, Z_DIM:],
    }


def m2_ff_forward(x_nchw, y, params):
    try:
        return _m2_ff_forward_impl(x_nchw, y, params, single_buffer_weights=True)
    except Exception:
        # Fallback for jax versions that reject BlockSpec(pipeline_mode=pl.Buffered(1)).
        return _m2_ff_forward_impl(x_nchw, y, params, single_buffer_weights=False)


if __name__ == "__main__":
    key = jax.random.PRNGKey(0)
    k_x, k_y, k_p = jax.random.split(key, 3)

    BATCH = 8
    x = jax.random.uniform(k_x, (BATCH, 1, 28, 28), jnp.float32)   # MNIST-like, in [0, 1]
    y = jax.random.randint(k_y, (BATCH,), 0, N_LABELS, jnp.int32)
    params = init_params(k_p)

    out = m2_ff_forward(x, y, params)
    jax.block_until_ready(out)

    assert out["recon_x"].shape == (BATCH, X_DIM)
    assert out["y_probs"].shape == (BATCH, N_LABELS)
    assert out["recon_y"].shape == (BATCH,)
    assert out["mean_bn"].shape == (BATCH, Z_DIM)
    assert out["lvar_bn"].shape == (BATCH, Z_DIM)
    assert out["loss"].shape == ()
    assert bool(jnp.isfinite(out["loss"]))
    assert bool(jnp.all(jnp.isfinite(out["recon_x"])))
    assert bool(jnp.all(jnp.isfinite(out["y_probs"])))

    print("KERNEL_OK")
</pallas_src>

<mosaic_0001>
module attributes {stable_mosaic.version = 11 : i64} {
  func.func @m2_ff_kernel(%arg0: i32, %arg1: memref<8x784xbf16, #tpu.memory_space<vmem>>, %arg2: memref<8x1xi32, #tpu.memory_space<vmem>>, %arg3: memref<784x1024xbf16, #tpu.memory_space<vmem>>, %arg4: memref<1x1024xf32, #tpu.memory_space<vmem>>, %arg5: memref<512x40xbf16, #tpu.memory_space<vmem>>, %arg6: memref<1x40xf32, #tpu.memory_space<vmem>>, %arg7: memref<512x10xbf16, #tpu.memory_space<vmem>>, %arg8: memref<1x10xf32, #tpu.memory_space<vmem>>, %arg9: memref<20x512xbf16, #tpu.memory_space<vmem>>, %arg10: memref<10x512xbf16, #tpu.memory_space<vmem>>, %arg11: memref<1x512xf32, #tpu.memory_space<vmem>>, %arg12: memref<512x784xbf16, #tpu.memory_space<vmem>>, %arg13: memref<1x784xf32, #tpu.memory_space<vmem>>, %arg14: memref<8x784xf32, #tpu.memory_space<vmem>>, %arg15: memref<8x10xf32, #tpu.memory_space<vmem>>, %arg16: memref<8x40xf32, #tpu.memory_space<vmem>>, %arg17: memref<8x128xf32, #tpu.memory_space<vmem>>) attributes {dimension_semantics = [#tpu.dimension_semantics<parallel>], iteration_bounds = array<i64: 1>, scalar_prefetch = 0 : i64, scratch_operands = 0 : i64, tpu.core_type = #tpu.core_type<tc>, window_params = [{transform_indices = @transform_0, window_bounds = array<i64: 8, 784>}, {transform_indices = @transform_1, window_bounds = array<i64: 8, 1>}, {pipeline_mode = #tpu.pipeline_mode<synchronous>, transform_indices = @transform_2, window_bounds = array<i64: 784, 1024>}, {pipeline_mode = #tpu.pipeline_mode<synchronous>, transform_indices = @transform_3, window_bounds = array<i64: 1, 1024>}, {pipeline_mode = #tpu.pipeline_mode<synchronous>, transform_indices = @transform_4, window_bounds = array<i64: 512, 40>}, {pipeline_mode = #tpu.pipeline_mode<synchronous>, transform_indices = @transform_5, window_bounds = array<i64: 1, 40>}, {pipeline_mode = #tpu.pipeline_mode<synchronous>, transform_indices = @transform_6, window_bounds = array<i64: 512, 10>}, {pipeline_mode = #tpu.pipeline_mode<synchronous>, transform_indices = @transform_7, window_bounds = array<i64: 1, 10>}, {pipeline_mode = #tpu.pipeline_mode<synchronous>, transform_indices = @transform_8, window_bounds = array<i64: 20, 512>}, {pipeline_mode = #tpu.pipeline_mode<synchronous>, transform_indices = @transform_9, window_bounds = array<i64: 10, 512>}, {pipeline_mode = #tpu.pipeline_mode<synchronous>, transform_indices = @transform_10, window_bounds = array<i64: 1, 512>}, {pipeline_mode = #tpu.pipeline_mode<synchronous>, transform_indices = @transform_11, window_bounds = array<i64: 512, 784>}, {pipeline_mode = #tpu.pipeline_mode<synchronous>, transform_indices = @transform_12, window_bounds = array<i64: 1, 784>}, {transform_indices = @transform_13, window_bounds = array<i64: 8, 784>}, {transform_indices = @transform_14, window_bounds = array<i64: 8, 10>}, {transform_indices = @transform_15, window_bounds = array<i64: 8, 40>}, {transform_indices = @transform_16, window_bounds = array<i64: 8, 128>}]} {
    %c0 = arith.constant 0 : index
    %c0_0 = arith.constant 0 : index
    %0 = vector.load %arg1[%c0, %c0_0] : memref<8x784xbf16, #tpu.memory_space<vmem>>, vector<8x784xbf16>
    %1 = arith.extf %0 : vector<8x784xbf16> to vector<8x784xf32>
    %c0_1 = arith.constant 0 : index
    %c0_2 = arith.constant 0 : index
    %2 = vector.load %arg2[%c0_1, %c0_2] : memref<8x1xi32, #tpu.memory_space<vmem>>, vector<8x1xi32>
    %c0_3 = arith.constant 0 : index
    %c0_4 = arith.constant 0 : index
    %3 = vector.load %arg3[%c0_3, %c0_4] : memref<784x1024xbf16, #tpu.memory_space<vmem>>, vector<784x1024xbf16>
    %cst = arith.constant dense<0.000000e+00> : vector<8x1024xf32>
    %4 = tpu.matmul %0, %3, %cst {dimension_numbers = #tpu.dot_dimension_numbers<[1], [0], [0], [1], [0, 0, 1, 1], [], []>} : vector<8x784xbf16>, vector<784x1024xbf16>, vector<8x1024xf32> -> vector<8x1024xf32>
    %c0_5 = arith.constant 0 : index
    %c0_6 = arith.constant 0 : index
    %5 = vector.load %arg4[%c0_5, %c0_6] : memref<1x1024xf32, #tpu.memory_space<vmem>>, vector<1x1024xf32>
    %6 = vector.broadcast %5 : vector<1x1024xf32> to vector<8x1024xf32>
    %7 = arith.addf %4, %6 : vector<8x1024xf32>
    %cst_7 = arith.constant 0.000000e+00 : f32
    %8 = vector.broadcast %cst_7 : f32 to vector<8x1024xf32>
    %9 = arith.maximumf %7, %8 : vector<8x1024xf32>
    %10 = vector.extract_strided_slice %9 {offsets = [0, 0], sizes = [8, 512], strides = [1, 1]} : vector<8x1024xf32> to vector<8x512xf32>
    %11 = arith.truncf %10 : vector<8x512xf32> to vector<8x512xbf16>
    %12 = vector.extract_strided_slice %9 {offsets = [0, 512], sizes = [8, 512], strides = [1, 1]} : vector<8x1024xf32> to vector<8x512xf32>
    %13 = arith.truncf %12 : vector<8x512xf32> to vector<8x512xbf16>
    %c0_8 = arith.constant 0 : index
    %c0_9 = arith.constant 0 : index
    %14 = vector.load %arg5[%c0_8, %c0_9] : memref<512x40xbf16, #tpu.memory_space<vmem>>, vector<512x40xbf16>
    %cst_10 = arith.constant dense<0.000000e+00> : vector<8x40xf32>
    %15 = tpu.matmul %11, %14, %cst_10 {dimension_numbers = #tpu.dot_dimension_numbers<[1], [0], [0], [1], [0, 0, 1, 1], [], []>} : vector<8x512xbf16>, vector<512x40xbf16>, vector<8x40xf32> -> vector<8x40xf32>
    %c0_11 = arith.constant 0 : index
    %c0_12 = arith.constant 0 : index
    %16 = vector.load %arg6[%c0_11, %c0_12] : memref<1x40xf32, #tpu.memory_space<vmem>>, vector<1x40xf32>
    %17 = vector.broadcast %16 : vector<1x40xf32> to vector<8x40xf32>
    %18 = arith.addf %15, %17 : vector<8x40xf32>
    %19 = vector.extract_strided_slice %18 {offsets = [0, 0], sizes = [8, 20], strides = [1, 1]} : vector<8x40xf32> to vector<8x20xf32>
    %20 = vector.extract_strided_slice %18 {offsets = [0, 20], sizes = [8, 20], strides = [1, 1]} : vector<8x40xf32> to vector<8x20xf32>
    %c0_13 = arith.constant 0 : index
    %c0_14 = arith.constant 0 : index
    %21 = vector.load %arg7[%c0_13, %c0_14] : memref<512x10xbf16, #tpu.memory_space<vmem>>, vector<512x10xbf16>
    %cst_15 = arith.constant dense<0.000000e+00> : vector<8x10xf32>
    %22 = tpu.matmul %13, %21, %cst_15 {dimension_numbers = #tpu.dot_dimension_numbers<[1], [0], [0], [1], [0, 0, 1, 1], [], []>} : vector<8x512xbf16>, vector<512x10xbf16>, vector<8x10xf32> -> vector<8x10xf32>
    %c0_16 = arith.constant 0 : index
    %c0_17 = arith.constant 0 : index
    %23 = vector.load %arg8[%c0_16, %c0_17] : memref<1x10xf32, #tpu.memory_space<vmem>>, vector<1x10xf32>
    %24 = vector.broadcast %23 : vector<1x10xf32> to vector<8x10xf32>
    %25 = arith.addf %22, %24 : vector<8x10xf32>
    %cst_18 = arith.constant dense<0xFF800000> : vector<8xf32>
    %26 = vector.multi_reduction <maximumf>, %25, %cst_18 [1] : vector<8x10xf32> to vector<8xf32>
    %27 = vector.shape_cast %26 : vector<8xf32> to vector<8x1xf32>
    %28 = vector.broadcast %27 : vector<8x1xf32> to vector<8x10xf32>
    %29 = arith.subf %25, %28 : vector<8x10xf32>
    %30 = math.exp %29 : vector<8x10xf32>
    %cst_19 = arith.constant dense<0.000000e+00> : vector<8xf32>
    %31 = vector.multi_reduction <add>, %30, %cst_19 [1] : vector<8x10xf32> to vector<8xf32>
    %32 = vector.shape_cast %31 : vector<8xf32> to vector<8x1xf32>
    %33 = tpu.reciprocal %32 : vector<8x1xf32> -> vector<8x1xf32>
    %34 = vector.broadcast %33 : vector<8x1xf32> to vector<8x10xf32>
    %35 = arith.mulf %30, %34 : vector<8x10xf32>
    %36 = tpu.iota {dimensions = array<i32: 1>} : vector<8x10xi32>
    %37 = vector.broadcast %2 : vector<8x1xi32> to vector<8x10xi32>
    %38 = arith.cmpi eq, %36, %37 : vector<8x10xi32>
    %39 = arith.extui %38 : vector<8x10xi1> to vector<8x10xi32>
    %40 = arith.sitofp %39 : vector<8x10xi32> to vector<8x10xf32>
    %41 = arith.truncf %19 : vector<8x20xf32> to vector<8x20xbf16>
    %c0_20 = arith.constant 0 : index
    %c0_21 = arith.constant 0 : index
    %42 = vector.load %arg9[%c0_20, %c0_21] : memref<20x512xbf16, #tpu.memory_space<vmem>>, vector<20x512xbf16>
    %cst_22 = arith.constant dense<0.000000e+00> : vector<8x512xf32>
    %43 = tpu.matmul %41, %42, %cst_22 {dimension_numbers = #tpu.dot_dimension_numbers<[1], [0], [0], [1], [0, 0, 1, 1], [], []>} : vector<8x20xbf16>, vector<20x512xbf16>, vector<8x512xf32> -> vector<8x512xf32>
    %44 = arith.truncf %40 : vector<8x10xf32> to vector<8x10xbf16>
    %c0_23 = arith.constant 0 : index
    %c0_24 = arith.constant 0 : index
    %45 = vector.load %arg10[%c0_23, %c0_24] : memref<10x512xbf16, #tpu.memory_space<vmem>>, vector<10x512xbf16>
    %cst_25 = arith.constant dense<0.000000e+00> : vector<8x512xf32>
    %46 = tpu.matmul %44, %45, %cst_25 {dimension_numbers = #tpu.dot_dimension_numbers<[1], [0], [0], [1], [0, 0, 1, 1], [], []>} : vector<8x10xbf16>, vector<10x512xbf16>, vector<8x512xf32> -> vector<8x512xf32>
    %47 = arith.addf %43, %46 : vector<8x512xf32>
    %c0_26 = arith.constant 0 : index
    %c0_27 = arith.constant 0 : index
    %48 = vector.load %arg11[%c0_26, %c0_27] : memref<1x512xf32, #tpu.memory_space<vmem>>, vector<1x512xf32>
    %49 = vector.broadcast %48 : vector<1x512xf32> to vector<8x512xf32>
    %50 = arith.addf %47, %49 : vector<8x512xf32>
    %cst_28 = arith.constant 0.000000e+00 : f32
    %51 = vector.broadcast %cst_28 : f32 to vector<8x512xf32>
    %52 = arith.maximumf %50, %51 : vector<8x512xf32>
    %53 = arith.truncf %52 : vector<8x512xf32> to vector<8x512xbf16>
    %c0_29 = arith.constant 0 : index
    %c0_30 = arith.constant 0 : index
    %54 = vector.load %arg12[%c0_29, %c0_30] : memref<512x784xbf16, #tpu.memory_space<vmem>>, vector<512x784xbf16>
    %cst_31 = arith.constant dense<0.000000e+00> : vector<8x784xf32>
    %55 = tpu.matmul %53, %54, %cst_31 {dimension_numbers = #tpu.dot_dimension_numbers<[1], [0], [0], [1], [0, 0, 1, 1], [], []>} : vector<8x512xbf16>, vector<512x784xbf16>, vector<8x784xf32> -> vector<8x784xf32>
    %c0_32 = arith.constant 0 : index
    %c0_33 = arith.constant 0 : index
    %56 = vector.load %arg13[%c0_32, %c0_33] : memref<1x784xf32, #tpu.memory_space<vmem>>, vector<1x784xf32>
    %57 = vector.broadcast %56 : vector<1x784xf32> to vector<8x784xf32>
    %58 = arith.addf %55, %57 : vector<8x784xf32>
    %59 = math.absf %58 : vector<8x784xf32>
    %cst_34 = arith.constant 0.000000e+00 : f32
    %60 = vector.broadcast %cst_34 : f32 to vector<8x784xf32>
    %61 = arith.subf %60, %59 : vector<8x784xf32>
    %62 = math.exp %61 : vector<8x784xf32>
    %cst_35 = arith.constant 1.000000e+00 : f32
    %63 = vector.broadcast %cst_35 : f32 to vector<8x784xf32>
    %64 = arith.addf %63, %62 : vector<8x784xf32>
    %65 = math.log %64 : vector<8x784xf32>
    %cst_36 = arith.constant 0.000000e+00 : f32
    %66 = vector.broadcast %cst_36 : f32 to vector<8x784xf32>
    %67 = arith.subf %66, %58 : vector<8x784xf32>
    %cst_37 = arith.constant 0.000000e+00 : f32
    %68 = vector.broadcast %cst_37 : f32 to vector<8x784xf32>
    %69 = arith.maximumf %67, %68 : vector<8x784xf32>
    %70 = arith.addf %69, %65 : vector<8x784xf32>
    %cst_38 = arith.constant 0.000000e+00 : f32
    %71 = vector.broadcast %cst_38 : f32 to vector<8x784xf32>
    %72 = arith.subf %71, %70 : vector<8x784xf32>
    %cst_39 = arith.constant -1.000000e+02 : f32
    %73 = vector.broadcast %cst_39 : f32 to vector<8x784xf32>
    %74 = arith.maximumf %72, %73 : vector<8x784xf32>
    %cst_40 = arith.constant 0.000000e+00 : f32
    %75 = vector.broadcast %cst_40 : f32 to vector<8x784xf32>
    %76 = arith.maximumf %58, %75 : vector<8x784xf32>
    %77 = arith.addf %76, %65 : vector<8x784xf32>
    %cst_41 = arith.constant 0.000000e+00 : f32
    %78 = vector.broadcast %cst_41 : f32 to vector<8x784xf32>
    %79 = arith.subf %78, %77 : vector<8x784xf32>
    %cst_42 = arith.constant -1.000000e+02 : f32
    %80 = vector.broadcast %cst_42 : f32 to vector<8x784xf32>
    %81 = arith.maximumf %79, %80 : vector<8x784xf32>
    %cst_43 = arith.constant 1.000000e+00 : f32
    %82 = vector.broadcast %cst_43 : f32 to vector<8x784xf32>
    %83 = arith.addf %82, %62 : vector<8x784xf32>
    %84 = tpu.reciprocal %83 {approx = true} : vector<8x784xf32> -> vector<8x784xf32>
    %cst_44 = arith.constant 0.000000e+00 : f32
    %85 = vector.broadcast %cst_44 : f32 to vector<8x784xf32>
    %86 = arith.cmpf oge, %58, %85 : vector<8x784xf32>
    %87 = arith.mulf %62, %84 : vector<8x784xf32>
    %88 = arith.select %86, %84, %87 : vector<8x784xi1>, vector<8x784xf32>
    %c8_i32 = arith.constant 8 : i32
    %89 = arith.muli %arg0, %c8_i32 : i32
    %90 = tpu.iota {dimensions = array<i32: 0>} : vector<8x1xi32>
    %91 = vector.broadcast %89 : i32 to vector<8x1xi32>
    %92 = arith.addi %91, %90 : vector<8x1xi32>
    %c8_i32_45 = arith.constant 8 : i32
    %93 = vector.broadcast %c8_i32_45 : i32 to vector<8x1xi32>
    %94 = arith.cmpi slt, %92, %93 : vector<8x1xi32>
    %95 = arith.extui %94 : vector<8x1xi1> to vector<8x1xi32>
    %96 = arith.sitofp %95 : vector<8x1xi32> to vector<8x1xf32>
    %97 = arith.mulf %1, %74 : vector<8x784xf32>
    %cst_46 = arith.constant 1.000000e+00 : f32
    %98 = vector.broadcast %cst_46 : f32 to vector<8x784xf32>
    %99 = arith.subf %98, %1 : vector<8x784xf32>
    %100 = arith.mulf %99, %81 : vector<8x784xf32>
    %101 = arith.addf %97, %100 : vector<8x784xf32>
    %102 = vector.broadcast %96 : vector<8x1xf32> to vector<8x784xf32>
    %103 = arith.mulf %102, %101 : vector<8x784xf32>
    %104 = vector.shape_cast %103 : vector<8x784xf32> to vector<1x8x784xf32>
    %cst_47 = arith.constant dense<0.000000e+00> : vector<1xf32>
    %105 = vector.multi_reduction <add>, %104, %cst_47 [1, 2] : vector<1x8x784xf32> to vector<1xf32>
    %106 = vector.shape_cast %105 : vector<1xf32> to vector<1x1x1xf32>
    %107 = vector.extract %106[0, 0, 0] : f32 from vector<1x1x1xf32>
    %cst_48 = arith.constant 0.000000e+00 : f32
    %108 = arith.subf %cst_48, %107 : f32
    %cst_49 = arith.constant 1.000000e+00 : f32
    %109 = vector.broadcast %cst_49 : f32 to vector<8x20xf32>
    %110 = arith.addf %109, %20 : vector<8x20xf32>
    %111 = arith.mulf %19, %19 : vector<8x20xf32>
    %112 = arith.subf %110, %111 : vector<8x20xf32>
    %113 = math.exp %20 : vector<8x20xf32>
    %114 = arith.subf %112, %113 : vector<8x20xf32>
    %115 = vector.broadcast %96 : vector<8x1xf32> to vector<8x20xf32>
    %116 = arith.mulf %115, %114 : vector<8x20xf32>
    %117 = vector.shape_cast %116 : vector<8x20xf32> to vector<1x8x20xf32>
    %cst_50 = arith.constant dense<0.000000e+00> : vector<1xf32>
    %118 = vector.multi_reduction <add>, %117, %cst_50 [1, 2] : vector<1x8x20xf32> to vector<1xf32>
    %119 = vector.shape_cast %118 : vector<1xf32> to vector<1x1x1xf32>
    %120 = vector.extract %119[0, 0, 0] : f32 from vector<1x1x1xf32>
    %cst_51 = arith.constant -5.000000e-01 : f32
    %121 = arith.mulf %cst_51, %120 : f32
    %cst_52 = arith.constant dense<0xFF800000> : vector<8xf32>
    %122 = vector.multi_reduction <maximumf>, %35, %cst_52 [1] : vector<8x10xf32> to vector<8xf32>
    %123 = vector.shape_cast %122 : vector<8xf32> to vector<8x1xf32>
    %124 = vector.broadcast %123 : vector<8x1xf32> to vector<8x10xf32>
    %125 = arith.subf %35, %124 : vector<8x10xf32>
    %126 = math.exp %125 : vector<8x10xf32>
    %cst_53 = arith.constant dense<0.000000e+00> : vector<8xf32>
    %127 = vector.multi_reduction <add>, %126, %cst_53 [1] : vector<8x10xf32> to vector<8xf32>
    %128 = vector.shape_cast %127 : vector<8xf32> to vector<8x1xf32>
    %129 = math.log %128 : vector<8x1xf32>
    %130 = arith.addf %129, %123 : vector<8x1xf32>
    %131 = vector.broadcast %96 : vector<8x1xf32> to vector<8x10xf32>
    %132 = arith.mulf %131, %40 : vector<8x10xf32>
    %133 = vector.broadcast %130 : vector<8x1xf32> to vector<8x10xf32>
    %134 = arith.subf %35, %133 : vector<8x10xf32>
    %135 = arith.mulf %132, %134 : vector<8x10xf32>
    %136 = vector.shape_cast %135 : vector<8x10xf32> to vector<1x8x10xf32>
    %cst_54 = arith.constant dense<0.000000e+00> : vector<1xf32>
    %137 = vector.multi_reduction <add>, %136, %cst_54 [1, 2] : vector<1x8x10xf32> to vector<1xf32>
    %138 = vector.shape_cast %137 : vector<1xf32> to vector<1x1x1xf32>
    %139 = vector.extract %138[0, 0, 0] : f32 from vector<1x1x1xf32>
    %cst_55 = arith.constant 0.000000e+00 : f32
    %140 = arith.subf %cst_55, %139 : f32
    %cst_56 = arith.constant 8.000000e+00 : f32
    %141 = arith.divf %140, %cst_56 : f32
    %142 = arith.addf %108, %121 : f32
    %cst_57 = arith.constant 0.899999976 : f32
    %143 = arith.mulf %cst_57, %142 : f32
    %cst_58 = arith.constant 1.000000e-01 : f32
    %144 = arith.mulf %cst_58, %141 : f32
    %145 = arith.addf %143, %144 : f32
    %c0_59 = arith.constant 0 : index
    %c0_60 = arith.constant 0 : index
    %146 = vector.load %arg14[%c0_59, %c0_60] : memref<8x784xf32, #tpu.memory_space<vmem>>, vector<8x784xf32>
    tpu.vector_store %arg14[%c0_59, %c0_60], %88 {strides = array<i32>} : memref<8x784xf32, #tpu.memory_space<vmem>>, vector<8x784xf32>,
    %c0_61 = arith.constant 0 : index
    %c0_62 = arith.constant 0 : index
    %147 = vector.load %arg15[%c0_61, %c0_62] : memref<8x10xf32, #tpu.memory_space<vmem>>, vector<8x10xf32>
    tpu.vector_store %arg15[%c0_61, %c0_62], %35 {strides = array<i32>} : memref<8x10xf32, #tpu.memory_space<vmem>>, vector<8x10xf32>,
    %c0_63 = arith.constant 0 : index
    %c0_64 = arith.constant 0 : index
    %148 = vector.load %arg16[%c0_63, %c0_64] : memref<8x40xf32, #tpu.memory_space<vmem>>, vector<8x40xf32>
    tpu.vector_store %arg16[%c0_63, %c0_64], %18 {strides = array<i32>} : memref<8x40xf32, #tpu.memory_space<vmem>>, vector<8x40xf32>,
    %149 = vector.broadcast %145 : f32 to vector<8x128xf32>
    %c0_65 = arith.constant 0 : index
    %c0_66 = arith.constant 0 : index
    %150 = vector.load %arg17[%c0_65, %c0_66] : memref<8x128xf32, #tpu.memory_space<vmem>>, vector<8x128xf32>
    tpu.vector_store %arg17[%c0_65, %c0_66], %149 {strides = array<i32>} : memref<8x128xf32, #tpu.memory_space<vmem>>, vector<8x128xf32>,
    return
  }
  func.func @transform_0(%arg0: i32) -> (i32, i32) {
    %c0_i32 = arith.constant 0 : i32
    %c0_i32_0 = arith.constant 0 : i32
    return %arg0, %c0_i32 : i32, i32
  }
  func.func @transform_1(%arg0: i32) -> (i32, i32) {
    %c0_i32 = arith.constant 0 : i32
    %c0_i32_0 = arith.constant 0 : i32
    return %arg0, %c0_i32 : i32, i32
  }
  func.func @transform_2(%arg0: i32) -> (i32, i32) {
    %c0_i32 = arith.constant 0 : i32
    %c0_i32_0 = arith.constant 0 : i32
    %c0_i32_1 = arith.constant 0 : i32
    return %c0_i32, %c0_i32_0 : i32, i32
  }
  func.func @transform_3(%arg0: i32) -> (i32, i32) {
    %c0_i32 = arith.constant 0 : i32
    %c0_i32_0 = arith.constant 0 : i32
    %c0_i32_1 = arith.constant 0 : i32
    return %c0_i32, %c0_i32_0 : i32, i32
  }
  func.func @transform_4(%arg0: i32) -> (i32, i32) {
    %c0_i32 = arith.constant 0 : i32
    %c0_i32_0 = arith.constant 0 : i32
    %c0_i32_1 = arith.constant 0 : i32
    return %c0_i32, %c0_i32_0 : i32, i32
  }
  func.func @transform_5(%arg0: i32) -> (i32, i32) {
    %c0_i32 = arith.constant 0 : i32
    %c0_i32_0 = arith.constant 0 : i32
    %c0_i32_1 = arith.constant 0 : i32
    return %c0_i32, %c0_i32_0 : i32, i32
  }
  func.func @transform_6(%arg0: i32) -> (i32, i32) {
    %c0_i32 = arith.constant 0 : i32
    %c0_i32_0 = arith.constant 0 : i32
    %c0_i32_1 = arith.constant 0 : i32
    return %c0_i32, %c0_i32_0 : i32, i32
  }
  func.func @transform_7(%arg0: i32) -> (i32, i32) {
    %c0_i32 = arith.constant 0 : i32
    %c0_i32_0 = arith.constant 0 : i32
    %c0_i32_1 = arith.constant 0 : i32
    return %c0_i32, %c0_i32_0 : i32, i32
  }
  func.func @transform_8(%arg0: i32) -> (i32, i32) {
    %c0_i32 = arith.constant 0 : i32
    %c0_i32_0 = arith.constant 0 : i32
    %c0_i32_1 = arith.constant 0 : i32
    return %c0_i32, %c0_i32_0 : i32, i32
  }
  func.func @transform_9(%arg0: i32) -> (i32, i32) {
    %c0_i32 = arith.constant 0 : i32
    %c0_i32_0 = arith.constant 0 : i32
    %c0_i32_1 = arith.constant 0 : i32
    return %c0_i32, %c0_i32_0 : i32, i32
  }
  func.func @transform_10(%arg0: i32) -> (i32, i32) {
    %c0_i32 = arith.constant 0 : i32
    %c0_i32_0 = arith.constant 0 : i32
    %c0_i32_1 = arith.constant 0 : i32
    return %c0_i32, %c0_i32_0 : i32, i32
  }
  func.func @transform_11(%arg0: i32) -> (i32, i32) {
    %c0_i32 = arith.constant 0 : i32
    %c0_i32_0 = arith.constant 0 : i32
    %c0_i32_1 = arith.constant 0 : i32
    return %c0_i32, %c0_i32_0 : i32, i32
  }
  func.func @transform_12(%arg0: i32) -> (i32, i32) {
    %c0_i32 = arith.constant 0 : i32
    %c0_i32_0 = arith.constant 0 : i32
    %c0_i32_1 = arith.constant 0 : i32
    return %c0_i32, %c0_i32_0 : i32, i32
  }
  func.func @transform_13(%arg0: i32) -> (i32, i32) {
    %c0_i32 = arith.constant 0 : i32
    %c0_i32_0 = arith.constant 0 : i32
    return %arg0, %c0_i32 : i32, i32
  }
  func.func @transform_14(%arg0: i32) -> (i32, i32) {
    %c0_i32 = arith.constant 0 : i32
    %c0_i32_0 = arith.constant 0 : i32
    return %arg0, %c0_i32 : i32, i32
  }
  func.func @transform_15(%arg0: i32) -> (i32, i32) {
    %c0_i32 = arith.constant 0 : i32
    %c0_i32_0 = arith.constant 0 : i32
    return %arg0, %c0_i32 : i32, i32
  }
  func.func @transform_16(%arg0: i32) -> (i32, i32) {
    %c0_i32 = arith.constant 0 : i32
    %c0_i32_0 = arith.constant 0 : i32
    return %arg0, %c0_i32 : i32, i32
  }
}

module attributes {stable_mosaic.version = 11 : i64} {
  func.func @m2_ff_kernel(%arg0: i32, %arg1: memref<8x784xbf16, #tpu.memory_space<vmem>>, %arg2: memref<8x1xi32, #tpu.memory_space<vmem>>, %arg3: memref<784x1024xbf16, #tpu.memory_space<vmem>>, %arg4: memref<1x1024xf32, #tpu.memory_space<vmem>>, %arg5: memref<512x40xbf16, #tpu.memory_space<vmem>>, %arg6: memref<1x40xf32, #tpu.memory_space<vmem>>, %arg7: memref<512x10xbf16, #tpu.memory_space<vmem>>, %arg8: memref<1x10xf32, #tpu.memory_space<vmem>>, %arg9: memref<20x512xbf16, #tpu.memory_space<vmem>>, %arg10: memref<10x512xbf16, #tpu.memory_space<vmem>>, %arg11: memref<1x512xf32, #tpu.memory_space<vmem>>, %arg12: memref<512x784xbf16, #tpu.memory_space<vmem>>, %arg13: memref<1x784xf32, #tpu.memory_space<vmem>>, %arg14: memref<8x784xf32, #tpu.memory_space<vmem>>, %arg15: memref<8x10xf32, #tpu.memory_space<vmem>>, %arg16: memref<8x40xf32, #tpu.memory_space<vmem>>, %arg17: memref<8x128xf32, #tpu.memory_space<vmem>>) attributes {dimension_semantics = [#tpu.dimension_semantics<parallel>], iteration_bounds = array<i64: 1>, scalar_prefetch = 0 : i64, scratch_operands = 0 : i64, tpu.core_type = #tpu.core_type<tc>, window_params = [{transform_indices = @transform_0, window_bounds = array<i64: 8, 784>}, {transform_indices = @transform_1, window_bounds = array<i64: 8, 1>}, {pipeline_mode = #tpu.pipeline_mode<synchronous>, transform_indices = @transform_2, window_bounds = array<i64: 784, 1024>}, {pipeline_mode = #tpu.pipeline_mode<synchronous>, transform_indices = @transform_3, window_bounds = array<i64: 1, 1024>}, {pipeline_mode = #tpu.pipeline_mode<synchronous>, transform_indices = @transform_4, window_bounds = array<i64: 512, 40>}, {pipeline_mode = #tpu.pipeline_mode<synchronous>, transform_indices = @transform_5, window_bounds = array<i64: 1, 40>}, {pipeline_mode = #tpu.pipeline_mode<synchronous>, transform_indices = @transform_6, window_bounds = array<i64: 512, 10>}, {pipeline_mode = #tpu.pipeline_mode<synchronous>, transform_indices = @transform_7, window_bounds = array<i64: 1, 10>}, {pipeline_mode = #tpu.pipeline_mode<synchronous>, transform_indices = @transform_8, window_bounds = array<i64: 20, 512>}, {pipeline_mode = #tpu.pipeline_mode<synchronous>, transform_indices = @transform_9, window_bounds = array<i64: 10, 512>}, {pipeline_mode = #tpu.pipeline_mode<synchronous>, transform_indices = @transform_10, window_bounds = array<i64: 1, 512>}, {pipeline_mode = #tpu.pipeline_mode<synchronous>, transform_indices = @transform_11, window_bounds = array<i64: 512, 784>}, {pipeline_mode = #tpu.pipeline_mode<synchronous>, transform_indices = @transform_12, window_bounds = array<i64: 1, 784>}, {transform_indices = @transform_13, window_bounds = array<i64: 8, 784>}, {transform_indices = @transform_14, window_bounds = array<i64: 8, 10>}, {transform_indices = @transform_15, window_bounds = array<i64: 8, 40>}, {transform_indices = @transform_16, window_bounds = array<i64: 8, 128>}]} {
    %c0 = arith.constant 0 : index
    %c0_0 = arith.constant 0 : index
    %0 = vector.load %arg1[%c0, %c0_0] : memref<8x784xbf16, #tpu.memory_space<vmem>>, vector<8x784xbf16>
    %1 = arith.extf %0 : vector<8x784xbf16> to vector<8x784xf32>
    %c0_1 = arith.constant 0 : index
    %c0_2 = arith.constant 0 : index
    %2 = vector.load %arg2[%c0_1, %c0_2] : memref<8x1xi32, #tpu.memory_space<vmem>>, vector<8x1xi32>
    %c0_3 = arith.constant 0 : index
    %c0_4 = arith.constant 0 : index
    %3 = vector.load %arg3[%c0_3, %c0_4] : memref<784x1024xbf16, #tpu.memory_space<vmem>>, vector<784x1024xbf16>
    %cst = arith.constant dense<0.000000e+00> : vector<8x1024xf32>
    %4 = tpu.matmul %0, %3, %cst {dimension_numbers = #tpu.dot_dimension_numbers<[1], [0], [0], [1], [0, 0, 1, 1], [], []>} : vector<8x784xbf16>, vector<784x1024xbf16>, vector<8x1024xf32> -> vector<8x1024xf32>
    %c0_5 = arith.constant 0 : index
    %c0_6 = arith.constant 0 : index
    %5 = vector.load %arg4[%c0_5, %c0_6] : memref<1x1024xf32, #tpu.memory_space<vmem>>, vector<1x1024xf32>
    %6 = vector.broadcast %5 : vector<1x1024xf32> to vector<8x1024xf32>
    %7 = arith.addf %4, %6 : vector<8x1024xf32>
    %cst_7 = arith.constant 0.000000e+00 : f32
    %8 = vector.broadcast %cst_7 : f32 to vector<8x1024xf32>
    %9 = arith.maximumf %7, %8 : vector<8x1024xf32>
    %10 = vector.extract_strided_slice %9 {offsets = [0, 0], sizes = [8, 512], strides = [1, 1]} : vector<8x1024xf32> to vector<8x512xf32>
    %11 = arith.truncf %10 : vector<8x512xf32> to vector<8x512xbf16>
    %12 = vector.extract_strided_slice %9 {offsets = [0, 512], sizes = [8, 512], strides = [1, 1]} : vector<8x1024xf32> to vector<8x512xf32>
    %13 = arith.truncf %12 : vector<8x512xf32> to vector<8x512xbf16>
    %c0_8 = arith.constant 0 : index
    %c0_9 = arith.constant 0 : index
    %14 = vector.load %arg5[%c0_8, %c0_9] : memref<512x40xbf16, #tpu.memory_space<vmem>>, vector<512x40xbf16>
    %cst_10 = arith.constant dense<0.000000e+00> : vector<8x40xf32>
    %15 = tpu.matmul %11, %14, %cst_10 {dimension_numbers = #tpu.dot_dimension_numbers<[1], [0], [0], [1], [0, 0, 1, 1], [], []>} : vector<8x512xbf16>, vector<512x40xbf16>, vector<8x40xf32> -> vector<8x40xf32>
    %c0_11 = arith.constant 0 : index
    %c0_12 = arith.constant 0 : index
    %16 = vector.load %arg6[%c0_11, %c0_12] : memref<1x40xf32, #tpu.memory_space<vmem>>, vector<1x40xf32>
    %17 = vector.broadcast %16 : vector<1x40xf32> to vector<8x40xf32>
    %18 = arith.addf %15, %17 : vector<8x40xf32>
    %19 = vector.extract_strided_slice %18 {offsets = [0, 0], sizes = [8, 20], strides = [1, 1]} : vector<8x40xf32> to vector<8x20xf32>
    %20 = vector.extract_strided_slice %18 {offsets = [0, 20], sizes = [8, 20], strides = [1, 1]} : vector<8x40xf32> to vector<8x20xf32>
    %c0_13 = arith.constant 0 : index
    %c0_14 = arith.constant 0 : index
    %21 = vector.load %arg7[%c0_13, %c0_14] : memref<512x10xbf16, #tpu.memory_space<vmem>>, vector<512x10xbf16>
    %cst_15 = arith.constant dense<0.000000e+00> : vector<8x10xf32>
    %22 = tpu.matmul %13, %21, %cst_15 {dimension_numbers = #tpu.dot_dimension_numbers<[1], [0], [0], [1], [0, 0, 1, 1], [], []>} : vector<8x512xbf16>, vector<512x10xbf16>, vector<8x10xf32> -> vector<8x10xf32>
    %c0_16 = arith.constant 0 : index
    %c0_17 = arith.constant 0 : index
    %23 = vector.load %arg8[%c0_16, %c0_17] : memref<1x10xf32, #tpu.memory_space<vmem>>, vector<1x10xf32>
    %24 = vector.broadcast %23 : vector<1x10xf32> to vector<8x10xf32>
    %25 = arith.addf %22, %24 : vector<8x10xf32>
    %cst_18 = arith.constant dense<0xFF800000> : vector<8xf32>
    %26 = vector.multi_reduction <maximumf>, %25, %cst_18 [1] : vector<8x10xf32> to vector<8xf32>
    %27 = vector.shape_cast %26 : vector<8xf32> to vector<8x1xf32>
    %28 = vector.broadcast %27 : vector<8x1xf32> to vector<8x10xf32>
    %29 = arith.subf %25, %28 : vector<8x10xf32>
    %30 = math.exp %29 : vector<8x10xf32>
    %cst_19 = arith.constant dense<0.000000e+00> : vector<8xf32>
    %31 = vector.multi_reduction <add>, %30, %cst_19 [1] : vector<8x10xf32> to vector<8xf32>
    %32 = vector.shape_cast %31 : vector<8xf32> to vector<8x1xf32>
    %33 = tpu.reciprocal %32 : vector<8x1xf32> -> vector<8x1xf32>
    %34 = vector.broadcast %33 : vector<8x1xf32> to vector<8x10xf32>
    %35 = arith.mulf %30, %34 : vector<8x10xf32>
    %36 = tpu.iota {dimensions = array<i32: 1>} : vector<8x10xi32>
    %37 = vector.broadcast %2 : vector<8x1xi32> to vector<8x10xi32>
    %38 = arith.cmpi eq, %36, %37 : vector<8x10xi32>
    %39 = arith.extui %38 : vector<8x10xi1> to vector<8x10xi32>
    %40 = arith.sitofp %39 : vector<8x10xi32> to vector<8x10xf32>
    %41 = arith.truncf %19 : vector<8x20xf32> to vector<8x20xbf16>
    %c0_20 = arith.constant 0 : index
    %c0_21 = arith.constant 0 : index
    %42 = vector.load %arg9[%c0_20, %c0_21] : memref<20x512xbf16, #tpu.memory_space<vmem>>, vector<20x512xbf16>
    %cst_22 = arith.constant dense<0.000000e+00> : vector<8x512xf32>
    %43 = tpu.matmul %41, %42, %cst_22 {dimension_numbers = #tpu.dot_dimension_numbers<[1], [0], [0], [1], [0, 0, 1, 1], [], []>} : vector<8x20xbf16>, vector<20x512xbf16>, vector<8x512xf32> -> vector<8x512xf32>
    %44 = arith.truncf %40 : vector<8x10xf32> to vector<8x10xbf16>
    %c0_23 = arith.constant 0 : index
    %c0_24 = arith.constant 0 : index
    %45 = vector.load %arg10[%c0_23, %c0_24] : memref<10x512xbf16, #tpu.memory_space<vmem>>, vector<10x512xbf16>
    %cst_25 = arith.constant dense<0.000000e+00> : vector<8x512xf32>
    %46 = tpu.matmul %44, %45, %cst_25 {dimension_numbers = #tpu.dot_dimension_numbers<[1], [0], [0], [1], [0, 0, 1, 1], [], []>} : vector<8x10xbf16>, vector<10x512xbf16>, vector<8x512xf32> -> vector<8x512xf32>
    %47 = arith.addf %43, %46 : vector<8x512xf32>
    %c0_26 = arith.constant 0 : index
    %c0_27 = arith.constant 0 : index
    %48 = vector.load %arg11[%c0_26, %c0_27] : memref<1x512xf32, #tpu.memory_space<vmem>>, vector<1x512xf32>
    %49 = vector.broadcast %48 : vector<1x512xf32> to vector<8x512xf32>
    %50 = arith.addf %47, %49 : vector<8x512xf32>
    %cst_28 = arith.constant 0.000000e+00 : f32
    %51 = vector.broadcast %cst_28 : f32 to vector<8x512xf32>
    %52 = arith.maximumf %50, %51 : vector<8x512xf32>
    %53 = arith.truncf %52 : vector<8x512xf32> to vector<8x512xbf16>
    %c0_29 = arith.constant 0 : index
    %c0_30 = arith.constant 0 : index
    %54 = vector.load %arg12[%c0_29, %c0_30] : memref<512x784xbf16, #tpu.memory_space<vmem>>, vector<512x784xbf16>
    %cst_31 = arith.constant dense<0.000000e+00> : vector<8x784xf32>
    %55 = tpu.matmul %53, %54, %cst_31 {dimension_numbers = #tpu.dot_dimension_numbers<[1], [0], [0], [1], [0, 0, 1, 1], [], []>} : vector<8x512xbf16>, vector<512x784xbf16>, vector<8x784xf32> -> vector<8x784xf32>
    %c0_32 = arith.constant 0 : index
    %c0_33 = arith.constant 0 : index
    %56 = vector.load %arg13[%c0_32, %c0_33] : memref<1x784xf32, #tpu.memory_space<vmem>>, vector<1x784xf32>
    %57 = vector.broadcast %56 : vector<1x784xf32> to vector<8x784xf32>
    %58 = arith.addf %55, %57 : vector<8x784xf32>
    %59 = math.absf %58 : vector<8x784xf32>
    %cst_34 = arith.constant 0.000000e+00 : f32
    %60 = vector.broadcast %cst_34 : f32 to vector<8x784xf32>
    %61 = arith.subf %60, %59 : vector<8x784xf32>
    %62 = math.exp %61 : vector<8x784xf32>
    %cst_35 = arith.constant 1.000000e+00 : f32
    %63 = vector.broadcast %cst_35 : f32 to vector<8x784xf32>
    %64 = arith.addf %63, %62 : vector<8x784xf32>
    %65 = math.log %64 : vector<8x784xf32>
    %cst_36 = arith.constant 0.000000e+00 : f32
    %66 = vector.broadcast %cst_36 : f32 to vector<8x784xf32>
    %67 = arith.subf %66, %58 : vector<8x784xf32>
    %cst_37 = arith.constant 0.000000e+00 : f32
    %68 = vector.broadcast %cst_37 : f32 to vector<8x784xf32>
    %69 = arith.maximumf %67, %68 : vector<8x784xf32>
    %70 = arith.addf %69, %65 : vector<8x784xf32>
    %cst_38 = arith.constant 0.000000e+00 : f32
    %71 = vector.broadcast %cst_38 : f32 to vector<8x784xf32>
    %72 = arith.subf %71, %70 : vector<8x784xf32>
    %cst_39 = arith.constant -1.000000e+02 : f32
    %73 = vector.broadcast %cst_39 : f32 to vector<8x784xf32>
    %74 = arith.maximumf %72, %73 : vector<8x784xf32>
    %cst_40 = arith.constant 0.000000e+00 : f32
    %75 = vector.broadcast %cst_40 : f32 to vector<8x784xf32>
    %76 = arith.maximumf %58, %75 : vector<8x784xf32>
    %77 = arith.addf %76, %65 : vector<8x784xf32>
    %cst_41 = arith.constant 0.000000e+00 : f32
    %78 = vector.broadcast %cst_41 : f32 to vector<8x784xf32>
    %79 = arith.subf %78, %77 : vector<8x784xf32>
    %cst_42 = arith.constant -1.000000e+02 : f32
    %80 = vector.broadcast %cst_42 : f32 to vector<8x784xf32>
    %81 = arith.maximumf %79, %80 : vector<8x784xf32>
    %cst_43 = arith.constant 1.000000e+00 : f32
    %82 = vector.broadcast %cst_43 : f32 to vector<8x784xf32>
    %83 = arith.addf %82, %62 : vector<8x784xf32>
    %84 = tpu.reciprocal %83 {approx = true} : vector<8x784xf32> -> vector<8x784xf32>
    %cst_44 = arith.constant 0.000000e+00 : f32
    %85 = vector.broadcast %cst_44 : f32 to vector<8x784xf32>
    %86 = arith.cmpf oge, %58, %85 : vector<8x784xf32>
    %87 = arith.mulf %62, %84 : vector<8x784xf32>
    %88 = arith.select %86, %84, %87 : vector<8x784xi1>, vector<8x784xf32>
    %c8_i32 = arith.constant 8 : i32
    %89 = arith.muli %arg0, %c8_i32 : i32
    %90 = tpu.iota {dimensions = array<i32: 0>} : vector<8x1xi32>
    %91 = vector.broadcast %89 : i32 to vector<8x1xi32>
    %92 = arith.addi %91, %90 : vector<8x1xi32>
    %c8_i32_45 = arith.constant 8 : i32
    %93 = vector.broadcast %c8_i32_45 : i32 to vector<8x1xi32>
    %94 = arith.cmpi slt, %92, %93 : vector<8x1xi32>
    %95 = arith.extui %94 : vector<8x1xi1> to vector<8x1xi32>
    %96 = arith.sitofp %95 : vector<8x1xi32> to vector<8x1xf32>
    %97 = arith.mulf %1, %74 : vector<8x784xf32>
    %cst_46 = arith.constant 1.000000e+00 : f32
    %98 = vector.broadcast %cst_46 : f32 to vector<8x784xf32>
    %99 = arith.subf %98, %1 : vector<8x784xf32>
    %100 = arith.mulf %99, %81 : vector<8x784xf32>
    %101 = arith.addf %97, %100 : vector<8x784xf32>
    %102 = vector.broadcast %96 : vector<8x1xf32> to vector<8x784xf32>
    %103 = arith.mulf %102, %101 : vector<8x784xf32>
    %104 = vector.shape_cast %103 : vector<8x784xf32> to vector<1x8x784xf32>
    %cst_47 = arith.constant dense<0.000000e+00> : vector<1xf32>
    %105 = vector.multi_reduction <add>, %104, %cst_47 [1, 2] : vector<1x8x784xf32> to vector<1xf32>
    %106 = vector.shape_cast %105 : vector<1xf32> to vector<1x1x1xf32>
    %107 = vector.extract %106[0, 0, 0] : f32 from vector<1x1x1xf32>
    %cst_48 = arith.constant 0.000000e+00 : f32
    %108 = arith.subf %cst_48, %107 : f32
    %cst_49 = arith.constant 1.000000e+00 : f32
    %109 = vector.broadcast %cst_49 : f32 to vector<8x20xf32>
    %110 = arith.addf %109, %20 : vector<8x20xf32>
    %111 = arith.mulf %19, %19 : vector<8x20xf32>
    %112 = arith.subf %110, %111 : vector<8x20xf32>
    %113 = math.exp %20 : vector<8x20xf32>
    %114 = arith.subf %112, %113 : vector<8x20xf32>
    %115 = vector.broadcast %96 : vector<8x1xf32> to vector<8x20xf32>
    %116 = arith.mulf %115, %114 : vector<8x20xf32>
    %117 = vector.shape_cast %116 : vector<8x20xf32> to vector<1x8x20xf32>
    %cst_50 = arith.constant dense<0.000000e+00> : vector<1xf32>
    %118 = vector.multi_reduction <add>, %117, %cst_50 [1, 2] : vector<1x8x20xf32> to vector<1xf32>
    %119 = vector.shape_cast %118 : vector<1xf32> to vector<1x1x1xf32>
    %120 = vector.extract %119[0, 0, 0] : f32 from vector<1x1x1xf32>
    %cst_51 = arith.constant -5.000000e-01 : f32
    %121 = arith.mulf %cst_51, %120 : f32
    %cst_52 = arith.constant dense<0xFF800000> : vector<8xf32>
    %122 = vector.multi_reduction <maximumf>, %35, %cst_52 [1] : vector<8x10xf32> to vector<8xf32>
    %123 = vector.shape_cast %122 : vector<8xf32> to vector<8x1xf32>
    %124 = vector.broadcast %123 : vector<8x1xf32> to vector<8x10xf32>
    %125 = arith.subf %35, %124 : vector<8x10xf32>
    %126 = math.exp %125 : vector<8x10xf32>
    %cst_53 = arith.constant dense<0.000000e+00> : vector<8xf32>
    %127 = vector.multi_reduction <add>, %126, %cst_53 [1] : vector<8x10xf32> to vector<8xf32>
    %128 = vector.shape_cast %127 : vector<8xf32> to vector<8x1xf32>
    %129 = math.log %128 : vector<8x1xf32>
    %130 = arith.addf %129, %123 : vector<8x1xf32>
    %131 = vector.broadcast %96 : vector<8x1xf32> to vector<8x10xf32>
    %132 = arith.mulf %131, %40 : vector<8x10xf32>
    %133 = vector.broadcast %130 : vector<8x1xf32> to vector<8x10xf32>
    %134 = arith.subf %35, %133 : vector<8x10xf32>
    %135 = arith.mulf %132, %134 : vector<8x10xf32>
    %136 = vector.shape_cast %135 : vector<8x10xf32> to vector<1x8x10xf32>
    %cst_54 = arith.constant dense<0.000000e+00> : vector<1xf32>
    %137 = vector.multi_reduction <add>, %136, %cst_54 [1, 2] : vector<1x8x10xf32> to vector<1xf32>
    %138 = vector.shape_cast %137 : vector<1xf32> to vector<1x1x1xf32>
    %139 = vector.extract %138[0, 0, 0] : f32 from vector<1x1x1xf32>
    %cst_55 = arith.constant 0.000000e+00 : f32
    %140 = arith.subf %cst_55, %139 : f32
    %cst_56 = arith.constant 8.000000e+00 : f32
    %141 = arith.divf %140, %cst_56 : f32
    %142 = arith.addf %108, %121 : f32
    %cst_57 = arith.constant 0.899999976 : f32
    %143 = arith.mulf %cst_57, %142 : f32
    %cst_58 = arith.constant 1.000000e-01 : f32
    %144 = arith.mulf %cst_58, %141 : f32
    %145 = arith.addf %143, %144 : f32
    %c0_59 = arith.constant 0 : index
    %c0_60 = arith.constant 0 : index
    %146 = vector.load %arg14[%c0_59, %c0_60] : memref<8x784xf32, #tpu.memory_space<vmem>>, vector<8x784xf32>
    tpu.vector_store %arg14[%c0_59, %c0_60], %88 {strides = array<i32>} : memref<8x784xf32, #tpu.memory_space<vmem>>, vector<8x784xf32>,
    %c0_61 = arith.constant 0 : index
    %c0_62 = arith.constant 0 : index
    %147 = vector.load %arg15[%c0_61, %c0_62] : memref<8x10xf32, #tpu.memory_space<vmem>>, vector<8x10xf32>
    tpu.vector_store %arg15[%c0_61, %c0_62], %35 {strides = array<i32>} : memref<8x10xf32, #tpu.memory_space<vmem>>, vector<8x10xf32>,
    %c0_63 = arith.constant 0 : index
    %c0_64 = arith.constant 0 : index
    %148 = vector.load %arg16[%c0_63, %c0_64] : memref<8x40xf32, #tpu.memory_space<vmem>>, vector<8x40xf32>
    tpu.vector_store %arg16[%c0_63, %c0_64], %18 {strides = array<i32>} : memref<8x40xf32, #tpu.memory_space<vmem>>, vector<8x40xf32>,
    %149 = vector.broadcast %145 : f32 to vector<8x128xf32>
    %c0_65 = arith.constant 0 : index
    %c0_66 = arith.constant 0 : index
    %150 = vector.load %arg17[%c0_65, %c0_66] : memref<8x128xf32, #tpu.memory_space<vmem>>, vector<8x128xf32>
    tpu.vector_store %arg17[%c0_65, %c0_66], %149 {strides = array<i32>} : memref<8x128xf32, #tpu.memory_space<vmem>>, vector<8x128xf32>,
    return
  }
  func.func @transform_0(%arg0: i32) -> (i32, i32) {
    %c0_i32 = arith.constant 0 : i32
    %c0_i32_0 = arith.constant 0 : i32
    return %arg0, %c0_i32 : i32, i32
  }
  func.func @transform_1(%arg0: i32) -> (i32, i32) {
    %c0_i32 = arith.constant 0 : i32
    %c0_i32_0 = arith.constant 0 : i32
    return %arg0, %c0_i32 : i32, i32
  }
  func.func @transform_2(%arg0: i32) -> (i32, i32) {
    %c0_i32 = arith.constant 0 : i32
    %c0_i32_0 = arith.constant 0 : i32
    %c0_i32_1 = arith.constant 0 : i32
    return %c0_i32, %c0_i32_0 : i32, i32
  }
  func.func @transform_3(%arg0: i32) -> (i32, i32) {
    %c0_i32 = arith.constant 0 : i32
    %c0_i32_0 = arith.constant 0 : i32
    %c0_i32_1 = arith.constant 0 : i32
    return %c0_i32, %c0_i32_0 : i32, i32
  }
  func.func @transform_4(%arg0: i32) -> (i32, i32) {
    %c0_i32 = arith.constant 0 : i32
    %c0_i32_0 = arith.constant 0 : i32
    %c0_i32_1 = arith.constant 0 : i32
    return %c0_i32, %c0_i32_0 : i32, i32
  }
  func.func @transform_5(%arg0: i32) -> (i32, i32) {
    %c0_i32 = arith.constant 0 : i32
    %c0_i32_0 = arith.constant 0 : i32
    %c0_i32_1 = arith.constant 0 : i32
    return %c0_i32, %c0_i32_0 : i32, i32
  }
  func.func @transform_6(%arg0: i32) -> (i32, i32) {
    %c0_i32 = arith.constant 0 : i32
    %c0_i32_0 = arith.constant 0 : i32
    %c0_i32_1 = arith.constant 0 : i32
    return %c0_i32, %c0_i32_0 : i32, i32
  }
  func.func @transform_7(%arg0: i32) -> (i32, i32) {
    %c0_i32 = arith.constant 0 : i32
    %c0_i32_0 = arith.constant 0 : i32
    %c0_i32_1 = arith.constant 0 : i32
    return %c0_i32, %c0_i32_0 : i32, i32
  }
  func.func @transform_8(%arg0: i32) -> (i32, i32) {
    %c0_i32 = arith.constant 0 : i32
    %c0_i32_0 = arith.constant 0 : i32
    %c0_i32_1 = arith.constant 0 : i32
    return %c0_i32, %c0_i32_0 : i32, i32
  }
  func.func @transform_9(%arg0: i32) -> (i32, i32) {
    %c0_i32 = arith.constant 0 : i32
    %c0_i32_0 = arith.constant 0 : i32
    %c0_i32_1 = arith.constant 0 : i32
    return %c0_i32, %c0_i32_0 : i32, i32
  }
  func.func @transform_10(%arg0: i32) -> (i32, i32) {
    %c0_i32 = arith.constant 0 : i32
    %c0_i32_0 = arith.constant 0 : i32
    %c0_i32_1 = arith.constant 0 : i32
    return %c0_i32, %c0_i32_0 : i32, i32
  }
  func.func @transform_11(%arg0: i32) -> (i32, i32) {
    %c0_i32 = arith.constant 0 : i32
    %c0_i32_0 = arith.constant 0 : i32
    %c0_i32_1 = arith.constant 0 : i32
    return %c0_i32, %c0_i32_0 : i32, i32
  }
  func.func @transform_12(%arg0: i32) -> (i32, i32) {
    %c0_i32 = arith.constant 0 : i32
    %c0_i32_0 = arith.constant 0 : i32
    %c0_i32_1 = arith.constant 0 : i32
    return %c0_i32, %c0_i32_0 : i32, i32
  }
  func.func @transform_13(%arg0: i32) -> (i32, i32) {
    %c0_i32 = arith.constant 0 : i32
    %c0_i32_0 = arith.constant 0 : i32
    return %arg0, %c0_i32 : i32, i32
  }
  func.func @transform_14(%arg0: i32) -> (i32, i32) {
    %c0_i32 = arith.constant 0 : i32
    %c0_i32_0 = arith.constant 0 : i32
    return %arg0, %c0_i32 : i32, i32
  }
  func.func @transform_15(%arg0: i32) -> (i32, i32) {
    %c0_i32 = arith.constant 0 : i32
    %c0_i32_0 = arith.constant 0 : i32
    return %arg0, %c0_i32 : i32, i32
  }
  func.func @transform_16(%arg0: i32) -> (i32, i32) {
    %c0_i32 = arith.constant 0 : i32
    %c0_i32_0 = arith.constant 0 : i32
    return %arg0, %c0_i32 : i32, i32
  }
}

</mosaic_0001>

<bundles_post_ra>
// kernel: _m2_ff_forward_impl.1
= control target key start
LH: loop header
LB: loop body
LE: loop exit
PB: predicated region body
PF: predicated region fallthrough
CT: control target
= control target key end

     0   :  { %s8858_s0 = inlined_call_operand.hbm [shape: bf16[8,784], index: 0, kind: input, shape index: {}]   ;;  %s8859_s1 = inlined_call_operand.hbm [shape: s32[8,1], index: 1, kind: input, shape index: {}]   ;;  %s8860_s2 = inlined_call_operand.hbm [shape: bf16[784,1024], index: 2, kind: input, shape index: {}]   ;;  %s8861_s3 = inlined_call_operand.hbm [shape: f32[1,1024], index: 3, kind: input, shape index: {}]   ;;  %s8862_s4 = inlined_call_operand.hbm [shape: bf16[512,40], index: 4, kind: input, shape index: {}]   ;;  %s8863_s5 = inlined_call_operand.hbm [shape: f32[1,40], index: 5, kind: input, shape index: {}]   ;;  %s8864_s6 = inlined_call_operand.hbm [shape: bf16[512,10], index: 6, kind: input, shape index: {}]   ;;  %s8865_s7 = inlined_call_operand.hbm [shape: f32[1,10], index: 7, kind: input, shape index: {}]   ;;  %s8866_s8 = inlined_call_operand.hbm [shape: bf16[20,512], index: 8, kind: input, shape index: {}]   ;;  %s8867_s9 = inlined_call_operand.hbm [shape: bf16[10,512], index: 9, kind: input, shape index: {}]   ;;  %s8868_s10 = inlined_call_operand.hbm [shape: f32[1,512], index: 10, kind: input, shape index: {}]   ;;  %s8869_s11 = inlined_call_operand.hbm [shape: bf16[512,784], index: 11, kind: input, shape index: {}]   ;;  %s8870_s12 = inlined_call_operand.hbm [shape: f32[1,784], index: 12, kind: input, shape index: {}]   ;;  %s8871_s13 = inlined_call_operand.hbm [shape: f32[8,784], index: 13, kind: output, shape index: {0}]   ;;  %s8872_s14 = inlined_call_operand.hbm [shape: f32[8,10], index: 14, kind: output, shape index: {1}]   ;;  %s8873_s15 = inlined_call_operand.hbm [shape: f32[8,40], index: 15, kind: output, shape index: {2}]   ;;  %s8874_s16 = inlined_call_operand.hbm [shape: f32[8,128], index: 16, kind: output, shape index: {3}]  }
   0x1   :  { %8876 = sst [smem:[#allocation39_spill]] %s8858_s0 }
   0x2   :  { %22 = vsyncpa [#allocation3], 0 }
   0x3   :  { %23 = vsyncpa [#allocation6], 0 }
   0x4   :  { %24 = vsyncpa [#allocation9], 0 }
   0x5   :  { %25 = vsyncpa [#allocation12], 0 }
   0x6   :  { %26 = vsyncpa [#allocation15], 0 }
   0x7   :  { %27 = vsyncpa [#allocation18], 0 }
   0x8   :  { %28 = vsyncpa [#allocation21], 0 }
   0x9   :  { %29 = vsyncpa [#allocation4], 0 }
   0xa   :  { %30 = vsyncpa [#allocation25], 0 }
   0xb   :  { %31 = vsyncpa [#allocation28], 0  ;;  %s8232_s21 = smov [#allocation5]   ;;  %s8233_s23 = smov [#allocation8]  }
   0xc   :  { %s48_s22 = sshll.u32 %s8232_s21, 4  ;;  %s70_s24 = sshll.u32 %s8233_s23, 4  ;;  %s49_s22 = int_to_ptr.vmem [resolvable:$true] %s48_s22  ;;  %s71_s24 = int_to_ptr.vmem [resolvable:$true] %s70_s24 }
   0xd   :  { %s7838_s27 = scalar_lea.hbm %s8859_s1, 128 }
   0xe   :  { %p7839_p0 = scmp.ne.s32.totalorder %s8859_s1, %s7838_s27  ;;  %p7842_p1 = scmp.lt.u32.totalorder %s7838_s27, %s8859_s1 }
  0x10   :  { %p7844_p2 = pnand %p7842_p1, %p7839_p0 }
  0x12   :  { %7847 = shalt.err (!%p7844_p2)
}
  0x13   :  { %s7848_s17 = scalar_lea.vmem %s49_s22, 128  ;;  %p7853_p4 = scmp.lt.s32.totalorder %s49_s22, %s49_s22 }
  0x14   :  { %p7849_p3 = scmp.ne.s32.totalorder %s49_s22, %s7848_s17  ;;  %p7854_p5 = scmp.lt.s32.totalorder %s7848_s17, %s7848_s17 }
  0x16   :  { %p7855_p6 = por %p7854_p5, %p7853_p4 }
  0x18   :  { %p7856_p7 = pnand %p7855_p6, %p7849_p3 }
  0x1a   :  { %7859 = shalt.err (!%p7856_p7)
}
  0x1b   :  { %51 = dma.hbm_to_vmem [thread:$0]  %s8859_s1, 128, %s49_s22, [#allocation6]  }
  0x1c   :  { %s7860_s23 = scalar_lea.hbm %s8861_s3, 128 }
  0x1d   :  { %p7861_p8 = scmp.ne.s32.totalorder %s8861_s3, %s7860_s23  ;;  %p7864_p9 = scmp.lt.u32.totalorder %s7860_s23, %s8861_s3 }
  0x1f   :  { %p7866_p10 = pnand %p7864_p9, %p7861_p8 }
  0x21   :  { %7869 = shalt.err (!%p7866_p10)
}
  0x22   :  { %s7870_s29 = scalar_lea.vmem %s71_s24, 128  ;;  %p7875_p12 = scmp.lt.s32.totalorder %s71_s24, %s71_s24 }
  0x23   :  { %p7871_p11 = scmp.ne.s32.totalorder %s71_s24, %s7870_s29  ;;  %p7876_p13 = scmp.lt.s32.totalorder %s7870_s29, %s7870_s29 }
  0x25   :  { %p7877_p0 = por %p7876_p13, %p7875_p12 }
  0x27   :  { %p7878_p1 = pnand %p7877_p0, %p7871_p11 }
  0x29   :  { %7881 = shalt.err (!%p7878_p1)
}
  0x2a   :  { %73 = dma.hbm_to_vmem [thread:$0]  %s8861_s3, 128, %s71_s24, [#allocation9]  }
  0x2b   :  { %s8234_s30 = smov [#allocation11]   ;;  %s8235_s17 = smov [#allocation14]  }
  0x2c   :  { %s92_s0 = sshll.u32 %s8234_s30, 4  ;;  %s114_s18 = sshll.u32 %s8235_s17, 4  ;;  %s93_s0 = int_to_ptr.vmem [resolvable:$true] %s92_s0  ;;  %s115_s18 = int_to_ptr.vmem [resolvable:$true] %s114_s18 }
  0x2d   :  { %s7882_s21 = scalar_lea.hbm %s8863_s5, 16 }
  0x2e   :  { %p7883_p2 = scmp.ne.s32.totalorder %s8863_s5, %s7882_s21  ;;  %p7886_p3 = scmp.lt.u32.totalorder %s7882_s21, %s8863_s5 }
  0x30   :  { %p7888_p4 = pnand %p7886_p3, %p7883_p2 }
  0x32   :  { %7891 = shalt.err (!%p7888_p4)
}
  0x33   :  { %s7892_s3 = scalar_lea.vmem %s93_s0, 16  ;;  %s7896_s24 = scalar_lea.vmem %s93_s0, 32 }
  0x34   :  { %p7893_p5 = scmp.ne.s32.totalorder %s93_s0, %s7892_s3  ;;  %p7897_p6 = scmp.lt.s32.totalorder %s93_s0, %s93_s0 }
  0x35   :  { %p7898_p7 = scmp.lt.s32.totalorder %s7896_s24, %s7892_s3 }
  0x37   :  { %p7899_p8 = por %p7898_p7, %p7897_p6 }
  0x39   :  { %p7900_p9 = pnand %p7899_p8, %p7893_p5 }
  0x3b   :  { %7903 = shalt.err (!%p7900_p9)
}
  0x3c   :  { %95 = dma.hbm_to_vmem [thread:$0]  %s8863_s5, 16, %s93_s0, [#allocation12]  }
  0x3d   :  { %s7904_s30 = scalar_lea.hbm %s8865_s7, 16 }
  0x3e   :  { %p7905_p10 = scmp.ne.s32.totalorder %s8865_s7, %s7904_s30  ;;  %p7908_p11 = scmp.lt.u32.totalorder %s7904_s30, %s8865_s7 }
  0x40   :  { %p7910_p12 = pnand %p7908_p11, %p7905_p10 }
  0x42   :  { %7913 = shalt.err (!%p7910_p12)
}
  0x43   :  { %s7914_s23 = scalar_lea.vmem %s115_s18, 16  ;;  %s7918_s25 = scalar_lea.vmem %s115_s18, 32 }
  0x44   :  { %p7915_p13 = scmp.ne.s32.totalorder %s115_s18, %s7914_s23  ;;  %p7919_p0 = scmp.lt.s32.totalorder %s115_s18, %s115_s18 }
  0x45   :  { %p7920_p1 = scmp.lt.s32.totalorder %s7918_s25, %s7914_s23 }
  0x47   :  { %p7921_p2 = por %p7920_p1, %p7919_p0 }
  0x49   :  { %p7922_p3 = pnand %p7921_p2, %p7915_p13 }
  0x4b   :  { %7925 = shalt.err (!%p7922_p3)
}
  0x4c   :  { %117 = dma.hbm_to_vmem [thread:$0]  %s8865_s7, 16, %s115_s18, [#allocation15]  }
  0x4d   :  { %s8236_s26 = smov [#allocation17]   ;;  %s8237_s3 = smov [#allocation20]  }
  0x4e   :  { %s135_s27 = sshll.u32 %s8236_s26, 4  ;;  %s157_s24 = sshll.u32 %s8237_s3, 4  ;;  %s136_s27 = int_to_ptr.vmem [resolvable:$true] %s135_s27  ;;  %s8394_s24 = int_to_ptr.vmem [resolvable:$true] %s157_s24 }
  0x4f   :  { %s7926_s1 = scalar_lea.hbm %s8867_s9, 512 }
  0x50   :  { %p7927_p4 = scmp.ne.s32.totalorder %s8867_s9, %s7926_s1  ;;  %p7930_p5 = scmp.lt.u32.totalorder %s7926_s1, %s8867_s9 }
  0x52   :  { %p7932_p6 = pnand %p7930_p5, %p7927_p4 }
  0x54   :  { %7935 = shalt.err (!%p7932_p6)
}
  0x55   :  { %s7936_s7 = scalar_lea.vmem %s136_s27, 512  ;;  %p7941_p8 = scmp.lt.s32.totalorder %s136_s27, %s136_s27 }
  0x56   :  { %p7937_p7 = scmp.ne.s32.totalorder %s136_s27, %s7936_s7  ;;  %p7942_p9 = scmp.lt.s32.totalorder %s7936_s7, %s7936_s7 }
  0x58   :  { %p7943_p10 = por %p7942_p9, %p7941_p8 }
  0x5a   :  { %p7944_p11 = pnand %p7943_p10, %p7937_p7 }
  0x5c   :  { %7947 = shalt.err (!%p7944_p11)
}
  0x5d   :  { %s8238_s18 = smov 256   ;;  %s8239_s20 = smov 16  }
  0x5e   :  { %141 = dma.hbm_to_vmem [thread:$0]  %s8867_s9, 512, %s136_s27, [#allocation18], %s8238_s18, %s8238_s18, %s8239_s20  }
  0x5f   :  { %s7948_s0 = scalar_lea.hbm %s8869_s11, 28672 }
  0x60   :  { %p7949_p12 = scmp.ne.s32.totalorder %s8869_s11, %s7948_s0  ;;  %p7952_p13 = scmp.lt.u32.totalorder %s7948_s0, %s8869_s11 }
  0x62   :  { %p7954_p0 = pnand %p7952_p13, %p7949_p12 }
  0x64   :  { %7957 = shalt.err (!%p7954_p0)
}
  0x65   :  { %s7958_s1 = scalar_lea.vmem %s8394_s24, 28672  ;;  %p7963_p2 = scmp.lt.s32.totalorder %s8394_s24, %s8394_s24 }
  0x66   :  { %p7959_p1 = scmp.ne.s32.totalorder %s8394_s24, %s7958_s1  ;;  %p7964_p3 = scmp.lt.s32.totalorder %s7958_s1, %s7958_s1 }
  0x68   :  { %p7965_p4 = por %p7964_p3, %p7963_p2 }
  0x6a   :  { %p7966_p5 = pnand %p7965_p4, %p7959_p1 }
  0x6c   :  { %7969 = shalt.err (!%p7966_p5)
}
  0x6d   :  { %s8240_s9 = smov 448   ;;  %s8241_s27 = smov 28  }
  0x6e   :  { %163 = dma.hbm_to_vmem [thread:$0]  %s8869_s11, 28672, %s8394_s24, [#allocation21], %s8240_s9, %s8240_s9, %s8241_s27  }
  0x6f   :  { %s8242_s17 = smov [#allocation2]   ;;  %s8243_s7 = smov [#allocation7]  }
  0x70   :  { %s38_s19 = sshll.u32 %s8242_s17, 4  ;;  %s57_s21 = sshll.u32 %s8243_s7, 4  ;;  %s39_s19 = int_to_ptr.vmem [resolvable:$true] %s38_s19  ;;  %s8428_s21 = int_to_ptr.vmem [resolvable:$true] %s57_s21 }
  0x71   :  { %s8877_s5 = sld [smem:[#allocation39_spill]] }
  0x77   :  { %s7970_s0 = scalar_lea.hbm %s8877_s5, 448 }
  0x78   :  { %p7971_p6 = scmp.ne.s32.totalorder %s8877_s5, %s7970_s0  ;;  %p7974_p7 = scmp.lt.u32.totalorder %s7970_s0, %s8877_s5 }
  0x7a   :  { %p7976_p8 = pnand %p7974_p7, %p7971_p6 }
  0x7c   :  { %7979 = shalt.err (!%p7976_p8)
}
  0x7d   :  { %s7980_s11 = scalar_lea.vmem %s39_s19, 448  ;;  %p7985_p10 = scmp.lt.s32.totalorder %s39_s19, %s39_s19 }
  0x7e   :  { %p7981_p9 = scmp.ne.s32.totalorder %s39_s19, %s7980_s11  ;;  %p7986_p11 = scmp.lt.s32.totalorder %s7980_s11, %s7980_s11 }
  0x80   :  { %p7987_p12 = por %p7986_p11, %p7985_p10 }
  0x82   :  { %p7988_p13 = pnand %p7987_p12, %p7981_p9 }
  0x84   :  { %7991 = shalt.err (!%p7988_p13)
}
  0x85   :  { %41 = dma.hbm_to_vmem [thread:$0]  %s8877_s5, 448, %s39_s19, [#allocation3]  }
  0x86   :  { %s7992_s22 = scalar_lea.hbm %s8860_s2, 50176 }
  0x87   :  { %p7993_p0 = scmp.ne.s32.totalorder %s8860_s2, %s7992_s22  ;;  %p7996_p1 = scmp.lt.u32.totalorder %s7992_s22, %s8860_s2 }
  0x89   :  { %p7998_p2 = pnand %p7996_p1, %p7993_p0 }
  0x8b   :  { %8001 = shalt.err (!%p7998_p2)
}
  0x8c   :  { %s8002_s25 = scalar_lea.vmem %s8428_s21, 50176  ;;  %p8007_p4 = scmp.lt.s32.totalorder %s8428_s21, %s8428_s21 }
  0x8d   :  { %p8003_p3 = scmp.ne.s32.totalorder %s8428_s21, %s8002_s25  ;;  %p8008_p5 = scmp.lt.s32.totalorder %s8002_s25, %s8002_s25 }
  0x8f   :  { %p8009_p6 = por %p8008_p5, %p8007_p4 }
  0x91   :  { %p8010_p7 = pnand %p8009_p6, %p8003_p3 }
  0x93   :  { %8013 = shalt.err (!%p8010_p7)
}
  0x94   :  { %s8244_s19 = smov 512   ;;  %s8245_s5 = smov 32  }
  0x95   :  { %63 = dma.hbm_to_vmem [thread:$0]  %s8860_s2, 50176, %s8428_s21, [#allocation6], %s8244_s19, %s8244_s19, %s8245_s5  }
  0x96   :  { %s8246_s3 = smov [#allocation10]   ;;  %s8014_s24 = scalar_lea.hbm %s8862_s4, 4096 }
  0x97   :  { %s79_s28 = sshll.u32 %s8246_s3, 4  ;;  %p8015_p8 = scmp.ne.s32.totalorder %s8862_s4, %s8014_s24  ;;  %s80_s28 = int_to_ptr.vmem [resolvable:$true] %s79_s28 }
  0x98   :  { %p8018_p9 = scmp.lt.u32.totalorder %s8014_s24, %s8862_s4 }
  0x9a   :  { %p8020_p10 = pnand %p8018_p9, %p8015_p8 }
  0x9c   :  { %8023 = shalt.err (!%p8020_p10)
}
  0x9d   :  { %s8024_s30 = scalar_lea.vmem %s80_s28, 4096  ;;  %p8029_p12 = scmp.lt.s32.totalorder %s80_s28, %s80_s28 }
  0x9e   :  { %p8025_p11 = scmp.ne.s32.totalorder %s80_s28, %s8024_s30  ;;  %p8030_p13 = scmp.lt.s32.totalorder %s8024_s30, %s8024_s30 }
  0xa0   :  { %p8031_p0 = por %p8030_p13, %p8029_p12 }
  0xa2   :  { %p8032_p1 = pnand %p8031_p0, %p8025_p11 }
  0xa4   :  { %8035 = shalt.err (!%p8032_p1)
}
  0xa5   :  { %s8247_s2 = smov 64   ;;  %s8248_s21 = smov 4  }
  0xa6   :  { %85 = dma.hbm_to_vmem [thread:$0]  %s8862_s4, 4096, %s80_s28, [#allocation9], %s8247_s2, %s8247_s2, %s8248_s21  }
  0xa7   :  { %s8249_s23 = smov [#allocation13]   ;;  %s8250_s19 = smov [#allocation16]  }
  0xa8   :  { %s101_s25 = sshll.u32 %s8249_s23, 4  ;;  %s123_s5 = sshll.u32 %s8250_s19, 4  ;;  %s102_s25 = int_to_ptr.vmem [resolvable:$true] %s101_s25  ;;  %s124_s5 = int_to_ptr.vmem [resolvable:$true] %s123_s5 }
  0xa9   :  { %s8036_s3 = scalar_lea.hbm %s8864_s6, 4096 }
  0xaa   :  { %p8037_p2 = scmp.ne.s32.totalorder %s8864_s6, %s8036_s3  ;;  %p8040_p3 = scmp.lt.u32.totalorder %s8036_s3, %s8864_s6 }
  0xac   :  { %p8042_p4 = pnand %p8040_p3, %p8037_p2 }
  0xae   :  { %8045 = shalt.err (!%p8042_p4)
}
  0xaf   :  { %s8046_s4 = scalar_lea.vmem %s102_s25, 4096  ;;  %p8051_p6 = scmp.lt.s32.totalorder %s102_s25, %s102_s25 }
  0xb0   :  { %p8047_p5 = scmp.ne.s32.totalorder %s102_s25, %s8046_s4  ;;  %p8052_p7 = scmp.lt.s32.totalorder %s8046_s4, %s8046_s4 }
  0xb2   :  { %p8053_p8 = por %p8052_p7, %p8051_p6 }
  0xb4   :  { %p8054_p9 = pnand %p8053_p8, %p8047_p5 }
  0xb6   :  { %8057 = shalt.err (!%p8054_p9)
}
  0xb7   :  { %107 = dma.hbm_to_vmem [thread:$0]  %s8864_s6, 4096, %s102_s25, [#allocation12], %s8247_s2, %s8247_s2, %s8248_s21  }
  0xb8   :  { %s8058_s30 = scalar_lea.hbm %s8866_s8, 768 }
  0xb9   :  { %p8059_p10 = scmp.ne.s32.totalorder %s8866_s8, %s8058_s30  ;;  %p8062_p11 = scmp.lt.u32.totalorder %s8058_s30, %s8866_s8 }
  0xbb   :  { %p8064_p12 = pnand %p8062_p11, %p8059_p10 }
  0xbd   :  { %8067 = shalt.err (!%p8064_p12)
}
  0xbe   :  { %s8068_s0 = scalar_lea.vmem %s124_s5, 768  ;;  %p8073_p0 = scmp.lt.s32.totalorder %s124_s5, %s124_s5 }
  0xbf   :  { %p8069_p13 = scmp.ne.s32.totalorder %s124_s5, %s8068_s0  ;;  %p8074_p1 = scmp.lt.s32.totalorder %s8068_s0, %s8068_s0 }
  0xc1   :  { %p8075_p2 = por %p8074_p1, %p8073_p0 }
  0xc3   :  { %p8076_p3 = pnand %p8075_p2, %p8069_p13 }
  0xc5   :  { %8079 = shalt.err (!%p8076_p3)
}
  0xc6   :  { %129 = dma.hbm_to_vmem [thread:$0]  %s8866_s8, 768, %s124_s5, [#allocation15], %s8238_s18, %s8238_s18, %s8239_s20  }
  0xc7   :  { %s8251_s21 = smov [#allocation19]   ;;  %s8252_s26 = smov [#allocation22]  }
  0xc8   :  { %s148_s25 = sshll.u32 %s8251_s21, 4  ;;  %s170_s3 = sshll.u32 %s8252_s26, 4  ;;  %s149_s25 = int_to_ptr.vmem [resolvable:$true] %s148_s25  ;;  %s171_s3 = int_to_ptr.vmem [resolvable:$true] %s170_s3 }
  0xc9   :  { %s8080_s24 = scalar_lea.hbm %s8868_s10, 64 }
  0xca   :  { %p8081_p4 = scmp.ne.s32.totalorder %s8868_s10, %s8080_s24  ;;  %p8084_p5 = scmp.lt.u32.totalorder %s8080_s24, %s8868_s10 }
  0xcc   :  { %p8086_p6 = pnand %p8084_p5, %p8081_p4 }
  0xce   :  { %8089 = shalt.err (!%p8086_p6)
}
  0xcf   :  { %s8090_s8 = scalar_lea.vmem %s149_s25, 64  ;;  %p8095_p8 = scmp.lt.s32.totalorder %s149_s25, %s149_s25 }
  0xd0   :  { %p8091_p7 = scmp.ne.s32.totalorder %s149_s25, %s8090_s8  ;;  %p8096_p9 = scmp.lt.s32.totalorder %s8090_s8, %s8090_s8 }
  0xd2   :  { %p8097_p10 = por %p8096_p9, %p8095_p8 }
  0xd4   :  { %p8098_p11 = pnand %p8097_p10, %p8091_p7 }
  0xd6   :  { %8101 = shalt.err (!%p8098_p11)
}
  0xd7   :  { %151 = dma.hbm_to_vmem [thread:$0]  %s8868_s10, 64, %s149_s25, [#allocation18]  }
  0xd8   :  { %s8102_s22 = scalar_lea.hbm %s8870_s12, 112 }
  0xd9   :  { %p8103_p12 = scmp.ne.s32.totalorder %s8870_s12, %s8102_s22  ;;  %p8106_p13 = scmp.lt.u32.totalorder %s8102_s22, %s8870_s12 }
  0xdb   :  { %p8108_p0 = pnand %p8106_p13, %p8103_p12 }
  0xdd   :  { %8111 = shalt.err (!%p8108_p0)
}
  0xde   :  { %s8112_s19 = scalar_lea.vmem %s171_s3, 112  ;;  %s8116_s0 = scalar_lea.vmem %s171_s3, 128 }
  0xdf   :  { %p8113_p1 = scmp.ne.s32.totalorder %s171_s3, %s8112_s19  ;;  %p8117_p2 = scmp.lt.s32.totalorder %s171_s3, %s171_s3 }
  0xe0   :  { %p8118_p3 = scmp.lt.s32.totalorder %s8116_s0, %s8112_s19 }
  0xe2   :  { %p8119_p4 = por %p8118_p3, %p8117_p2 }
  0xe4   :  { %p8120_p5 = pnand %p8119_p4, %p8113_p1 }
  0xe6   :  { %8123 = shalt.err (!%p8120_p5)
}
  0xe7   :  { %173 = dma.hbm_to_vmem [thread:$0]  %s8870_s12, 112, %s171_s3, [#allocation21]  }
  0xe8   :  { %8212 = dma.done.wait [#allocation3], 448  }
  0xe9   :  { %8213 = vsyncadd [#allocation3], 4294966848 }
  0xea   :  { %8214 = dma.done.wait [#allocation6], 50304  }
  0xeb   :  { %8215 = vsyncadd [#allocation6], 4294916992 }
  0xec   :  { %8216 = dma.done.wait [#allocation9], 4224  }
  0xed   :  { %8217 = vsyncadd [#allocation9], 4294963072 }
  0xee   :  { %8218 = dma.done.wait [#allocation12], 4112  }
  0xef   :  { %8219 = vsyncadd [#allocation12], 4294963184 }
  0xf0   :  { %8220 = dma.done.wait [#allocation15], 784  }
  0xf1   :  { %8221 = vsyncadd [#allocation15], 4294966512 }
  0xf2   :  { %8222 = dma.done.wait [#allocation18], 576  }
  0xf3   :  { %8223 = vsyncadd [#allocation18], 4294966720 }
  0xf4   :  { %8224 = dma.done.wait [#allocation21], 28784  }
  0xf5   :  { %8225 = vsyncadd [#allocation21], 4294938512  ;;  %v226_v0 = vld [vmem:[#allocation7] sm:$0xff]  ;;  %v227_v2 = vld [vmem:[#allocation7 + $0x8] sm:$0xff]  ;;  %vm2644_vm0 = vcmask 130048   ;;  %vm4057_vm1 = vcmask 1044480  }
  0xf6   :  { %v230_v1 = vld [vmem:[#allocation7 + $0x20] sm:$0xff]  ;;  %v231_v4 = vld [vmem:[#allocation7 + $0x28] sm:$0xff]  ;;  %vm4006_vm3 = vcmask 80896   ;;  %vm4186_vm4 = vcmask 1041408   ;;  %vm6353_vm5 = vcmask 326656   ;;  %vm4182_vm6 = vcmask 162816  }
  0xf7   :  { %v6427_v3 = vcombine.high %v226_v0, %v230_v1  ;;  %v6426_v5 = vcombine.low %v226_v0, %v230_v1  ;;  %v234_v6 = vld [vmem:[#allocation7 + $0x40] sm:$0xff]  ;;  %v6429_v8 = vcombine.high %v227_v2, %v231_v4  ;;  %v6428_v9 = vcombine.low %v227_v2, %v231_v4  ;;  %v235_v11 = vld [vmem:[#allocation7 + $0x48] sm:$0xff]  ;;  %s8255_s12 = smov 20   ;;  %s8256_s2 = smov 108  }
  0xf8   :  { %v238_v7 = vld [vmem:[#allocation7 + $0x60] sm:$0xff]  ;;  %v239_v12 = vld [vmem:[#allocation7 + $0x68] sm:$0xff]  ;;  %s8257_s21 = smov [#allocation24]   ;;  %s8258_s26 = smov [#allocation23]  }
  0xf9   :  { %v6435_v10 = vcombine.high %v234_v6, %v238_v7  ;;  %v242_v13 = vld [vmem:[#allocation7 + $0x80] sm:$0xff]  ;;  %2648 = vmatprep.subr.bf16.mxu0 %v6427_v3  ;;  %v6437_v14 = vcombine.high %v235_v11, %v239_v12  ;;  %v243_v16 = vld [vmem:[#allocation7 + $0x88] sm:$0xff]  ;;  %2812 = vmatprep.subr.bf16.mxu1 %v6429_v8  ;;  %v6434_v18 = vcombine.low %v234_v6, %v238_v7  ;;  %s6373_s25 = sshll.u32 %s8257_s21, 4  ;;  %s6363_s3 = sshll.u32 %s8258_s26, 4  ;;  %s6374_s25 = int_to_ptr.vmem [resolvable:$true] %s6373_s25  ;;  %s6364_s3 = int_to_ptr.vmem [resolvable:$true] %s6363_s3 }
  0xfa   :  { %v246_v15 = vld [vmem:[#allocation7 + $0xa0] sm:$0xff]  ;;  %v247_v17 = vld [vmem:[#allocation7 + $0xa8] sm:$0xff]  ;;  %2649 = vmatpush1.bf16.msra.mxu0 %v6426_v5  ;;  %2813 = vmatpush1.bf16.msra.mxu1 %v6428_v9  ;;  %v6436_v19 = vcombine.low %v235_v11, %v239_v12  ;;  %s8124_s29 = scalar_lea.vmem %s6374_s25, 128  ;;  %p8129_p7 = scmp.lt.s32.totalorder %s6374_s25, %s6374_s25 }
  0xfb   :  { %2650 = vmatprep.subr.bf16.mxu0 %v6435_v10  ;;  %v6443_v20 = vcombine.high %v242_v13, %v246_v15  ;;  %2814 = vmatprep.subr.bf16.mxu1 %v6437_v14  ;;  %v6445_v21 = vcombine.high %v243_v16, %v247_v17  ;;  %v250_v22 = vld [vmem:[#allocation7 + $0xc0] sm:$0xff]  ;;  %v251_v24 = vld [vmem:[#allocation7 + $0xc8] sm:$0xff]  ;;  %v6442_v26 = vcombine.low %v242_v13, %v246_v15  ;;  %p8125_p6 = scmp.ne.s32.totalorder %s6374_s25, %s8124_s29  ;;  %p8130_p8 = scmp.lt.s32.totalorder %s8124_s29, %s8124_s29 }
  0xfc   :  { %v254_v23 = vld [vmem:[#allocation7 + $0xe0] sm:$0xff]  ;;  %v255_v25 = vld [vmem:[#allocation7 + $0xe8] sm:$0xff]  ;;  %v6444_v27 = vcombine.low %v243_v16, %v247_v17 }
  0xfd   :  { %v6451_v28 = vcombine.high %v250_v22, %v254_v23  ;;  %v6453_v29 = vcombine.high %v251_v24, %v255_v25  ;;  %v258_v30 = vld [vmem:[#allocation7 + $0x100] sm:$0xff]  ;;  %v259_v32 = vld [vmem:[#allocation7 + $0x108] sm:$0xff]  ;;  %v6450_v34 = vcombine.low %v250_v22, %v254_v23  ;;  %v6452_v35 = vcombine.low %v251_v24, %v255_v25  ;;  %p8131_p9 = por %p8130_p8, %p8129_p7 }
  0xfe   :  { %2651 = vmatpush1.bf16.msra.mxu0 %v6434_v18  ;;  %2815 = vmatpush1.bf16.msra.mxu1 %v6436_v19  ;;  %v262_v31 = vld [vmem:[#allocation7 + $0x120] sm:$0xff]  ;;  %v263_v33 = vld [vmem:[#allocation7 + $0x128] sm:$0xff] }
  0xff   :  { %2652 = vmatprep.subr.bf16.mxu0 %v6443_v20  ;;  %2816 = vmatprep.subr.bf16.mxu1 %v6445_v21  ;;  %v6459_v36 = vcombine.high %v258_v30, %v262_v31  ;;  %v6461_v37 = vcombine.high %v259_v32, %v263_v33  ;;  %v266_v38 = vld [vmem:[#allocation7 + $0x140] sm:$0xff]  ;;  %v267_v40 = vld [vmem:[#allocation7 + $0x148] sm:$0xff]  ;;  %v6458_v42 = vcombine.low %v258_v30, %v262_v31  ;;  %p8132_p10 = pnand %p8131_p9, %p8125_p6 }
 0x100   :  { %v270_v39 = vld [vmem:[#allocation7 + $0x160] sm:$0xff]  ;;  %v271_v41 = vld [vmem:[#allocation7 + $0x168] sm:$0xff]  ;;  %v6460_v43 = vcombine.low %v259_v32, %v263_v33 }
 0x101   :  { %v6467_v44 = vcombine.high %v266_v38, %v270_v39  ;;  %v6469_v45 = vcombine.high %v267_v40, %v271_v41  ;;  %v274_v46 = vld [vmem:[#allocation7 + $0x180] sm:$0xff]  ;;  %v275_v48 = vld [vmem:[#allocation7 + $0x188] sm:$0xff]  ;;  %v6466_v50 = vcombine.low %v266_v38, %v270_v39  ;;  %v6468_v51 = vcombine.low %v267_v40, %v271_v41 }
 0x102   :  { %2653 = vmatpush1.bf16.msra.mxu0 %v6442_v26  ;;  %2817 = vmatpush1.bf16.msra.mxu1 %v6444_v27  ;;  %v278_v47 = vld [vmem:[#allocation7 + $0x1a0] sm:$0xff]  ;;  %v279_v49 = vld [vmem:[#allocation7 + $0x1a8] sm:$0xff] }
 0x103   :  { %2654 = vmatprep.subr.bf16.mxu0 %v6451_v28  ;;  %2818 = vmatprep.subr.bf16.mxu1 %v6453_v29  ;;  %v6475_v52 = vcombine.high %v274_v46, %v278_v47  ;;  %v8522_v53 = vld [vmem:[#allocation2] sm:$0xff]  ;;  %v6477_v54 = vcombine.high %v275_v48, %v279_v49  ;;  %v283_v57 = vld [vmem:[#allocation7 + $0x1c8] sm:$0xff]  ;;  %v6474_v60 = vcombine.low %v274_v46, %v278_v47 }
 0x104   :  { %v282_v55 = vld [vmem:[#allocation7 + $0x1c0] sm:$0xff]  ;;  %v287_v58 = vld [vmem:[#allocation7 + $0x1e8] sm:$0xff]  ;;  %v8526_v59 = vcombine.high %v8522_v53, %v8522_v53  ;;  %v6476_v61 = vcombine.low %v275_v48, %v279_v49 }
 0x105   :  { %v286_v56 = vld [vmem:[#allocation7 + $0x1e0] sm:$0xff]  ;;  %v6485_v63 = vcombine.high %v283_v57, %v287_v58  ;;  %v291_v2 = vld [vmem:[#allocation7 + $0x208] sm:$0xff]  ;;  %v6484_v5 = vcombine.low %v283_v57, %v287_v58 }
 0x106   :  { %2655 = vmatpush1.bf16.msra.mxu0 %v6450_v34  ;;  %2819 = vmatpush1.bf16.msra.mxu1 %v6452_v35  ;;  %v6483_v62 = vcombine.high %v282_v55, %v286_v56  ;;  %v290_v0 = vld [vmem:[#allocation7 + $0x200] sm:$0xff]  ;;  %v295_v3 = vld [vmem:[#allocation7 + $0x228] sm:$0xff]  ;;  %v6482_v4 = vcombine.low %v282_v55, %v286_v56 }
 0x107   :  { %2656 = vmatprep.subr.bf16.mxu0 %v6459_v36  ;;  %2820 = vmatprep.subr.bf16.mxu1 %v6461_v37  ;;  %v294_v1 = vld [vmem:[#allocation7 + $0x220] sm:$0xff]  ;;  %v6493_v7 = vcombine.high %v291_v2, %v295_v3  ;;  %v299_v10 = vld [vmem:[#allocation7 + $0x248] sm:$0xff]  ;;  %v6492_v13 = vcombine.low %v291_v2, %v295_v3 }
 0x108   :  { %2680 = vmatprep.mubr.bf16.mxu0 %v8526_v59  ;;  %2844 = vmatprep.mubr.bf16.mxu1 %v8526_v59  ;;  %v6491_v6 = vcombine.high %v290_v0, %v294_v1  ;;  %v298_v8 = vld [vmem:[#allocation7 + $0x240] sm:$0xff]  ;;  %v303_v11 = vld [vmem:[#allocation7 + $0x268] sm:$0xff]  ;;  %v6490_v12 = vcombine.low %v290_v0, %v294_v1 }
 0x109   :  { %v302_v9 = vld [vmem:[#allocation7 + $0x260] sm:$0xff]  ;;  %v6501_v15 = vcombine.high %v299_v10, %v303_v11  ;;  %v307_v18 = vld [vmem:[#allocation7 + $0x288] sm:$0xff]  ;;  %v6500_v21 = vcombine.low %v299_v10, %v303_v11 }
 0x10a   :  { %2657 = vmatpush1.bf16.msra.mxu0 %v6458_v42  ;;  %2821 = vmatpush1.bf16.msra.mxu1 %v6460_v43  ;;  %v6499_v14 = vcombine.high %v298_v8, %v302_v9  ;;  %v306_v16 = vld [vmem:[#allocation7 + $0x280] sm:$0xff]  ;;  %v311_v19 = vld [vmem:[#allocation7 + $0x2a8] sm:$0xff]  ;;  %v6498_v20 = vcombine.low %v298_v8, %v302_v9 }
 0x10b   :  { %2658 = vmatprep.subr.bf16.mxu0 %v6467_v44  ;;  %2822 = vmatprep.subr.bf16.mxu1 %v6469_v45  ;;  %v310_v17 = vld [vmem:[#allocation7 + $0x2a0] sm:$0xff]  ;;  %v6509_v23 = vcombine.high %v307_v18, %v311_v19  ;;  %v315_v26 = vld [vmem:[#allocation7 + $0x2c8] sm:$0xff]  ;;  %v6508_v29 = vcombine.low %v307_v18, %v311_v19 }
 0x10c   :  { %v6507_v22 = vcombine.high %v306_v16, %v310_v17  ;;  %v314_v24 = vld [vmem:[#allocation7 + $0x2c0] sm:$0xff]  ;;  %v319_v27 = vld [vmem:[#allocation7 + $0x2e8] sm:$0xff]  ;;  %v6506_v28 = vcombine.low %v306_v16, %v310_v17 }
 0x10d   :  { %v318_v25 = vld [vmem:[#allocation7 + $0x2e0] sm:$0xff]  ;;  %v6517_v31 = vcombine.high %v315_v26, %v319_v27  ;;  %v323_v34 = vld [vmem:[#allocation7 + $0x308] sm:$0xff]  ;;  %v6516_v37 = vcombine.low %v315_v26, %v319_v27 }
 0x10e   :  { %2659 = vmatpush1.bf16.msra.mxu0 %v6466_v50  ;;  %2823 = vmatpush1.bf16.msra.mxu1 %v6468_v51  ;;  %v6515_v30 = vcombine.high %v314_v24, %v318_v25  ;;  %v322_v32 = vld [vmem:[#allocation7 + $0x300] sm:$0xff]  ;;  %v327_v35 = vld [vmem:[#allocation7 + $0x328] sm:$0xff]  ;;  %v6514_v36 = vcombine.low %v314_v24, %v318_v25 }
 0x10f   :  { %2660 = vmatprep.subr.bf16.mxu0 %v6475_v52  ;;  %2824 = vmatprep.subr.bf16.mxu1 %v6477_v54  ;;  %v326_v33 = vld [vmem:[#allocation7 + $0x320] sm:$0xff]  ;;  %v6525_v39 = vcombine.high %v323_v34, %v327_v35  ;;  %v331_v42 = vld [vmem:[#allocation7 + $0x348] sm:$0xff]  ;;  %v6524_v45 = vcombine.low %v323_v34, %v327_v35 }
 0x110   :  { %v6523_v38 = vcombine.high %v322_v32, %v326_v33  ;;  %v330_v40 = vld [vmem:[#allocation7 + $0x340] sm:$0xff]  ;;  %v335_v43 = vld [vmem:[#allocation7 + $0x368] sm:$0xff]  ;;  %v6522_v44 = vcombine.low %v322_v32, %v326_v33  ;;  %v8253_v32 = vmov 0  }
 0x111   :  { %v334_v41 = vld [vmem:[#allocation7 + $0x360] sm:$0xff]  ;;  %v6533_v47 = vcombine.high %v331_v42, %v335_v43  ;;  %v339_v50 = vld [vmem:[#allocation7 + $0x388] sm:$0xff]  ;;  %v6532_v54 = vcombine.low %v331_v42, %v335_v43  ;;  %7374 = vset.pattern.permute.xlu0 %v8253_v32 }
 0x112   :  { %2661 = vmatpush1.bf16.msra.mxu0 %v6474_v60  ;;  %2825 = vmatpush1.bf16.msra.mxu1 %v6476_v61  ;;  %v6531_v46 = vcombine.high %v330_v40, %v334_v41  ;;  %v338_v48 = vld [vmem:[#allocation7 + $0x380] sm:$0xff]  ;;  %v343_v51 = vld [vmem:[#allocation7 + $0x3a8] sm:$0xff]  ;;  %v6530_v52 = vcombine.low %v330_v40, %v334_v41 }
 0x113   :  { %2662 = vmatprep.subr.bf16.mxu0 %v6483_v62  ;;  %2826 = vmatprep.subr.bf16.mxu1 %v6485_v63  ;;  %v342_v49 = vld [vmem:[#allocation7 + $0x3a0] sm:$0xff]  ;;  %v6541_v56 = vcombine.high %v339_v50, %v343_v51  ;;  %v347_v60 = vld [vmem:[#allocation7 + $0x3c8] sm:$0xff]  ;;  %v6540_v63 = vcombine.low %v339_v50, %v343_v51 }
 0x114   :  { %v6539_v55 = vcombine.high %v338_v48, %v342_v49  ;;  %v346_v57 = vld [vmem:[#allocation7 + $0x3c0] sm:$0xff]  ;;  %v351_v61 = vld [vmem:[#allocation7 + $0x3e8] sm:$0xff]  ;;  %v6538_v62 = vcombine.low %v338_v48, %v342_v49 }
 0x115   :  { %v350_v58 = vld [vmem:[#allocation7 + $0x3e0] sm:$0xff]  ;;  %v6549_v1 = vcombine.high %v347_v60, %v351_v61 }
 0x116   :  { %2663 = vmatpush1.bf16.msra.mxu0 %v6482_v4  ;;  %2827 = vmatpush1.bf16.msra.mxu1 %v6484_v5  ;;  %v6547_v0 = vcombine.high %v346_v57, %v350_v58  ;;  %v354_v2 = vld [vmem:[#allocation7 + $0x400] sm:$0xff]  ;;  %v355_v4 = vld [vmem:[#allocation7 + $0x408] sm:$0xff] }
 0x117   :  { %2664 = vmatprep.subr.bf16.mxu0 %v6491_v6  ;;  %2828 = vmatprep.subr.bf16.mxu1 %v6493_v7  ;;  %v358_v3 = vld [vmem:[#allocation7 + $0x420] sm:$0xff]  ;;  %v359_v5 = vld [vmem:[#allocation7 + $0x428] sm:$0xff]  ;;  %v6546_v6 = vcombine.low %v346_v57, %v350_v58  ;;  %v6548_v7 = vcombine.low %v347_v60, %v351_v61 }
 0x118   :  { %v6555_v8 = vcombine.high %v354_v2, %v358_v3  ;;  %v6557_v9 = vcombine.high %v355_v4, %v359_v5  ;;  %v362_v10 = vld [vmem:[#allocation7 + $0x440] sm:$0xff]  ;;  %v6554_v16 = vcombine.low %v354_v2, %v358_v3  ;;  %v6556_v19 = vcombine.low %v355_v4, %v359_v5  ;;  %v407_v57 = vld [vmem:[#allocation7 + $0x5a8] sm:$0xff] }
 0x119   :  { %v366_v11 = vld [vmem:[#allocation7 + $0x460] sm:$0xff]  ;;  %v415_v2 = vld [vmem:[#allocation7 + $0x5e8] sm:$0xff] }
 0x11a   :  { %2665 = vmatpush1.bf16.msra.mxu0 %v6490_v12  ;;  %2829 = vmatpush1.bf16.msra.mxu1 %v6492_v13  ;;  %v8532_v12 = vcombine.low %v8522_v53, %v8522_v53  ;;  %v363_v13 = vld [vmem:[#allocation7 + $0x448] sm:$0xff]  ;;  %v370_v17 = vld [vmem:[#allocation7 + $0x480] sm:$0xff]  ;;  %v6562_v24 = vcombine.low %v362_v10, %v366_v11 }
 0x11b   :  { %2666 = vmatprep.subr.bf16.mxu0 %v6499_v14  ;;  %2830 = vmatprep.subr.bf16.mxu1 %v6501_v15  ;;  %v367_v14 = vld [vmem:[#allocation7 + $0x468] sm:$0xff]  ;;  %v374_v18 = vld [vmem:[#allocation7 + $0x4a0] sm:$0xff] }
 0x11c   :  { %v8534_v15 = vld [vmem:[#allocation2 + $0x8] sm:$0xff]  ;;  %v6564_v25 = vcombine.low %v363_v13, %v367_v14  ;;  %v6571_v26 = vcombine.high %v370_v17, %v374_v18  ;;  %v6570_v33 = vcombine.low %v370_v17, %v374_v18 }
 0x11d   :  { %v371_v53 = vld [vmem:[#allocation7 + $0x488] sm:$0xff]  ;;  %v386_v34 = vld [vmem:[#allocation7 + $0x500] sm:$0xff] }
 0x11e   :  { %2667 = vmatpush1.bf16.msra.mxu0 %v6498_v20  ;;  %2831 = vmatpush1.bf16.msra.mxu1 %v6500_v21  ;;  %v6563_v20 = vcombine.high %v362_v10, %v366_v11  ;;  %v6565_v21 = vcombine.high %v363_v13, %v367_v14  ;;  %v390_v35 = vld [vmem:[#allocation7 + $0x520] sm:$0xff]  ;;  %v423_v10 = vld [vmem:[#allocation7 + $0x628] sm:$0xff] }
 0x11f   :  { %2668 = vmatprep.subr.bf16.mxu0 %v6507_v22  ;;  %2832 = vmatprep.subr.bf16.mxu1 %v6509_v23  ;;  %v8538_v22 = vcombine.high %v8534_v15, %v8534_v15  ;;  %v375_v23 = vld [vmem:[#allocation7 + $0x4a8] sm:$0xff]  ;;  %v394_v42 = vld [vmem:[#allocation7 + $0x540] sm:$0xff]  ;;  %v6586_v49 = vcombine.low %v386_v34, %v390_v35 }
 0x120   :  { %v6573_v27 = vcombine.high %v371_v53, %v375_v23  ;;  %v398_v43 = vld [vmem:[#allocation7 + $0x560] sm:$0xff]  ;;  %v427_v18 = vld [vmem:[#allocation7 + $0x648] sm:$0xff] }
 0x121   :  { %v6595_v51 = vcombine.high %v394_v42, %v398_v43  ;;  %v6594_v58 = vcombine.low %v394_v42, %v398_v43  ;;  %v430_v17 = vld [vmem:[#allocation7 + $0x660] sm:$0xff]  ;;  %v451_v43 = vld [vmem:[#allocation7 + $0x708] sm:$0xff] }
 0x122   :  { %2669 = vmatpush1.bf16.msra.mxu0 %v6506_v28  ;;  %2833 = vmatpush1.bf16.msra.mxu1 %v6508_v29  ;;  %v378_v28 = vld [vmem:[#allocation7 + $0x4c0] sm:$0xff] }
 0x123   :  { %2670 = vmatprep.subr.bf16.mxu0 %v6515_v30  ;;  %2834 = vmatprep.subr.bf16.mxu1 %v6517_v31  ;;  %v382_v29 = vld [vmem:[#allocation7 + $0x4e0] sm:$0xff]  ;;  %v379_v30 = vld [vmem:[#allocation7 + $0x4c8] sm:$0xff] }
 0x124   :  { %v383_v31 = vld [vmem:[#allocation7 + $0x4e8] sm:$0xff]  ;;  %v6578_v41 = vcombine.low %v378_v28, %v382_v29  ;;  %v454_v42 = vld [vmem:[#allocation7 + $0x720] sm:$0xff] }
 0x125   :  { %v6581_v40 = vcombine.high %v379_v30, %v383_v31 }
 0x126   :  { %2671 = vmatpush1.bf16.msra.mxu0 %v6514_v36  ;;  %2835 = vmatpush1.bf16.msra.mxu1 %v6516_v37  ;;  %v6572_v36 = vcombine.low %v371_v53, %v375_v23  ;;  %v6579_v37 = vcombine.high %v378_v28, %v382_v29  ;;  %v439_v28 = vld [vmem:[#allocation7 + $0x6a8] sm:$0xff] }
 0x127   :  { %2672 = vmatprep.subr.bf16.mxu0 %v6523_v38  ;;  %2836 = vmatprep.subr.bf16.mxu1 %v6525_v39  ;;  %v387_v38 = vld [vmem:[#allocation7 + $0x508] sm:$0xff] }
 0x128   :  { %v391_v39 = vld [vmem:[#allocation7 + $0x528] sm:$0xff] }
 0x129   :  { %v6589_v48 = vcombine.high %v387_v38, %v391_v39  ;;  %v6588_v50 = vcombine.low %v387_v38, %v391_v39 }
 0x12a   :  { %2673 = vmatpush1.bf16.msra.mxu0 %v6522_v44  ;;  %2837 = vmatpush1.bf16.msra.mxu1 %v6524_v45  ;;  %v6580_v44 = vcombine.low %v379_v30, %v383_v31  ;;  %v6587_v45 = vcombine.high %v386_v34, %v390_v35  ;;  %v446_v34 = vld [vmem:[#allocation7 + $0x6e0] sm:$0xff]  ;;  %v443_v35 = vld [vmem:[#allocation7 + $0x6c8] sm:$0xff] }
 0x12b   :  { %2674 = vmatprep.subr.bf16.mxu0 %v6531_v46  ;;  %2838 = vmatprep.subr.bf16.mxu1 %v6533_v47  ;;  %v395_v46 = vld [vmem:[#allocation7 + $0x548] sm:$0xff] }
 0x12c   :  { %v399_v47 = vld [vmem:[#allocation7 + $0x568] sm:$0xff] }
 0x12d   :  { %v6596_v60 = vcombine.low %v395_v46, %v399_v47 }
 0x12e   :  { %2675 = vmatpush1.bf16.msra.mxu0 %v6530_v52  ;;  %2839 = vmatpush1.bf16.msra.mxu1 %v6532_v54  ;;  %v402_v52 = vld [vmem:[#allocation7 + $0x580] sm:$0xff] }
 0x12f   :  { %2676 = vmatprep.subr.bf16.mxu0 %v6539_v55  ;;  %2840 = vmatprep.subr.bf16.mxu1 %v6541_v56  ;;  %v406_v54 = vld [vmem:[#allocation7 + $0x5a0] sm:$0xff]  ;;  %v403_v55 = vld [vmem:[#allocation7 + $0x588] sm:$0xff]  ;;  %v6597_v56 = vcombine.high %v395_v46, %v399_v47 }
 0x130   :  { %v6603_v61 = vcombine.high %v402_v52, %v406_v54  ;;  %v6602_v3 = vcombine.low %v402_v52, %v406_v54  ;;  %v6604_v4 = vcombine.low %v403_v55, %v407_v57  ;;  %v463_v54 = vld [vmem:[#allocation7 + $0x768] sm:$0xff] }
 0x132   :  { %2677 = vmatpush1.bf16.msra.mxu0 %v6538_v62  ;;  %2841 = vmatpush1.bf16.msra.mxu1 %v6540_v63  ;;  %v410_v62 = vld [vmem:[#allocation7 + $0x5c0] sm:$0xff] }
 0x133   :  { %2678 = vmatprep.subr.bf16.mxu0 %v6547_v0  ;;  %2842 = vmatprep.subr.bf16.mxu1 %v6549_v1  ;;  %v414_v63 = vld [vmem:[#allocation7 + $0x5e0] sm:$0xff]  ;;  %v411_v0 = vld [vmem:[#allocation7 + $0x5c8] sm:$0xff]  ;;  %v6605_v1 = vcombine.high %v403_v55, %v407_v57 }
 0x134   :  { %v6611_v5 = vcombine.high %v410_v62, %v414_v63  ;;  %v6610_v11 = vcombine.low %v410_v62, %v414_v63  ;;  %v6612_v13 = vcombine.low %v411_v0, %v415_v2  ;;  %v471_v63 = vld [vmem:[#allocation7 + $0x7a8] sm:$0xff] }
 0x136   :  { %2679 = vmatpush1.bf16.msra.mxu0 %v6546_v6  ;;  %2843 = vmatpush1.bf16.msra.mxu1 %v6548_v7  ;;  %v418_v6 = vld [vmem:[#allocation7 + $0x600] sm:$0xff] }
 0x137   :  { %2689 = vmatprep.subr.bf16.mxu0 %v6555_v8  ;;  %2853 = vmatprep.subr.bf16.mxu1 %v6557_v9  ;;  %v422_v7 = vld [vmem:[#allocation7 + $0x620] sm:$0xff]  ;;  %v419_v8 = vld [vmem:[#allocation7 + $0x608] sm:$0xff]  ;;  %v6613_v9 = vcombine.high %v411_v0, %v415_v2 }
 0x138   :  { %v6619_v14 = vcombine.high %v418_v6, %v422_v7  ;;  %v6620_v53 = vcombine.low %v419_v8, %v423_v10 }
 0x139   :  { %2681 = vmatmul.mubr.bf16.vlgmr.msra.gmra.mrb[0].mxu0 %v8532_v12  ;;  %2845 = vmatmul.mubr.bf16.vlgmr.msra.gmra.mrb[0].mxu1 %v8532_v12 }
 0x13a   :  { %2690 = vmatpush1.bf16.msra.mxu0 %v6554_v16  ;;  %2854 = vmatpush1.bf16.msra.mxu1 %v6556_v19  ;;  %v426_v16 = vld [vmem:[#allocation7 + $0x640] sm:$0xff]  ;;  %v6621_v19 = vcombine.high %v419_v8, %v423_v10 }
 0x13b   :  { %2691 = vmatprep.subr.bf16.mxu0 %v6563_v20  ;;  %2855 = vmatprep.subr.bf16.mxu1 %v6565_v21  ;;  %v431_v20 = vld [vmem:[#allocation7 + $0x668] sm:$0xff]  ;;  %v6618_v21 = vcombine.low %v418_v6, %v422_v7  ;;  %v6627_v23 = vcombine.high %v426_v16, %v430_v17  ;;  %v6626_v29 = vcombine.low %v426_v16, %v430_v17 }
 0x13c   :  { %2721 = vmatprep.mubr.bf16.mxu0 %v8538_v22  ;;  %2885 = vmatprep.mubr.bf16.mxu1 %v8538_v22  ;;  %v6628_v30 = vcombine.low %v427_v18, %v431_v20  ;;  %v479_v7 = vld [vmem:[#allocation7 + $0x7e8] sm:$0xff] }
 0x13d   :  { %v487_v17 = vld [vmem:[#allocation7 + $0x828] sm:$0xff] }
 0x13e   :  { %2692 = vmatpush1.bf16.msra.mxu0 %v6562_v24  ;;  %2856 = vmatpush1.bf16.msra.mxu1 %v6564_v25  ;;  %v434_v24 = vld [vmem:[#allocation7 + $0x680] sm:$0xff] }
 0x13f   :  { %2693 = vmatprep.subr.bf16.mxu0 %v6571_v26  ;;  %2857 = vmatprep.subr.bf16.mxu1 %v6573_v27  ;;  %v438_v25 = vld [vmem:[#allocation7 + $0x6a0] sm:$0xff]  ;;  %v435_v26 = vld [vmem:[#allocation7 + $0x688] sm:$0xff]  ;;  %v6629_v27 = vcombine.high %v427_v18, %v431_v20 }
 0x140   :  { %v6635_v31 = vcombine.high %v434_v24, %v438_v25  ;;  %v6634_v38 = vcombine.low %v434_v24, %v438_v25  ;;  %v6636_v39 = vcombine.low %v435_v26, %v439_v28  ;;  %v495_v24 = vld [vmem:[#allocation7 + $0x868] sm:$0xff] }
 0x142   :  { %2694 = vmatpush1.bf16.msra.mxu0 %v6570_v33  ;;  %2858 = vmatpush1.bf16.msra.mxu1 %v6572_v36  ;;  %v442_v33 = vld [vmem:[#allocation7 + $0x6c0] sm:$0xff]  ;;  %v6637_v36 = vcombine.high %v435_v26, %v439_v28  ;;  %v8545_v26 = vld [vmem:[#allocation2 + $0x10] sm:$0xff] }
 0x143   :  { %2695 = vmatprep.subr.bf16.mxu0 %v6579_v37  ;;  %2859 = vmatprep.subr.bf16.mxu1 %v6581_v40  ;;  %v447_v37 = vld [vmem:[#allocation7 + $0x6e8] sm:$0xff]  ;;  %v6643_v40 = vcombine.high %v442_v33, %v446_v34  ;;  %v6642_v46 = vcombine.low %v442_v33, %v446_v34  ;;  %v502_v33 = vld [vmem:[#allocation7 + $0x8a0] sm:$0xff] }
 0x144   :  { %v6644_v47 = vcombine.low %v443_v35, %v447_v37  ;;  %v499_v34 = vld [vmem:[#allocation7 + $0x888] sm:$0xff] }
 0x146   :  { %2696 = vmatpush1.bf16.msra.mxu0 %v6578_v41  ;;  %2860 = vmatpush1.bf16.msra.mxu1 %v6580_v44  ;;  %v450_v41 = vld [vmem:[#allocation7 + $0x700] sm:$0xff]  ;;  %v6645_v44 = vcombine.high %v443_v35, %v447_v37  ;;  %v8553_v37 = vcombine.high %v8545_v26, %v8545_v26 }
 0x147   :  { %2697 = vmatprep.subr.bf16.mxu0 %v6587_v45  ;;  %2861 = vmatprep.subr.bf16.mxu1 %v6589_v48  ;;  %v455_v45 = vld [vmem:[#allocation7 + $0x728] sm:$0xff]  ;;  %v6651_v48 = vcombine.high %v450_v41, %v454_v42  ;;  %v6650_v55 = vcombine.low %v450_v41, %v454_v42  ;;  %v510_v41 = vld [vmem:[#allocation7 + $0x8e0] sm:$0xff] }
 0x148   :  { %v6653_v52 = vcombine.high %v451_v43, %v455_v45  ;;  %v507_v42 = vld [vmem:[#allocation7 + $0x8c8] sm:$0xff] }
 0x14a   :  { %2698 = vmatpush1.bf16.msra.mxu0 %v6586_v49  ;;  %2862 = vmatpush1.bf16.msra.mxu1 %v6588_v50  ;;  %v458_v49 = vld [vmem:[#allocation7 + $0x740] sm:$0xff] }
 0x14b   :  { %2699 = vmatprep.subr.bf16.mxu0 %v6595_v51  ;;  %2863 = vmatprep.subr.bf16.mxu1 %v6597_v56  ;;  %v462_v50 = vld [vmem:[#allocation7 + $0x760] sm:$0xff]  ;;  %v459_v51 = vld [vmem:[#allocation7 + $0x748] sm:$0xff]  ;;  %v6652_v56 = vcombine.low %v451_v43, %v455_v45 }
 0x14c   :  { %v6659_v57 = vcombine.high %v458_v49, %v462_v50  ;;  %v6661_v62 = vcombine.high %v459_v51, %v463_v54  ;;  %v6658_v0 = vcombine.low %v458_v49, %v462_v50  ;;  %v518_v49 = vld [vmem:[#allocation7 + $0x920] sm:$0xff]  ;;  %v515_v50 = vld [vmem:[#allocation7 + $0x908] sm:$0xff] }
 0x14e   :  { %2700 = vmatpush1.bf16.msra.mxu0 %v6594_v58  ;;  %2864 = vmatpush1.bf16.msra.mxu1 %v6596_v60  ;;  %v466_v58 = vld [vmem:[#allocation7 + $0x780] sm:$0xff] }
 0x14f   :  { %2701 = vmatprep.subr.bf16.mxu0 %v6603_v61  ;;  %2865 = vmatprep.subr.bf16.mxu1 %v6605_v1  ;;  %v470_v60 = vld [vmem:[#allocation7 + $0x7a0] sm:$0xff]  ;;  %v467_v61 = vld [vmem:[#allocation7 + $0x788] sm:$0xff]  ;;  %v6660_v1 = vcombine.low %v459_v51, %v463_v54 }
 0x150   :  { %v6667_v2 = vcombine.high %v466_v58, %v470_v60  ;;  %v6669_v6 = vcombine.high %v467_v61, %v471_v63  ;;  %v6666_v8 = vcombine.low %v466_v58, %v470_v60  ;;  %v526_v58 = vld [vmem:[#allocation7 + $0x960] sm:$0xff]  ;;  %v523_v60 = vld [vmem:[#allocation7 + $0x948] sm:$0xff] }
 0x152   :  { %2702 = vmatpush1.bf16.msra.mxu0 %v6602_v3  ;;  %2866 = vmatpush1.bf16.msra.mxu1 %v6604_v4  ;;  %v474_v3 = vld [vmem:[#allocation7 + $0x7c0] sm:$0xff] }
 0x153   :  { %2703 = vmatprep.subr.bf16.mxu0 %v6611_v5  ;;  %2867 = vmatprep.subr.bf16.mxu1 %v6613_v9  ;;  %v478_v4 = vld [vmem:[#allocation7 + $0x7e0] sm:$0xff]  ;;  %v475_v5 = vld [vmem:[#allocation7 + $0x7c8] sm:$0xff]  ;;  %v6668_v9 = vcombine.low %v467_v61, %v471_v63 }
 0x154   :  { %v6675_v10 = vcombine.high %v474_v3, %v478_v4  ;;  %v6677_v16 = vcombine.high %v475_v5, %v479_v7  ;;  %v6674_v18 = vcombine.low %v474_v3, %v478_v4  ;;  %v6676_v20 = vcombine.low %v475_v5, %v479_v7  ;;  %v534_v3 = vld [vmem:[#allocation7 + $0x9a0] sm:$0xff]  ;;  %v531_v4 = vld [vmem:[#allocation7 + $0x988] sm:$0xff] }
 0x156   :  { %2704 = vmatpush1.bf16.msra.mxu0 %v6610_v11  ;;  %2868 = vmatpush1.bf16.msra.mxu1 %v6612_v13  ;;  %v482_v11 = vld [vmem:[#allocation7 + $0x800] sm:$0xff] }
 0x157   :  { %2705 = vmatprep.subr.bf16.mxu0 %v6619_v14  ;;  %2869 = vmatprep.subr.bf16.mxu1 %v6621_v19  ;;  %v486_v13 = vld [vmem:[#allocation7 + $0x820] sm:$0xff]  ;;  %v483_v14 = vld [vmem:[#allocation7 + $0x808] sm:$0xff] }
 0x158   :  { %v490_v19 = vld [vmem:[#allocation7 + $0x840] sm:$0xff]  ;;  %v6685_v25 = vcombine.high %v483_v14, %v487_v17  ;;  %v6682_v28 = vcombine.low %v482_v11, %v486_v13 }
 0x15a   :  { %2706 = vmatpush1.bf16.msra.mxu0 %v6618_v21  ;;  %2870 = vmatpush1.bf16.msra.mxu1 %v6620_v53  ;;  %v6683_v21 = vcombine.high %v482_v11, %v486_v13  ;;  %v494_v53 = vld [vmem:[#allocation7 + $0x860] sm:$0xff]  ;;  %v539_v13 = vld [vmem:[#allocation7 + $0x9c8] sm:$0xff] }
 0x15b   :  { %2707 = vmatprep.subr.bf16.mxu0 %v6627_v23  ;;  %2871 = vmatprep.subr.bf16.mxu1 %v6629_v27  ;;  %v491_v23 = vld [vmem:[#allocation7 + $0x848] sm:$0xff]  ;;  %v8549_v27 = vcombine.low %v8534_v15, %v8534_v15  ;;  %v6690_v15 = vcombine.low %v490_v19, %v494_v53  ;;  %v542_v11 = vld [vmem:[#allocation7 + $0x9e0] sm:$0xff] }
 0x15c   :  { %v6693_v35 = vcombine.high %v491_v23, %v495_v24 }
 0x15e   :  { %2708 = vmatpush1.bf16.msra.mxu0 %v6626_v29  ;;  %2872 = vmatpush1.bf16.msra.mxu1 %v6628_v30  ;;  %v6684_v29 = vcombine.low %v483_v14, %v487_v17  ;;  %v6691_v30 = vcombine.high %v490_v19, %v494_v53  ;;  %v547_v53 = vld [vmem:[#allocation7 + $0xa08] sm:$0xff] }
 0x15f   :  { %2709 = vmatprep.subr.bf16.mxu0 %v6635_v31  ;;  %2873 = vmatprep.subr.bf16.mxu1 %v6637_v36  ;;  %v498_v31 = vld [vmem:[#allocation7 + $0x880] sm:$0xff]  ;;  %v503_v36 = vld [vmem:[#allocation7 + $0x8a8] sm:$0xff] }
 0x160   :  { %v6701_v43 = vcombine.high %v499_v34, %v503_v36  ;;  %v6698_v45 = vcombine.low %v498_v31, %v502_v33 }
 0x162   :  { %2710 = vmatpush1.bf16.msra.mxu0 %v6634_v38  ;;  %2874 = vmatpush1.bf16.msra.mxu1 %v6636_v39  ;;  %v6692_v38 = vcombine.low %v491_v23, %v495_v24  ;;  %v6699_v39 = vcombine.high %v498_v31, %v502_v33  ;;  %v551_v24 = vld [vmem:[#allocation7 + $0xa28] sm:$0xff]  ;;  %v558_v31 = vld [vmem:[#allocation7 + $0xa60] sm:$0xff] }
 0x163   :  { %2711 = vmatprep.subr.bf16.mxu0 %v6643_v40  ;;  %2875 = vmatprep.subr.bf16.mxu1 %v6645_v44  ;;  %v506_v40 = vld [vmem:[#allocation7 + $0x8c0] sm:$0xff]  ;;  %v511_v44 = vld [vmem:[#allocation7 + $0x8e8] sm:$0xff] }
 0x164   :  { %v6709_v51 = vcombine.high %v507_v42, %v511_v44  ;;  %v6706_v54 = vcombine.low %v506_v40, %v510_v41  ;;  %v555_v33 = vld [vmem:[#allocation7 + $0xa48] sm:$0xff] }
 0x166   :  { %2712 = vmatpush1.bf16.msra.mxu0 %v6642_v46  ;;  %2876 = vmatpush1.bf16.msra.mxu1 %v6644_v47  ;;  %v6700_v46 = vcombine.low %v499_v34, %v503_v36  ;;  %v6707_v47 = vcombine.high %v506_v40, %v510_v41  ;;  %v6749_v34 = vcombine.high %v547_v53, %v551_v24  ;;  %v566_v40 = vld [vmem:[#allocation7 + $0xaa0] sm:$0xff]  ;;  %v563_v41 = vld [vmem:[#allocation7 + $0xa88] sm:$0xff] }
 0x167   :  { %2713 = vmatprep.subr.bf16.mxu0 %v6651_v48  ;;  %2877 = vmatprep.subr.bf16.mxu1 %v6653_v52  ;;  %v514_v48 = vld [vmem:[#allocation7 + $0x900] sm:$0xff]  ;;  %v519_v52 = vld [vmem:[#allocation7 + $0x928] sm:$0xff] }
 0x168   :  { %v6717_v61 = vcombine.high %v515_v50, %v519_v52  ;;  %v6714_v63 = vcombine.low %v514_v48, %v518_v49 }
 0x16a   :  { %2714 = vmatpush1.bf16.msra.mxu0 %v6650_v55  ;;  %2878 = vmatpush1.bf16.msra.mxu1 %v6652_v56  ;;  %v6708_v55 = vcombine.low %v507_v42, %v511_v44  ;;  %v6715_v56 = vcombine.high %v514_v48, %v518_v49  ;;  %v574_v48 = vld [vmem:[#allocation7 + $0xae0] sm:$0xff]  ;;  %v571_v49 = vld [vmem:[#allocation7 + $0xac8] sm:$0xff] }
 0x16b   :  { %2715 = vmatprep.subr.bf16.mxu0 %v6659_v57  ;;  %2879 = vmatprep.subr.bf16.mxu1 %v6661_v62  ;;  %v522_v57 = vld [vmem:[#allocation7 + $0x940] sm:$0xff]  ;;  %v527_v62 = vld [vmem:[#allocation7 + $0x968] sm:$0xff] }
 0x16c   :  { %v6725_v5 = vcombine.high %v523_v60, %v527_v62  ;;  %v6722_v7 = vcombine.low %v522_v57, %v526_v58 }
 0x16e   :  { %2716 = vmatpush1.bf16.msra.mxu0 %v6658_v0  ;;  %2880 = vmatpush1.bf16.msra.mxu1 %v6660_v1  ;;  %v6716_v0 = vcombine.low %v515_v50, %v519_v52  ;;  %v6723_v1 = vcombine.high %v522_v57, %v526_v58  ;;  %v582_v57 = vld [vmem:[#allocation7 + $0xb20] sm:$0xff]  ;;  %v579_v58 = vld [vmem:[#allocation7 + $0xb08] sm:$0xff] }
 0x16f   :  { %2717 = vmatprep.subr.bf16.mxu0 %v6667_v2  ;;  %2881 = vmatprep.subr.bf16.mxu1 %v6669_v6  ;;  %v530_v2 = vld [vmem:[#allocation7 + $0x980] sm:$0xff]  ;;  %v535_v6 = vld [vmem:[#allocation7 + $0x9a8] sm:$0xff] }
 0x170   :  { %v6733_v14 = vcombine.high %v531_v4, %v535_v6  ;;  %v6730_v17 = vcombine.low %v530_v2, %v534_v3 }
 0x172   :  { %2718 = vmatpush1.bf16.msra.mxu0 %v6666_v8  ;;  %2882 = vmatpush1.bf16.msra.mxu1 %v6668_v9  ;;  %v6724_v8 = vcombine.low %v523_v60, %v527_v62  ;;  %v6731_v9 = vcombine.high %v530_v2, %v534_v3  ;;  %v590_v2 = vld [vmem:[#allocation7 + $0xb60] sm:$0xff]  ;;  %v587_v3 = vld [vmem:[#allocation7 + $0xb48] sm:$0xff] }
 0x173   :  { %2719 = vmatprep.subr.bf16.mxu0 %v6675_v10  ;;  %2883 = vmatprep.subr.bf16.mxu1 %v6677_v16  ;;  %v538_v10 = vld [vmem:[#allocation7 + $0x9c0] sm:$0xff]  ;;  %v543_v16 = vld [vmem:[#allocation7 + $0x9e8] sm:$0xff] }
 0x174   :  { %v6739_v19 = vcombine.high %v538_v10, %v542_v11  ;;  %v6741_v23 = vcombine.high %v539_v13, %v543_v16 }
 0x176   :  { %2720 = vmatpush1.bf16.msra.mxu0 %v6674_v18  ;;  %2884 = vmatpush1.bf16.msra.mxu1 %v6676_v20  ;;  %v6732_v18 = vcombine.low %v531_v4, %v535_v6  ;;  %v546_v20 = vld [vmem:[#allocation7 + $0xa00] sm:$0xff] }
 0x177   :  { %2730 = vmatprep.subr.bf16.mxu0 %v6683_v21  ;;  %2894 = vmatprep.subr.bf16.mxu1 %v6685_v25  ;;  %v550_v21 = vld [vmem:[#allocation7 + $0xa20] sm:$0xff]  ;;  %v6738_v25 = vcombine.low %v538_v10, %v542_v11  ;;  %v595_v11 = vld [vmem:[#allocation7 + $0xb88] sm:$0xff] }
 0x178   :  { %v6746_v36 = vcombine.low %v546_v20, %v550_v21  ;;  %v598_v10 = vld [vmem:[#allocation7 + $0xba0] sm:$0xff] }
 0x179   :  { %2722 = vmatmul.mubr.bf16.vlgmr.msra.gmra.mrb[0].mxu0 %v8549_v27  ;;  %2886 = vmatmul.mubr.bf16.vlgmr.msra.gmra.mrb[0].mxu1 %v8549_v27 }
 0x17a   :  { %2731 = vmatpush1.bf16.msra.mxu0 %v6682_v28  ;;  %2895 = vmatpush1.bf16.msra.mxu1 %v6684_v29  ;;  %v6740_v28 = vcombine.low %v539_v13, %v543_v16  ;;  %v6747_v29 = vcombine.high %v546_v20, %v550_v21  ;;  %v606_v20 = vld [vmem:[#allocation7 + $0xbe0] sm:$0xff]  ;;  %v603_v21 = vld [vmem:[#allocation7 + $0xbc8] sm:$0xff] }
 0x17b   :  { %2732 = vmatprep.subr.bf16.mxu0 %v6691_v30  ;;  %2896 = vmatprep.subr.bf16.mxu1 %v6693_v35  ;;  %v554_v30 = vld [vmem:[#allocation7 + $0xa40] sm:$0xff]  ;;  %v559_v35 = vld [vmem:[#allocation7 + $0xa68] sm:$0xff] }
 0x17c   :  { %2762 = vmatprep.mubr.bf16.mxu0 %v8553_v37  ;;  %2926 = vmatprep.mubr.bf16.mxu1 %v8553_v37  ;;  %v6757_v42 = vcombine.high %v555_v33, %v559_v35  ;;  %v6754_v44 = vcombine.low %v554_v30, %v558_v31 }
 0x17e   :  { %2733 = vmatpush1.bf16.msra.mxu0 %v6690_v15  ;;  %2897 = vmatpush1.bf16.msra.mxu1 %v6692_v38  ;;  %v6748_v15 = vcombine.low %v547_v53, %v551_v24  ;;  %v6755_v38 = vcombine.high %v554_v30, %v558_v31  ;;  %v614_v30 = vld [vmem:[#allocation7 + $0xc20] sm:$0xff]  ;;  %v611_v31 = vld [vmem:[#allocation7 + $0xc08] sm:$0xff] }
 0x17f   :  { %2734 = vmatprep.subr.bf16.mxu0 %v6699_v39  ;;  %2898 = vmatprep.subr.bf16.mxu1 %v6701_v43  ;;  %v562_v39 = vld [vmem:[#allocation7 + $0xa80] sm:$0xff]  ;;  %v567_v43 = vld [vmem:[#allocation7 + $0xaa8] sm:$0xff] }
 0x180   :  { %v6765_v50 = vcombine.high %v563_v41, %v567_v43  ;;  %v6762_v52 = vcombine.low %v562_v39, %v566_v40 }
 0x182   :  { %2735 = vmatpush1.bf16.msra.mxu0 %v6698_v45  ;;  %2899 = vmatpush1.bf16.msra.mxu1 %v6700_v46  ;;  %v6756_v45 = vcombine.low %v555_v33, %v559_v35  ;;  %v6763_v46 = vcombine.high %v562_v39, %v566_v40  ;;  %v232_v39 = vld [vmem:[#allocation7 + $0x30] sm:$0xff] }
 0x183   :  { %2736 = vmatprep.subr.bf16.mxu0 %v6707_v47  ;;  %2900 = vmatprep.subr.bf16.mxu1 %v6709_v51  ;;  %v570_v47 = vld [vmem:[#allocation7 + $0xac0] sm:$0xff]  ;;  %v575_v51 = vld [vmem:[#allocation7 + $0xae8] sm:$0xff] }
 0x184   :  { %v6773_v60 = vcombine.high %v571_v49, %v575_v51  ;;  %v6770_v62 = vcombine.low %v570_v47, %v574_v48 }
 0x186   :  { %2737 = vmatpush1.bf16.msra.mxu0 %v6706_v54  ;;  %2901 = vmatpush1.bf16.msra.mxu1 %v6708_v55  ;;  %v6764_v54 = vcombine.low %v563_v41, %v567_v43  ;;  %v6771_v55 = vcombine.high %v570_v47, %v574_v48  ;;  %v229_v41 = vld [vmem:[#allocation7 + $0x18] sm:$0xff]  ;;  %v8561_v43 = vcombine.low %v8545_v26, %v8545_v26  ;;  %v217_v26 = vld [vmem:[#allocation2 + $0x18] sm:$0xf] }
 0x187   :  { %2738 = vmatprep.subr.bf16.mxu0 %v6715_v56  ;;  %2902 = vmatprep.subr.bf16.mxu1 %v6717_v61  ;;  %v578_v56 = vld [vmem:[#allocation7 + $0xb00] sm:$0xff]  ;;  %v583_v61 = vld [vmem:[#allocation7 + $0xb28] sm:$0xff]  ;;  %v236_v48 = vld [vmem:[#allocation7 + $0x50] sm:$0xff] }
 0x188   :  { %v6781_v4 = vcombine.high %v579_v58, %v583_v61  ;;  %v6778_v6 = vcombine.low %v578_v56, %v582_v57 }
 0x18a   :  { %2739 = vmatpush1.bf16.msra.mxu0 %v6714_v63  ;;  %2903 = vmatpush1.bf16.msra.mxu1 %v6716_v0  ;;  %v6772_v63 = vcombine.low %v571_v49, %v575_v51  ;;  %v6779_v0 = vcombine.high %v578_v56, %v582_v57  ;;  %v240_v49 = vld [vmem:[#allocation7 + $0x70] sm:$0xff]  ;;  %v241_v51 = vld [vmem:[#allocation7 + $0x78] sm:$0xff] }
 0x18b   :  { %2740 = vmatprep.subr.bf16.mxu0 %v6723_v1  ;;  %2904 = vmatprep.subr.bf16.mxu1 %v6725_v5  ;;  %v586_v1 = vld [vmem:[#allocation7 + $0xb40] sm:$0xff]  ;;  %v591_v5 = vld [vmem:[#allocation7 + $0xb68] sm:$0xff]  ;;  %v6439_v56 = vcombine.high %v236_v48, %v240_v49  ;;  %v244_v57 = vld [vmem:[#allocation7 + $0x90] sm:$0xff] }
 0x18c   :  { %v6789_v13 = vcombine.high %v587_v3, %v591_v5  ;;  %v6786_v16 = vcombine.low %v586_v1, %v590_v2 }
 0x18e   :  { %2741 = vmatpush1.bf16.msra.mxu0 %v6722_v7  ;;  %2905 = vmatpush1.bf16.msra.mxu1 %v6724_v8  ;;  %v6780_v7 = vcombine.low %v579_v58, %v583_v61  ;;  %v6787_v8 = vcombine.high %v586_v1, %v590_v2  ;;  %v248_v58 = vld [vmem:[#allocation7 + $0xb0] sm:$0xff] }
 0x18f   :  { %2742 = vmatprep.subr.bf16.mxu0 %v6731_v9  ;;  %2906 = vmatprep.subr.bf16.mxu1 %v6733_v14  ;;  %v594_v9 = vld [vmem:[#allocation7 + $0xb80] sm:$0xff]  ;;  %v599_v14 = vld [vmem:[#allocation7 + $0xba8] sm:$0xff]  ;;  %v6447_v1 = vcombine.high %v244_v57, %v248_v58  ;;  %v252_v2 = vld [vmem:[#allocation7 + $0xd0] sm:$0xff] }
 0x190   :  { %v6797_v53 = vcombine.high %v595_v11, %v599_v14  ;;  %v6794_v24 = vcombine.low %v594_v9, %v598_v10 }
 0x192   :  { %2743 = vmatpush1.bf16.msra.mxu0 %v6730_v17  ;;  %2907 = vmatpush1.bf16.msra.mxu1 %v6732_v18  ;;  %v6788_v17 = vcombine.low %v587_v3, %v591_v5  ;;  %v6795_v18 = vcombine.high %v594_v9, %v598_v10  ;;  %v256_v3 = vld [vmem:[#allocation7 + $0xf0] sm:$0xff] }
 0x193   :  { %2744 = vmatprep.subr.bf16.mxu0 %v6739_v19  ;;  %2908 = vmatprep.subr.bf16.mxu1 %v6741_v23  ;;  %v602_v19 = vld [vmem:[#allocation7 + $0xbc0] sm:$0xff]  ;;  %v607_v23 = vld [vmem:[#allocation7 + $0xbe8] sm:$0xff]  ;;  %v6455_v9 = vcombine.high %v252_v2, %v256_v3  ;;  %v260_v10 = vld [vmem:[#allocation7 + $0x110] sm:$0xff] }
 0x194   :  { %v6805_v33 = vcombine.high %v603_v21, %v607_v23  ;;  %v6802_v35 = vcombine.low %v602_v19, %v606_v20 }
 0x196   :  { %2745 = vmatpush1.bf16.msra.mxu0 %v6738_v25  ;;  %2909 = vmatpush1.bf16.msra.mxu1 %v6740_v28  ;;  %v6796_v25 = vcombine.low %v595_v11, %v599_v14  ;;  %v6803_v28 = vcombine.high %v602_v19, %v606_v20  ;;  %v264_v11 = vld [vmem:[#allocation7 + $0x130] sm:$0xff] }
 0x197   :  { %2746 = vmatprep.subr.bf16.mxu0 %v6747_v29  ;;  %2910 = vmatprep.subr.bf16.mxu1 %v6749_v34  ;;  %v610_v29 = vld [vmem:[#allocation7 + $0xc00] sm:$0xff]  ;;  %v615_v34 = vld [vmem:[#allocation7 + $0xc28] sm:$0xff]  ;;  %v6463_v19 = vcombine.high %v260_v10, %v264_v11  ;;  %v268_v20 = vld [vmem:[#allocation7 + $0x150] sm:$0xff] }
 0x198   :  { %v6813_v40 = vcombine.high %v611_v31, %v615_v34 }
 0x19a   :  { %2747 = vmatpush1.bf16.msra.mxu0 %v6746_v36  ;;  %2911 = vmatpush1.bf16.msra.mxu1 %v6748_v15  ;;  %v6804_v36 = vcombine.low %v603_v21, %v607_v23  ;;  %v6811_v15 = vcombine.high %v610_v29, %v614_v30  ;;  %v269_v21 = vld [vmem:[#allocation7 + $0x158] sm:$0xff] }
 0x19b   :  { %2748 = vmatprep.subr.bf16.mxu0 %v6755_v38  ;;  %2912 = vmatprep.subr.bf16.mxu1 %v6757_v42  ;;  %v228_v38 = vld [vmem:[#allocation7 + $0x10] sm:$0xff]  ;;  %v233_v42 = vld [vmem:[#allocation7 + $0x38] sm:$0xff] }
 0x19c   :  { %v6433_v47 = vcombine.high %v229_v41, %v233_v42  ;;  %v273_v23 = vld [vmem:[#allocation7 + $0x178] sm:$0xff] }
 0x19e   :  { %2749 = vmatpush1.bf16.msra.mxu0 %v6754_v44  ;;  %2913 = vmatpush1.bf16.msra.mxu1 %v6756_v45  ;;  %v6810_v44 = vcombine.low %v610_v29, %v614_v30  ;;  %v6812_v45 = vcombine.low %v611_v31, %v615_v34  ;;  %v276_v29 = vld [vmem:[#allocation7 + $0x190] sm:$0xff]  ;;  %v277_v31 = vld [vmem:[#allocation7 + $0x198] sm:$0xff] }
 0x19f   :  { %2750 = vmatprep.subr.bf16.mxu0 %v6763_v46  ;;  %2914 = vmatprep.subr.bf16.mxu1 %v6765_v50  ;;  %v6431_v46 = vcombine.high %v228_v38, %v232_v39  ;;  %v237_v50 = vld [vmem:[#allocation7 + $0x58] sm:$0xff]  ;;  %v280_v30 = vld [vmem:[#allocation7 + $0x1b0] sm:$0xff] }
 0x1a0   :  { %v6441_v61 = vcombine.high %v237_v50, %v241_v51  ;;  %v281_v34 = vld [vmem:[#allocation7 + $0x1b8] sm:$0xff] }
 0x1a2   :  { %2751 = vmatpush1.bf16.msra.mxu0 %v6762_v52  ;;  %2915 = vmatpush1.bf16.msra.mxu1 %v6764_v54  ;;  %v8567_v52 = vcombine.low %v217_v26, %v217_v26  ;;  %v6430_v54 = vcombine.low %v228_v38, %v232_v39  ;;  %v284_v38 = vld [vmem:[#allocation7 + $0x1d0] sm:$0xff] }
 0x1a3   :  { %2752 = vmatprep.subr.bf16.mxu0 %v6771_v55  ;;  %2916 = vmatprep.subr.bf16.mxu1 %v6773_v60  ;;  %v6432_v55 = vcombine.low %v229_v41, %v233_v42  ;;  %v245_v60 = vld [vmem:[#allocation7 + $0x98] sm:$0xff]  ;;  %v288_v39 = vld [vmem:[#allocation7 + $0x1f0] sm:$0xff]  ;;  %v6481_v41 = vcombine.high %v277_v31, %v281_v34 }
 0x1a4   :  { %v289_v42 = vld [vmem:[#allocation7 + $0x1f8] sm:$0xff]  ;;  %v296_v26 = vld [vmem:[#allocation7 + $0x230] sm:$0xff] }
 0x1a6   :  { %2753 = vmatpush1.bf16.msra.mxu0 %v6770_v62  ;;  %2917 = vmatpush1.bf16.msra.mxu1 %v6772_v63  ;;  %v249_v62 = vld [vmem:[#allocation7 + $0xb8] sm:$0xff]  ;;  %v6438_v63 = vcombine.low %v236_v48, %v240_v49 }
 0x1a7   :  { %2754 = vmatprep.subr.bf16.mxu0 %v6779_v0  ;;  %2918 = vmatprep.subr.bf16.mxu1 %v6781_v4  ;;  %v6440_v0 = vcombine.low %v237_v50, %v241_v51  ;;  %v253_v4 = vld [vmem:[#allocation7 + $0xd8] sm:$0xff]  ;;  %v6449_v5 = vcombine.high %v245_v60, %v249_v62  ;;  %v6486_v51 = vcombine.low %v284_v38, %v288_v39 }
 0x1a8   :  { %v293_v48 = vld [vmem:[#allocation7 + $0x218] sm:$0xff] }
 0x1a9   :  { %v297_v50 = vld [vmem:[#allocation7 + $0x238] sm:$0xff] }
 0x1aa   :  { %2755 = vmatpush1.bf16.msra.mxu0 %v6778_v6  ;;  %2919 = vmatpush1.bf16.msra.mxu1 %v6780_v7  ;;  %v257_v6 = vld [vmem:[#allocation7 + $0xf8] sm:$0xff]  ;;  %v6446_v7 = vcombine.low %v244_v57, %v248_v58  ;;  %v304_v57 = vld [vmem:[#allocation7 + $0x270] sm:$0xff] }
 0x1ab   :  { %2756 = vmatprep.subr.bf16.mxu0 %v6787_v8  ;;  %2920 = vmatprep.subr.bf16.mxu1 %v6789_v13  ;;  %v6448_v8 = vcombine.low %v245_v60, %v249_v62  ;;  %v261_v13 = vld [vmem:[#allocation7 + $0x118] sm:$0xff]  ;;  %v6457_v14 = vcombine.high %v253_v4, %v257_v6  ;;  %v6497_v60 = vcombine.high %v293_v48, %v297_v50 }
 0x1ac   :  { %v301_v58 = vld [vmem:[#allocation7 + $0x258] sm:$0xff] }
 0x1ae   :  { %2757 = vmatpush1.bf16.msra.mxu0 %v6786_v16  ;;  %2921 = vmatpush1.bf16.msra.mxu1 %v6788_v17  ;;  %v265_v16 = vld [vmem:[#allocation7 + $0x138] sm:$0xff]  ;;  %v6454_v17 = vcombine.low %v252_v2, %v256_v3  ;;  %v312_v2 = vld [vmem:[#allocation7 + $0x2b0] sm:$0xff] }
 0x1af   :  { %2758 = vmatprep.subr.bf16.mxu0 %v6795_v18  ;;  %2922 = vmatprep.subr.bf16.mxu1 %v6797_v53  ;;  %v6456_v18 = vcombine.low %v253_v4, %v257_v6  ;;  %v6465_v53 = vcombine.high %v261_v13, %v265_v16  ;;  %v309_v3 = vld [vmem:[#allocation7 + $0x298] sm:$0xff] }
 0x1b2   :  { %2759 = vmatpush1.bf16.msra.mxu0 %v6794_v24  ;;  %2923 = vmatpush1.bf16.msra.mxu1 %v6796_v25  ;;  %v6462_v24 = vcombine.low %v260_v10, %v264_v11  ;;  %v6464_v25 = vcombine.low %v261_v13, %v265_v16  ;;  %v320_v10 = vld [vmem:[#allocation7 + $0x2f0] sm:$0xff]  ;;  %v317_v11 = vld [vmem:[#allocation7 + $0x2d8] sm:$0xff] }
 0x1b3   :  { %2760 = vmatprep.subr.bf16.mxu0 %v6803_v28  ;;  %2924 = vmatprep.subr.bf16.mxu1 %v6805_v33  ;;  %v6473_v33 = vcombine.high %v269_v21, %v273_v23 }
 0x1b6   :  { %2761 = vmatpush1.bf16.msra.mxu0 %v6802_v35  ;;  %2925 = vmatpush1.bf16.msra.mxu1 %v6804_v36  ;;  %v6472_v36 = vcombine.low %v269_v21, %v273_v23 }
 0x1b7   :  { %2771 = vmatprep.subr.bf16.mxu0 %v6811_v15  ;;  %2935 = vmatprep.subr.bf16.mxu1 %v6813_v40  ;;  %v6479_v15 = vcombine.high %v276_v29, %v280_v30  ;;  %v285_v40 = vld [vmem:[#allocation7 + $0x1d8] sm:$0xff] }
 0x1b8   :  { %v6489_v49 = vcombine.high %v285_v40, %v289_v42 }
 0x1b9   :  { %2763 = vmatmul.mubr.bf16.vlgmr.msra.gmra.mrb[0].mxu0 %v8561_v43  ;;  %2927 = vmatmul.mubr.bf16.vlgmr.msra.gmra.mrb[0].mxu1 %v8561_v43 }
 0x1ba   :  { %2772 = vmatpush1.bf16.msra.mxu0 %v6810_v44  ;;  %2936 = vmatpush1.bf16.msra.mxu1 %v6812_v45  ;;  %v6478_v44 = vcombine.low %v276_v29, %v280_v30  ;;  %v6480_v45 = vcombine.low %v277_v31, %v281_v34  ;;  %v336_v29 = vld [vmem:[#allocation7 + $0x370] sm:$0xff]  ;;  %v333_v30 = vld [vmem:[#allocation7 + $0x358] sm:$0xff] }
 0x1bb   :  { %2803 = vmatprep.mubr.bf16.mxu0 %v8253_v32  ;;  %2967 = vmatprep.mubr.bf16.mxu1 %v8253_v32 }
 0x1bc   :  { %2976 = vmatprep.subr.bf16.mxu0 %v6431_v46  ;;  %3140 = vmatprep.subr.bf16.mxu1 %v6433_v47  ;;  %v6487_v46 = vcombine.high %v284_v38, %v288_v39  ;;  %v292_v47 = vld [vmem:[#allocation7 + $0x210] sm:$0xff]  ;;  %v341_v39 = vld [vmem:[#allocation7 + $0x398] sm:$0xff] }
 0x1bd   :  { %v6494_v62 = vcombine.low %v292_v47, %v296_v26  ;;  %v344_v38 = vld [vmem:[#allocation7 + $0x3b0] sm:$0xff] }
 0x1c5   :  { %6818 = vmatmul.mubr.msk.bf16.vlgmr.msra.gmra.mrb[0].mxu0 %vm2644_vm0, %v8567_v52  ;;  %6819 = vmatmul.mubr.msk.bf16.vlgmr.msra.gmra.mrb[0].mxu1 %vm2644_vm0, %v8567_v52 }
 0x1c6   :  { %2977 = vmatpush1.bf16.msra.mxu0 %v6430_v54  ;;  %3141 = vmatpush1.bf16.msra.mxu1 %v6432_v55  ;;  %v6488_v54 = vcombine.low %v285_v40, %v289_v42  ;;  %v6495_v55 = vcombine.high %v292_v47, %v296_v26  ;;  %v348_v47 = vld [vmem:[#allocation7 + $0x3d0] sm:$0xff] }
 0x1c7   :  { %2978 = vmatprep.subr.bf16.mxu0 %v6439_v56  ;;  %3142 = vmatprep.subr.bf16.mxu1 %v6441_v61  ;;  %v300_v56 = vld [vmem:[#allocation7 + $0x250] sm:$0xff]  ;;  %v305_v61 = vld [vmem:[#allocation7 + $0x278] sm:$0xff] }
 0x1c8   :  { %3008 = vmatprep.mubr.bf16.mxu0 %v8526_v59  ;;  %3172 = vmatprep.mubr.bf16.mxu1 %v8526_v59  ;;  %v272_v59 = vld [vmem:[#allocation7 + $0x170] sm:$0xff]  ;;  %v6505_v4 = vcombine.high %v301_v58, %v305_v61  ;;  %v6502_v6 = vcombine.low %v300_v56, %v304_v57 }
 0x1c9   :  { %v6471_v28 = vcombine.high %v268_v20, %v272_v59  ;;  %v6470_v35 = vcombine.low %v268_v20, %v272_v59  ;;  %v328_v20 = vld [vmem:[#allocation7 + $0x330] sm:$0xff]  ;;  %v325_v59 = vld [vmem:[#allocation7 + $0x318] sm:$0xff] }
 0x1ca   :  { %2979 = vmatpush1.bf16.msra.mxu0 %v6438_v63  ;;  %3143 = vmatpush1.bf16.msra.mxu1 %v6440_v0  ;;  %v6496_v63 = vcombine.low %v293_v48, %v297_v50  ;;  %v6503_v0 = vcombine.high %v300_v56, %v304_v57  ;;  %v352_v26 = vld [vmem:[#allocation7 + $0x3f0] sm:$0xff]  ;;  %v349_v48 = vld [vmem:[#allocation7 + $0x3d8] sm:$0xff] }
 0x1cb   :  { %2980 = vmatprep.subr.bf16.mxu0 %v6447_v1  ;;  %3144 = vmatprep.subr.bf16.mxu1 %v6449_v5  ;;  %v308_v1 = vld [vmem:[#allocation7 + $0x290] sm:$0xff]  ;;  %v313_v5 = vld [vmem:[#allocation7 + $0x2b8] sm:$0xff] }
 0x1cc   :  { %v6513_v13 = vcombine.high %v309_v3, %v313_v5  ;;  %v6510_v16 = vcombine.low %v308_v1, %v312_v2  ;;  %v356_v56 = vld [vmem:[#allocation7 + $0x410] sm:$0xff] }
 0x1cd   :  { %v360_v57 = vld [vmem:[#allocation7 + $0x430] sm:$0xff] }
 0x1ce   :  { %2981 = vmatpush1.bf16.msra.mxu0 %v6446_v7  ;;  %3145 = vmatpush1.bf16.msra.mxu1 %v6448_v8  ;;  %v6504_v7 = vcombine.low %v301_v58, %v305_v61  ;;  %v6511_v8 = vcombine.high %v308_v1, %v312_v2  ;;  %v357_v58 = vld [vmem:[#allocation7 + $0x418] sm:$0xff]  ;;  %v6550_v61 = vcombine.low %v348_v47, %v352_v26  ;;  %v364_v1 = vld [vmem:[#allocation7 + $0x450] sm:$0xff] }
 0x1cf   :  { %2982 = vmatprep.subr.bf16.mxu0 %v6455_v9  ;;  %3146 = vmatprep.subr.bf16.mxu1 %v6457_v14  ;;  %v316_v9 = vld [vmem:[#allocation7 + $0x2d0] sm:$0xff]  ;;  %v321_v14 = vld [vmem:[#allocation7 + $0x2f8] sm:$0xff] }
 0x1d0   :  { %v6521_v21 = vcombine.high %v317_v11, %v321_v14  ;;  %v6518_v23 = vcombine.low %v316_v9, %v320_v10  ;;  %v368_v2 = vld [vmem:[#allocation7 + $0x470] sm:$0xff] }
 0x1d2   :  { %2983 = vmatpush1.bf16.msra.mxu0 %v6454_v17  ;;  %3147 = vmatpush1.bf16.msra.mxu1 %v6456_v18  ;;  %v6512_v17 = vcombine.low %v309_v3, %v313_v5  ;;  %v6519_v18 = vcombine.high %v316_v9, %v320_v10  ;;  %v365_v3 = vld [vmem:[#allocation7 + $0x458] sm:$0xff]  ;;  %v6558_v5 = vcombine.low %v356_v56, %v360_v57  ;;  %v372_v9 = vld [vmem:[#allocation7 + $0x490] sm:$0xff] }
 0x1d3   :  { %2984 = vmatprep.subr.bf16.mxu0 %v6463_v19  ;;  %3148 = vmatprep.subr.bf16.mxu1 %v6465_v53  ;;  %v324_v19 = vld [vmem:[#allocation7 + $0x310] sm:$0xff]  ;;  %v329_v53 = vld [vmem:[#allocation7 + $0x338] sm:$0xff] }
 0x1d4   :  { %v6529_v31 = vcombine.high %v325_v59, %v329_v53  ;;  %v6526_v34 = vcombine.low %v324_v19, %v328_v20  ;;  %v376_v10 = vld [vmem:[#allocation7 + $0x4b0] sm:$0xff] }
 0x1d6   :  { %2985 = vmatpush1.bf16.msra.mxu0 %v6462_v24  ;;  %3149 = vmatpush1.bf16.msra.mxu1 %v6464_v25  ;;  %v6520_v24 = vcombine.low %v317_v11, %v321_v14  ;;  %v6527_v25 = vcombine.high %v324_v19, %v328_v20  ;;  %v373_v11 = vld [vmem:[#allocation7 + $0x498] sm:$0xff]  ;;  %v6566_v14 = vcombine.low %v364_v1, %v368_v2  ;;  %v380_v19 = vld [vmem:[#allocation7 + $0x4d0] sm:$0xff] }
 0x1d7   :  { %2986 = vmatprep.subr.bf16.mxu0 %v6471_v28  ;;  %3150 = vmatprep.subr.bf16.mxu1 %v6473_v33  ;;  %v332_v28 = vld [vmem:[#allocation7 + $0x350] sm:$0xff]  ;;  %v337_v33 = vld [vmem:[#allocation7 + $0x378] sm:$0xff] }
 0x1d8   :  { %v6537_v40 = vcombine.high %v333_v30, %v337_v33  ;;  %v6534_v42 = vcombine.low %v332_v28, %v336_v29  ;;  %v384_v20 = vld [vmem:[#allocation7 + $0x4f0] sm:$0xff] }
 0x1da   :  { %2987 = vmatpush1.bf16.msra.mxu0 %v6470_v35  ;;  %3151 = vmatpush1.bf16.msra.mxu1 %v6472_v36  ;;  %v6528_v35 = vcombine.low %v325_v59, %v329_v53  ;;  %v6535_v36 = vcombine.high %v332_v28, %v336_v29  ;;  %v381_v59 = vld [vmem:[#allocation7 + $0x4d8] sm:$0xff]  ;;  %v6574_v53 = vcombine.low %v372_v9, %v376_v10  ;;  %v392_v28 = vld [vmem:[#allocation7 + $0x530] sm:$0xff] }
 0x1db   :  { %2988 = vmatprep.subr.bf16.mxu0 %v6479_v15  ;;  %3152 = vmatprep.subr.bf16.mxu1 %v6481_v41  ;;  %v340_v15 = vld [vmem:[#allocation7 + $0x390] sm:$0xff]  ;;  %v345_v41 = vld [vmem:[#allocation7 + $0x3b8] sm:$0xff] }
 0x1dc   :  { %v6542_v50 = vcombine.low %v340_v15, %v344_v38  ;;  %v389_v29 = vld [vmem:[#allocation7 + $0x518] sm:$0xff] }
 0x1de   :  { %2989 = vmatpush1.bf16.msra.mxu0 %v6478_v44  ;;  %3153 = vmatpush1.bf16.msra.mxu1 %v6480_v45  ;;  %v6536_v44 = vcombine.low %v333_v30, %v337_v33  ;;  %v6543_v45 = vcombine.high %v340_v15, %v344_v38  ;;  %v393_v30 = vld [vmem:[#allocation7 + $0x538] sm:$0xff] }
 0x1df   :  { %2990 = vmatprep.subr.bf16.mxu0 %v6487_v46  ;;  %3154 = vmatprep.subr.bf16.mxu1 %v6489_v49  ;;  %v6545_v46 = vcombine.high %v341_v39, %v345_v41  ;;  %v353_v49 = vld [vmem:[#allocation7 + $0x3f8] sm:$0xff] }
 0x1e0   :  { %v397_v15 = vld [vmem:[#allocation7 + $0x558] sm:$0xff] }
 0x1e1   :  { %v401_v38 = vld [vmem:[#allocation7 + $0x578] sm:$0xff] }
 0x1e2   :  { %2991 = vmatpush1.bf16.msra.mxu0 %v6486_v51  ;;  %3155 = vmatpush1.bf16.msra.mxu1 %v6488_v54  ;;  %v6544_v51 = vcombine.low %v341_v39, %v345_v41  ;;  %v6551_v54 = vcombine.high %v348_v47, %v352_v26  ;;  %v409_v47 = vld [vmem:[#allocation7 + $0x5b8] sm:$0xff] }
 0x1e3   :  { %2992 = vmatprep.subr.bf16.mxu0 %v6495_v55  ;;  %3156 = vmatprep.subr.bf16.mxu1 %v6497_v60  ;;  %v6553_v55 = vcombine.high %v349_v48, %v353_v49  ;;  %v361_v60 = vld [vmem:[#allocation7 + $0x438] sm:$0xff] }
 0x1e6   :  { %2993 = vmatpush1.bf16.msra.mxu0 %v6494_v62  ;;  %3157 = vmatpush1.bf16.msra.mxu1 %v6496_v63  ;;  %v6552_v62 = vcombine.low %v349_v48, %v353_v49  ;;  %v6559_v63 = vcombine.high %v356_v56, %v360_v57  ;;  %v6600_v48 = vcombine.low %v397_v15, %v401_v38  ;;  %v417_v56 = vld [vmem:[#allocation7 + $0x5f8] sm:$0xff] }
 0x1e7   :  { %2994 = vmatprep.subr.bf16.mxu0 %v6503_v0  ;;  %3158 = vmatprep.subr.bf16.mxu1 %v6505_v4  ;;  %v6561_v0 = vcombine.high %v357_v58, %v361_v60  ;;  %v369_v4 = vld [vmem:[#allocation7 + $0x478] sm:$0xff] }
 0x1ea   :  { %2995 = vmatpush1.bf16.msra.mxu0 %v6502_v6  ;;  %3159 = vmatpush1.bf16.msra.mxu1 %v6504_v7  ;;  %v6560_v6 = vcombine.low %v357_v58, %v361_v60  ;;  %v6567_v7 = vcombine.high %v364_v1, %v368_v2  ;;  %v425_v1 = vld [vmem:[#allocation7 + $0x638] sm:$0xff] }
 0x1eb   :  { %2996 = vmatprep.subr.bf16.mxu0 %v6511_v8  ;;  %3160 = vmatprep.subr.bf16.mxu1 %v6513_v13  ;;  %v6569_v8 = vcombine.high %v365_v3, %v369_v4  ;;  %v377_v13 = vld [vmem:[#allocation7 + $0x4b8] sm:$0xff] }
 0x1ee   :  { %2997 = vmatpush1.bf16.msra.mxu0 %v6510_v16  ;;  %3161 = vmatpush1.bf16.msra.mxu1 %v6512_v17  ;;  %v6568_v16 = vcombine.low %v365_v3, %v369_v4  ;;  %v6575_v17 = vcombine.high %v372_v9, %v376_v10  ;;  %v433_v9 = vld [vmem:[#allocation7 + $0x678] sm:$0xff] }
 0x1ef   :  { %2998 = vmatprep.subr.bf16.mxu0 %v6519_v18  ;;  %3162 = vmatprep.subr.bf16.mxu1 %v6521_v21  ;;  %v6577_v18 = vcombine.high %v373_v11, %v377_v13  ;;  %v385_v21 = vld [vmem:[#allocation7 + $0x4f8] sm:$0xff] }
 0x1f0   :  { %v6584_v33 = vcombine.low %v381_v59, %v385_v21 }
 0x1f2   :  { %2999 = vmatpush1.bf16.msra.mxu0 %v6518_v23  ;;  %3163 = vmatpush1.bf16.msra.mxu1 %v6520_v24  ;;  %v6583_v23 = vcombine.high %v380_v19, %v384_v20  ;;  %v6585_v24 = vcombine.high %v381_v59, %v385_v21 }
 0x1f3   :  { %3000 = vmatprep.subr.bf16.mxu0 %v6527_v25  ;;  %3164 = vmatprep.subr.bf16.mxu1 %v6529_v31  ;;  %v388_v25 = vld [vmem:[#allocation7 + $0x510] sm:$0xff]  ;;  %v6582_v31 = vcombine.low %v380_v19, %v384_v20  ;;  %v441_v19 = vld [vmem:[#allocation7 + $0x6b8] sm:$0xff] }
 0x1f4   :  { %v6590_v39 = vcombine.low %v388_v25, %v392_v28 }
 0x1f6   :  { %3001 = vmatpush1.bf16.msra.mxu0 %v6526_v34  ;;  %3165 = vmatpush1.bf16.msra.mxu1 %v6528_v35  ;;  %v6591_v34 = vcombine.high %v388_v25, %v392_v28  ;;  %v396_v35 = vld [vmem:[#allocation7 + $0x550] sm:$0xff]  ;;  %v449_v25 = vld [vmem:[#allocation7 + $0x6f8] sm:$0xff] }
 0x1f7   :  { %3002 = vmatprep.subr.bf16.mxu0 %v6535_v36  ;;  %3166 = vmatprep.subr.bf16.mxu1 %v6537_v40  ;;  %v400_v36 = vld [vmem:[#allocation7 + $0x570] sm:$0xff]  ;;  %v6592_v40 = vcombine.low %v389_v29, %v393_v30 }
 0x1f8   :  { %v6599_v41 = vcombine.high %v396_v35, %v400_v36  ;;  %v6598_v26 = vcombine.low %v396_v35, %v400_v36  ;;  %v457_v35 = vld [vmem:[#allocation7 + $0x738] sm:$0xff] }
 0x1fa   :  { %3003 = vmatpush1.bf16.msra.mxu0 %v6534_v42  ;;  %3167 = vmatpush1.bf16.msra.mxu1 %v6536_v44  ;;  %v6601_v42 = vcombine.high %v397_v15, %v401_v38  ;;  %v404_v44 = vld [vmem:[#allocation7 + $0x590] sm:$0xff] }
 0x1fb   :  { %3004 = vmatprep.subr.bf16.mxu0 %v6543_v45  ;;  %3168 = vmatprep.subr.bf16.mxu1 %v6545_v46  ;;  %v408_v45 = vld [vmem:[#allocation7 + $0x5b0] sm:$0xff]  ;;  %v405_v46 = vld [vmem:[#allocation7 + $0x598] sm:$0xff] }
 0x1fc   :  { %v6607_v49 = vcombine.high %v404_v44, %v408_v45  ;;  %v6606_v57 = vcombine.low %v404_v44, %v408_v45  ;;  %v6608_v58 = vcombine.low %v405_v46, %v409_v47  ;;  %v465_v44 = vld [vmem:[#allocation7 + $0x778] sm:$0xff] }
 0x1fe   :  { %3005 = vmatpush1.bf16.msra.mxu0 %v6542_v50  ;;  %3169 = vmatpush1.bf16.msra.mxu1 %v6544_v51  ;;  %v6609_v50 = vcombine.high %v405_v46, %v409_v47  ;;  %v412_v51 = vld [vmem:[#allocation7 + $0x5d0] sm:$0xff] }
 0x1ff   :  { %3006 = vmatprep.subr.bf16.mxu0 %v6551_v54  ;;  %3170 = vmatprep.subr.bf16.mxu1 %v6553_v55  ;;  %v416_v54 = vld [vmem:[#allocation7 + $0x5f0] sm:$0xff]  ;;  %v413_v55 = vld [vmem:[#allocation7 + $0x5d8] sm:$0xff] }
 0x200   :  { %v6615_v60 = vcombine.high %v412_v51, %v416_v54  ;;  %v6614_v2 = vcombine.low %v412_v51, %v416_v54  ;;  %v6616_v3 = vcombine.low %v413_v55, %v417_v56  ;;  %v473_v51 = vld [vmem:[#allocation7 + $0x7b8] sm:$0xff] }
 0x202   :  { %3007 = vmatpush1.bf16.msra.mxu0 %v6550_v61  ;;  %3171 = vmatpush1.bf16.msra.mxu1 %v6552_v62  ;;  %v6617_v61 = vcombine.high %v413_v55, %v417_v56  ;;  %v420_v62 = vld [vmem:[#allocation7 + $0x610] sm:$0xff] }
 0x203   :  { %3017 = vmatprep.subr.bf16.mxu0 %v6559_v63  ;;  %3181 = vmatprep.subr.bf16.mxu1 %v6561_v0  ;;  %v424_v63 = vld [vmem:[#allocation7 + $0x630] sm:$0xff]  ;;  %v421_v0 = vld [vmem:[#allocation7 + $0x618] sm:$0xff] }
 0x204   :  { %v6623_v4 = vcombine.high %v420_v62, %v424_v63  ;;  %v6622_v10 = vcombine.low %v420_v62, %v424_v63  ;;  %v481_v62 = vld [vmem:[#allocation7 + $0x7f8] sm:$0xff] }
 0x205   :  { %3009 = vmatmul.mubr.bf16.vlgmr.msra.gmra.mrb[4].mxu0 %v8532_v12  ;;  %3173 = vmatmul.mubr.bf16.vlgmr.msra.gmra.mrb[4].mxu1 %v8532_v12  ;;  %v6576_v12 = vcombine.low %v373_v11, %v377_v13  ;;  %v6624_v11 = vcombine.low %v421_v0, %v425_v1 }
 0x206   :  { %3018 = vmatpush1.bf16.msra.mxu0 %v6558_v5  ;;  %3182 = vmatpush1.bf16.msra.mxu1 %v6560_v6  ;;  %v6625_v5 = vcombine.high %v421_v0, %v425_v1  ;;  %v428_v6 = vld [vmem:[#allocation7 + $0x650] sm:$0xff] }
 0x207   :  { %3019 = vmatprep.subr.bf16.mxu0 %v6567_v7  ;;  %3183 = vmatprep.subr.bf16.mxu1 %v6569_v8  ;;  %v432_v7 = vld [vmem:[#allocation7 + $0x670] sm:$0xff]  ;;  %v429_v8 = vld [vmem:[#allocation7 + $0x658] sm:$0xff] }
 0x208   :  { %3049 = vmatprep.mubr.bf16.mxu0 %v8538_v22  ;;  %3213 = vmatprep.mubr.bf16.mxu1 %v8538_v22  ;;  %v6593_v22 = vcombine.high %v389_v29, %v393_v30  ;;  %v6631_v13 = vcombine.high %v428_v6, %v432_v7  ;;  %v6630_v20 = vcombine.low %v428_v6, %v432_v7  ;;  %v489_v6 = vld [vmem:[#allocation7 + $0x838] sm:$0xff] }
 0x209   :  { %v6632_v59 = vcombine.low %v429_v8, %v433_v9 }
 0x20a   :  { %3020 = vmatpush1.bf16.msra.mxu0 %v6566_v14  ;;  %3184 = vmatpush1.bf16.msra.mxu1 %v6568_v16  ;;  %v6633_v14 = vcombine.high %v429_v8, %v433_v9  ;;  %v436_v16 = vld [vmem:[#allocation7 + $0x690] sm:$0xff] }
 0x20b   :  { %3021 = vmatprep.subr.bf16.mxu0 %v6575_v17  ;;  %3185 = vmatprep.subr.bf16.mxu1 %v6577_v18  ;;  %v440_v17 = vld [vmem:[#allocation7 + $0x6b0] sm:$0xff]  ;;  %v437_v18 = vld [vmem:[#allocation7 + $0x698] sm:$0xff] }
 0x20c   :  { %v6639_v21 = vcombine.high %v436_v16, %v440_v17  ;;  %v6638_v28 = vcombine.low %v436_v16, %v440_v17  ;;  %v6640_v29 = vcombine.low %v437_v18, %v441_v19  ;;  %v497_v16 = vld [vmem:[#allocation7 + $0x878] sm:$0xff] }
 0x20e   :  { %3022 = vmatpush1.bf16.msra.mxu0 %v6574_v53  ;;  %3186 = vmatpush1.bf16.msra.mxu1 %v6576_v12  ;;  %v6641_v53 = vcombine.high %v437_v18, %v441_v19  ;;  %v444_v12 = vld [vmem:[#allocation7 + $0x6d0] sm:$0xff] }
 0x20f   :  { %3023 = vmatprep.subr.bf16.mxu0 %v6583_v23  ;;  %3187 = vmatprep.subr.bf16.mxu1 %v6585_v24  ;;  %v448_v23 = vld [vmem:[#allocation7 + $0x6f0] sm:$0xff]  ;;  %v445_v24 = vld [vmem:[#allocation7 + $0x6d8] sm:$0xff] }
 0x210   :  { %v6647_v30 = vcombine.high %v444_v12, %v448_v23  ;;  %v6646_v36 = vcombine.low %v444_v12, %v448_v23  ;;  %v6648_v15 = vcombine.low %v445_v24, %v449_v25  ;;  %v505_v12 = vld [vmem:[#allocation7 + $0x8b8] sm:$0xff] }
 0x212   :  { %3024 = vmatpush1.bf16.msra.mxu0 %v6582_v31  ;;  %3188 = vmatpush1.bf16.msra.mxu1 %v6584_v33  ;;  %v6649_v31 = vcombine.high %v445_v24, %v449_v25  ;;  %v452_v33 = vld [vmem:[#allocation7 + $0x710] sm:$0xff] }
 0x213   :  { %3025 = vmatprep.subr.bf16.mxu0 %v6591_v34  ;;  %3189 = vmatprep.subr.bf16.mxu1 %v6593_v22  ;;  %v456_v34 = vld [vmem:[#allocation7 + $0x730] sm:$0xff]  ;;  %v453_v22 = vld [vmem:[#allocation7 + $0x718] sm:$0xff] }
 0x214   :  { %v6655_v38 = vcombine.high %v452_v33, %v456_v34  ;;  %v6654_v45 = vcombine.low %v452_v33, %v456_v34  ;;  %v6656_v46 = vcombine.low %v453_v22, %v457_v35  ;;  %v513_v33 = vld [vmem:[#allocation7 + $0x8f8] sm:$0xff] }
 0x216   :  { %3026 = vmatpush1.bf16.msra.mxu0 %v6590_v39  ;;  %3190 = vmatpush1.bf16.msra.mxu1 %v6592_v40  ;;  %v6657_v39 = vcombine.high %v453_v22, %v457_v35  ;;  %v460_v40 = vld [vmem:[#allocation7 + $0x750] sm:$0xff] }
 0x217   :  { %3027 = vmatprep.subr.bf16.mxu0 %v6599_v41  ;;  %3191 = vmatprep.subr.bf16.mxu1 %v6601_v42  ;;  %v464_v41 = vld [vmem:[#allocation7 + $0x770] sm:$0xff]  ;;  %v461_v42 = vld [vmem:[#allocation7 + $0x758] sm:$0xff] }
 0x218   :  { %v6663_v47 = vcombine.high %v460_v40, %v464_v41  ;;  %v6662_v54 = vcombine.low %v460_v40, %v464_v41  ;;  %v6664_v55 = vcombine.low %v461_v42, %v465_v44 }
 0x21a   :  { %3028 = vmatpush1.bf16.msra.mxu0 %v6598_v26  ;;  %3192 = vmatpush1.bf16.msra.mxu1 %v6600_v48  ;;  %v6665_v26 = vcombine.high %v461_v42, %v465_v44  ;;  %v468_v48 = vld [vmem:[#allocation7 + $0x790] sm:$0xff] }
 0x21b   :  { %3029 = vmatprep.subr.bf16.mxu0 %v6607_v49  ;;  %3193 = vmatprep.subr.bf16.mxu1 %v6609_v50  ;;  %v472_v49 = vld [vmem:[#allocation7 + $0x7b0] sm:$0xff]  ;;  %v469_v50 = vld [vmem:[#allocation7 + $0x798] sm:$0xff] }
 0x21c   :  { %v6671_v56 = vcombine.high %v468_v48, %v472_v49  ;;  %v6670_v63 = vcombine.low %v468_v48, %v472_v49  ;;  %v6672_v0 = vcombine.low %v469_v50, %v473_v51  ;;  %v524_v44 = vld [vmem:[#allocation7 + $0x950] sm:$0xff]  ;;  %v225_v48 = vld [vmem:[#allocation5] sm:$0xff] }
 0x21d   :  { %4021 = vperm.xlu0 %7374, %v225_v48   ;;  %v592_v48 = vld [vmem:[#allocation7 + $0xb70] sm:$0xff] }
 0x21e   :  { %3030 = vmatpush1.bf16.msra.mxu0 %v6606_v57  ;;  %3194 = vmatpush1.bf16.msra.mxu1 %v6608_v58  ;;  %v6673_v57 = vcombine.high %v469_v50, %v473_v51  ;;  %v476_v58 = vld [vmem:[#allocation7 + $0x7d0] sm:$0xff] }
 0x21f   :  { %3031 = vmatprep.subr.bf16.mxu0 %v6615_v60  ;;  %3195 = vmatprep.subr.bf16.mxu1 %v6617_v61  ;;  %v480_v60 = vld [vmem:[#allocation7 + $0x7f0] sm:$0xff]  ;;  %v477_v61 = vld [vmem:[#allocation7 + $0x7d8] sm:$0xff] }
 0x220   :  { %v6679_v1 = vcombine.high %v476_v58, %v480_v60  ;;  %v6678_v7 = vcombine.low %v476_v58, %v480_v60  ;;  %v6680_v8 = vcombine.low %v477_v61, %v481_v62 }
 0x222   :  { %3032 = vmatpush1.bf16.msra.mxu0 %v6614_v2  ;;  %3196 = vmatpush1.bf16.msra.mxu1 %v6616_v3  ;;  %v6681_v2 = vcombine.high %v477_v61, %v481_v62  ;;  %v484_v3 = vld [vmem:[#allocation7 + $0x810] sm:$0xff] }
 0x223   :  { %3033 = vmatprep.subr.bf16.mxu0 %v6623_v4  ;;  %3197 = vmatprep.subr.bf16.mxu1 %v6625_v5  ;;  %v488_v4 = vld [vmem:[#allocation7 + $0x830] sm:$0xff]  ;;  %v485_v5 = vld [vmem:[#allocation7 + $0x818] sm:$0xff] }
 0x224   :  { %v6687_v9 = vcombine.high %v484_v3, %v488_v4  ;;  %v6686_v17 = vcombine.low %v484_v3, %v488_v4  ;;  %v6688_v18 = vcombine.low %v485_v5, %v489_v6 }
 0x226   :  { %3034 = vmatpush1.bf16.msra.mxu0 %v6622_v10  ;;  %3198 = vmatpush1.bf16.msra.mxu1 %v6624_v11  ;;  %v6689_v10 = vcombine.high %v485_v5, %v489_v6  ;;  %v492_v11 = vld [vmem:[#allocation7 + $0x850] sm:$0xff] }
 0x227   :  { %3035 = vmatprep.subr.bf16.mxu0 %v6631_v13  ;;  %3199 = vmatprep.subr.bf16.mxu1 %v6633_v14  ;;  %v496_v13 = vld [vmem:[#allocation7 + $0x870] sm:$0xff]  ;;  %v493_v14 = vld [vmem:[#allocation7 + $0x858] sm:$0xff] }
 0x228   :  { %v6695_v19 = vcombine.high %v492_v11, %v496_v13  ;;  %v6694_v23 = vcombine.low %v492_v11, %v496_v13  ;;  %v6696_v24 = vcombine.low %v493_v14, %v497_v16 }
 0x22a   :  { %3036 = vmatpush1.bf16.msra.mxu0 %v6630_v20  ;;  %3200 = vmatpush1.bf16.msra.mxu1 %v6632_v59  ;;  %v6697_v20 = vcombine.high %v493_v14, %v497_v16  ;;  %v500_v59 = vld [vmem:[#allocation7 + $0x890] sm:$0xff] }
 0x22b   :  { %3037 = vmatprep.subr.bf16.mxu0 %v6639_v21  ;;  %3201 = vmatprep.subr.bf16.mxu1 %v6641_v53  ;;  %v504_v21 = vld [vmem:[#allocation7 + $0x8b0] sm:$0xff]  ;;  %v501_v53 = vld [vmem:[#allocation7 + $0x898] sm:$0xff] }
 0x22c   :  { %v6703_v25 = vcombine.high %v500_v59, %v504_v21  ;;  %v6702_v34 = vcombine.low %v500_v59, %v504_v21 }
 0x22e   :  { %3038 = vmatpush1.bf16.msra.mxu0 %v6638_v28  ;;  %3202 = vmatpush1.bf16.msra.mxu1 %v6640_v29  ;;  %v6705_v28 = vcombine.high %v501_v53, %v505_v12  ;;  %v508_v29 = vld [vmem:[#allocation7 + $0x8d0] sm:$0xff] }
 0x22f   :  { %3039 = vmatprep.subr.bf16.mxu0 %v6647_v30  ;;  %3203 = vmatprep.subr.bf16.mxu1 %v6649_v31  ;;  %v512_v30 = vld [vmem:[#allocation7 + $0x8f0] sm:$0xff]  ;;  %v509_v31 = vld [vmem:[#allocation7 + $0x8d8] sm:$0xff] }
 0x230   :  { %v6711_v22 = vcombine.high %v508_v29, %v512_v30  ;;  %v6713_v35 = vcombine.high %v509_v31, %v513_v33  ;;  %v6710_v40 = vcombine.low %v508_v29, %v512_v30  ;;  %v6712_v41 = vcombine.low %v509_v31, %v513_v33 }
 0x232   :  { %3040 = vmatpush1.bf16.msra.mxu0 %v6646_v36  ;;  %3204 = vmatpush1.bf16.msra.mxu1 %v6648_v15  ;;  %v516_v36 = vld [vmem:[#allocation7 + $0x910] sm:$0xff] }
 0x233   :  { %3041 = vmatprep.subr.bf16.mxu0 %v6655_v38  ;;  %3205 = vmatprep.subr.bf16.mxu1 %v6657_v39  ;;  %v520_v15 = vld [vmem:[#allocation7 + $0x930] sm:$0xff]  ;;  %v517_v38 = vld [vmem:[#allocation7 + $0x918] sm:$0xff] }
 0x234   :  { %v521_v39 = vld [vmem:[#allocation7 + $0x938] sm:$0xff]  ;;  %v6719_v42 = vcombine.high %v516_v36, %v520_v15 }
 0x235   :  { %v6720_v49 = vcombine.low %v517_v38, %v521_v39 }
 0x236   :  { %3042 = vmatpush1.bf16.msra.mxu0 %v6654_v45  ;;  %3206 = vmatpush1.bf16.msra.mxu1 %v6656_v46  ;;  %v528_v45 = vld [vmem:[#allocation7 + $0x970] sm:$0xff]  ;;  %v525_v46 = vld [vmem:[#allocation7 + $0x958] sm:$0xff] }
 0x237   :  { %3043 = vmatprep.subr.bf16.mxu0 %v6663_v47  ;;  %3207 = vmatprep.subr.bf16.mxu1 %v6665_v26  ;;  %v529_v47 = vld [vmem:[#allocation7 + $0x978] sm:$0xff]  ;;  %v6718_v26 = vcombine.low %v516_v36, %v520_v15  ;;  %v6727_v50 = vcombine.high %v524_v44, %v528_v45  ;;  %v6726_v58 = vcombine.low %v524_v44, %v528_v45 }
 0x238   :  { %v6729_v51 = vcombine.high %v525_v46, %v529_v47  ;;  %v6728_v60 = vcombine.low %v525_v46, %v529_v47 }
 0x23a   :  { %3044 = vmatpush1.bf16.msra.mxu0 %v6662_v54  ;;  %3208 = vmatpush1.bf16.msra.mxu1 %v6664_v55  ;;  %v532_v54 = vld [vmem:[#allocation7 + $0x990] sm:$0xff] }
 0x23b   :  { %3045 = vmatprep.subr.bf16.mxu0 %v6671_v56  ;;  %3209 = vmatprep.subr.bf16.mxu1 %v6673_v57  ;;  %v536_v55 = vld [vmem:[#allocation7 + $0x9b0] sm:$0xff]  ;;  %v533_v56 = vld [vmem:[#allocation7 + $0x998] sm:$0xff] }
 0x23c   :  { %v537_v57 = vld [vmem:[#allocation7 + $0x9b8] sm:$0xff]  ;;  %v6735_v61 = vcombine.high %v532_v54, %v536_v55  ;;  %v6734_v3 = vcombine.low %v532_v54, %v536_v55 }
 0x23d   :  { %v6737_v62 = vcombine.high %v533_v56, %v537_v57  ;;  %v6736_v4 = vcombine.low %v533_v56, %v537_v57  ;;  %v596_v57 = vld [vmem:[#allocation7 + $0xb90] sm:$0xff] }
 0x23e   :  { %3046 = vmatpush1.bf16.msra.mxu0 %v6670_v63  ;;  %3210 = vmatpush1.bf16.msra.mxu1 %v6672_v0  ;;  %v540_v63 = vld [vmem:[#allocation7 + $0x9d0] sm:$0xff] }
 0x23f   :  { %3047 = vmatprep.subr.bf16.mxu0 %v6679_v1  ;;  %3211 = vmatprep.subr.bf16.mxu1 %v6681_v2  ;;  %v544_v0 = vld [vmem:[#allocation7 + $0x9f0] sm:$0xff]  ;;  %v541_v1 = vld [vmem:[#allocation7 + $0x9d8] sm:$0xff] }
 0x240   :  { %v545_v2 = vld [vmem:[#allocation7 + $0x9f8] sm:$0xff]  ;;  %v6743_v5 = vcombine.high %v540_v63, %v544_v0  ;;  %v6742_v11 = vcombine.low %v540_v63, %v544_v0 }
 0x241   :  { %v6745_v6 = vcombine.high %v541_v1, %v545_v2  ;;  %v6744_v13 = vcombine.low %v541_v1, %v545_v2  ;;  %v604_v2 = vld [vmem:[#allocation7 + $0xbd0] sm:$0xff] }
 0x242   :  { %3048 = vmatpush1.bf16.msra.mxu0 %v6678_v7  ;;  %3212 = vmatpush1.bf16.msra.mxu1 %v6680_v8  ;;  %v548_v7 = vld [vmem:[#allocation7 + $0xa10] sm:$0xff] }
 0x243   :  { %3058 = vmatprep.subr.bf16.mxu0 %v6687_v9  ;;  %3222 = vmatprep.subr.bf16.mxu1 %v6689_v10  ;;  %v552_v8 = vld [vmem:[#allocation7 + $0xa30] sm:$0xff]  ;;  %v549_v9 = vld [vmem:[#allocation7 + $0xa18] sm:$0xff] }
 0x244   :  { %v553_v10 = vld [vmem:[#allocation7 + $0xa38] sm:$0xff]  ;;  %v6751_v14 = vcombine.high %v548_v7, %v552_v8  ;;  %v6750_v59 = vcombine.low %v548_v7, %v552_v8 }
 0x245   :  { %3050 = vmatmul.mubr.bf16.vlgmr.msra.gmra.mrb[4].mxu0 %v8549_v27  ;;  %3214 = vmatmul.mubr.bf16.vlgmr.msra.gmra.mrb[4].mxu1 %v8549_v27  ;;  %v6704_v27 = vcombine.low %v501_v53, %v505_v12  ;;  %v6753_v16 = vcombine.high %v549_v9, %v553_v10  ;;  %v6752_v21 = vcombine.low %v549_v9, %v553_v10  ;;  %v612_v10 = vld [vmem:[#allocation7 + $0xc10] sm:$0xff] }
 0x246   :  { %3059 = vmatpush1.bf16.msra.mxu0 %v6686_v17  ;;  %3223 = vmatpush1.bf16.msra.mxu1 %v6688_v18  ;;  %v556_v17 = vld [vmem:[#allocation7 + $0xa50] sm:$0xff] }
 0x247   :  { %3060 = vmatprep.subr.bf16.mxu0 %v6695_v19  ;;  %3224 = vmatprep.subr.bf16.mxu1 %v6697_v20  ;;  %v560_v18 = vld [vmem:[#allocation7 + $0xa70] sm:$0xff]  ;;  %v557_v19 = vld [vmem:[#allocation7 + $0xa58] sm:$0xff] }
 0x248   :  { %3090 = vmatprep.mubr.bf16.mxu0 %v8553_v37  ;;  %3254 = vmatprep.mubr.bf16.mxu1 %v8553_v37  ;;  %v6721_v37 = vcombine.high %v517_v38, %v521_v39  ;;  %v561_v20 = vld [vmem:[#allocation7 + $0xa78] sm:$0xff]  ;;  %v6759_v53 = vcombine.high %v556_v17, %v560_v18  ;;  %v6758_v29 = vcombine.low %v556_v17, %v560_v18 }
 0x249   :  { %v6761_v12 = vcombine.high %v557_v19, %v561_v20  ;;  %v6760_v30 = vcombine.low %v557_v19, %v561_v20 }
 0x24a   :  { %3061 = vmatpush1.bf16.msra.mxu0 %v6694_v23  ;;  %3225 = vmatpush1.bf16.msra.mxu1 %v6696_v24  ;;  %v564_v23 = vld [vmem:[#allocation7 + $0xa90] sm:$0xff] }
 0x24b   :  { %3062 = vmatprep.subr.bf16.mxu0 %v6703_v25  ;;  %3226 = vmatprep.subr.bf16.mxu1 %v6705_v28  ;;  %v568_v24 = vld [vmem:[#allocation7 + $0xab0] sm:$0xff]  ;;  %v565_v25 = vld [vmem:[#allocation7 + $0xa98] sm:$0xff] }
 0x24c   :  { %v569_v28 = vld [vmem:[#allocation7 + $0xab8] sm:$0xff]  ;;  %v6767_v31 = vcombine.high %v564_v23, %v568_v24  ;;  %v6766_v36 = vcombine.low %v564_v23, %v568_v24  ;;  %v7416_v24 = vld [vmem:[#allocation13] sm:$0xff]  }
 0x24d   :  { %v6769_v33 = vcombine.high %v565_v25, %v569_v28  ;;  %v6768_v15 = vcombine.low %v565_v25, %v569_v28  ;;  %v7383_v25 = vld [vmem:[#allocation10] sm:$0xff]   ;;  %v7418_v28 = vld [vmem:[#allocation13 + $0x48] sm:$0xff]  }
 0x24e   :  { %3063 = vmatpush1.bf16.msra.mxu0 %v6702_v34  ;;  %3227 = vmatpush1.bf16.msra.mxu1 %v6704_v27  ;;  %v572_v34 = vld [vmem:[#allocation7 + $0xad0] sm:$0xff] }
 0x24f   :  { %3064 = vmatprep.subr.bf16.mxu0 %v6711_v22  ;;  %3228 = vmatprep.subr.bf16.mxu1 %v6713_v35  ;;  %v576_v27 = vld [vmem:[#allocation7 + $0xaf0] sm:$0xff]  ;;  %v573_v22 = vld [vmem:[#allocation7 + $0xad8] sm:$0xff] }
 0x250   :  { %v577_v35 = vld [vmem:[#allocation7 + $0xaf8] sm:$0xff]  ;;  %v6775_v38 = vcombine.high %v572_v34, %v576_v27  ;;  %v6774_v44 = vcombine.low %v572_v34, %v576_v27 }
 0x251   :  { %v6777_v39 = vcombine.high %v573_v22, %v577_v35  ;;  %v6776_v45 = vcombine.low %v573_v22, %v577_v35  ;;  %v7422_v34 = vld [vmem:[#allocation13 + $0x50] sm:$0xff]  }
 0x252   :  { %3065 = vmatpush1.bf16.msra.mxu0 %v6710_v40  ;;  %3229 = vmatpush1.bf16.msra.mxu1 %v6712_v41  ;;  %v580_v40 = vld [vmem:[#allocation7 + $0xb10] sm:$0xff]  ;;  %v7386_v27 = vld [vmem:[#allocation10 + $0x50] sm:$0xff]  }
 0x253   :  { %3066 = vmatprep.subr.bf16.mxu0 %v6719_v42  ;;  %3230 = vmatprep.subr.bf16.mxu1 %v6721_v37  ;;  %v584_v41 = vld [vmem:[#allocation7 + $0xb30] sm:$0xff]  ;;  %v581_v42 = vld [vmem:[#allocation7 + $0xb18] sm:$0xff] }
 0x254   :  { %v585_v37 = vld [vmem:[#allocation7 + $0xb38] sm:$0xff]  ;;  %v6783_v46 = vcombine.high %v580_v40, %v584_v41 }
 0x255   :  { %v6785_v47 = vcombine.high %v581_v42, %v585_v37  ;;  %v6784_v54 = vcombine.low %v581_v42, %v585_v37  ;;  %v7424_v35 = vld [vmem:[#allocation13 + $0x10] sm:$0xff]  }
 0x256   :  { %3067 = vmatpush1.bf16.msra.mxu0 %v6718_v26  ;;  %3231 = vmatpush1.bf16.msra.mxu1 %v6720_v49  ;;  %v588_v26 = vld [vmem:[#allocation7 + $0xb50] sm:$0xff]  ;;  %v589_v49 = vld [vmem:[#allocation7 + $0xb58] sm:$0xff] }
 0x257   :  { %3068 = vmatprep.subr.bf16.mxu0 %v6727_v50  ;;  %3232 = vmatprep.subr.bf16.mxu1 %v6729_v51  ;;  %v593_v50 = vld [vmem:[#allocation7 + $0xb78] sm:$0xff]  ;;  %v6782_v51 = vcombine.low %v580_v40, %v584_v41  ;;  %v6791_v55 = vcombine.high %v588_v26, %v592_v48 }
 0x258   :  { %v6793_v56 = vcombine.high %v589_v49, %v593_v50  ;;  %v6792_v63 = vcombine.low %v589_v49, %v593_v50  ;;  %v7390_v50 = vld [vmem:[#allocation10 + $0x60] sm:$0xff]  }
 0x25a   :  { %3069 = vmatpush1.bf16.msra.mxu0 %v6726_v58  ;;  %3233 = vmatpush1.bf16.msra.mxu1 %v6728_v60  ;;  %v600_v58 = vld [vmem:[#allocation7 + $0xbb0] sm:$0xff]  ;;  %v597_v60 = vld [vmem:[#allocation7 + $0xb98] sm:$0xff] }
 0x25b   :  { %3070 = vmatprep.subr.bf16.mxu0 %v6735_v61  ;;  %3234 = vmatprep.subr.bf16.mxu1 %v6737_v62  ;;  %v601_v61 = vld [vmem:[#allocation7 + $0xbb8] sm:$0xff]  ;;  %v6790_v62 = vcombine.low %v588_v26, %v592_v48  ;;  %v6799_v0 = vcombine.high %v596_v57, %v600_v58  ;;  %v7430_v26 = vld [vmem:[#allocation13 + $0x60] sm:$0xff]  }
 0x25c   :  { %v6801_v1 = vcombine.high %v597_v60, %v601_v61  ;;  %v6800_v7 = vcombine.low %v597_v60, %v601_v61  ;;  %v7436_v61 = vld [vmem:[#allocation13 + $0x28] sm:$0xff]  }
 0x25e   :  { %3071 = vmatpush1.bf16.msra.mxu0 %v6734_v3  ;;  %3235 = vmatpush1.bf16.msra.mxu1 %v6736_v4  ;;  %v608_v3 = vld [vmem:[#allocation7 + $0xbf0] sm:$0xff]  ;;  %v605_v4 = vld [vmem:[#allocation7 + $0xbd8] sm:$0xff] }
 0x25f   :  { %3072 = vmatprep.subr.bf16.mxu0 %v6743_v5  ;;  %3236 = vmatprep.subr.bf16.mxu1 %v6745_v6  ;;  %v609_v5 = vld [vmem:[#allocation7 + $0xbf8] sm:$0xff]  ;;  %v6798_v6 = vcombine.low %v596_v57, %v600_v58  ;;  %v6807_v8 = vcombine.high %v604_v2, %v608_v3  ;;  %v7392_v58 = vld [vmem:[#allocation10 + $0x68] sm:$0xff]  }
 0x260   :  { %v6809_v9 = vcombine.high %v605_v4, %v609_v5  ;;  %v6808_v17 = vcombine.low %v605_v4, %v609_v5  ;;  %v7396_v4 = vld [vmem:[#allocation10 + $0x78] sm:$0xff]  }
 0x262   :  { %3073 = vmatpush1.bf16.msra.mxu0 %v6742_v11  ;;  %3237 = vmatpush1.bf16.msra.mxu1 %v6744_v13  ;;  %v616_v11 = vld [vmem:[#allocation7 + $0xc30] sm:$0xff]  ;;  %v613_v13 = vld [vmem:[#allocation7 + $0xc18] sm:$0xff] }
 0x263   :  { %3074 = vmatprep.subr.bf16.mxu0 %v6751_v14  ;;  %3238 = vmatprep.subr.bf16.mxu1 %v6753_v16  ;;  %v617_v14 = vld [vmem:[#allocation7 + $0xc38] sm:$0xff]  ;;  %v6806_v16 = vcombine.low %v604_v2, %v608_v3  ;;  %v6815_v18 = vcombine.high %v612_v10, %v616_v11  ;;  %v6814_v20 = vcombine.low %v612_v10, %v616_v11  ;;  %v7399_v10 = vld [vmem:[#allocation10 + $0x80] sm:$0xff]  }
 0x264   :  { %v6817_v19 = vcombine.high %v613_v13, %v617_v14  ;;  %v7395_v2 = vld [vmem:[#allocation10 + $0x30] sm:$0xff]  }
 0x266   :  { %3075 = vmatpush1.bf16.msra.mxu0 %v6750_v59  ;;  %3239 = vmatpush1.bf16.msra.mxu1 %v6752_v21  ;;  %v6816_v59 = vcombine.low %v613_v13, %v617_v14  ;;  %v7382_v21 = vld [vmem:[#allocation10 + $0x40] sm:$0xff]   ;;  %v7400_v13 = vld [vmem:[#allocation10 + $0xc8] sm:$0xff]  }
 0x267   :  { %3076 = vmatprep.subr.bf16.mxu0 %v6759_v53  ;;  %3240 = vmatprep.subr.bf16.mxu1 %v6761_v12  ;;  %v7414_v53 = vld [vmem:[#allocation13 + $0x40] sm:$0xff]   ;;  %v620_v12 = vlaneseq }
 0x269   :  { %v8588_v23 = vshrl.u32 %v620_v12, 7 }
 0x26a   :  { %3077 = vmatpush1.bf16.msra.mxu0 %v6758_v29  ;;  %3241 = vmatpush1.bf16.msra.mxu1 %v6760_v30  ;;  %v7384_v29 = vld [vmem:[#allocation10 + $0x48] sm:$0xff]  }
 0x26b   :  { %3078 = vmatprep.subr.bf16.mxu0 %v6767_v31  ;;  %3242 = vmatprep.subr.bf16.mxu1 %v6769_v33  ;;  %v7420_v30 = vld [vmem:[#allocation13 + $0x8] sm:$0xff]   ;;  %v8597_v33 = vld [vmem:[#allocation8] sm:$0xff]  ;;  %v8604_v57 = vsub.s32 0, %v8588_v23  ;;  %v8607_v60 = vsub.s32 3, %v8588_v23 }
 0x26c   :  { %v7385_v31 = vld [vmem:[#allocation10 + $0x8] sm:$0xff]  }
 0x26e   :  { %3079 = vmatpush1.bf16.msra.mxu0 %v6766_v36  ;;  %3243 = vmatpush1.bf16.msra.mxu1 %v6768_v15  ;;  %v7426_v36 = vld [vmem:[#allocation13 + $0x58] sm:$0xff]  }
 0x26f   :  { %3080 = vmatprep.subr.bf16.mxu0 %v6775_v38  ;;  %3244 = vmatprep.subr.bf16.mxu1 %v6777_v39  ;;  %v7388_v38 = vld [vmem:[#allocation10 + $0x58] sm:$0xff]  }
 0x272   :  { %3081 = vmatpush1.bf16.msra.mxu0 %v6774_v44  ;;  %3245 = vmatpush1.bf16.msra.mxu1 %v6776_v45  ;;  %v7428_v44 = vld [vmem:[#allocation13 + $0x18] sm:$0xff]  }
 0x273   :  { %3082 = vmatprep.subr.bf16.mxu0 %v6783_v46  ;;  %3246 = vmatprep.subr.bf16.mxu1 %v6785_v47  ;;  %v7389_v47 = vld [vmem:[#allocation10 + $0x18] sm:$0xff]  }
 0x276   :  { %3083 = vmatpush1.bf16.msra.mxu0 %v6782_v51  ;;  %3247 = vmatpush1.bf16.msra.mxu1 %v6784_v54  ;;  %v7432_v54 = vld [vmem:[#allocation13 + $0x20] sm:$0xff]  }
 0x277   :  { %3084 = vmatprep.subr.bf16.mxu0 %v6791_v55  ;;  %3248 = vmatprep.subr.bf16.mxu1 %v6793_v56  ;;  %v7391_v55 = vld [vmem:[#allocation10 + $0x20] sm:$0xff]   ;;  %v7434_v56 = vld [vmem:[#allocation13 + $0x68] sm:$0xff]  }
 0x27a   :  { %3085 = vmatpush1.bf16.msra.mxu0 %v6790_v62  ;;  %3249 = vmatpush1.bf16.msra.mxu1 %v6792_v63  ;;  %v7393_v62 = vld [vmem:[#allocation10 + $0x28] sm:$0xff]   ;;  %v623_v63 = vrot.slane %v8597_v33, %v8604_v57 }
 0x27b   :  { %3086 = vmatprep.subr.bf16.mxu0 %v6799_v0  ;;  %3250 = vmatprep.subr.bf16.mxu1 %v6801_v1  ;;  %v7394_v0 = vld [vmem:[#allocation10 + $0x70] sm:$0xff]   ;;  %v635_v1 = vrot.slane %v8597_v33, %v8607_v60 }
 0x27e   :  { %3087 = vmatpush1.bf16.msra.mxu0 %v6798_v6  ;;  %3251 = vmatpush1.bf16.msra.mxu1 %v6800_v7  ;;  %v7397_v6 = vld [vmem:[#allocation10 + $0x38] sm:$0xff]  }
 0x27f   :  { %3088 = vmatprep.subr.bf16.mxu0 %v6807_v8  ;;  %3252 = vmatprep.subr.bf16.mxu1 %v6809_v9  ;;  %v7398_v8 = vld [vmem:[#allocation10 + $0xc0] sm:$0xff]  }
 0x282   :  { %3089 = vmatpush1.bf16.msra.mxu0 %v6806_v16  ;;  %3253 = vmatpush1.bf16.msra.mxu1 %v6808_v17  ;;  %v7401_v16 = vld [vmem:[#allocation10 + $0x88] sm:$0xff]   ;;  %v7402_v17 = vld [vmem:[#allocation10 + $0xd0] sm:$0xff]  }
 0x283   :  { %3099 = vmatprep.subr.bf16.mxu0 %v6815_v18  ;;  %3263 = vmatprep.subr.bf16.mxu1 %v6817_v19  ;;  %v7403_v18 = vld [vmem:[#allocation10 + $0x90] sm:$0xff]   ;;  %v7404_v19 = vld [vmem:[#allocation10 + $0xd8] sm:$0xff]  }
 0x285   :  { %3091 = vmatmul.mubr.bf16.vlgmr.msra.gmra.mrb[4].mxu0 %v8561_v43  ;;  %3255 = vmatmul.mubr.bf16.vlgmr.msra.gmra.mrb[4].mxu1 %v8561_v43  ;;  %v8595_v43 = vsub.s32 1, %v8588_v23 }
 0x286   :  { %3100 = vmatpush1.bf16.msra.mxu0 %v6814_v20  ;;  %3264 = vmatpush1.bf16.msra.mxu1 %v6816_v59  ;;  %v7405_v20 = vld [vmem:[#allocation10 + $0x98] sm:$0xff]   ;;  %v7406_v59 = vld [vmem:[#allocation10 + $0xe0] sm:$0xff]  }
 0x287   :  { %3131 = vmatprep.mubr.bf16.mxu0 %v8253_v32  ;;  %3295 = vmatprep.mubr.bf16.mxu1 %v8253_v32  ;;  %v627_v22 = vrot.slane %v8597_v33, %v8595_v43 }
 0x288   :  { %7133 = vmatprep.subr.bf16.mxu1 %v7382_v21  ;;  %7177 = vmatprep.subr.bf16.mxu0 %v7414_v53  ;;  %v7407_v21 = vld [vmem:[#allocation10 + $0xa0] sm:$0xff]   ;;  %v8614_v53 = vsub.s32 2, %v8588_v23 }
 0x291   :  { %6820 = vmatmul.mubr.msk.bf16.vlgmr.msra.gmra.mrb[4].mxu0 %vm2644_vm0, %v8567_v52  ;;  %6821 = vmatmul.mubr.msk.bf16.vlgmr.msra.gmra.mrb[4].mxu1 %vm2644_vm0, %v8567_v52  ;;  %v7387_v52 = vld [vmem:[#allocation10 + $0x10] sm:$0xff]  }
 0x292   :  { %7178 = vmatpush3.bf16.msra.mxu0 %v7416_v24  ;;  %7134 = vmatpush3.bf16.msra.mxu1 %v7383_v25  ;;  %v7408_v24 = vld [vmem:[#allocation10 + $0xe8] sm:$0xff]  }
 0x293   :  { %7179 = vmatprep.subr.bf16.mxu0 %v7418_v28  ;;  %7135 = vmatprep.subr.bf16.mxu1 %v7384_v29  ;;  %v7409_v25 = vld [vmem:[#allocation10 + $0xa8] sm:$0xff]   ;;  %v631_v28 = vrot.slane %v8597_v33, %v8614_v53  ;;  %v7410_v29 = vld [vmem:[#allocation10 + $0xf0] sm:$0xff]  }
 0x296   :  { %7180 = vmatpush3.bf16.msra.mxu0 %v7420_v30  ;;  %7136 = vmatpush3.bf16.msra.mxu1 %v7385_v31  ;;  %v7411_v30 = vld [vmem:[#allocation10 + $0xb0] sm:$0xff]  }
 0x297   :  { %7181 = vmatprep.subr.bf16.mxu0 %v7422_v34  ;;  %7137 = vmatprep.subr.bf16.mxu1 %v7386_v27  ;;  %v7412_v34 = vld [vmem:[#allocation10 + $0xf8] sm:$0xff]  }
 0x298   :  { %v2805_v15 = vpop.f32.mrb[0].mxu0  ;;  %v8601_v39 = vpop.f32.mrb[0].mxu1  ;;  %v7413_v27 = vld [vmem:[#allocation10 + $0xb8] sm:$0xff]  }
 0x299   :  { %v2807_v40 = vpop.f32.mrb[1].mxu0  ;;  %v2971_v42 = vpop.f32.mrb[1].mxu1  ;;  %v7265_v3 = vadd.f32 %v2805_v15, %v623_v63  ;;  %v7267_v31 = vadd.f32 %v8601_v39, %v631_v28  ;;  %v7419_v15 = vld [vmem:[#allocation13 + $0xc8] sm:$0xff]   ;;  %v7427_v39 = vld [vmem:[#allocation13 + $0xd8] sm:$0xff]   ;;  %v642_v63 = vsub.s32 5, %v8588_v23 }
 0x29a   :  { %v7266_v41 = vadd.f32 %v2807_v40, %v627_v22  ;;  %v2809_v37 = vpop.f32.mrb[2].mxu0  ;;  %7182 = vmatpush3.bf16.msra.mxu0 %v7424_v35  ;;  %7138 = vmatpush3.bf16.msra.mxu1 %v7387_v52  ;;  %v2973_v45 = vpop.f32.mrb[2].mxu1  ;;  %v7268_v5 = vadd.f32 %v2971_v42, %v635_v1  ;;  %v7415_v35 = vld [vmem:[#allocation13 + $0xc0] sm:$0xff]   ;;  %v7423_v40 = vld [vmem:[#allocation13 + $0xd0] sm:$0xff]   ;;  %v7429_v42 = vld [vmem:[#allocation13 + $0x98] sm:$0xff]  }
 0x29b   :  { %v2810_v46 = vpop.f32.mrb[3].mxu0  ;;  %7183 = vmatprep.subr.bf16.mxu0 %v7426_v36  ;;  %v2974_v49 = vpop.f32.mrb[3].mxu1  ;;  %7139 = vmatprep.subr.bf16.mxu1 %v7388_v38  ;;  %v3304_v7 = vmax.f32 %v7265_v3, 0.0  ;;  %v3306_v22 = vmax.f32 %v7267_v31, 0.0  ;;  %v7417_v52 = vld [vmem:[#allocation13 + $0x80] sm:$0xff]   ;;  %v7421_v38 = vld [vmem:[#allocation13 + $0x88] sm:$0xff]   ;;  %v643_v3 = vrot.slane %v8597_v33, %v642_v63 }
 0x29c   :  { %v3305_v48 = vmax.f32 %v7266_v41, 0.0  ;;  %v3307_v9 = vmax.f32 %v7268_v5, 0.0  ;;  %v7425_v41 = vld [vmem:[#allocation13 + $0x90] sm:$0xff]   ;;  %v7431_v37 = vld [vmem:[#allocation13 + $0xe0] sm:$0xff]   ;;  %v7435_v45 = vld [vmem:[#allocation13 + $0xe8] sm:$0xff]  }
 0x29d   :  { %v3312_v11 = vpack.c.bf16 %v3304_v7, %v3304_v7  ;;  %v3314_v36 = vpack.c.bf16 %v3306_v22, %v3306_v22  ;;  %v7437_v46 = vld [vmem:[#allocation13 + $0xa8] sm:$0xff]   ;;  %v7441_v49 = vld [vmem:[#allocation13 + $0xb0] sm:$0xff]  }
 0x29e   :  { %v3313_v51 = vpack.c.bf16 %v3305_v48, %v3305_v48  ;;  %7184 = vmatpush3.bf16.msra.mxu0 %v7428_v44  ;;  %7140 = vmatpush3.bf16.msra.mxu1 %v7389_v47  ;;  %v3315_v14 = vpack.c.bf16 %v3307_v9, %v3307_v9  ;;  %v7433_v44 = vld [vmem:[#allocation13 + $0xa0] sm:$0xff]   ;;  %v7438_v47 = vld [vmem:[#allocation13 + $0x70] sm:$0xff]  }
 0x29f   :  { %7185 = vmatprep.subr.bf16.mxu0 %v7430_v26  ;;  %7141 = vmatprep.subr.bf16.mxu1 %v7390_v50  ;;  %v7439_v26 = vld [vmem:[#allocation13 + $0xf0] sm:$0xff]   ;;  %v7442_v50 = vld [vmem:[#allocation13 + $0x78] sm:$0xff]  }
 0x2a0   :  { %3615 = vmatprep.mubr.bf16.mxu1 %v3313_v51  ;;  %v7440_v48 = vld [vmem:[#allocation13 + $0x30] sm:$0xff]   ;;  %v7443_v51 = vld [vmem:[#allocation13 + $0xf8] sm:$0xff]  }
 0x2a1   :  { %v7454_v22 = vld [vmem:[#allocation16 + $0x4] ss:$16 sps:$4 sm:$0xff]  }
 0x2a2   :  { %7186 = vmatpush3.bf16.msra.mxu0 %v7432_v54  ;;  %7142 = vmatpush3.bf16.msra.mxu1 %v7391_v55  ;;  %v7444_v54 = vld [vmem:[#allocation13 + $0x38] sm:$0xff]  }
 0x2a3   :  { %7187 = vmatprep.subr.bf16.mxu0 %v7434_v56  ;;  %7143 = vmatprep.subr.bf16.mxu1 %v7392_v58  ;;  %v7445_v55 = vld [vmem:[#allocation13 + $0xb8] sm:$0xff]  }
 0x2a4   :  { %v7446_v56 = vld [vmem:[#allocation17 + $0x4] ss:$16 sps:$4 sm:$0x1f]   ;;  %v7448_v58 = vld [vmem:[#allocation17 + $0xc] ss:$16 sps:$4 sm:$0x1f]  }
 0x2a6   :  { %7188 = vmatpush3.bf16.msra.mxu0 %v7436_v61  ;;  %7144 = vmatpush3.bf16.msra.mxu1 %v7393_v62  ;;  %v638_v61 = vsub.s32 4, %v8588_v23  ;;  %v646_v62 = vsub.s32 6, %v8588_v23 }
 0x2a7   :  { %7145 = vmatprep.subr.bf16.mxu1 %v7394_v0  ;;  %7189 = vmatprep.subr.bf16.mxu0 %v7438_v47  ;;  %v650_v0 = vsub.s32 7, %v8588_v23 }
 0x2a8   :  { %v639_v1 = vrot.slane %v8597_v33, %v638_v61 }
 0x2aa   :  { %7146 = vmatpush3.bf16.msra.mxu1 %v7395_v2  ;;  %7190 = vmatpush3.bf16.msra.mxu0 %v7440_v48  ;;  %v647_v2 = vrot.slane %v8597_v33, %v646_v62 }
 0x2ab   :  { %7147 = vmatprep.subr.bf16.mxu1 %v7396_v4  ;;  %7191 = vmatprep.subr.bf16.mxu0 %v7442_v50  ;;  %v651_v4 = vrot.slane %v8597_v33, %v650_v0  ;;  %v7451_v33 = vld [vmem:[#allocation17 + $0x8] ss:$16 sps:$4 sm:$0x1f]  }
 0x2ae   :  { %7148 = vmatpush3.bf16.msra.mxu1 %v7397_v6  ;;  %7192 = vmatpush3.bf16.msra.mxu0 %v7444_v54  ;;  %v6822_v54 = vld [vmem:[#allocation11] ss:$0 sm:$0xff] }
 0x2af   :  { %7155 = vmatprep.subr.bf16.mxu1 %v7398_v8  ;;  %6893 = vmatprep.subr.msk.bf16.mxu0 %vm4057_vm1, %v7446_v56 }
 0x2b1   :  { %3616 = vmatmul.mubr.bf16.vlgmr.msra.gmra.mrb[8].mxu1 %v3312_v11 }
 0x2b2   :  { %7156 = vmatpush3.bf16.msra.mxu1 %v7399_v10  ;;  %3655 = vmatprep.mubr.bf16.mxu1 %v3315_v14  ;;  %v4019_v14 = vand.u32 127, %v620_v12  ;;  %v4065_v12 = vsel %vm4057_vm1, %v7451_v33, 0  ;;  %v7489_v33 = vld [vmem:[#allocation20 + $0xe8] ss:$28 sps:$4 sm:$0xff]  }
 0x2b3   :  { %7157 = vmatprep.subr.bf16.mxu1 %v7400_v13 }
 0x2b6   :  { %7158 = vmatpush3.bf16.msra.mxu1 %v7401_v16 }
 0x2b7   :  { %7159 = vmatprep.subr.bf16.mxu1 %v7402_v17 }
 0x2ba   :  { %7160 = vmatpush3.bf16.msra.mxu1 %v7403_v18 }
 0x2bb   :  { %7161 = vmatprep.subr.bf16.mxu1 %v7404_v19 }
 0x2be   :  { %7162 = vmatpush3.bf16.msra.mxu1 %v7405_v20  ;;  %v7450_v20 = vld [vmem:[#allocation17] ss:$16 sps:$4 sm:$0x1f]  }
 0x2bf   :  { %7163 = vmatprep.subr.bf16.mxu1 %v7406_v59 }
 0x2c2   :  { %7164 = vmatpush3.bf16.msra.mxu1 %v7407_v21 }
 0x2c3   :  { %7165 = vmatprep.subr.bf16.mxu1 %v7408_v24 }
 0x2c6   :  { %7166 = vmatpush3.bf16.msra.mxu1 %v7409_v25  ;;  %v4022_v25 = vpop.permute.xlu0 %4021 }
 0x2c7   :  { %7167 = vmatprep.subr.bf16.mxu1 %v7410_v29  ;;  %vm4023_vm2 = vcmp.eq.s32.totalorder %v4019_v14, %v4022_v25  ;;  %v7479_v14 = vld [vmem:[#allocation20 + $0x7c] ss:$28 sps:$4 sm:$0xff]  }
 0x2c8   :  { %v7486_v25 = vld [vmem:[#allocation20 + $0xe0] ss:$28 sps:$4 sm:$0xff]  }
 0x2ca   :  { %7168 = vmatpush3.bf16.msra.mxu1 %v7411_v30 }
 0x2cb   :  { %7169 = vmatprep.subr.bf16.mxu1 %v7412_v34  ;;  %v4059_v34 = vsel %vm4057_vm1, %v7450_v20, 0  ;;  %v7480_v20 = vld [vmem:[#allocation20 + $0xa8] ss:$28 sps:$4 sm:$0xff]  }
 0x2ce   :  { %7170 = vmatpush3.bf16.msra.mxu1 %v7413_v27 }
 0x2cf   :  { %7199 = vmatprep.subr.bf16.mxu1 %v7415_v35  ;;  %v7457_v35 = vld [vmem:[#allocation16 + $0xc] ss:$16 sps:$4 sm:$0xff]  }
 0x2d1   :  { %3656 = vmatmul.mubr.bf16.vlgmr.msra.gmra.mrb[12].mxu1 %v3314_v36 }
 0x2d2   :  { %7200 = vmatpush3.bf16.msra.mxu1 %v7417_v52  ;;  %v8254_v52 = vmov 0.0  }
 0x2d3   :  { %7201 = vmatprep.subr.bf16.mxu1 %v7419_v15  ;;  %v8638_v36 = vsel %vm4023_vm2, 1.0, %v8254_v52  ;;  %v4031_v15 = vld [vmem:[#allocation16 + $0x20] sm:$0x33] }
 0x2d4   :  { %v7509_v52 = vld [vmem:[#allocation20 + $0x194] ss:$28 sps:$4 sm:$0xff]  }
 0x2d6   :  { %7202 = vmatpush3.bf16.msra.mxu1 %v7421_v38  ;;  %v4033_v38 = vpack.c.bf16 %v8638_v36, %v8638_v36 }
 0x2d7   :  { %7203 = vmatprep.subr.bf16.mxu1 %v7423_v40  ;;  %v4032_v40 = vld [vmem:[#allocation16 + $0x28] sm:$0x33] }
 0x2da   :  { %7204 = vmatpush3.bf16.msra.mxu1 %v7425_v41  ;;  %v7452_v41 = vld [vmem:[#allocation16] ss:$16 sps:$4 sm:$0xff]  }
 0x2db   :  { %7205 = vmatprep.subr.bf16.mxu1 %v7427_v39  ;;  %v7455_v39 = vld [vmem:[#allocation16 + $0x8] ss:$16 sps:$4 sm:$0xff]  }
 0x2de   :  { %7206 = vmatpush3.bf16.msra.mxu1 %v7429_v42  ;;  %v6902_v42 = vcombine.high %v4031_v15, %v4031_v15 }
 0x2df   :  { %7207 = vmatprep.subr.bf16.mxu1 %v7431_v37  ;;  %v6901_v37 = vcombine.low %v4031_v15, %v4031_v15  ;;  %v7504_v15 = vld [vmem:[#allocation20 + $0x188] ss:$28 sps:$4 sm:$0xff]  }
 0x2e2   :  { %7208 = vmatpush3.bf16.msra.mxu1 %v7433_v44  ;;  %v6904_v44 = vcombine.high %v4032_v40, %v4032_v40 }
 0x2e3   :  { %7209 = vmatprep.subr.bf16.mxu1 %v7435_v45  ;;  %v6903_v45 = vcombine.low %v4032_v40, %v4032_v40  ;;  %v7512_v40 = vld [vmem:[#allocation20 + $0x1c4] ss:$28 sps:$4 sm:$0xff]  }
 0x2e5   :  { %v4194_v47 = vsel %vm4186_vm4, %v6903_v45, 0  ;;  %v7516_v45 = vld [vmem:[#allocation20 + $0x1f8] ss:$28 sps:$4 sm:$0xff]  }
 0x2e6   :  { %7210 = vmatpush3.bf16.msra.mxu1 %v7437_v46  ;;  %v4188_v46 = vsel %vm4186_vm4, %v6901_v37, 0  ;;  %v7518_v37 = vld [vmem:[#allocation20 + $0x1fc] ss:$28 sps:$4 sm:$0xff]  }
 0x2e7   :  { %7211 = vmatprep.subr.bf16.mxu1 %v7439_v26 }
 0x2ea   :  { %7212 = vmatpush3.bf16.msra.mxu1 %v7441_v49 }
 0x2eb   :  { %7213 = vmatprep.subr.bf16.mxu1 %v7443_v51 }
 0x2ee   :  { %7214 = vmatpush3.bf16.msra.mxu1 %v7445_v55 }
 0x2ef   :  { %6895 = vmatprep.subr.msk.bf16.mxu1 %vm4057_vm1, %v7448_v58 }
 0x364   :  { %v3133_v5 = vpop.f32.mrb[4].mxu0  ;;  %v3297_v7 = vpop.f32.mrb[4].mxu1 }
 0x365   :  { %v7269_v6 = vadd.f32 %v3133_v5, %v639_v1  ;;  %v3135_v8 = vpop.f32.mrb[5].mxu0  ;;  %v7271_v9 = vadd.f32 %v3297_v7, %v647_v2  ;;  %v3299_v11 = vpop.f32.mrb[5].mxu1  ;;  %v7464_v5 = vld [vmem:[#allocation20 + $0x4] ss:$28 sps:$4 sm:$0xff]   ;;  %v7467_v7 = vld [vmem:[#allocation20 + $0xc] ss:$28 sps:$4 sm:$0xff]  }
 0x366   :  { %v7270_v10 = vadd.f32 %v3135_v8, %v643_v3  ;;  %v3137_v13 = vpop.f32.mrb[6].mxu0  ;;  %v7272_v17 = vadd.f32 %v3299_v11, %v651_v4  ;;  %v3301_v18 = vpop.f32.mrb[6].mxu1  ;;  %v7462_v4 = vld [vmem:[#allocation20] ss:$28 sps:$4 sm:$0xff]   ;;  %v7468_v8 = vld [vmem:[#allocation20 + $0x38] ss:$28 sps:$4 sm:$0xff]  }
 0x367   :  { %v3308_v16 = vmax.f32 %v7269_v6, 0.0  ;;  %v3138_v19 = vpop.f32.mrb[7].mxu0  ;;  %v3310_v59 = vmax.f32 %v7271_v9, 0.0  ;;  %v3302_v24 = vpop.f32.mrb[7].mxu1  ;;  %v7465_v6 = vld [vmem:[#allocation20 + $0x8] ss:$28 sps:$4 sm:$0xff]  }
 0x368   :  { %v3309_v21 = vmax.f32 %v7270_v10, 0.0  ;;  %v3311_v28 = vmax.f32 %v7272_v17, 0.0  ;;  %v7470_v9 = vld [vmem:[#allocation20 + $0x3c] ss:$28 sps:$4 sm:$0xff]   ;;  %v7473_v11 = vld [vmem:[#allocation20 + $0x44] ss:$28 sps:$4 sm:$0xff]  }
 0x369   :  { %v3316_v30 = vpack.c.bf16 %v3308_v16, %v3308_v16  ;;  %v3318_v27 = vpack.c.bf16 %v3310_v59, %v3310_v59  ;;  %v7471_v10 = vld [vmem:[#allocation20 + $0x40] ss:$28 sps:$4 sm:$0xff]   ;;  %v7476_v13 = vld [vmem:[#allocation20 + $0x74] ss:$28 sps:$4 sm:$0xff]   ;;  %v7482_v18 = vld [vmem:[#allocation20 + $0xac] ss:$28 sps:$4 sm:$0xff]  }
 0x36a   :  { %v3317_v29 = vpack.c.bf16 %v3309_v21, %v3309_v21  ;;  %v3319_v31 = vpack.c.bf16 %v3311_v28, %v3311_v28  ;;  %v7474_v16 = vld [vmem:[#allocation20 + $0x70] ss:$28 sps:$4 sm:$0xff]   ;;  %v7477_v17 = vld [vmem:[#allocation20 + $0x78] ss:$28 sps:$4 sm:$0xff]   ;;  %v7488_v21 = vld [vmem:[#allocation20 + $0xe4] ss:$28 sps:$4 sm:$0xff]  }
 0x36b   :  { %v7485_v19 = vld [vmem:[#allocation20 + $0xb4] ss:$28 sps:$4 sm:$0xff]   ;;  %v7491_v24 = vld [vmem:[#allocation20 + $0xec] ss:$28 sps:$4 sm:$0xff]   ;;  %v7494_v28 = vld [vmem:[#allocation20 + $0x11c] ss:$28 sps:$4 sm:$0xff]  }
 0x36c   :  { %3958 = vmatprep.mubr.bf16.mxu0 %v3317_v29  ;;  %3998 = vmatprep.mubr.bf16.mxu1 %v3319_v31  ;;  %v7483_v59 = vld [vmem:[#allocation20 + $0xb0] ss:$28 sps:$4 sm:$0xff]   ;;  %v7497_v29 = vld [vmem:[#allocation20 + $0x124] ss:$28 sps:$4 sm:$0xff]  }
 0x36d   :  { %3959 = vmatmul.mubr.bf16.vlgmr.msra.gmra.mrb[8].mxu0 %v3316_v30  ;;  %3999 = vmatmul.mubr.bf16.vlgmr.msra.gmra.mrb[16].mxu1 %v3318_v27  ;;  %v7492_v30 = vld [vmem:[#allocation20 + $0x118] ss:$28 sps:$4 sm:$0xff]   ;;  %v7495_v31 = vld [vmem:[#allocation20 + $0x120] ss:$28 sps:$4 sm:$0xff]  }
 0x36e   :  { %4071 = vmatpush1.bf16.msra.mxu0 %v4059_v34  ;;  %4112 = vmatpush1.bf16.msra.mxu1 %v4065_v12  ;;  %v7500_v34 = vld [vmem:[#allocation20 + $0x154] ss:$28 sps:$4 sm:$0xff]   ;;  %v7503_v27 = vld [vmem:[#allocation20 + $0x15c] ss:$28 sps:$4 sm:$0xff]  }
 0x36f   :  { %4102 = vmatprep.mubr.bf16.mxu0 %v8253_v32  ;;  %4143 = vmatprep.mubr.bf16.mxu1 %v8253_v32  ;;  %v7498_v12 = vld [vmem:[#allocation20 + $0x150] ss:$28 sps:$4 sm:$0xff]  }
 0x370   :  { %4199 = vmatprep.subr.bf16.mxu0 %v7454_v22  ;;  %4240 = vmatprep.subr.bf16.mxu1 %v7457_v35  ;;  %v7501_v22 = vld [vmem:[#allocation20 + $0x158] ss:$28 sps:$4 sm:$0xff]   ;;  %v7506_v35 = vld [vmem:[#allocation20 + $0x18c] ss:$28 sps:$4 sm:$0xff]  }
 0x375   :  { %6894 = vmatmul.mubr.msk.bf16.vlgmr.msra.gmra.mrb[12].mxu0 %vm4006_vm3, %v4033_v38  ;;  %6896 = vmatmul.mubr.msk.bf16.vlgmr.msra.gmra.mrb[20].mxu1 %vm4006_vm3, %v4033_v38  ;;  %v7507_v38 = vld [vmem:[#allocation20 + $0x190] ss:$28 sps:$4 sm:$0xff]  }
 0x376   :  { %4200 = vmatpush1.bf16.msra.mxu0 %v7452_v41  ;;  %4241 = vmatpush1.bf16.msra.mxu1 %v7455_v39  ;;  %v7515_v41 = vld [vmem:[#allocation20 + $0x1cc] ss:$28 sps:$4 sm:$0xff]   ;;  %v7510_v39 = vld [vmem:[#allocation20 + $0x1c0] ss:$28 sps:$4 sm:$0xff]  }
 0x377   :  { %6905 = vmatprep.subr.msk.bf16.mxu0 %vm4186_vm4, %v6902_v42  ;;  %6907 = vmatprep.subr.msk.bf16.mxu1 %vm4186_vm4, %v6904_v44  ;;  %v7513_v42 = vld [vmem:[#allocation20 + $0x1c8] ss:$28 sps:$4 sm:$0xff]  }
 0x378   :  { %4231 = vmatprep.mubr.bf16.mxu0 %v8253_v32  ;;  %4272 = vmatprep.mubr.bf16.mxu1 %v8253_v32  ;;  %v7521_v44 = vld [vmem:[#allocation20 + $0x204] ss:$28 sps:$4 sm:$0xff]  }
 0x37a   :  { %4202 = vmatpush1.bf16.msra.mxu0 %v4188_v46  ;;  %4243 = vmatpush1.bf16.msra.mxu1 %v4194_v47  ;;  %v7519_v46 = vld [vmem:[#allocation20 + $0x200] ss:$28 sps:$4 sm:$0xff]   ;;  %v7524_v47 = vld [vmem:[#allocation20 + $0x234] ss:$28 sps:$4 sm:$0xff]  }
 0x37b   :  { %5760 = vmatprep.subr.bf16.mxu0 %v7464_v5  ;;  %5842 = vmatprep.subr.bf16.mxu1 %v7467_v7  ;;  %v7543_v5 = vld [vmem:[#allocation20 + $0x2e0] ss:$28 sps:$4 sm:$0xff]  }
 0x37c   :  { %v7551_v7 = vld [vmem:[#allocation20 + $0x31c] ss:$28 sps:$4 sm:$0xff]  }
 0x384   :  { %v7149_v26 = vpop.f32.mrb[8].mxu1 }
 0x385   :  { %v7150_v48 = vpop.f32.mrb[9].mxu1 }
 0x386   :  { %v7151_v49 = vadd.f32 %v7150_v48, %v7149_v26  ;;  %v7152_v50 = vpop.f32.mrb[10].mxu1  ;;  %v7527_v26 = vld [vmem:[#allocation20 + $0x23c] ss:$28 sps:$4 sm:$0xff]   ;;  %v7522_v48 = vld [vmem:[#allocation20 + $0x230] ss:$28 sps:$4 sm:$0xff]  }
 0x387   :  { %v7153_v51 = vpop.f32.mrb[11].mxu1  ;;  %v7530_v50 = vld [vmem:[#allocation20 + $0x26c] ss:$28 sps:$4 sm:$0xff]  }
 0x388   :  { %v3618_v58 = vadd.f32 %v7151_v49, %v6822_v54  ;;  %v7525_v49 = vld [vmem:[#allocation20 + $0x238] ss:$28 sps:$4 sm:$0xff]   ;;  %v7528_v54 = vld [vmem:[#allocation20 + $0x268] ss:$28 sps:$4 sm:$0xff]  }
 0x389   :  { %v7533_v51 = vld [vmem:[#allocation20 + $0x274] ss:$28 sps:$4 sm:$0xff]  }
 0x3a4   :  { %v7171_v55 = vpop.f32.mrb[12].mxu1 }
 0x3a5   :  { %v7172_v56 = vpop.f32.mrb[13].mxu1 }
 0x3a6   :  { %v7173_v0 = vadd.f32 %v7172_v56, %v7171_v55  ;;  %v7174_v1 = vpop.f32.mrb[14].mxu1  ;;  %v7531_v55 = vld [vmem:[#allocation20 + $0x270] ss:$28 sps:$4 sm:$0xff]   ;;  %v7536_v56 = vld [vmem:[#allocation20 + $0x2a4] ss:$28 sps:$4 sm:$0xff]  }
 0x3a7   :  { %v7175_v2 = vpop.f32.mrb[15].mxu1  ;;  %v7537_v1 = vld [vmem:[#allocation20 + $0x2a8] ss:$28 sps:$4 sm:$0xff]  }
 0x3a8   :  { %v8648_v3 = vadd.f32 %v7173_v0, %v3618_v58  ;;  %v7539_v58 = vld [vmem:[#allocation20 + $0x2ac] ss:$28 sps:$4 sm:$0xff]   ;;  %v7534_v0 = vld [vmem:[#allocation20 + $0x2a0] ss:$28 sps:$4 sm:$0xff]  }
 0x3a9   :  { %v7542_v2 = vld [vmem:[#allocation20 + $0x2dc] ss:$28 sps:$4 sm:$0xff]  }
 0x3aa   :  { %v4026_v32 = vpack.c.bf16 %v8648_v3, %v8648_v3  ;;  %6354 = vst.msk [vmem:[#allocation26] sm:$0xff] %vm6353_vm5, %v8648_v3 }
 0x3ac   :  { %6906 = vmatmul.mubr.msk.bf16.vlgmr.msra.gmra.mrb[16].mxu0 %vm4182_vm6, %v4026_v32  ;;  %6908 = vmatmul.mubr.msk.bf16.vlgmr.msra.gmra.mrb[24].mxu1 %vm4182_vm6, %v4026_v32  ;;  %v7545_v32 = vld [vmem:[#allocation20 + $0x2e4] ss:$28 sps:$4 sm:$0xff]  }
 0x3ad   :  { %5761 = vmatpush1.bf16.msra.mxu0 %v7462_v4  ;;  %5843 = vmatpush1.bf16.msra.mxu1 %v7465_v6  ;;  %v7540_v4 = vld [vmem:[#allocation20 + $0x2d8] ss:$28 sps:$4 sm:$0xff]  }
 0x3ae   :  { %5762 = vmatprep.subr.bf16.mxu0 %v7470_v9  ;;  %5844 = vmatprep.subr.bf16.mxu1 %v7473_v11  ;;  %v7548_v6 = vld [vmem:[#allocation20 + $0x314] ss:$28 sps:$4 sm:$0xff]  }
 0x3af   :  { %v7549_v9 = vld [vmem:[#allocation20 + $0x318] ss:$28 sps:$4 sm:$0xff]  }
 0x3b0   :  { %v7557_v11 = vld [vmem:[#allocation20 + $0x354] ss:$28 sps:$4 sm:$0xff]  }
 0x3b1   :  { %5763 = vmatpush1.bf16.msra.mxu0 %v7468_v8  ;;  %5845 = vmatpush1.bf16.msra.mxu1 %v7471_v10  ;;  %v7546_v8 = vld [vmem:[#allocation20 + $0x310] ss:$28 sps:$4 sm:$0xff]  }
 0x3b2   :  { %5764 = vmatprep.subr.bf16.mxu0 %v7476_v13  ;;  %5846 = vmatprep.subr.bf16.mxu1 %v7479_v14  ;;  %v7554_v10 = vld [vmem:[#allocation20 + $0x34c] ss:$28 sps:$4 sm:$0xff]  }
 0x3b3   :  { %v7552_v13 = vld [vmem:[#allocation20 + $0x348] ss:$28 sps:$4 sm:$0xff]   ;;  %v7555_v14 = vld [vmem:[#allocation20 + $0x350] ss:$28 sps:$4 sm:$0xff]  }
 0x3b5   :  { %5765 = vmatpush1.bf16.msra.mxu0 %v7474_v16  ;;  %5847 = vmatpush1.bf16.msra.mxu1 %v7477_v17  ;;  %v7560_v16 = vld [vmem:[#allocation20 + $0x384] ss:$28 sps:$4 sm:$0xff]   ;;  %v7563_v17 = vld [vmem:[#allocation20 + $0x38c] ss:$28 sps:$4 sm:$0xff]  }
 0x3b6   :  { %5766 = vmatprep.subr.bf16.mxu0 %v7482_v18  ;;  %5848 = vmatprep.subr.bf16.mxu1 %v7485_v19 }
 0x3b9   :  { %5767 = vmatpush1.bf16.msra.mxu0 %v7480_v20  ;;  %5849 = vmatpush1.bf16.msra.mxu1 %v7483_v59  ;;  %v6855_v20 = vld [vmem:[#allocation14] ss:$0 sm:$0xff] }
 0x3ba   :  { %5768 = vmatprep.subr.bf16.mxu0 %v7488_v21  ;;  %5850 = vmatprep.subr.bf16.mxu1 %v7491_v24 }
 0x3bd   :  { %5769 = vmatpush1.bf16.msra.mxu0 %v7486_v25  ;;  %5851 = vmatpush1.bf16.msra.mxu1 %v7489_v33 }
 0x3be   :  { %5770 = vmatprep.subr.bf16.mxu0 %v7494_v28  ;;  %5852 = vmatprep.subr.bf16.mxu1 %v7497_v29 }
 0x3c1   :  { %5771 = vmatpush1.bf16.msra.mxu0 %v7492_v30  ;;  %5853 = vmatpush1.bf16.msra.mxu1 %v7495_v31 }
 0x3c2   :  { %5772 = vmatprep.subr.bf16.mxu0 %v7500_v34  ;;  %5854 = vmatprep.subr.bf16.mxu1 %v7503_v27 }
 0x3c5   :  { %5773 = vmatpush1.bf16.msra.mxu0 %v7498_v12  ;;  %5855 = vmatpush1.bf16.msra.mxu1 %v7501_v22 }
 0x3c6   :  { %5774 = vmatprep.subr.bf16.mxu0 %v7506_v35  ;;  %5856 = vmatprep.subr.bf16.mxu1 %v7509_v52 }
 0x3c9   :  { %5775 = vmatpush1.bf16.msra.mxu0 %v7504_v15  ;;  %5857 = vmatpush1.bf16.msra.mxu1 %v7507_v38 }
 0x3ca   :  { %5776 = vmatprep.subr.bf16.mxu0 %v7512_v40  ;;  %5858 = vmatprep.subr.bf16.mxu1 %v7515_v41 }
 0x3cd   :  { %5777 = vmatpush1.bf16.msra.mxu0 %v7510_v39  ;;  %5859 = vmatpush1.bf16.msra.mxu1 %v7513_v42  ;;  %v4281_v39 = vld [vmem:[#allocation19] sm:$0xf] }
 0x3ce   :  { %5778 = vmatprep.subr.bf16.mxu0 %v7518_v37  ;;  %5860 = vmatprep.subr.bf16.mxu1 %v7521_v44  ;;  %v4286_v42 = vrot.slane %v4281_v39, %v8604_v57  ;;  %v4294_v37 = vrot.slane %v4281_v39, %v8614_v53 }
 0x3d1   :  { %5779 = vmatpush1.bf16.msra.mxu0 %v7516_v45  ;;  %5861 = vmatpush1.bf16.msra.mxu1 %v7519_v46  ;;  %v4290_v46 = vrot.slane %v4281_v39, %v8595_v43 }
 0x3d2   :  { %5780 = vmatprep.subr.bf16.mxu0 %v7524_v47  ;;  %5862 = vmatprep.subr.bf16.mxu1 %v7527_v26  ;;  %v4298_v47 = vrot.slane %v4281_v39, %v8607_v60  ;;  %v7602_v39 = vld [vmem:[#allocation20 + $0x50c] ss:$28 sps:$4 sm:$0xff]  }
 0x3d5   :  { %5781 = vmatpush1.bf16.msra.mxu0 %v7522_v48  ;;  %5863 = vmatpush1.bf16.msra.mxu1 %v7525_v49 }
 0x3d6   :  { %5782 = vmatprep.subr.bf16.mxu0 %v7530_v50  ;;  %5864 = vmatprep.subr.bf16.mxu1 %v7533_v51 }
 0x3d9   :  { %5783 = vmatpush1.bf16.msra.mxu0 %v7528_v54  ;;  %5865 = vmatpush1.bf16.msra.mxu1 %v7531_v55 }
 0x3da   :  { %5784 = vmatprep.subr.bf16.mxu0 %v7536_v56  ;;  %5866 = vmatprep.subr.bf16.mxu1 %v7539_v58 }
 0x3dd   :  { %5785 = vmatpush1.bf16.msra.mxu0 %v7534_v0  ;;  %5867 = vmatpush1.bf16.msra.mxu1 %v7537_v1 }
 0x3de   :  { %5786 = vmatprep.subr.bf16.mxu0 %v7542_v2  ;;  %5868 = vmatprep.subr.bf16.mxu1 %v7545_v32 }
 0x3e1   :  { %5787 = vmatpush1.bf16.msra.mxu0 %v7540_v4  ;;  %5869 = vmatpush1.bf16.msra.mxu1 %v7543_v5 }
 0x3e2   :  { %5788 = vmatprep.subr.bf16.mxu0 %v7548_v6  ;;  %5870 = vmatprep.subr.bf16.mxu1 %v7551_v7 }
 0x3e5   :  { %5789 = vmatpush1.bf16.msra.mxu0 %v7546_v8  ;;  %5871 = vmatpush1.bf16.msra.mxu1 %v7549_v9  ;;  %v7558_v9 = vld [vmem:[#allocation20 + $0x380] ss:$28 sps:$4 sm:$0xff]  }
 0x3e6   :  { %5790 = vmatprep.subr.bf16.mxu0 %v7554_v10  ;;  %5872 = vmatprep.subr.bf16.mxu1 %v7557_v11  ;;  %v7561_v10 = vld [vmem:[#allocation20 + $0x388] ss:$28 sps:$4 sm:$0xff]  }
 0x3e9   :  { %5791 = vmatpush1.bf16.msra.mxu0 %v7552_v13  ;;  %5873 = vmatpush1.bf16.msra.mxu1 %v7555_v14  ;;  %v7566_v13 = vld [vmem:[#allocation20 + $0x3bc] ss:$28 sps:$4 sm:$0xff]   ;;  %v7569_v14 = vld [vmem:[#allocation20 + $0x3c4] ss:$28 sps:$4 sm:$0xff]  }
 0x3ea   :  { %5801 = vmatprep.subr.bf16.mxu0 %v7560_v16  ;;  %5883 = vmatprep.subr.bf16.mxu1 %v7563_v17  ;;  %v7564_v17 = vld [vmem:[#allocation20 + $0x3b8] ss:$28 sps:$4 sm:$0xff]  }
 0x440   :  { %v7193_v18 = vpop.f32.mrb[8].mxu0  ;;  %v7215_v19 = vpop.f32.mrb[16].mxu1 }
 0x441   :  { %v7194_v59 = vpop.f32.mrb[9].mxu0  ;;  %v7216_v24 = vpop.f32.mrb[17].mxu1 }
 0x442   :  { %v7195_v21 = vadd.f32 %v7194_v59, %v7193_v18  ;;  %v7196_v25 = vpop.f32.mrb[10].mxu0  ;;  %v7217_v33 = vadd.f32 %v7216_v24, %v7215_v19  ;;  %v7218_v28 = vpop.f32.mrb[18].mxu1  ;;  %v7567_v18 = vld [vmem:[#allocation20 + $0x3c0] ss:$28 sps:$4 sm:$0xff]   ;;  %v7572_v19 = vld [vmem:[#allocation20 + $0x3f4] ss:$28 sps:$4 sm:$0xff]  }
 0x443   :  { %v7197_v29 = vpop.f32.mrb[11].mxu0  ;;  %v7219_v31 = vpop.f32.mrb[19].mxu1  ;;  %v7570_v59 = vld [vmem:[#allocation20 + $0x3f0] ss:$28 sps:$4 sm:$0xff]  }
 0x444   :  { %v3961_v30 = vadd.f32 %v7195_v21, %v6855_v20  ;;  %v7575_v20 = vld [vmem:[#allocation20 + $0x3fc] ss:$28 sps:$4 sm:$0xff]   ;;  %v7578_v24 = vld [vmem:[#allocation20 + $0x42c] ss:$28 sps:$4 sm:$0xff]   ;;  %v7581_v25 = vld [vmem:[#allocation20 + $0x434] ss:$28 sps:$4 sm:$0xff]  }
 0x445   :  { %v7573_v21 = vld [vmem:[#allocation20 + $0x3f8] ss:$28 sps:$4 sm:$0xff]   ;;  %v7579_v28 = vld [vmem:[#allocation20 + $0x430] ss:$28 sps:$4 sm:$0xff]   ;;  %v7584_v29 = vld [vmem:[#allocation20 + $0x464] ss:$28 sps:$4 sm:$0xff]  }
 0x446   :  { %v8655_v34 = vadd.f32 %v7217_v33, %v3961_v30  ;;  %v7576_v33 = vld [vmem:[#allocation20 + $0x428] ss:$28 sps:$4 sm:$0xff]   ;;  %v7582_v31 = vld [vmem:[#allocation20 + $0x460] ss:$28 sps:$4 sm:$0xff]  }
 0x447   :  { %v7587_v30 = vld [vmem:[#allocation20 + $0x46c] ss:$28 sps:$4 sm:$0xff]  }
 0x448   :  { %v4007_v27 = vsel %vm4006_vm3, %v8655_v34, -inf  ;;  %v4104_v12 = vpop.f32.mrb[12].mxu0  ;;  %v4145_v22 = vpop.f32.mrb[20].mxu1 }
 0x449   :  { %4008 = vmax.xlane.f32.xlu0 %v4007_v27  ;;  %v4106_v35 = vpop.f32.mrb[13].mxu0  ;;  %v4147_v52 = vpop.f32.mrb[21].mxu1  ;;  %v7585_v27 = vld [vmem:[#allocation20 + $0x468] ss:$28 sps:$4 sm:$0xff]  }
 0x44a   :  { %v4108_v15 = vpop.f32.mrb[14].mxu0  ;;  %v4149_v38 = vpop.f32.mrb[22].mxu1 }
 0x44b   :  { %v4109_v40 = vpop.f32.mrb[15].mxu0  ;;  %v4150_v41 = vpop.f32.mrb[23].mxu1  ;;  %v7596_v15 = vld [vmem:[#allocation20 + $0x4d4] ss:$28 sps:$4 sm:$0xff]   ;;  %v7599_v38 = vld [vmem:[#allocation20 + $0x4dc] ss:$28 sps:$4 sm:$0xff]  }
 0x44c   :  { %v7594_v40 = vld [vmem:[#allocation20 + $0x4d0] ss:$28 sps:$4 sm:$0xff]   ;;  %v7597_v41 = vld [vmem:[#allocation20 + $0x4d8] ss:$28 sps:$4 sm:$0xff]  }
 0x47f   :  { %v4233_v44 = vpop.f32.mrb[16].mxu0  ;;  %v4274_v45 = vpop.f32.mrb[24].mxu1 }
 0x480   :  { %v4234_v26 = vadd.f32 %v4233_v44, %v4104_v12  ;;  %v4275_v48 = vadd.f32 %v4274_v45, %v4145_v22  ;;  %v4235_v49 = vpop.f32.mrb[17].mxu0  ;;  %v4276_v50 = vpop.f32.mrb[25].mxu1  ;;  %v7590_v12 = vld [vmem:[#allocation20 + $0x49c] ss:$28 sps:$4 sm:$0xff]   ;;  %v7593_v22 = vld [vmem:[#allocation20 + $0x4a4] ss:$28 sps:$4 sm:$0xff]  }
 0x481   :  { %v4236_v51 = vadd.f32 %v4235_v49, %v4106_v35  ;;  %v4277_v54 = vadd.f32 %v4276_v50, %v4147_v52  ;;  %v4237_v55 = vpop.f32.mrb[18].mxu0  ;;  %v4278_v56 = vpop.f32.mrb[26].mxu1  ;;  %v7588_v35 = vld [vmem:[#allocation20 + $0x498] ss:$28 sps:$4 sm:$0xff]   ;;  %v7591_v52 = vld [vmem:[#allocation20 + $0x4a0] ss:$28 sps:$4 sm:$0xff]  }
 0x482   :  { %v4303_v58 = vadd.f32 %v4286_v42, %v4234_v26  ;;  %v8663_v0 = vadd.f32 %v4294_v37, %v4275_v48  ;;  %v4238_v1 = vpop.f32.mrb[19].mxu0  ;;  %v4279_v2 = vpop.f32.mrb[27].mxu1  ;;  %v7605_v42 = vld [vmem:[#allocation20 + $0x514] ss:$28 sps:$4 sm:$0xff]   ;;  %v7600_v37 = vld [vmem:[#allocation20 + $0x508] ss:$28 sps:$4 sm:$0xff]  }
 0x483   :  { %v4304_v32 = vadd.f32 %v4290_v46, %v4236_v51  ;;  %v4306_v4 = vadd.f32 %v4298_v47, %v4277_v54  ;;  %v7603_v44 = vld [vmem:[#allocation20 + $0x510] ss:$28 sps:$4 sm:$0xff]   ;;  %v7608_v45 = vld [vmem:[#allocation20 + $0x544] ss:$28 sps:$4 sm:$0xff]   ;;  %v7614_v48 = vld [vmem:[#allocation20 + $0x57c] ss:$28 sps:$4 sm:$0xff]  }
 0x484   :  { %v4307_v5 = vmax.f32 %v4303_v58, 0.0  ;;  %v7611_v46 = vld [vmem:[#allocation20 + $0x54c] ss:$28 sps:$4 sm:$0xff]   ;;  %v7606_v47 = vld [vmem:[#allocation20 + $0x540] ss:$28 sps:$4 sm:$0xff]  }
 0x485   :  { %v4308_v6 = vmax.f32 %v4304_v32, 0.0  ;;  %v4310_v7 = vmax.f32 %v4306_v4, 0.0  ;;  %v7609_v26 = vld [vmem:[#allocation20 + $0x548] ss:$28 sps:$4 sm:$0xff]   ;;  %v7612_v50 = vld [vmem:[#allocation20 + $0x578] ss:$28 sps:$4 sm:$0xff]  }
 0x486   :  { %v8667_v11 = vpack.c.bf16 %v4307_v5, %v4307_v5  ;;  %v7617_v49 = vld [vmem:[#allocation20 + $0x584] ss:$28 sps:$4 sm:$0xff]   ;;  %v7620_v54 = vld [vmem:[#allocation20 + $0x5b4] ss:$28 sps:$4 sm:$0xff]   ;;  %v7623_v55 = vld [vmem:[#allocation20 + $0x5bc] ss:$28 sps:$4 sm:$0xff]  }
 0x487   :  { %v8665_v8 = vpack.c.bf16 %v4308_v6, %v4308_v6  ;;  %v8671_v16 = vpack.c.bf16 %v4310_v7, %v4310_v7  ;;  %v7615_v51 = vld [vmem:[#allocation20 + $0x580] ss:$28 sps:$4 sm:$0xff]   ;;  %v7618_v56 = vld [vmem:[#allocation20 + $0x5b0] ss:$28 sps:$4 sm:$0xff]   ;;  %v7621_v58 = vld [vmem:[#allocation20 + $0x5b8] ss:$28 sps:$4 sm:$0xff]  }
 0x488   :  { %v7626_v1 = vld [vmem:[#allocation20 + $0x5ec] ss:$28 sps:$4 sm:$0xff]   ;;  %v7629_v2 = vld [vmem:[#allocation20 + $0x5f4] ss:$28 sps:$4 sm:$0xff]   ;;  %v7632_v5 = vld [vmem:[#allocation20 + $0x624] ss:$28 sps:$4 sm:$0xff]  }
 0x489   :  { %5792 = vmatprep.mubr.bf16.mxu0 %v8665_v8  ;;  %5874 = vmatprep.mubr.bf16.mxu1 %v8665_v8  ;;  %v7624_v32 = vld [vmem:[#allocation20 + $0x5e8] ss:$28 sps:$4 sm:$0xff]   ;;  %v7627_v4 = vld [vmem:[#allocation20 + $0x5f0] ss:$28 sps:$4 sm:$0xff]   ;;  %v7630_v7 = vld [vmem:[#allocation20 + $0x620] ss:$28 sps:$4 sm:$0xff]  }
 0x48a   :  { %5793 = vmatmul.mubr.bf16.vlgmr.msra.gmra.mrb[20].mxu0 %v8667_v11  ;;  %5875 = vmatmul.mubr.bf16.vlgmr.msra.gmra.mrb[28].mxu1 %v8667_v11  ;;  %v7635_v6 = vld [vmem:[#allocation20 + $0x62c] ss:$28 sps:$4 sm:$0xff]  }
 0x48b   :  { %5802 = vmatpush1.bf16.msra.mxu0 %v7558_v9  ;;  %5884 = vmatpush1.bf16.msra.mxu1 %v7561_v10  ;;  %v7633_v9 = vld [vmem:[#allocation20 + $0x628] ss:$28 sps:$4 sm:$0xff]   ;;  %v7638_v10 = vld [vmem:[#allocation20 + $0x65c] ss:$28 sps:$4 sm:$0xff]  }
 0x48c   :  { %5833 = vmatprep.mubr.bf16.mxu0 %v8671_v16  ;;  %5915 = vmatprep.mubr.bf16.mxu1 %v8671_v16 }
 0x48d   :  { %5803 = vmatprep.subr.bf16.mxu0 %v7566_v13  ;;  %5885 = vmatprep.subr.bf16.mxu1 %v7569_v14  ;;  %v7641_v13 = vld [vmem:[#allocation20 + $0x664] ss:$28 sps:$4 sm:$0xff]   ;;  %v7636_v14 = vld [vmem:[#allocation20 + $0x658] ss:$28 sps:$4 sm:$0xff]  }
 0x48f   :  { %5804 = vmatpush1.bf16.msra.mxu0 %v7564_v17  ;;  %5886 = vmatpush1.bf16.msra.mxu1 %v7567_v18  ;;  %v7639_v17 = vld [vmem:[#allocation20 + $0x660] ss:$28 sps:$4 sm:$0xff]   ;;  %v7644_v18 = vld [vmem:[#allocation20 + $0x694] ss:$28 sps:$4 sm:$0xff]  }
 0x490   :  { %5805 = vmatprep.subr.bf16.mxu0 %v7572_v19  ;;  %5887 = vmatprep.subr.bf16.mxu1 %v7575_v20  ;;  %v7647_v19 = vld [vmem:[#allocation20 + $0x69c] ss:$28 sps:$4 sm:$0xff]   ;;  %v7642_v20 = vld [vmem:[#allocation20 + $0x690] ss:$28 sps:$4 sm:$0xff]  }
 0x493   :  { %5806 = vmatpush1.bf16.msra.mxu0 %v7570_v59  ;;  %5888 = vmatpush1.bf16.msra.mxu1 %v7573_v21  ;;  %v7645_v59 = vld [vmem:[#allocation20 + $0x698] ss:$28 sps:$4 sm:$0xff]   ;;  %v7650_v21 = vld [vmem:[#allocation20 + $0x6cc] ss:$28 sps:$4 sm:$0xff]  }
 0x494   :  { %5807 = vmatprep.subr.bf16.mxu0 %v7578_v24  ;;  %5889 = vmatprep.subr.bf16.mxu1 %v7581_v25  ;;  %v7653_v24 = vld [vmem:[#allocation20 + $0x6d4] ss:$28 sps:$4 sm:$0xff]   ;;  %v7648_v25 = vld [vmem:[#allocation20 + $0x6c8] ss:$28 sps:$4 sm:$0xff]  }
 0x497   :  { %5808 = vmatpush1.bf16.msra.mxu0 %v7576_v33  ;;  %5890 = vmatpush1.bf16.msra.mxu1 %v7579_v28  ;;  %v7651_v33 = vld [vmem:[#allocation20 + $0x6d0] ss:$28 sps:$4 sm:$0xff]   ;;  %v4309_v28 = vmax.f32 %v8663_v0, 0.0  ;;  %v7659_v0 = vld [vmem:[#allocation20 + $0x48] ss:$28 sps:$4 sm:$0xff]  }
 0x498   :  { %5809 = vmatprep.subr.bf16.mxu0 %v7584_v29  ;;  %5891 = vmatprep.subr.bf16.mxu1 %v7587_v30  ;;  %v7656_v29 = vld [vmem:[#allocation20 + $0x14] ss:$28 sps:$4 sm:$0xff]  }
 0x499   :  { %v7657_v30 = vld [vmem:[#allocation20 + $0x1d8] ss:$28 sps:$4 sm:$0xff]  }
 0x49b   :  { %5810 = vmatpush1.bf16.msra.mxu0 %v7582_v31  ;;  %5892 = vmatpush1.bf16.msra.mxu1 %v7585_v27  ;;  %v7654_v31 = vld [vmem:[#allocation20 + $0x10] ss:$28 sps:$4 sm:$0xff]   ;;  %v8678_v27 = vpack.c.bf16 %v4309_v28, %v4309_v28  ;;  %v7712_v28 = vld [vmem:[#allocation20 + $0x600] ss:$28 sps:$4 sm:$0xff]  }
 0x49c   :  { %5811 = vmatprep.subr.bf16.mxu0 %v7590_v12  ;;  %5893 = vmatprep.subr.bf16.mxu1 %v7593_v22  ;;  %v7658_v12 = vld [vmem:[#allocation20 + $0x18] ss:$28 sps:$4 sm:$0xff]   ;;  %v7661_v22 = vld [vmem:[#allocation20 + $0x4c] ss:$28 sps:$4 sm:$0xff]  }
 0x49f   :  { %5812 = vmatpush1.bf16.msra.mxu0 %v7588_v35  ;;  %5894 = vmatpush1.bf16.msra.mxu1 %v7591_v52  ;;  %v7662_v35 = vld [vmem:[#allocation20 + $0x210] ss:$28 sps:$4 sm:$0xff]  }
 0x4a0   :  { %5813 = vmatprep.subr.bf16.mxu0 %v7596_v15  ;;  %5895 = vmatprep.subr.bf16.mxu1 %v7599_v38  ;;  %v7663_v52 = vld [vmem:[#allocation20 + $0x50] ss:$28 sps:$4 sm:$0xff]   ;;  %v7666_v15 = vld [vmem:[#allocation20 + $0x84] ss:$28 sps:$4 sm:$0xff]  }
 0x4a1   :  { %v7667_v38 = vld [vmem:[#allocation20 + $0x248] ss:$28 sps:$4 sm:$0xff]  }
 0x4a3   :  { %5814 = vmatpush1.bf16.msra.mxu0 %v7594_v40  ;;  %5896 = vmatpush1.bf16.msra.mxu1 %v7597_v41  ;;  %v7664_v40 = vld [vmem:[#allocation20 + $0x80] ss:$28 sps:$4 sm:$0xff]   ;;  %v7668_v41 = vld [vmem:[#allocation20 + $0x88] ss:$28 sps:$4 sm:$0xff]  }
 0x4a4   :  { %5815 = vmatprep.subr.bf16.mxu0 %v7602_v39  ;;  %5897 = vmatprep.subr.bf16.mxu1 %v7605_v42  ;;  %v7671_v39 = vld [vmem:[#allocation20 + $0xbc] ss:$28 sps:$4 sm:$0xff]  }
 0x4a5   :  { %v7672_v42 = vld [vmem:[#allocation20 + $0x280] ss:$28 sps:$4 sm:$0xff]  }
 0x4a7   :  { %5816 = vmatpush1.bf16.msra.mxu0 %v7600_v37  ;;  %5898 = vmatpush1.bf16.msra.mxu1 %v7603_v44  ;;  %v7669_v37 = vld [vmem:[#allocation20 + $0xb8] ss:$28 sps:$4 sm:$0xff]   ;;  %v7673_v44 = vld [vmem:[#allocation20 + $0xc0] ss:$28 sps:$4 sm:$0xff]  }
 0x4a8   :  { %5817 = vmatprep.subr.bf16.mxu0 %v7608_v45  ;;  %5899 = vmatprep.subr.bf16.mxu1 %v7611_v46  ;;  %v7676_v45 = vld [vmem:[#allocation20 + $0xf4] ss:$28 sps:$4 sm:$0xff]  }
 0x4a9   :  { %v7677_v46 = vld [vmem:[#allocation20 + $0x2b8] ss:$28 sps:$4 sm:$0xff]  }
 0x4ab   :  { %5818 = vmatpush1.bf16.msra.mxu0 %v7606_v47  ;;  %5900 = vmatpush1.bf16.msra.mxu1 %v7609_v26  ;;  %v7674_v26 = vld [vmem:[#allocation20 + $0xf0] ss:$28 sps:$4 sm:$0xff]  }
 0x4ac   :  { %5819 = vmatprep.subr.bf16.mxu0 %v7614_v48  ;;  %5901 = vmatprep.subr.bf16.mxu1 %v7617_v49  ;;  %v7678_v49 = vld [vmem:[#allocation20 + $0xf8] ss:$28 sps:$4 sm:$0xff]  }
 0x4af   :  { %5820 = vmatpush1.bf16.msra.mxu0 %v7612_v50  ;;  %5902 = vmatpush1.bf16.msra.mxu1 %v7615_v51  ;;  %v7681_v50 = vld [vmem:[#allocation20 + $0x12c] ss:$28 sps:$4 sm:$0xff]  }
 0x4b0   :  { %5821 = vmatprep.subr.bf16.mxu0 %v7620_v54  ;;  %5903 = vmatprep.subr.bf16.mxu1 %v7623_v55  ;;  %v7682_v51 = vld [vmem:[#allocation20 + $0x2f0] ss:$28 sps:$4 sm:$0xff]   ;;  %v7679_v54 = vld [vmem:[#allocation20 + $0x128] ss:$28 sps:$4 sm:$0xff]  }
 0x4b1   :  { %v7683_v55 = vld [vmem:[#allocation20 + $0x130] ss:$28 sps:$4 sm:$0xff]  }
 0x4b3   :  { %5822 = vmatpush1.bf16.msra.mxu0 %v7618_v56  ;;  %5904 = vmatpush1.bf16.msra.mxu1 %v7621_v58  ;;  %v7686_v56 = vld [vmem:[#allocation20 + $0x164] ss:$28 sps:$4 sm:$0xff]  }
 0x4b4   :  { %5823 = vmatprep.subr.bf16.mxu0 %v7626_v1  ;;  %5905 = vmatprep.subr.bf16.mxu1 %v7629_v2  ;;  %v7687_v58 = vld [vmem:[#allocation20 + $0x328] ss:$28 sps:$4 sm:$0xff]   ;;  %v7691_v2 = vld [vmem:[#allocation20 + $0x19c] ss:$28 sps:$4 sm:$0xff]  }
 0x4b5   :  { %v7688_v1 = vld [vmem:[#allocation20 + $0x168] ss:$28 sps:$4 sm:$0xff]  }
 0x4b7   :  { %5824 = vmatpush1.bf16.msra.mxu0 %v7624_v32  ;;  %5906 = vmatpush1.bf16.msra.mxu1 %v7627_v4  ;;  %v7692_v32 = vld [vmem:[#allocation20 + $0x360] ss:$28 sps:$4 sm:$0xff]   ;;  %v7689_v4 = vld [vmem:[#allocation20 + $0x198] ss:$28 sps:$4 sm:$0xff]  }
 0x4b8   :  { %5825 = vmatprep.subr.bf16.mxu0 %v7632_v5  ;;  %5907 = vmatprep.subr.bf16.mxu1 %v7635_v6  ;;  %v7693_v6 = vld [vmem:[#allocation20 + $0x1a0] ss:$28 sps:$4 sm:$0xff]  }
 0x4bb   :  { %5826 = vmatpush1.bf16.msra.mxu0 %v7630_v7  ;;  %5908 = vmatpush1.bf16.msra.mxu1 %v7633_v9  ;;  %v7696_v7 = vld [vmem:[#allocation20 + $0x1d4] ss:$28 sps:$4 sm:$0xff]  }
 0x4bc   :  { %5827 = vmatprep.subr.bf16.mxu0 %v7638_v10  ;;  %5909 = vmatprep.subr.bf16.mxu1 %v7641_v13  ;;  %v7697_v10 = vld [vmem:[#allocation20 + $0x558] ss:$28 sps:$4 sm:$0xff]   ;;  %v7694_v13 = vld [vmem:[#allocation20 + $0x1d0] ss:$28 sps:$4 sm:$0xff]  }
 0x4bf   :  { %5828 = vmatpush1.bf16.msra.mxu0 %v7636_v14  ;;  %5910 = vmatpush1.bf16.msra.mxu1 %v7639_v17  ;;  %v7698_v14 = vld [vmem:[#allocation20 + $0x398] ss:$28 sps:$4 sm:$0xff]   ;;  %v7701_v17 = vld [vmem:[#allocation20 + $0x20c] ss:$28 sps:$4 sm:$0xff]  }
 0x4c0   :  { %5829 = vmatprep.subr.bf16.mxu0 %v7644_v18  ;;  %5911 = vmatprep.subr.bf16.mxu1 %v7647_v19  ;;  %v7702_v18 = vld [vmem:[#allocation20 + $0x590] ss:$28 sps:$4 sm:$0xff]   ;;  %v7699_v19 = vld [vmem:[#allocation20 + $0x208] ss:$28 sps:$4 sm:$0xff]  }
 0x4c3   :  { %5830 = vmatpush1.bf16.msra.mxu0 %v7642_v20  ;;  %5912 = vmatpush1.bf16.msra.mxu1 %v7645_v59  ;;  %v7703_v20 = vld [vmem:[#allocation20 + $0x3d0] ss:$28 sps:$4 sm:$0xff]   ;;  %v7706_v59 = vld [vmem:[#allocation20 + $0x244] ss:$28 sps:$4 sm:$0xff]  }
 0x4c4   :  { %5831 = vmatprep.subr.bf16.mxu0 %v7650_v21  ;;  %5913 = vmatprep.subr.bf16.mxu1 %v7653_v24  ;;  %v7707_v21 = vld [vmem:[#allocation20 + $0x5c8] ss:$28 sps:$4 sm:$0xff]   ;;  %v7704_v24 = vld [vmem:[#allocation20 + $0x240] ss:$28 sps:$4 sm:$0xff]  }
 0x4c7   :  { %5832 = vmatpush1.bf16.msra.mxu0 %v7648_v25  ;;  %5914 = vmatpush1.bf16.msra.mxu1 %v7651_v33  ;;  %v7708_v25 = vld [vmem:[#allocation20 + $0x408] ss:$28 sps:$4 sm:$0xff]   ;;  %v7711_v33 = vld [vmem:[#allocation20 + $0x27c] ss:$28 sps:$4 sm:$0xff]  }
 0x4c8   :  { %5924 = vmatprep.subr.bf16.mxu0 %v7656_v29  ;;  %7221 = vmatprep.subr.bf16.mxu1 %v7657_v30  ;;  %v7709_v29 = vld [vmem:[#allocation20 + $0x278] ss:$28 sps:$4 sm:$0xff]   ;;  %v7713_v30 = vld [vmem:[#allocation20 + $0x440] ss:$28 sps:$4 sm:$0xff]  }
 0x4ca   :  { %5834 = vmatmul.mubr.bf16.vlgmr.msra.gmra.mrb[20].mxu0 %v8678_v27  ;;  %5916 = vmatmul.mubr.bf16.vlgmr.msra.gmra.mrb[28].mxu1 %v8678_v27 }
 0x4cb   :  { %5925 = vmatpush1.bf16.msra.mxu0 %v7654_v31  ;;  %5956 = vmatprep.mubr.bf16.mxu0 %v8665_v8  ;;  %v7716_v31 = vld [vmem:[#allocation20 + $0x2b4] ss:$28 sps:$4 sm:$0xff]  }
 0x4cc   :  { %7222 = vmatpush3.bf16.msra.mxu1 %v7658_v12  ;;  %6038 = vmatprep.mubr.bf16.mxu1 %v8665_v8  ;;  %v7717_v12 = vld [vmem:[#allocation20 + $0x638] ss:$28 sps:$4 sm:$0xff]  }
 0x4cd   :  { %5926 = vmatprep.subr.bf16.mxu0 %v7661_v22  ;;  %7223 = vmatprep.subr.bf16.mxu1 %v7662_v35  ;;  %v7714_v22 = vld [vmem:[#allocation20 + $0x2b0] ss:$28 sps:$4 sm:$0xff]   ;;  %v7718_v35 = vld [vmem:[#allocation20 + $0x478] ss:$28 sps:$4 sm:$0xff]  }
 0x4cf   :  { %5927 = vmatpush1.bf16.msra.mxu0 %v7659_v0  ;;  %v7721_v0 = vld [vmem:[#allocation20 + $0x2ec] ss:$28 sps:$4 sm:$0xff]  }
 0x4d0   :  { %7224 = vmatpush3.bf16.msra.mxu1 %v7663_v52  ;;  %5928 = vmatprep.subr.bf16.mxu0 %v7666_v15  ;;  %v7722_v52 = vld [vmem:[#allocation20 + $0x670] ss:$28 sps:$4 sm:$0xff]   ;;  %v7719_v15 = vld [vmem:[#allocation20 + $0x2e8] ss:$28 sps:$4 sm:$0xff]  }
 0x4d1   :  { %7225 = vmatprep.subr.bf16.mxu1 %v7667_v38  ;;  %v7723_v38 = vld [vmem:[#allocation20 + $0x4b0] ss:$28 sps:$4 sm:$0xff]  }
 0x4d3   :  { %5929 = vmatpush1.bf16.msra.mxu0 %v7664_v40  ;;  %v7726_v40 = vld [vmem:[#allocation20 + $0x324] ss:$28 sps:$4 sm:$0xff]  }
 0x4d4   :  { %7226 = vmatpush3.bf16.msra.mxu1 %v7668_v41  ;;  %5930 = vmatprep.subr.bf16.mxu0 %v7671_v39  ;;  %v7727_v41 = vld [vmem:[#allocation20 + $0x6a8] ss:$28 sps:$4 sm:$0xff]   ;;  %v7724_v39 = vld [vmem:[#allocation20 + $0x320] ss:$28 sps:$4 sm:$0xff]  }
 0x4d5   :  { %7227 = vmatprep.subr.bf16.mxu1 %v7672_v42  ;;  %v7728_v42 = vld [vmem:[#allocation20 + $0x4e8] ss:$28 sps:$4 sm:$0xff]  }
 0x4d6   :  { %v4009_v8 = vpop.xlane.xlu0 %4008 }
 0x4d7   :  { %v4010_v47 = vsub.f32 %v8655_v34, %v4009_v8  ;;  %5931 = vmatpush1.bf16.msra.mxu0 %v7669_v37  ;;  %v7684_v34 = vld [vmem:[#allocation20 + $0x160] ss:$28 sps:$4 sm:$0xff]  }
 0x4d8   :  { %7228 = vmatpush3.bf16.msra.mxu1 %v7673_v44  ;;  %5932 = vmatprep.subr.bf16.mxu0 %v7676_v45  ;;  %v7731_v37 = vld [vmem:[#allocation20 + $0x35c] ss:$28 sps:$4 sm:$0xff]  }
 0x4d9   :  { %v4011_v48 = vmul.f32 1.442695, %v4010_v47  ;;  %7229 = vmatprep.subr.bf16.mxu1 %v7677_v46  ;;  %v7732_v44 = vld [vmem:[#allocation20 + $0x6e0] ss:$28 sps:$4 sm:$0xff]   ;;  %v7729_v45 = vld [vmem:[#allocation20 + $0x358] ss:$28 sps:$4 sm:$0xff]  }
 0x4da   :  { %v7733_v8 = vld [vmem:[#allocation20 + $0x520] ss:$28 sps:$4 sm:$0xff]   ;;  %v7736_v46 = vld [vmem:[#allocation20 + $0x394] ss:$28 sps:$4 sm:$0xff]  }
 0x4db   :  { %7782 = vpow2.f32 %v4011_v48  ;;  %5933 = vmatpush1.bf16.msra.mxu0 %v7674_v26  ;;  %v7734_v47 = vld [vmem:[#allocation20 + $0x390] ss:$28 sps:$4 sm:$0xff]   ;;  %v7737_v48 = vld [vmem:[#allocation20 + $0x3c8] ss:$28 sps:$4 sm:$0xff]  }
 0x4dc   :  { %7230 = vmatpush3.bf16.msra.mxu1 %v7678_v49  ;;  %5934 = vmatprep.subr.bf16.mxu0 %v7681_v50  ;;  %v7739_v26 = vld [vmem:[#allocation20 + $0x3cc] ss:$28 sps:$4 sm:$0xff]   ;;  %v7742_v49 = vld [vmem:[#allocation20 + $0x404] ss:$28 sps:$4 sm:$0xff]  }
 0x4dd   :  { %7231 = vmatprep.subr.bf16.mxu1 %v7682_v51  ;;  %v7740_v50 = vld [vmem:[#allocation20 + $0x400] ss:$28 sps:$4 sm:$0xff]  }
 0x4de   :  { %v7745_v51 = vld [vmem:[#allocation20 + $0x43c] ss:$28 sps:$4 sm:$0xff]  }
 0x4df   :  { %5935 = vmatpush1.bf16.msra.mxu0 %v7679_v54  ;;  %v7743_v54 = vld [vmem:[#allocation20 + $0x438] ss:$28 sps:$4 sm:$0xff]  }
 0x4e0   :  { %7232 = vmatpush3.bf16.msra.mxu1 %v7683_v55  ;;  %5936 = vmatprep.subr.bf16.mxu0 %v7686_v56  ;;  %v7748_v55 = vld [vmem:[#allocation20 + $0x474] ss:$28 sps:$4 sm:$0xff]  }
 0x4e1   :  { %7233 = vmatprep.subr.bf16.mxu1 %v7687_v58  ;;  %v7746_v56 = vld [vmem:[#allocation20 + $0x470] ss:$28 sps:$4 sm:$0xff]   ;;  %v7749_v58 = vld [vmem:[#allocation20 + $0x4a8] ss:$28 sps:$4 sm:$0xff]  }
 0x4e3   :  { %5937 = vmatpush1.bf16.msra.mxu0 %v7684_v34  ;;  %v7754_v34 = vld [vmem:[#allocation20 + $0x4e4] ss:$28 sps:$4 sm:$0xff]  }
 0x4e4   :  { %7234 = vmatpush3.bf16.msra.mxu1 %v7688_v1  ;;  %5938 = vmatprep.subr.bf16.mxu0 %v7691_v2  ;;  %v7757_v1 = vld [vmem:[#allocation20 + $0x51c] ss:$28 sps:$4 sm:$0xff]  }
 0x4e5   :  { %v8685_v5 = vpop.eup %7782  ;;  %7235 = vmatprep.subr.bf16.mxu1 %v7692_v32  ;;  %v7755_v2 = vld [vmem:[#allocation20 + $0x518] ss:$28 sps:$4 sm:$0xff]  }
 0x4e6   :  { %v4013_v9 = vsel %vm4006_vm3, %v8685_v5, 0.0  ;;  %v7760_v32 = vld [vmem:[#allocation20 + $0x554] ss:$28 sps:$4 sm:$0xff]  }
 0x4e7   :  { %4014 = vadd.xlane.f32.xlu1 %v4013_v9  ;;  %5939 = vmatpush1.bf16.msra.mxu0 %v7689_v4  ;;  %v7758_v4 = vld [vmem:[#allocation20 + $0x550] ss:$28 sps:$4 sm:$0xff]   ;;  %v7766_v9 = vld [vmem:[#allocation20 + $0x5c4] ss:$28 sps:$4 sm:$0xff]  }
 0x4e8   :  { %7236 = vmatpush3.bf16.msra.mxu1 %v7693_v6  ;;  %5940 = vmatprep.subr.bf16.mxu0 %v7696_v7  ;;  %v7763_v6 = vld [vmem:[#allocation20 + $0x58c] ss:$28 sps:$4 sm:$0xff]  }
 0x4e9   :  { %7243 = vmatprep.subr.bf16.mxu1 %v7697_v10  ;;  %v7761_v7 = vld [vmem:[#allocation20 + $0x588] ss:$28 sps:$4 sm:$0xff]   ;;  %v7764_v10 = vld [vmem:[#allocation20 + $0x5c0] ss:$28 sps:$4 sm:$0xff]  }
 0x4eb   :  { %6039 = vmatmul.mubr.bf16.vlgmr.msra.gmra.mrb[32].mxu1 %v8667_v11  ;;  %5941 = vmatpush1.bf16.msra.mxu0 %v7694_v13  ;;  %v7769_v13 = vld [vmem:[#allocation20 + $0x5fc] ss:$28 sps:$4 sm:$0xff]  }
 0x4ec   :  { %7244 = vmatpush3.bf16.msra.mxu1 %v7698_v14  ;;  %6078 = vmatprep.mubr.bf16.mxu1 %v8671_v16  ;;  %v7767_v14 = vld [vmem:[#allocation20 + $0x5f8] ss:$28 sps:$4 sm:$0xff]  }
 0x4ed   :  { %5942 = vmatprep.subr.bf16.mxu0 %v7701_v17  ;;  %7245 = vmatprep.subr.bf16.mxu1 %v7702_v18  ;;  %v7772_v17 = vld [vmem:[#allocation20 + $0x634] ss:$28 sps:$4 sm:$0xff]  }
 0x4ee   :  { %v7770_v18 = vld [vmem:[#allocation20 + $0x630] ss:$28 sps:$4 sm:$0xff]  }
 0x4ef   :  { %5943 = vmatpush1.bf16.msra.mxu0 %v7699_v19  ;;  %v7775_v19 = vld [vmem:[#allocation20 + $0x66c] ss:$28 sps:$4 sm:$0xff]  }
 0x4f0   :  { %7246 = vmatpush3.bf16.msra.mxu1 %v7703_v20  ;;  %5944 = vmatprep.subr.bf16.mxu0 %v7706_v59  ;;  %v7773_v20 = vld [vmem:[#allocation20 + $0x668] ss:$28 sps:$4 sm:$0xff]  }
 0x4f1   :  { %7247 = vmatprep.subr.bf16.mxu1 %v7707_v21  ;;  %v7778_v59 = vld [vmem:[#allocation20 + $0x6a4] ss:$28 sps:$4 sm:$0xff]  }
 0x4f2   :  { %v7776_v21 = vld [vmem:[#allocation20 + $0x6a0] ss:$28 sps:$4 sm:$0xff]  }
 0x4f3   :  { %5945 = vmatpush1.bf16.msra.mxu0 %v7704_v24  ;;  %v7781_v24 = vld [vmem:[#allocation20 + $0x6dc] ss:$28 sps:$4 sm:$0xff]  }
 0x4f4   :  { %7248 = vmatpush3.bf16.msra.mxu1 %v7708_v25  ;;  %5946 = vmatprep.subr.bf16.mxu0 %v7711_v33  ;;  %v7779_v25 = vld [vmem:[#allocation20 + $0x6d8] ss:$28 sps:$4 sm:$0xff]  }
 0x4f5   :  { %7249 = vmatprep.subr.bf16.mxu1 %v7712_v28 }
 0x4f7   :  { %5947 = vmatpush1.bf16.msra.mxu0 %v7709_v29 }
 0x4f8   :  { %7250 = vmatpush3.bf16.msra.mxu1 %v7713_v30  ;;  %5948 = vmatprep.subr.bf16.mxu0 %v7716_v31  ;;  %v6287_v31 = vmul.f32 %v8648_v3, %v8648_v3 }
 0x4f9   :  { %7251 = vmatprep.subr.bf16.mxu1 %v7717_v12  ;;  %v8704_v12 = vld [vmem:[#allocation22] sm:$0x7f] }
 0x4fb   :  { %5949 = vmatpush1.bf16.msra.mxu0 %v7714_v22  ;;  %v4580_v22 = vrot.slane %v8704_v12, %v8595_v43 }
 0x4fc   :  { %7252 = vmatpush3.bf16.msra.mxu1 %v7718_v35  ;;  %5950 = vmatprep.subr.bf16.mxu0 %v7721_v0  ;;  %v4588_v35 = vrot.slane %v8704_v12, %v8607_v60 }
 0x4fd   :  { %7253 = vmatprep.subr.bf16.mxu1 %v7722_v52 }
 0x4ff   :  { %5951 = vmatpush1.bf16.msra.mxu0 %v7719_v15 }
 0x500   :  { %7254 = vmatpush3.bf16.msra.mxu1 %v7723_v38  ;;  %5952 = vmatprep.subr.bf16.mxu0 %v7726_v40 }
 0x501   :  { %7255 = vmatprep.subr.bf16.mxu1 %v7727_v41 }
 0x503   :  { %5953 = vmatpush1.bf16.msra.mxu0 %v7724_v39 }
 0x504   :  { %7256 = vmatpush3.bf16.msra.mxu1 %v7728_v42  ;;  %5954 = vmatprep.subr.bf16.mxu0 %v7731_v37 }
 0x505   :  { %7257 = vmatprep.subr.bf16.mxu1 %v7732_v44 }
 0x507   :  { %5955 = vmatpush1.bf16.msra.mxu0 %v7729_v45 }
 0x508   :  { %7258 = vmatpush3.bf16.msra.mxu1 %v7733_v8  ;;  %5965 = vmatprep.subr.bf16.mxu0 %v7736_v46 }
 0x50a   :  { %5957 = vmatmul.mubr.bf16.vlgmr.msra.gmra.mrb[24].mxu0 %v8667_v11  ;;  %v7751_v11 = vld [vmem:[#allocation20 + $0x4ac] ss:$28 sps:$4 sm:$0xff]  }
 0x50b   :  { %6079 = vmatmul.mubr.bf16.vlgmr.msra.gmra.mrb[36].mxu1 %v8678_v27  ;;  %5966 = vmatpush1.bf16.msra.mxu0 %v7734_v47 }
 0x50c   :  { %5997 = vmatprep.mubr.bf16.mxu0 %v8671_v16  ;;  %5967 = vmatprep.subr.bf16.mxu0 %v7739_v26  ;;  %v7752_v16 = vld [vmem:[#allocation20 + $0x4e0] ss:$28 sps:$4 sm:$0xff]  }
 0x50f   :  { %5968 = vmatpush1.bf16.msra.mxu0 %v7737_v48 }
 0x510   :  { %5969 = vmatprep.subr.bf16.mxu0 %v7742_v49 }
 0x513   :  { %5970 = vmatpush1.bf16.msra.mxu0 %v7740_v50 }
 0x514   :  { %5971 = vmatprep.subr.bf16.mxu0 %v7745_v51 }
 0x517   :  { %5972 = vmatpush1.bf16.msra.mxu0 %v7743_v54 }
 0x518   :  { %5973 = vmatprep.subr.bf16.mxu0 %v7748_v55 }
 0x51b   :  { %5974 = vmatpush1.bf16.msra.mxu0 %v7746_v56 }
 0x51c   :  { %5975 = vmatprep.subr.bf16.mxu0 %v7751_v11 }
 0x51f   :  { %5976 = vmatpush1.bf16.msra.mxu0 %v7749_v58 }
 0x520   :  { %5977 = vmatprep.subr.bf16.mxu0 %v7754_v34 }
 0x523   :  { %5978 = vmatpush1.bf16.msra.mxu0 %v7752_v16 }
 0x524   :  { %5979 = vmatprep.subr.bf16.mxu0 %v7757_v1 }
 0x527   :  { %5980 = vmatpush1.bf16.msra.mxu0 %v7755_v2 }
 0x528   :  { %5981 = vmatprep.subr.bf16.mxu0 %v7760_v32  ;;  %v8729_v32 = vld [vmem:[#allocation2] sm:$0xff] }
 0x52b   :  { %5982 = vmatpush1.bf16.msra.mxu0 %v7758_v4  ;;  %v218_v4 = vunpack.c.l.bf16 %v8729_v32 }
 0x52c   :  { %5983 = vmatprep.subr.bf16.mxu0 %v7763_v6  ;;  %v219_v6 = vunpack.c.h.bf16 %v8729_v32  ;;  %v4600_v32 = vrot.slane %v8704_v12, %v646_v62 }
 0x52f   :  { %5984 = vmatpush1.bf16.msra.mxu0 %v7761_v7  ;;  %v8733_v7 = vld [vmem:[#allocation2 + $0x8] sm:$0xff] }
 0x530   :  { %5985 = vmatprep.subr.bf16.mxu0 %v7766_v9  ;;  %v220_v9 = vunpack.c.l.bf16 %v8733_v7 }
 0x533   :  { %5986 = vmatpush1.bf16.msra.mxu0 %v7764_v10 }
 0x534   :  { %5987 = vmatprep.subr.bf16.mxu0 %v7769_v13 }
 0x537   :  { %5988 = vmatpush1.bf16.msra.mxu0 %v7767_v14  ;;  %v6241_v14 = vsub.f32 1.0, %v218_v4 }
 0x538   :  { %5989 = vmatprep.subr.bf16.mxu0 %v7772_v17  ;;  %v8742_v17 = vsub.f32 1.0, %v219_v6 }
 0x53b   :  { %5990 = vmatpush1.bf16.msra.mxu0 %v7770_v18  ;;  %v221_v18 = vunpack.c.h.bf16 %v8733_v7 }
 0x53c   :  { %5991 = vmatprep.subr.bf16.mxu0 %v7775_v19  ;;  %v8747_v19 = vsub.f32 1.0, %v220_v9 }
 0x53f   :  { %5992 = vmatpush1.bf16.msra.mxu0 %v7773_v20 }
 0x540   :  { %5993 = vmatprep.subr.bf16.mxu0 %v7778_v59 }
 0x543   :  { %5994 = vmatpush1.bf16.msra.mxu0 %v7776_v21 }
 0x544   :  { %5995 = vmatprep.subr.bf16.mxu0 %v7781_v24 }
 0x547   :  { %5996 = vmatpush1.bf16.msra.mxu0 %v7779_v25 }
 0x54a   :  { %5998 = vmatmul.mubr.bf16.vlgmr.msra.gmra.mrb[24].mxu0 %v8678_v27  ;;  %v4576_v27 = vrot.slane %v8704_v12, %v8604_v57 }
 0x574   :  { %v4015_v33 = vpop.xlane.xlu1 %4014 }
 0x575   :  { %7784 = vrcp.f32 %v4015_v33 }
 0x57f   :  { %v7785_v28 = vpop.eup %7784 }
 0x580   :  { %v8696_v29 = vmul.f32 %v7785_v28, %v8685_v5  ;;  %v4584_v5 = vrot.slane %v8704_v12, %v8614_v53 }
 0x582   :  { %v6312_v30 = vsel %vm4006_vm3, %v8696_v29, -inf  ;;  %6352 = vst.msk [vmem:[#allocation24] sm:$0xff] %vm4006_vm3, %v8696_v29 }
 0x583   :  { %6313 = vmax.xlane.f32.xlu1 %v6312_v30 }
 0x594   :  { %6289 = vrot.lane.b32.xlu1 %v6287_v31, %s8255_s12 }
 0x59d   :  { %v5835_v0 = vpop.f32.mrb[20].mxu0  ;;  %v5917_v52 = vpop.f32.mrb[28].mxu1 }
 0x59e   :  { %v8714_v15 = vadd.f32 %v5835_v0, %v4576_v27  ;;  %v8716_v38 = vadd.f32 %v5917_v52, %v4584_v5  ;;  %v5837_v40 = vpop.f32.mrb[21].mxu0  ;;  %v5919_v41 = vpop.f32.mrb[29].mxu1 }
 0x59f   :  { %v8718_v39 = vadd.f32 %v5837_v40, %v4580_v22  ;;  %v5839_v57 = vpop.f32.mrb[22].mxu0  ;;  %v5921_v42 = vpop.f32.mrb[30].mxu1  ;;  %v8721_v37 = vadd.f32 %v5919_v41, %v4588_v35 }
 0x5a0   :  { %v6086_v53 = vand.u32 2147483647, %v8714_v15  ;;  %v5840_v43 = vpop.f32.mrb[23].mxu0  ;;  %v6088_v44 = vand.u32 2147483647, %v8716_v38  ;;  %v5922_v60 = vpop.f32.mrb[31].mxu1 }
 0x5a1   :  { %v6087_v8 = vand.u32 2147483647, %v8718_v39  ;;  %v6089_v48 = vand.u32 2147483647, %v8721_v37  ;;  %v6135_v10 = vsub.f32 0.0, %v8714_v15  ;;  %v6137_v13 = vsub.f32 0.0, %v8716_v38 }
 0x5a2   :  { %v6093_v45 = vsub.f32 0.0, %v6086_v53  ;;  %v6095_v46 = vsub.f32 0.0, %v6088_v44  ;;  %v6170_v59 = vmax.f32 %v8714_v15, 0.0  ;;  %vm6205_vm7 = vcmp.ge.f32.partialorder %v8714_v15, 0.0 }
 0x5a3   :  { %v6094_v26 = vsub.f32 0.0, %v6087_v8  ;;  %v6096_v51 = vsub.f32 0.0, %v6089_v48  ;;  %v6172_v21 = vmax.f32 %v8716_v38, 0.0  ;;  %v6136_v24 = vsub.f32 0.0, %v8718_v39 }
 0x5a4   :  { %v6100_v47 = vmul.f32 1.442695, %v6093_v45  ;;  %v6104_v49 = vmul.f32 1.442695, %v6095_v46  ;;  %v6142_v28 = vmax.f32 %v6135_v10, 0.0  ;;  %v6144_v30 = vmax.f32 %v6137_v13, 0.0 }
 0x5a5   :  { %v6102_v50 = vmul.f32 1.442695, %v6094_v26  ;;  %v6106_v54 = vmul.f32 1.442695, %v6096_v51  ;;  %vm6207_vm8 = vcmp.ge.f32.partialorder %v8716_v38, 0.0  ;;  %v6171_v22 = vmax.f32 %v8718_v39, 0.0 }
 0x5a6   :  { %7786 = vpow2.f32 %v6100_v47  ;;  %vm6206_vm9 = vcmp.ge.f32.partialorder %v8718_v39, 0.0  ;;  %v6138_v35 = vsub.f32 0.0, %v8721_v37  ;;  %v6143_v45 = vmax.f32 %v6136_v24, 0.0 }
 0x5a7   :  { %7788 = vpow2.f32 %v6104_v49  ;;  %v6173_v8 = vmax.f32 %v8721_v37, 0.0  ;;  %vm6208_vm10 = vcmp.ge.f32.partialorder %v8721_v37, 0.0 }
 0x5a8   :  { %7790 = vpow2.f32 %v6102_v50 }
 0x5a9   :  { %7792 = vpow2.f32 %v6106_v54 }
 0x5b0   :  { %v7787_v55 = vpop.eup %7786 }
 0x5b1   :  { %v7789_v56 = vpop.eup %7788  ;;  %v6114_v11 = vadd.f32 1.0, %v7787_v55 }
 0x5b2   :  { %v7791_v58 = vpop.eup %7790  ;;  %v6116_v34 = vadd.f32 1.0, %v7789_v56 }
 0x5b3   :  { %7794 = vlog2.f32 %v6114_v11  ;;  %v6115_v16 = vadd.f32 1.0, %v7791_v58  ;;  %v8726_v1 = vpop.eup %7792 }
 0x5b4   :  { %7796 = vrcp.f32 %v6114_v11  ;;  %v6117_v2 = vadd.f32 1.0, %v8726_v1 }
 0x5b5   :  { %7798 = vlog2.f32 %v6116_v34 }
 0x5b6   :  { %7800 = vrcp.f32 %v6116_v34  ;;  %v6145_v34 = vmax.f32 %v6138_v35, 0.0 }
 0x5b7   :  { %7802 = vlog2.f32 %v6115_v16 }
 0x5b8   :  { %7804 = vrcp.f32 %v6115_v16 }
 0x5b9   :  { %7806 = vlog2.f32 %v6117_v2 }
 0x5ba   :  { %7808 = vrcp.f32 %v6117_v2 }
 0x5bd   :  { %v7795_v20 = vpop.eup %7794 }
 0x5be   :  { %v7797_v25 = vpop.eup %7796  ;;  %v6122_v33 = vmul.f32 0.6931472, %v7795_v20  ;;  %v7237_v31 = vpop.f32.mrb[32].mxu1 }
 0x5bf   :  { %v7799_v27 = vpop.eup %7798  ;;  %v6212_v5 = vmul.f32 %v7797_v25, %v7787_v55  ;;  %v7238_v0 = vpop.f32.mrb[33].mxu1 }
 0x5c0   :  { %v7801_v52 = vpop.eup %7800  ;;  %v6149_v40 = vadd.f32 %v6142_v28, %v6122_v33  ;;  %v6177_v41 = vadd.f32 %v6170_v59, %v6122_v33  ;;  %v6126_v57 = vmul.f32 0.6931472, %v7799_v27  ;;  %v8757_v42 = vadd.f32 %v7238_v0, %v7237_v31  ;;  %v7240_v53 = vpop.f32.mrb[34].mxu1 }
 0x5c1   :  { %v7803_v43 = vpop.eup %7802  ;;  %v6219_v44 = vsel %vm6205_vm7, %v7797_v25, %v6212_v5  ;;  %v6214_v60 = vmul.f32 %v7801_v52, %v7789_v56  ;;  %v7241_v46 = vpop.f32.mrb[35].mxu1  ;;  %v6244_v5 = vsub.f32 1.0, %v221_v18 }
 0x5c2   :  { %v7805_v47 = vpop.eup %7804  ;;  %v6156_v26 = vsub.f32 0.0, %v6149_v40  ;;  %v6184_v48 = vsub.f32 0.0, %v6177_v41  ;;  %6345 = vst [vmem:[#allocation23] sm:$0xff] %v6219_v44  ;;  %v6151_v49 = vadd.f32 %v6144_v30, %v6126_v57  ;;  %v6179_v50 = vadd.f32 %v6172_v21, %v6126_v57 }
 0x5c3   :  { %v7807_v51 = vpop.eup %7806  ;;  %v6221_v54 = vsel %vm6207_vm8, %v7801_v52, %v6214_v60  ;;  %v6124_v55 = vmul.f32 0.6931472, %v7803_v43  ;;  %v6213_v11 = vmul.f32 %v7805_v47, %v7791_v58 }
 0x5c4   :  { %v6163_v15 = vmax.f32 %v6156_v26, -100.0  ;;  %v6191_v16 = vmax.f32 %v6184_v48, -100.0  ;;  %v6158_v56 = vsub.f32 0.0, %v6151_v49  ;;  %v6186_v2 = vsub.f32 0.0, %v6179_v50  ;;  %6347 = vst [vmem:[#allocation23 + $0x10] sm:$0xff] %v6221_v54  ;;  %v7809_v10 = vpop.eup %7808 }
 0x5c5   :  { %v6150_v13 = vadd.f32 %v6143_v45, %v6124_v55  ;;  %v6178_v20 = vadd.f32 %v6171_v22, %v6124_v55  ;;  %v6220_v59 = vsel %vm6206_vm9, %v7805_v47, %v6213_v11  ;;  %v6128_v24 = vmul.f32 0.6931472, %v7807_v51 }
 0x5c6   :  { %v6234_v21 = vmul.f32 %v6163_v15, %v218_v4  ;;  %v6248_v38 = vmul.f32 %v6241_v14, %v6191_v16  ;;  %v6165_v25 = vmax.f32 %v6158_v56, -100.0  ;;  %v6193_v33 = vmax.f32 %v6186_v2, -100.0  ;;  %6346 = vst [vmem:[#allocation23 + $0x8] sm:$0xff] %v6220_v59  ;;  %v7836_v15 = vld [vmem:[#allocation2 + $0x18] sm:$0xf] }
 0x5c7   :  { %v6157_v58 = vsub.f32 0.0, %v6150_v13  ;;  %v6185_v28 = vsub.f32 0.0, %v6178_v20  ;;  %v6152_v30 = vadd.f32 %v6145_v34, %v6128_v24  ;;  %v6180_v31 = vadd.f32 %v6173_v8, %v6128_v24 }
 0x5c8   :  { %v6215_v27 = vmul.f32 %v7809_v10, %v8726_v1  ;;  %v6236_v39 = vmul.f32 %v6165_v25, %v220_v9  ;;  %v6250_v52 = vmul.f32 %v8747_v19, %v6193_v33  ;;  %v6255_v57 = vadd.f32 %v6248_v38, %v6234_v21 }
 0x5c9   :  { %v6164_v22 = vmax.f32 %v6157_v58, -100.0  ;;  %v6192_v4 = vmax.f32 %v6185_v28, -100.0  ;;  %v6159_v14 = vsub.f32 0.0, %v6152_v30  ;;  %v6187_v35 = vsub.f32 0.0, %v6180_v31 }
 0x5ca   :  { %v6222_v0 = vsel %vm6208_vm10, %v7809_v10, %v6215_v27  ;;  %v6257_v9 = vadd.f32 %v6250_v52, %v6236_v39  ;;  %v6041_v19 = vadd.f32 %v8757_v42, %v4600_v32  ;;  %v224_v16 = vunpack.c.l.bf16 %v7836_v15 }
 0x5cb   :  { %v6235_v40 = vmul.f32 %v6164_v22, %v219_v6  ;;  %v6249_v37 = vmul.f32 %v8742_v17, %v6192_v4  ;;  %v6166_v41 = vmax.f32 %v6159_v14, -100.0  ;;  %v6194_v1 = vmax.f32 %v6187_v35, -100.0  ;;  %6348 = vst [vmem:[#allocation23 + $0x18] sm:$0xff] %v6222_v0 }
 0x5cc   :  { %v6293_v59 = vmul.f32 1.442695, %v8648_v3  ;;  %v6247_v38 = vsub.f32 1.0, %v224_v16  ;;  %v4592_v0 = vrot.slane %v8704_v12, %v638_v61  ;;  %v4596_v52 = vrot.slane %v8704_v12, %v642_v63 }
 0x5cd   :  { %v6237_v53 = vmul.f32 %v6166_v41, %v221_v18  ;;  %v6251_v43 = vmul.f32 %v6244_v5, %v6194_v1  ;;  %v6256_v44 = vadd.f32 %v6249_v37, %v6235_v40  ;;  %v6286_v5 = vadd.f32 1.0, %v8648_v3 }
 0x5cf   :  { %v6258_v60 = vadd.f32 %v6251_v43, %v6237_v53  ;;  %v6269_v45 = vadd.f32 %v6256_v44, %v6255_v57 }
 0x5d1   :  { %v6270_v8 = vadd.f32 %v6269_v45, %v6257_v9 }
 0x5d3   :  { %v8780_v46 = vadd.f32 %v6270_v8, %v6258_v60 }
 0x5de   :  { %v7259_v6 = vpop.f32.mrb[36].mxu1 }
 0x5df   :  { %v7260_v17 = vpop.f32.mrb[37].mxu1 }
 0x5e0   :  { %v7261_v47 = vadd.f32 %v7260_v17, %v7259_v6  ;;  %v7262_v26 = vpop.f32.mrb[38].mxu1 }
 0x5e1   :  { %v7263_v48 = vpop.f32.mrb[39].mxu1 }
 0x5e2   :  { %v6081_v7 = vadd.f32 %v7261_v47, %v6041_v19 }
 0x5e4   :  { %v6092_v18 = vand.u32 2147483647, %v6081_v7  ;;  %v6141_v55 = vsub.f32 0.0, %v6081_v7  ;;  %v6176_v42 = vmax.f32 %v6081_v7, 0.0  ;;  %vm6211_vm11 = vcmp.ge.f32.partialorder %v6081_v7, 0.0 }
 0x5e6   :  { %v6099_v49 = vsub.f32 0.0, %v6092_v18  ;;  %v6148_v56 = vmax.f32 %v6141_v55, 0.0  ;;  %v7837_v18 = vld [vmem:[#allocation2 + $0x10] sm:$0xff] }
 0x5e8   :  { %v6112_v50 = vmul.f32 1.442695, %v6099_v49  ;;  %v222_v49 = vunpack.c.l.bf16 %v7837_v18 }
 0x5ea   :  { %7810 = vpow2.f32 %v6112_v50 }
 0x5f4   :  { %v7811_v51 = vpop.eup %7810 }
 0x5f5   :  { %v6120_v54 = vadd.f32 1.0, %v7811_v51 }
 0x5f7   :  { %7812 = vrcp.f32 %v6120_v54 }
 0x5f8   :  { %7814 = vlog2.f32 %v6120_v54  ;;  %v223_v54 = vunpack.c.h.bf16 %v7837_v18 }
 0x5f9   :  { %7816 = vpow2.f32 %v6293_v59 }
 0x601   :  { %v7813_v11 = vpop.eup %7812 }
 0x602   :  { %v7815_v34 = vpop.eup %7814  ;;  %v6218_v62 = vmul.f32 %v7813_v11, %v7811_v51 }
 0x603   :  { %v6134_v2 = vmul.f32 0.6931472, %v7815_v34  ;;  %v7817_v14 = vpop.eup %7816 }
 0x604   :  { %v6225_v10 = vsel %vm6211_vm11, %v7813_v11, %v6218_v62 }
 0x605   :  { %6351 = vst.msk [vmem:[#allocation23 + $0x30] sm:$0xff] %vm2644_vm0, %v6225_v10  ;;  %v6155_v13 = vadd.f32 %v6148_v56, %v6134_v2  ;;  %v6183_v20 = vadd.f32 %v6176_v42, %v6134_v2 }
 0x607   :  { %v6162_v24 = vsub.f32 0.0, %v6155_v13  ;;  %v6190_v21 = vsub.f32 0.0, %v6183_v20  ;;  %v6245_v20 = vsub.f32 1.0, %v222_v49 }
 0x609   :  { %v6169_v25 = vmax.f32 %v6162_v24, -100.0  ;;  %v6197_v33 = vmax.f32 %v6190_v21, -100.0 }
 0x60b   :  { %v6240_v58 = vmul.f32 %v6169_v25, %v224_v16  ;;  %v6254_v28 = vmul.f32 %v6247_v38, %v6197_v33 }
 0x60d   :  { %v8788_v30 = vadd.f32 %v6254_v28, %v6240_v58  ;;  %v6246_v58 = vsub.f32 1.0, %v223_v54 }
 0x610   :  { %v8790_v31 = vpop.xlane.xlu1 %6313 }
 0x611   :  { %v6315_v27 = vsub.f32 %v8696_v29, %v8790_v31 }
 0x613   :  { %v6316_v39 = vmul.f32 1.442695, %v6315_v27 }
 0x614   :  { %v6290_v22 = vpop.permute.xlu1 %6289 }
 0x615   :  { %7818 = vpow2.f32 %v6316_v39  ;;  %v6292_v4 = vsub.f32 %v6286_v5, %v6290_v22 }
 0x617   :  { %v6295_v35 = vsub.f32 %v6292_v4, %v7817_v14 }
 0x619   :  { %6298 = vrot.lane.b32.xlu0 %v6295_v35, %s8256_s2 }
 0x61d   :  { %v5999_v40 = vpop.f32.mrb[24].mxu0 }
 0x61e   :  { %v7277_v41 = vadd.f32 %v5999_v40, %v4592_v0  ;;  %v6001_v1 = vpop.f32.mrb[25].mxu0  ;;  %v6274_v40 = vsel %vm2644_vm0, %v8788_v30, 0.0 }
 0x61f   :  { %v7819_v37 = vpop.eup %7818  ;;  %v7278_v3 = vadd.f32 %v6001_v1, %v4596_v52  ;;  %v6003_v57 = vpop.f32.mrb[26].mxu0 }
 0x620   :  { %v6318_v9 = vsel %vm4006_vm3, %v7819_v37, 0.0  ;;  %v6090_v53 = vand.u32 2147483647, %v7277_v41  ;;  %v6004_v43 = vpop.f32.mrb[27].mxu0  ;;  %v6139_v6 = vsub.f32 0.0, %v7277_v41  ;;  %v6174_v7 = vmax.f32 %v7277_v41, 0.0 }
 0x621   :  { %6319 = vadd.xlane.f32.xlu1 %v6318_v9  ;;  %v6091_v44 = vand.u32 2147483647, %v7278_v3  ;;  %v6140_v19 = vsub.f32 0.0, %v7278_v3  ;;  %vm6209_vm12 = vcmp.ge.f32.partialorder %v7277_v41, 0.0  ;;  %v6175_v62 = vmax.f32 %v7278_v3, 0.0 }
 0x622   :  { %v6097_v60 = vsub.f32 0.0, %v6090_v53  ;;  %v6146_v48 = vmax.f32 %v6139_v6, 0.0  ;;  %vm6210_vm13 = vcmp.ge.f32.partialorder %v7278_v3, 0.0 }
 0x623   :  { %v6098_v45 = vsub.f32 0.0, %v6091_v44  ;;  %v6147_v56 = vmax.f32 %v6140_v19, 0.0 }
 0x624   :  { %v6108_v8 = vmul.f32 1.442695, %v6097_v60 }
 0x625   :  { %v6110_v61 = vmul.f32 1.442695, %v6098_v45 }
 0x626   :  { %7820 = vpow2.f32 %v6108_v8 }
 0x627   :  { %7822 = vpow2.f32 %v6110_v61 }
 0x630   :  { %v7821_v23 = vpop.eup %7820 }
 0x631   :  { %v7823_v63 = vpop.eup %7822  ;;  %v6118_v12 = vadd.f32 1.0, %v7821_v23 }
 0x632   :  { %v6119_v32 = vadd.f32 1.0, %v7823_v63 }
 0x633   :  { %7824 = vlog2.f32 %v6118_v12 }
 0x634   :  { %7826 = vrcp.f32 %v6118_v12 }
 0x635   :  { %7828 = vrcp.f32 %v6119_v32 }
 0x636   :  { %7830 = vlog2.f32 %v6119_v32 }
 0x63d   :  { %v7825_v17 = vpop.eup %7824 }
 0x63e   :  { %v7827_v47 = vpop.eup %7826  ;;  %v6130_v26 = vmul.f32 0.6931472, %v7825_v17 }
 0x63f   :  { %v7829_v50 = vpop.eup %7828  ;;  %v6216_v51 = vmul.f32 %v7827_v47, %v7821_v23 }
 0x640   :  { %v7831_v55 = vpop.eup %7830  ;;  %v6153_v11 = vadd.f32 %v6146_v48, %v6130_v26  ;;  %v6181_v34 = vadd.f32 %v6174_v7, %v6130_v26  ;;  %v6217_v15 = vmul.f32 %v7829_v50, %v7823_v63 }
 0x641   :  { %v6223_v16 = vsel %vm6209_vm12, %v7827_v47, %v6216_v51  ;;  %v6132_v42 = vmul.f32 0.6931472, %v7831_v55 }
 0x642   :  { %v6160_v2 = vsub.f32 0.0, %v6153_v11  ;;  %v6188_v10 = vsub.f32 0.0, %v6181_v34  ;;  %6349 = vst [vmem:[#allocation23 + $0x20] sm:$0xff] %v6223_v16  ;;  %v6224_v13 = vsel %vm6210_vm13, %v7829_v50, %v6217_v15 }
 0x643   :  { %6350 = vst [vmem:[#allocation23 + $0x28] sm:$0xff] %v6224_v13  ;;  %v6154_v59 = vadd.f32 %v6147_v56, %v6132_v42  ;;  %v6182_v24 = vadd.f32 %v6175_v62, %v6132_v42 }
 0x644   :  { %v6167_v21 = vmax.f32 %v6160_v2, -100.0  ;;  %v6195_v38 = vmax.f32 %v6188_v10, -100.0 }
 0x645   :  { %v6161_v25 = vsub.f32 0.0, %v6154_v59  ;;  %v6189_v33 = vsub.f32 0.0, %v6182_v24 }
 0x646   :  { %v6238_v28 = vmul.f32 %v6167_v21, %v222_v49  ;;  %v6252_v27 = vmul.f32 %v6245_v20, %v6195_v38 }
 0x647   :  { %v6168_v39 = vmax.f32 %v6161_v25, -100.0  ;;  %v6196_v5 = vmax.f32 %v6189_v33, -100.0 }
 0x648   :  { %v6259_v22 = vadd.f32 %v6252_v27, %v6238_v28 }
 0x649   :  { %v6239_v4 = vmul.f32 %v6168_v39, %v223_v54  ;;  %v6253_v14 = vmul.f32 %v6246_v58, %v6196_v5 }
 0x64a   :  { %v6272_v35 = vadd.f32 %v8780_v46, %v6259_v22 }
 0x64b   :  { %v6260_v0 = vadd.f32 %v6253_v14, %v6239_v4 }
 0x64d   :  { %v6273_v52 = vadd.f32 %v6272_v35, %v6260_v0 }
 0x64f   :  { %v6275_v37 = vadd.f32 %v6274_v40, %v6273_v52 }
 0x651   :  { %6276 = vadd.xlane.f32.xlu0 %v6275_v37 }
 0x68b   :  { %v6299_v41 = vpop.permute.xlu0 %6298 }
 0x68c   :  { %v6301_v1 = vsel %vm4182_vm6, %v6299_v41, 0.0 }
 0x68d   :  { %6302 = vadd.xlane.f32.xlu1 %v6301_v1 }
 0x6ae   :  { %v6320_v3 = vpop.xlane.xlu1 %6319 }
 0x6af   :  { %7832 = vlog2.f32 %v6320_v3 }
 0x6b9   :  { %v7833_v57 = vpop.eup %7832 }
 0x6ba   :  { %v6322_v9 = vmul.f32 0.6931472, %v7833_v57 }
 0x6bc   :  { %v6323_v53 = vadd.f32 %v6322_v9, %v8790_v31 }
 0x6be   :  { %v6325_v43 = vsub.f32 %v8696_v29, %v6323_v53 }
 0x6c0   :  { %v6326_v46 = vmul.f32 %v8638_v36, %v6325_v43 }
 0x6c2   :  { %v6327_v44 = vsel %vm4006_vm3, %v6326_v46, 0.0 }
 0x6c3   :  { %6328 = vadd.xlane.f32.xlu1 %v6327_v44 }
 0x6de   :  { %v6277_v30 = vpop.xlane.xlu0 %6276 }
 0x6df   :  { %v6278_v60 = vrot.slane %v6277_v30, 4 }
 0x6e1   :  { %v6279_v45 = vadd.f32 %v6278_v60, %v6277_v30 }
 0x6e3   :  { %v6280_v8 = vrot.slane %v6279_v45, 2 }
 0x6e5   :  { %v6281_v61 = vadd.f32 %v6280_v8, %v6279_v45 }
 0x6e7   :  { %v6282_v23 = vrot.slane %v6281_v61, 1 }
 0x6e9   :  { %v6283_v63 = vadd.f32 %v6282_v23, %v6281_v61 }
 0x6eb   :  { %7339 = vpush %v6283_v63 }
 0x6ec   :  { %8135 = shalt.err (!%p8132_p10)
}
 0x6ed   :  { %s8136_s1 = scalar_lea.hbm %s8872_s14, 128 }
 0x6ee   :  { %p8137_p11 = scmp.ne.s32.totalorder %s8872_s14, %s8136_s1  ;;  %p8140_p12 = scmp.lt.u32.totalorder %s8136_s1, %s8872_s14 }
 0x6f0   :  { %p8142_p13 = pnand %p8140_p12, %p8137_p11 }
 0x6f2   :  { %8145 = shalt.err (!%p8142_p13)
}
 0x6f3   :  { %6376 = dma.vmem_to_hbm [thread:$0]  %s6374_s25, 128, %s8872_s14, [#allocation25]  }
 0x6f4   :  { %s8146_s5 = scalar_lea.vmem %s6364_s3, 896  ;;  %p8151_p1 = scmp.lt.s32.totalorder %s6364_s3, %s6364_s3 }
 0x6f5   :  { %p8147_p0 = scmp.ne.s32.totalorder %s6364_s3, %s8146_s5  ;;  %p8152_p2 = scmp.lt.s32.totalorder %s8146_s5, %s8146_s5 }
 0x6f7   :  { %p8153_p3 = por %p8152_p2, %p8151_p1 }
 0x6f9   :  { %p8154_p4 = pnand %p8153_p3, %p8147_p0 }
 0x6fb   :  { %8157 = shalt.err (!%p8154_p4)
}
 0x6fc   :  { %s8158_s30 = scalar_lea.hbm %s8871_s13, 896 }
 0x6fd   :  { %p8159_p5 = scmp.ne.s32.totalorder %s8871_s13, %s8158_s30  ;;  %p8162_p6 = scmp.lt.u32.totalorder %s8158_s30, %s8871_s13 }
 0x6ff   :  { %p8164_p7 = pnand %p8162_p6, %p8159_p5 }
 0x701   :  { %8167 = shalt.err (!%p8164_p7)
}
 0x702   :  { %6366 = dma.vmem_to_hbm [thread:$0]  %s6364_s3, 896, %s8871_s13, [#allocation4]  }
 0x703   :  { %s8259_s10 = smov [#allocation26]  }
 0x704   :  { %s6383_s6 = sshll.u32 %s8259_s10, 4  ;;  %s6384_s6 = int_to_ptr.vmem [resolvable:$true] %s6383_s6 }
 0x705   :  { %s8168_s12 = scalar_lea.vmem %s6384_s6, 128  ;;  %p8173_p9 = scmp.lt.s32.totalorder %s6384_s6, %s6384_s6 }
 0x706   :  { %p8169_p8 = scmp.ne.s32.totalorder %s6384_s6, %s8168_s12  ;;  %p8174_p10 = scmp.lt.s32.totalorder %s8168_s12, %s8168_s12 }
 0x708   :  { %p8175_p11 = por %p8174_p10, %p8173_p9 }
 0x70a   :  { %p8176_p12 = pnand %p8175_p11, %p8169_p8 }
 0x71a   :  { %v6303_v36 = vpop.xlane.xlu1 %6302 }
 0x71b   :  { %v6304_v29 = vrot.slane %v6303_v36, 4 }
 0x71d   :  { %v6305_v31 = vadd.f32 %v6304_v29, %v6303_v36 }
 0x71f   :  { %v6306_v12 = vrot.slane %v6305_v31, 2 }
 0x720   :  { %8179 = shalt.err (!%p8176_p12)
}
 0x721   :  { %s8180_s25 = scalar_lea.hbm %s8873_s15, 128 }
 0x722   :  { %p8181_p13 = scmp.ne.s32.totalorder %s8873_s15, %s8180_s25  ;;  %p8184_p0 = scmp.lt.u32.totalorder %s8180_s25, %s8873_s15 }
 0x724   :  { %p8186_p1 = pnand %p8184_p0, %p8181_p13 }
 0x726   :  { %8189 = shalt.err (!%p8186_p1)
}
 0x727   :  { %6386 = dma.vmem_to_hbm [thread:$0]  %s6384_s6, 128, %s8873_s15, [#allocation25]   ;;  %v6307_v32 = vadd.f32 %v6306_v12, %v6305_v31 }
 0x728   :  { %s7340_s1 = spop %7339  ;;  %s8260_s22 = smov [#allocation27]  }
 0x729   :  { %v6308_v6 = vrot.slane %v6307_v32, 1  ;;  %s6285_s9 = ssub.f32 0.0, %s7340_s1  ;;  %s6393_s30 = sshll.u32 %s8260_s22, 4  ;;  %s6394_s30 = int_to_ptr.vmem [resolvable:$true] %s6393_s30 }
 0x72a   :  { %s8190_s7 = scalar_lea.vmem %s6394_s30, 128  ;;  %p8195_p3 = scmp.lt.s32.totalorder %s6394_s30, %s6394_s30 }
 0x72b   :  { %v6309_v17 = vadd.f32 %v6308_v6, %v6307_v32  ;;  %p8191_p2 = scmp.ne.s32.totalorder %s6394_s30, %s8190_s7  ;;  %p8196_p4 = scmp.lt.s32.totalorder %s8190_s7, %s8190_s7 }
 0x72d   :  { %7341 = vpush %v6309_v17  ;;  %p8197_p5 = por %p8196_p4, %p8195_p3 }
 0x72f   :  { %p8198_p6 = pnand %p8197_p5, %p8191_p2 }
 0x750   :  { %v6329_v19 = vpop.xlane.xlu1 %6328 }
 0x751   :  { %v6330_v47 = vrot.slane %v6329_v19, 4 }
 0x753   :  { %v6331_v26 = vadd.f32 %v6330_v47, %v6329_v19 }
 0x755   :  { %v6332_v48 = vrot.slane %v6331_v26, 2 }
 0x757   :  { %v6333_v7 = vadd.f32 %v6332_v48, %v6331_v26 }
 0x759   :  { %v6334_v18 = vrot.slane %v6333_v7, 1 }
 0x75b   :  { %v6335_v49 = vadd.f32 %v6334_v18, %v6333_v7 }
 0x75d   :  { %7343 = vpush %v6335_v49 }
 0x75e   :  { %s7342_s4 = spop %7341 }
 0x75f   :  { %s6311_s28 = smul.f32 -0.5, %s7342_s4 }
 0x761   :  { %s6341_s8 = sadd.f32 %s6311_s28, %s6285_s9 }
 0x763   :  { %s6342_s5 = smul.f32 0.9, %s6341_s8 }
 0x78e   :  { %s7344_s18 = spop %7343 }
 0x78f   :  { %s6337_s20 = ssub.f32 0.0, %s7344_s18 }
 0x791   :  { %s6340_s15 = smul.f32 0.125, %s6337_s20 }
 0x793   :  { %s6343_s27 = smul.f32 0.1, %s6340_s15 }
 0x795   :  { %s6344_s17 = sadd.f32 %s6343_s27, %s6342_s5 }
 0x797   :  { %v6355_v50 = vstv %s6344_s17 }
 0x798   :  { %6356 = vst [vmem:[#allocation27] sm:$0xff] %v6355_v50 }
 0x799   :  { %8201 = shalt.err (!%p8198_p6)
}
 0x79a   :  { %s8202_s14 = scalar_lea.hbm %s8874_s16, 128 }
 0x79b   :  { %p8203_p7 = scmp.ne.s32.totalorder %s8874_s16, %s8202_s14  ;;  %p8206_p8 = scmp.lt.u32.totalorder %s8202_s14, %s8874_s16 }
 0x79d   :  { %p8208_p9 = pnand %p8206_p8, %p8203_p7 }
 0x79f   :  { %8211 = shalt.err (!%p8208_p9)
}
 0x7a0   :  { %6396 = dma.vmem_to_hbm [thread:$0]  %s6394_s30, 128, %s8874_s16, [#allocation28]  }
 0x7a1   :  { %8226 = dma.done.wait [#allocation4], 896  }
 0x7a2   :  { %8227 = vsyncadd [#allocation4], 4294966400 }
 0x7a3   :  { %8228 = dma.done.wait [#allocation25], 256  }
 0x7a4   :  { %8229 = vsyncadd [#allocation25], 4294967040 }
 0x7a5   :  { %8230 = dma.done.wait [#allocation28], 128  }
 0x7a6   :  { %8231 = vsyncadd [#allocation28], 4294967168 }
 0x7a7   :  { %6409 = vsyncpa [#allocation3], 1 }
 0x7a8   :  { %6410 = vsyncpa [#allocation6], 1 }
 0x7a9   :  { %6411 = vsyncpa [#allocation9], 1 }
 0x7aa   :  { %6412 = vsyncpa [#allocation12], 1 }
 0x7ab   :  { %6413 = vsyncpa [#allocation15], 1 }
 0x7ac   :  { %6414 = vsyncpa [#allocation18], 1 }
 0x7ad   :  { %6415 = vsyncpa [#allocation21], 1 }
 0x7ae   :  { %6416 = vsyncpa [#allocation4], 1 }
 0x7af   :  { %6417 = vsyncpa [#allocation25], 1 }
 0x7b0   :  { %6418 = vsyncpa [#allocation28], 1 }

// kernel: _m2_ff_forward_impl.1
= control target key start
LH: loop header
LB: loop body
LE: loop exit
PB: predicated region body
PF: predicated region fallthrough
CT: control target
= control target key end

     0   :  { %s8858_s0 = inlined_call_operand.hbm [shape: bf16[8,784], index: 0, kind: input, shape index: {}]   ;;  %s8859_s1 = inlined_call_operand.hbm [shape: s32[8,1], index: 1, kind: input, shape index: {}]   ;;  %s8860_s2 = inlined_call_operand.hbm [shape: bf16[784,1024], index: 2, kind: input, shape index: {}]   ;;  %s8861_s3 = inlined_call_operand.hbm [shape: f32[1,1024], index: 3, kind: input, shape index: {}]   ;;  %s8862_s4 = inlined_call_operand.hbm [shape: bf16[512,40], index: 4, kind: input, shape index: {}]   ;;  %s8863_s5 = inlined_call_operand.hbm [shape: f32[1,40], index: 5, kind: input, shape index: {}]   ;;  %s8864_s6 = inlined_call_operand.hbm [shape: bf16[512,10], index: 6, kind: input, shape index: {}]   ;;  %s8865_s7 = inlined_call_operand.hbm [shape: f32[1,10], index: 7, kind: input, shape index: {}]   ;;  %s8866_s8 = inlined_call_operand.hbm [shape: bf16[20,512], index: 8, kind: input, shape index: {}]   ;;  %s8867_s9 = inlined_call_operand.hbm [shape: bf16[10,512], index: 9, kind: input, shape index: {}]   ;;  %s8868_s10 = inlined_call_operand.hbm [shape: f32[1,512], index: 10, kind: input, shape index: {}]   ;;  %s8869_s11 = inlined_call_operand.hbm [shape: bf16[512,784], index: 11, kind: input, shape index: {}]   ;;  %s8870_s12 = inlined_call_operand.hbm [shape: f32[1,784], index: 12, kind: input, shape index: {}]   ;;  %s8871_s13 = inlined_call_operand.hbm [shape: f32[8,784], index: 13, kind: output, shape index: {0}]   ;;  %s8872_s14 = inlined_call_operand.hbm [shape: f32[8,10], index: 14, kind: output, shape index: {1}]   ;;  %s8873_s15 = inlined_call_operand.hbm [shape: f32[8,40], index: 15, kind: output, shape index: {2}]   ;;  %s8874_s16 = inlined_call_operand.hbm [shape: f32[8,128], index: 16, kind: output, shape index: {3}]  }
   0x1   :  { %8876 = sst [smem:[#allocation39_spill]] %s8858_s0 }
   0x2   :  { %22 = vsyncpa [#allocation3], 0 }
   0x3   :  { %23 = vsyncpa [#allocation6], 0 }
   0x4   :  { %24 = vsyncpa [#allocation9], 0 }
   0x5   :  { %25 = vsyncpa [#allocation12], 0 }
   0x6   :  { %26 = vsyncpa [#allocation15], 0 }
   0x7   :  { %27 = vsyncpa [#allocation18], 0 }
   0x8   :  { %28 = vsyncpa [#allocation21], 0 }
   0x9   :  { %29 = vsyncpa [#allocation4], 0 }
   0xa   :  { %30 = vsyncpa [#allocation25], 0 }
   0xb   :  { %31 = vsyncpa [#allocation28], 0  ;;  %s8232_s21 = smov [#allocation5]   ;;  %s8233_s23 = smov [#allocation8]  }
   0xc   :  { %s48_s22 = sshll.u32 %s8232_s21, 4  ;;  %s70_s24 = sshll.u32 %s8233_s23, 4  ;;  %s49_s22 = int_to_ptr.vmem [resolvable:$true] %s48_s22  ;;  %s71_s24 = int_to_ptr.vmem [resolvable:$true] %s70_s24 }
   0xd   :  { %s7838_s27 = scalar_lea.hbm %s8859_s1, 128 }
   0xe   :  { %p7839_p0 = scmp.ne.s32.totalorder %s8859_s1, %s7838_s27  ;;  %p7842_p1 = scmp.lt.u32.totalorder %s7838_s27, %s8859_s1 }
  0x10   :  { %p7844_p2 = pnand %p7842_p1, %p7839_p0 }
  0x12   :  { %7847 = shalt.err (!%p7844_p2)
}
  0x13   :  { %s7848_s17 = scalar_lea.vmem %s49_s22, 128  ;;  %p7853_p4 = scmp.lt.s32.totalorder %s49_s22, %s49_s22 }
  0x14   :  { %p7849_p3 = scmp.ne.s32.totalorder %s49_s22, %s7848_s17  ;;  %p7854_p5 = scmp.lt.s32.totalorder %s7848_s17, %s7848_s17 }
  0x16   :  { %p7855_p6 = por %p7854_p5, %p7853_p4 }
  0x18   :  { %p7856_p7 = pnand %p7855_p6, %p7849_p3 }
  0x1a   :  { %7859 = shalt.err (!%p7856_p7)
}
  0x1b   :  { %51 = dma.hbm_to_vmem [thread:$0]  %s8859_s1, 128, %s49_s22, [#allocation6]  }
  0x1c   :  { %s7860_s23 = scalar_lea.hbm %s8861_s3, 128 }
  0x1d   :  { %p7861_p8 = scmp.ne.s32.totalorder %s8861_s3, %s7860_s23  ;;  %p7864_p9 = scmp.lt.u32.totalorder %s7860_s23, %s8861_s3 }
  0x1f   :  { %p7866_p10 = pnand %p7864_p9, %p7861_p8 }
  0x21   :  { %7869 = shalt.err (!%p7866_p10)
}
  0x22   :  { %s7870_s29 = scalar_lea.vmem %s71_s24, 128  ;;  %p7875_p12 = scmp.lt.s32.totalorder %s71_s24, %s71_s24 }
  0x23   :  { %p7871_p11 = scmp.ne.s32.totalorder %s71_s24, %s7870_s29  ;;  %p7876_p13 = scmp.lt.s32.totalorder %s7870_s29, %s7870_s29 }
  0x25   :  { %p7877_p0 = por %p7876_p13, %p7875_p12 }
  0x27   :  { %p7878_p1 = pnand %p7877_p0, %p7871_p11 }
  0x29   :  { %7881 = shalt.err (!%p7878_p1)
}
  0x2a   :  { %73 = dma.hbm_to_vmem [thread:$0]  %s8861_s3, 128, %s71_s24, [#allocation9]  }
  0x2b   :  { %s8234_s30 = smov [#allocation11]   ;;  %s8235_s17 = smov [#allocation14]  }
  0x2c   :  { %s92_s0 = sshll.u32 %s8234_s30, 4  ;;  %s114_s18 = sshll.u32 %s8235_s17, 4  ;;  %s93_s0 = int_to_ptr.vmem [resolvable:$true] %s92_s0  ;;  %s115_s18 = int_to_ptr.vmem [resolvable:$true] %s114_s18 }
  0x2d   :  { %s7882_s21 = scalar_lea.hbm %s8863_s5, 16 }
  0x2e   :  { %p7883_p2 = scmp.ne.s32.totalorder %s8863_s5, %s7882_s21  ;;  %p7886_p3 = scmp.lt.u32.totalorder %s7882_s21, %s8863_s5 }
  0x30   :  { %p7888_p4 = pnand %p7886_p3, %p7883_p2 }
  0x32   :  { %7891 = shalt.err (!%p7888_p4)
}
  0x33   :  { %s7892_s3 = scalar_lea.vmem %s93_s0, 16  ;;  %s7896_s24 = scalar_lea.vmem %s93_s0, 32 }
  0x34   :  { %p7893_p5 = scmp.ne.s32.totalorder %s93_s0, %s7892_s3  ;;  %p7897_p6 = scmp.lt.s32.totalorder %s93_s0, %s93_s0 }
  0x35   :  { %p7898_p7 = scmp.lt.s32.totalorder %s7896_s24, %s7892_s3 }
  0x37   :  { %p7899_p8 = por %p7898_p7, %p7897_p6 }
  0x39   :  { %p7900_p9 = pnand %p7899_p8, %p7893_p5 }
  0x3b   :  { %7903 = shalt.err (!%p7900_p9)
}
  0x3c   :  { %95 = dma.hbm_to_vmem [thread:$0]  %s8863_s5, 16, %s93_s0, [#allocation12]  }
  0x3d   :  { %s7904_s30 = scalar_lea.hbm %s8865_s7, 16 }
  0x3e   :  { %p7905_p10 = scmp.ne.s32.totalorder %s8865_s7, %s7904_s30  ;;  %p7908_p11 = scmp.lt.u32.totalorder %s7904_s30, %s8865_s7 }
  0x40   :  { %p7910_p12 = pnand %p7908_p11, %p7905_p10 }
  0x42   :  { %7913 = shalt.err (!%p7910_p12)
}
  0x43   :  { %s7914_s23 = scalar_lea.vmem %s115_s18, 16  ;;  %s7918_s25 = scalar_lea.vmem %s115_s18, 32 }
  0x44   :  { %p7915_p13 = scmp.ne.s32.totalorder %s115_s18, %s7914_s23  ;;  %p7919_p0 = scmp.lt.s32.totalorder %s115_s18, %s115_s18 }
  0x45   :  { %p7920_p1 = scmp.lt.s32.totalorder %s7918_s25, %s7914_s23 }
  0x47   :  { %p7921_p2 = por %p7920_p1, %p7919_p0 }
  0x49   :  { %p7922_p3 = pnand %p7921_p2, %p7915_p13 }
  0x4b   :  { %7925 = shalt.err (!%p7922_p3)
}
  0x4c   :  { %117 = dma.hbm_to_vmem [thread:$0]  %s8865_s7, 16, %s115_s18, [#allocation15]  }
  0x4d   :  { %s8236_s26 = smov [#allocation17]   ;;  %s8237_s3 = smov [#allocation20]  }
  0x4e   :  { %s135_s27 = sshll.u32 %s8236_s26, 4  ;;  %s157_s24 = sshll.u32 %s8237_s3, 4  ;;  %s136_s27 = int_to_ptr.vmem [resolvable:$true] %s135_s27  ;;  %s8394_s24 = int_to_ptr.vmem [resolvable:$true] %s157_s24 }
  0x4f   :  { %s7926_s1 = scalar_lea.hbm %s8867_s9, 512 }
  0x50   :  { %p7927_p4 = scmp.ne.s32.totalorder %s8867_s9, %s7926_s1  ;;  %p7930_p5 = scmp.lt.u32.totalorder %s7926_s1, %s8867_s9 }
  0x52   :  { %p7932_p6 = pnand %p7930_p5, %p7927_p4 }
  0x54   :  { %7935 = shalt.err (!%p7932_p6)
}
  0x55   :  { %s7936_s7 = scalar_lea.vmem %s136_s27, 512  ;;  %p7941_p8 = scmp.lt.s32.totalorder %s136_s27, %s136_s27 }
  0x56   :  { %p7937_p7 = scmp.ne.s32.totalorder %s136_s27, %s7936_s7  ;;  %p7942_p9 = scmp.lt.s32.totalorder %s7936_s7, %s7936_s7 }
  0x58   :  { %p7943_p10 = por %p7942_p9, %p7941_p8 }
  0x5a   :  { %p7944_p11 = pnand %p7943_p10, %p7937_p7 }
  0x5c   :  { %7947 = shalt.err (!%p7944_p11)
}
  0x5d   :  { %s8238_s18 = smov 256   ;;  %s8239_s20 = smov 16  }
  0x5e   :  { %141 = dma.hbm_to_vmem [thread:$0]  %s8867_s9, 512, %s136_s27, [#allocation18], %s8238_s18, %s8238_s18, %s8239_s20  }
  0x5f   :  { %s7948_s0 = scalar_lea.hbm %s8869_s11, 28672 }
  0x60   :  { %p7949_p12 = scmp.ne.s32.totalorder %s8869_s11, %s7948_s0  ;;  %p7952_p13 = scmp.lt.u32.totalorder %s7948_s0, %s8869_s11 }
  0x62   :  { %p7954_p0 = pnand %p7952_p13, %p7949_p12 }
  0x64   :  { %7957 = shalt.err (!%p7954_p0)
}
  0x65   :  { %s7958_s1 = scalar_lea.vmem %s8394_s24, 28672  ;;  %p7963_p2 = scmp.lt.s32.totalorder %s8394_s24, %s8394_s24 }
  0x66   :  { %p7959_p1 = scmp.ne.s32.totalorder %s8394_s24, %s7958_s1  ;;  %p7964_p3 = scmp.lt.s32.totalorder %s7958_s1, %s7958_s1 }
  0x68   :  { %p7965_p4 = por %p7964_p3, %p7963_p2 }
  0x6a   :  { %p7966_p5 = pnand %p7965_p4, %p7959_p1 }
  0x6c   :  { %7969 = shalt.err (!%p7966_p5)
}
  0x6d   :  { %s8240_s9 = smov 448   ;;  %s8241_s27 = smov 28  }
  0x6e   :  { %163 = dma.hbm_to_vmem [thread:$0]  %s8869_s11, 28672, %s8394_s24, [#allocation21], %s8240_s9, %s8240_s9, %s8241_s27  }
  0x6f   :  { %s8242_s17 = smov [#allocation2]   ;;  %s8243_s7 = smov [#allocation7]  }
  0x70   :  { %s38_s19 = sshll.u32 %s8242_s17, 4  ;;  %s57_s21 = sshll.u32 %s8243_s7, 4  ;;  %s39_s19 = int_to_ptr.vmem [resolvable:$true] %s38_s19  ;;  %s8428_s21 = int_to_ptr.vmem [resolvable:$true] %s57_s21 }
  0x71   :  { %s8877_s5 = sld [smem:[#allocation39_spill]] }
  0x77   :  { %s7970_s0 = scalar_lea.hbm %s8877_s5, 448 }
  0x78   :  { %p7971_p6 = scmp.ne.s32.totalorder %s8877_s5, %s7970_s0  ;;  %p7974_p7 = scmp.lt.u32.totalorder %s7970_s0, %s8877_s5 }
  0x7a   :  { %p7976_p8 = pnand %p7974_p7, %p7971_p6 }
  0x7c   :  { %7979 = shalt.err (!%p7976_p8)
}
  0x7d   :  { %s7980_s11 = scalar_lea.vmem %s39_s19, 448  ;;  %p7985_p10 = scmp.lt.s32.totalorder %s39_s19, %s39_s19 }
  0x7e   :  { %p7981_p9 = scmp.ne.s32.totalorder %s39_s19, %s7980_s11  ;;  %p7986_p11 = scmp.lt.s32.totalorder %s7980_s11, %s7980_s11 }
  0x80   :  { %p7987_p12 = por %p7986_p11, %p7985_p10 }
  0x82   :  { %p7988_p13 = pnand %p7987_p12, %p7981_p9 }
  0x84   :  { %7991 = shalt.err (!%p7988_p13)
}
  0x85   :  { %41 = dma.hbm_to_vmem [thread:$0]  %s8877_s5, 448, %s39_s19, [#allocation3]  }
  0x86   :  { %s7992_s22 = scalar_lea.hbm %s8860_s2, 50176 }
  0x87   :  { %p7993_p0 = scmp.ne.s32.totalorder %s8860_s2, %s7992_s22  ;;  %p7996_p1 = scmp.lt.u32.totalorder %s7992_s22, %s8860_s2 }
  0x89   :  { %p7998_p2 = pnand %p7996_p1, %p7993_p0 }
  0x8b   :  { %8001 = shalt.err (!%p7998_p2)
}
  0x8c   :  { %s8002_s25 = scalar_lea.vmem %s8428_s21, 50176  ;;  %p8007_p4 = scmp.lt.s32.totalorder %s8428_s21, %s8428_s21 }
  0x8d   :  { %p8003_p3 = scmp.ne.s32.totalorder %s8428_s21, %s8002_s25  ;;  %p8008_p5 = scmp.lt.s32.totalorder %s8002_s25, %s8002_s25 }
  0x8f   :  { %p8009_p6 = por %p8008_p5, %p8007_p4 }
  0x91   :  { %p8010_p7 = pnand %p8009_p6, %p8003_p3 }
  0x93   :  { %8013 = shalt.err (!%p8010_p7)
}
  0x94   :  { %s8244_s19 = smov 512   ;;  %s8245_s5 = smov 32  }
  0x95   :  { %63 = dma.hbm_to_vmem [thread:$0]  %s8860_s2, 50176, %s8428_s21, [#allocation6], %s8244_s19, %s8244_s19, %s8245_s5  }
  0x96   :  { %s8246_s3 = smov [#allocation10]   ;;  %s8014_s24 = scalar_lea.hbm %s8862_s4, 4096 }
  0x97   :  { %s79_s28 = sshll.u32 %s8246_s3, 4  ;;  %p8015_p8 = scmp.ne.s32.totalorder %s8862_s4, %s8014_s24  ;;  %s80_s28 = int_to_ptr.vmem [resolvable:$true] %s79_s28 }
  0x98   :  { %p8018_p9 = scmp.lt.u32.totalorder %s8014_s24, %s8862_s4 }
  0x9a   :  { %p8020_p10 = pnand %p8018_p9, %p8015_p8 }
  0x9c   :  { %8023 = shalt.err (!%p8020_p10)
}
  0x9d   :  { %s8024_s30 = scalar_lea.vmem %s80_s28, 4096  ;;  %p8029_p12 = scmp.lt.s32.totalorder %s80_s28, %s80_s28 }
  0x9e   :  { %p8025_p11 = scmp.ne.s32.totalorder %s80_s28, %s8024_s30  ;;  %p8030_p13 = scmp.lt.s32.totalorder %s8024_s30, %s8024_s30 }
  0xa0   :  { %p8031_p0 = por %p8030_p13, %p8029_p12 }
  0xa2   :  { %p8032_p1 = pnand %p8031_p0, %p8025_p11 }
  0xa4   :  { %8035 = shalt.err (!%p8032_p1)
}
  0xa5   :  { %s8247_s2 = smov 64   ;;  %s8248_s21 = smov 4  }
  0xa6   :  { %85 = dma.hbm_to_vmem [thread:$0]  %s8862_s4, 4096, %s80_s28, [#allocation9], %s8247_s2, %s8247_s2, %s8248_s21  }
  0xa7   :  { %s8249_s23 = smov [#allocation13]   ;;  %s8250_s19 = smov [#allocation16]  }
  0xa8   :  { %s101_s25 = sshll.u32 %s8249_s23, 4  ;;  %s123_s5 = sshll.u32 %s8250_s19, 4  ;;  %s102_s25 = int_to_ptr.vmem [resolvable:$true] %s101_s25  ;;  %s124_s5 = int_to_ptr.vmem [resolvable:$true] %s123_s5 }
  0xa9   :  { %s8036_s3 = scalar_lea.hbm %s8864_s6, 4096 }
  0xaa   :  { %p8037_p2 = scmp.ne.s32.totalorder %s8864_s6, %s8036_s3  ;;  %p8040_p3 = scmp.lt.u32.totalorder %s8036_s3, %s8864_s6 }
  0xac   :  { %p8042_p4 = pnand %p8040_p3, %p8037_p2 }
  0xae   :  { %8045 = shalt.err (!%p8042_p4)
}
  0xaf   :  { %s8046_s4 = scalar_lea.vmem %s102_s25, 4096  ;;  %p8051_p6 = scmp.lt.s32.totalorder %s102_s25, %s102_s25 }
  0xb0   :  { %p8047_p5 = scmp.ne.s32.totalorder %s102_s25, %s8046_s4  ;;  %p8052_p7 = scmp.lt.s32.totalorder %s8046_s4, %s8046_s4 }
  0xb2   :  { %p8053_p8 = por %p8052_p7, %p8051_p6 }
  0xb4   :  { %p8054_p9 = pnand %p8053_p8, %p8047_p5 }
  0xb6   :  { %8057 = shalt.err (!%p8054_p9)
}
  0xb7   :  { %107 = dma.hbm_to_vmem [thread:$0]  %s8864_s6, 4096, %s102_s25, [#allocation12], %s8247_s2, %s8247_s2, %s8248_s21  }
  0xb8   :  { %s8058_s30 = scalar_lea.hbm %s8866_s8, 768 }
  0xb9   :  { %p8059_p10 = scmp.ne.s32.totalorder %s8866_s8, %s8058_s30  ;;  %p8062_p11 = scmp.lt.u32.totalorder %s8058_s30, %s8866_s8 }
  0xbb   :  { %p8064_p12 = pnand %p8062_p11, %p8059_p10 }
  0xbd   :  { %8067 = shalt.err (!%p8064_p12)
}
  0xbe   :  { %s8068_s0 = scalar_lea.vmem %s124_s5, 768  ;;  %p8073_p0 = scmp.lt.s32.totalorder %s124_s5, %s124_s5 }
  0xbf   :  { %p8069_p13 = scmp.ne.s32.totalorder %s124_s5, %s8068_s0  ;;  %p8074_p1 = scmp.lt.s32.totalorder %s8068_s0, %s8068_s0 }
  0xc1   :  { %p8075_p2 = por %p8074_p1, %p8073_p0 }
  0xc3   :  { %p8076_p3 = pnand %p8075_p2, %p8069_p13 }
  0xc5   :  { %8079 = shalt.err (!%p8076_p3)
}
  0xc6   :  { %129 = dma.hbm_to_vmem [thread:$0]  %s8866_s8, 768, %s124_s5, [#allocation15], %s8238_s18, %s8238_s18, %s8239_s20  }
  0xc7   :  { %s8251_s21 = smov [#allocation19]   ;;  %s8252_s26 = smov [#allocation22]  }
  0xc8   :  { %s148_s25 = sshll.u32 %s8251_s21, 4  ;;  %s170_s3 = sshll.u32 %s8252_s26, 4  ;;  %s149_s25 = int_to_ptr.vmem [resolvable:$true] %s148_s25  ;;  %s171_s3 = int_to_ptr.vmem [resolvable:$true] %s170_s3 }
  0xc9   :  { %s8080_s24 = scalar_lea.hbm %s8868_s10, 64 }
  0xca   :  { %p8081_p4 = scmp.ne.s32.totalorder %s8868_s10, %s8080_s24  ;;  %p8084_p5 = scmp.lt.u32.totalorder %s8080_s24, %s8868_s10 }
  0xcc   :  { %p8086_p6 = pnand %p8084_p5, %p8081_p4 }
  0xce   :  { %8089 = shalt.err (!%p8086_p6)
}
  0xcf   :  { %s8090_s8 = scalar_lea.vmem %s149_s25, 64  ;;  %p8095_p8 = scmp.lt.s32.totalorder %s149_s25, %s149_s25 }
  0xd0   :  { %p8091_p7 = scmp.ne.s32.totalorder %s149_s25, %s8090_s8  ;;  %p8096_p9 = scmp.lt.s32.totalorder %s8090_s8, %s8090_s8 }
  0xd2   :  { %p8097_p10 = por %p8096_p9, %p8095_p8 }
  0xd4   :  { %p8098_p11 = pnand %p8097_p10, %p8091_p7 }
  0xd6   :  { %8101 = shalt.err (!%p8098_p11)
}
  0xd7   :  { %151 = dma.hbm_to_vmem [thread:$0]  %s8868_s10, 64, %s149_s25, [#allocation18]  }
  0xd8   :  { %s8102_s22 = scalar_lea.hbm %s8870_s12, 112 }
  0xd9   :  { %p8103_p12 = scmp.ne.s32.totalorder %s8870_s12, %s8102_s22  ;;  %p8106_p13 = scmp.lt.u32.totalorder %s8102_s22, %s8870_s12 }
  0xdb   :  { %p8108_p0 = pnand %p8106_p13, %p8103_p12 }
  0xdd   :  { %8111 = shalt.err (!%p8108_p0)
}
  0xde   :  { %s8112_s19 = scalar_lea.vmem %s171_s3, 112  ;;  %s8116_s0 = scalar_lea.vmem %s171_s3, 128 }
  0xdf   :  { %p8113_p1 = scmp.ne.s32.totalorder %s171_s3, %s8112_s19  ;;  %p8117_p2 = scmp.lt.s32.totalorder %s171_s3, %s171_s3 }
  0xe0   :  { %p8118_p3 = scmp.lt.s32.totalorder %s8116_s0, %s8112_s19 }
  0xe2   :  { %p8119_p4 = por %p8118_p3, %p8117_p2 }
  0xe4   :  { %p8120_p5 = pnand %p8119_p4, %p8113_p1 }
  0xe6   :  { %8123 = shalt.err (!%p8120_p5)
}
  0xe7   :  { %173 = dma.hbm_to_vmem [thread:$0]  %s8870_s12, 112, %s171_s3, [#allocation21]  }
  0xe8   :  { %8212 = dma.done.wait [#allocation3], 448  }
  0xe9   :  { %8213 = vsyncadd [#allocation3], 4294966848 }
  0xea   :  { %8214 = dma.done.wait [#allocation6], 50304  }
  0xeb   :  { %8215 = vsyncadd [#allocation6], 4294916992 }
  0xec   :  { %8216 = dma.done.wait [#allocation9], 4224  }
  0xed   :  { %8217 = vsyncadd [#allocation9], 4294963072 }
  0xee   :  { %8218 = dma.done.wait [#allocation12], 4112  }
  0xef   :  { %8219 = vsyncadd [#allocation12], 4294963184 }
  0xf0   :  { %8220 = dma.done.wait [#allocation15], 784  }
  0xf1   :  { %8221 = vsyncadd [#allocation15], 4294966512 }
  0xf2   :  { %8222 = dma.done.wait [#allocation18], 576  }
  0xf3   :  { %8223 = vsyncadd [#allocation18], 4294966720 }
  0xf4   :  { %8224 = dma.done.wait [#allocation21], 28784  }
  0xf5   :  { %8225 = vsyncadd [#allocation21], 4294938512  ;;  %v226_v0 = vld [vmem:[#allocation7] sm:$0xff]  ;;  %v227_v2 = vld [vmem:[#allocation7 + $0x8] sm:$0xff]  ;;  %vm2644_vm0 = vcmask 130048   ;;  %vm4057_vm1 = vcmask 1044480  }
  0xf6   :  { %v230_v1 = vld [vmem:[#allocation7 + $0x20] sm:$0xff]  ;;  %v231_v4 = vld [vmem:[#allocation7 + $0x28] sm:$0xff]  ;;  %vm4006_vm3 = vcmask 80896   ;;  %vm4186_vm4 = vcmask 1041408   ;;  %vm6353_vm5 = vcmask 326656   ;;  %vm4182_vm6 = vcmask 162816  }
  0xf7   :  { %v6427_v3 = vcombine.high %v226_v0, %v230_v1  ;;  %v6426_v5 = vcombine.low %v226_v0, %v230_v1  ;;  %v234_v6 = vld [vmem:[#allocation7 + $0x40] sm:$0xff]  ;;  %v6429_v8 = vcombine.high %v227_v2, %v231_v4  ;;  %v6428_v9 = vcombine.low %v227_v2, %v231_v4  ;;  %v235_v11 = vld [vmem:[#allocation7 + $0x48] sm:$0xff]  ;;  %s8255_s12 = smov 20   ;;  %s8256_s2 = smov 108  }
  0xf8   :  { %v238_v7 = vld [vmem:[#allocation7 + $0x60] sm:$0xff]  ;;  %v239_v12 = vld [vmem:[#allocation7 + $0x68] sm:$0xff]  ;;  %s8257_s21 = smov [#allocation24]   ;;  %s8258_s26 = smov [#allocation23]  }
  0xf9   :  { %v6435_v10 = vcombine.high %v234_v6, %v238_v7  ;;  %v242_v13 = vld [vmem:[#allocation7 + $0x80] sm:$0xff]  ;;  %2648 = vmatprep.subr.bf16.mxu0 %v6427_v3  ;;  %v6437_v14 = vcombine.high %v235_v11, %v239_v12  ;;  %v243_v16 = vld [vmem:[#allocation7 + $0x88] sm:$0xff]  ;;  %2812 = vmatprep.subr.bf16.mxu1 %v6429_v8  ;;  %v6434_v18 = vcombine.low %v234_v6, %v238_v7  ;;  %s6373_s25 = sshll.u32 %s8257_s21, 4  ;;  %s6363_s3 = sshll.u32 %s8258_s26, 4  ;;  %s6374_s25 = int_to_ptr.vmem [resolvable:$true] %s6373_s25  ;;  %s6364_s3 = int_to_ptr.vmem [resolvable:$true] %s6363_s3 }
  0xfa   :  { %v246_v15 = vld [vmem:[#allocation7 + $0xa0] sm:$0xff]  ;;  %v247_v17 = vld [vmem:[#allocation7 + $0xa8] sm:$0xff]  ;;  %2649 = vmatpush1.bf16.msra.mxu0 %v6426_v5  ;;  %2813 = vmatpush1.bf16.msra.mxu1 %v6428_v9  ;;  %v6436_v19 = vcombine.low %v235_v11, %v239_v12  ;;  %s8124_s29 = scalar_lea.vmem %s6374_s25, 128  ;;  %p8129_p7 = scmp.lt.s32.totalorder %s6374_s25, %s6374_s25 }
  0xfb   :  { %2650 = vmatprep.subr.bf16.mxu0 %v6435_v10  ;;  %v6443_v20 = vcombine.high %v242_v13, %v246_v15  ;;  %2814 = vmatprep.subr.bf16.mxu1 %v6437_v14  ;;  %v6445_v21 = vcombine.high %v243_v16, %v247_v17  ;;  %v250_v22 = vld [vmem:[#allocation7 + $0xc0] sm:$0xff]  ;;  %v251_v24 = vld [vmem:[#allocation7 + $0xc8] sm:$0xff]  ;;  %v6442_v26 = vcombine.low %v242_v13, %v246_v15  ;;  %p8125_p6 = scmp.ne.s32.totalorder %s6374_s25, %s8124_s29  ;;  %p8130_p8 = scmp.lt.s32.totalorder %s8124_s29, %s8124_s29 }
  0xfc   :  { %v254_v23 = vld [vmem:[#allocation7 + $0xe0] sm:$0xff]  ;;  %v255_v25 = vld [vmem:[#allocation7 + $0xe8] sm:$0xff]  ;;  %v6444_v27 = vcombine.low %v243_v16, %v247_v17 }
  0xfd   :  { %v6451_v28 = vcombine.high %v250_v22, %v254_v23  ;;  %v6453_v29 = vcombine.high %v251_v24, %v255_v25  ;;  %v258_v30 = vld [vmem:[#allocation7 + $0x100] sm:$0xff]  ;;  %v259_v32 = vld [vmem:[#allocation7 + $0x108] sm:$0xff]  ;;  %v6450_v34 = vcombine.low %v250_v22, %v254_v23  ;;  %v6452_v35 = vcombine.low %v251_v24, %v255_v25  ;;  %p8131_p9 = por %p8130_p8, %p8129_p7 }
  0xfe   :  { %2651 = vmatpush1.bf16.msra.mxu0 %v6434_v18  ;;  %2815 = vmatpush1.bf16.msra.mxu1 %v6436_v19  ;;  %v262_v31 = vld [vmem:[#allocation7 + $0x120] sm:$0xff]  ;;  %v263_v33 = vld [vmem:[#allocation7 + $0x128] sm:$0xff] }
  0xff   :  { %2652 = vmatprep.subr.bf16.mxu0 %v6443_v20  ;;  %2816 = vmatprep.subr.bf16.mxu1 %v6445_v21  ;;  %v6459_v36 = vcombine.high %v258_v30, %v262_v31  ;;  %v6461_v37 = vcombine.high %v259_v32, %v263_v33  ;;  %v266_v38 = vld [vmem:[#allocation7 + $0x140] sm:$0xff]  ;;  %v267_v40 = vld [vmem:[#allocation7 + $0x148] sm:$0xff]  ;;  %v6458_v42 = vcombine.low %v258_v30, %v262_v31  ;;  %p8132_p10 = pnand %p8131_p9, %p8125_p6 }
 0x100   :  { %v270_v39 = vld [vmem:[#allocation7 + $0x160] sm:$0xff]  ;;  %v271_v41 = vld [vmem:[#allocation7 + $0x168] sm:$0xff]  ;;  %v6460_v43 = vcombine.low %v259_v32, %v263_v33 }
 0x101   :  { %v6467_v44 = vcombine.high %v266_v38, %v270_v39  ;;  %v6469_v45 = vcombine.high %v267_v40, %v271_v41  ;;  %v274_v46 = vld [vmem:[#allocation7 + $0x180] sm:$0xff]  ;;  %v275_v48 = vld [vmem:[#allocation7 + $0x188] sm:$0xff]  ;;  %v6466_v50 = vcombine.low %v266_v38, %v270_v39  ;;  %v6468_v51 = vcombine.low %v267_v40, %v271_v41 }
 0x102   :  { %2653 = vmatpush1.bf16.msra.mxu0 %v6442_v26  ;;  %2817 = vmatpush1.bf16.msra.mxu1 %v6444_v27  ;;  %v278_v47 = vld [vmem:[#allocation7 + $0x1a0] sm:$0xff]  ;;  %v279_v49 = vld [vmem:[#allocation7 + $0x1a8] sm:$0xff] }
 0x103   :  { %2654 = vmatprep.subr.bf16.mxu0 %v6451_v28  ;;  %2818 = vmatprep.subr.bf16.mxu1 %v6453_v29  ;;  %v6475_v52 = vcombine.high %v274_v46, %v278_v47  ;;  %v8522_v53 = vld [vmem:[#allocation2] sm:$0xff]  ;;  %v6477_v54 = vcombine.high %v275_v48, %v279_v49  ;;  %v283_v57 = vld [vmem:[#allocation7 + $0x1c8] sm:$0xff]  ;;  %v6474_v60 = vcombine.low %v274_v46, %v278_v47 }
 0x104   :  { %v282_v55 = vld [vmem:[#allocation7 + $0x1c0] sm:$0xff]  ;;  %v287_v58 = vld [vmem:[#allocation7 + $0x1e8] sm:$0xff]  ;;  %v8526_v59 = vcombine.high %v8522_v53, %v8522_v53  ;;  %v6476_v61 = vcombine.low %v275_v48, %v279_v49 }
 0x105   :  { %v286_v56 = vld [vmem:[#allocation7 + $0x1e0] sm:$0xff]  ;;  %v6485_v63 = vcombine.high %v283_v57, %v287_v58  ;;  %v291_v2 = vld [vmem:[#allocation7 + $0x208] sm:$0xff]  ;;  %v6484_v5 = vcombine.low %v283_v57, %v287_v58 }
 0x106   :  { %2655 = vmatpush1.bf16.msra.mxu0 %v6450_v34  ;;  %2819 = vmatpush1.bf16.msra.mxu1 %v6452_v35  ;;  %v6483_v62 = vcombine.high %v282_v55, %v286_v56  ;;  %v290_v0 = vld [vmem:[#allocation7 + $0x200] sm:$0xff]  ;;  %v295_v3 = vld [vmem:[#allocation7 + $0x228] sm:$0xff]  ;;  %v6482_v4 = vcombine.low %v282_v55, %v286_v56 }
 0x107   :  { %2656 = vmatprep.subr.bf16.mxu0 %v6459_v36  ;;  %2820 = vmatprep.subr.bf16.mxu1 %v6461_v37  ;;  %v294_v1 = vld [vmem:[#allocation7 + $0x220] sm:$0xff]  ;;  %v6493_v7 = vcombine.high %v291_v2, %v295_v3  ;;  %v299_v10 = vld [vmem:[#allocation7 + $0x248] sm:$0xff]  ;;  %v6492_v13 = vcombine.low %v291_v2, %v295_v3 }
 0x108   :  { %2680 = vmatprep.mubr.bf16.mxu0 %v8526_v59  ;;  %2844 = vmatprep.mubr.bf16.mxu1 %v8526_v59  ;;  %v6491_v6 = vcombine.high %v290_v0, %v294_v1  ;;  %v298_v8 = vld [vmem:[#allocation7 + $0x240] sm:$0xff]  ;;  %v303_v11 = vld [vmem:[#allocation7 + $0x268] sm:$0xff]  ;;  %v6490_v12 = vcombine.low %v290_v0, %v294_v1 }
 0x109   :  { %v302_v9 = vld [vmem:[#allocation7 + $0x260] sm:$0xff]  ;;  %v6501_v15 = vcombine.high %v299_v10, %v303_v11  ;;  %v307_v18 = vld [vmem:[#allocation7 + $0x288] sm:$0xff]  ;;  %v6500_v21 = vcombine.low %v299_v10, %v303_v11 }
 0x10a   :  { %2657 = vmatpush1.bf16.msra.mxu0 %v6458_v42  ;;  %2821 = vmatpush1.bf16.msra.mxu1 %v6460_v43  ;;  %v6499_v14 = vcombine.high %v298_v8, %v302_v9  ;;  %v306_v16 = vld [vmem:[#allocation7 + $0x280] sm:$0xff]  ;;  %v311_v19 = vld [vmem:[#allocation7 + $0x2a8] sm:$0xff]  ;;  %v6498_v20 = vcombine.low %v298_v8, %v302_v9 }
 0x10b   :  { %2658 = vmatprep.subr.bf16.mxu0 %v6467_v44  ;;  %2822 = vmatprep.subr.bf16.mxu1 %v6469_v45  ;;  %v310_v17 = vld [vmem:[#allocation7 + $0x2a0] sm:$0xff]  ;;  %v6509_v23 = vcombine.high %v307_v18, %v311_v19  ;;  %v315_v26 = vld [vmem:[#allocation7 + $0x2c8] sm:$0xff]  ;;  %v6508_v29 = vcombine.low %v307_v18, %v311_v19 }
 0x10c   :  { %v6507_v22 = vcombine.high %v306_v16, %v310_v17  ;;  %v314_v24 = vld [vmem:[#allocation7 + $0x2c0] sm:$0xff]  ;;  %v319_v27 = vld [vmem:[#allocation7 + $0x2e8] sm:$0xff]  ;;  %v6506_v28 = vcombine.low %v306_v16, %v310_v17 }
 0x10d   :  { %v318_v25 = vld [vmem:[#allocation7 + $0x2e0] sm:$0xff]  ;;  %v6517_v31 = vcombine.high %v315_v26, %v319_v27  ;;  %v323_v34 = vld [vmem:[#allocation7 + $0x308] sm:$0xff]  ;;  %v6516_v37 = vcombine.low %v315_v26, %v319_v27 }
 0x10e   :  { %2659 = vmatpush1.bf16.msra.mxu0 %v6466_v50  ;;  %2823 = vmatpush1.bf16.msra.mxu1 %v6468_v51  ;;  %v6515_v30 = vcombine.high %v314_v24, %v318_v25  ;;  %v322_v32 = vld [vmem:[#allocation7 + $0x300] sm:$0xff]  ;;  %v327_v35 = vld [vmem:[#allocation7 + $0x328] sm:$0xff]  ;;  %v6514_v36 = vcombine.low %v314_v24, %v318_v25 }
 0x10f   :  { %2660 = vmatprep.subr.bf16.mxu0 %v6475_v52  ;;  %2824 = vmatprep.subr.bf16.mxu1 %v6477_v54  ;;  %v326_v33 = vld [vmem:[#allocation7 + $0x320] sm:$0xff]  ;;  %v6525_v39 = vcombine.high %v323_v34, %v327_v35  ;;  %v331_v42 = vld [vmem:[#allocation7 + $0x348] sm:$0xff]  ;;  %v6524_v45 = vcombine.low %v323_v34, %v327_v35 }
 0x110   :  { %v6523_v38 = vcombine.high %v322_v32, %v326_v33  ;;  %v330_v40 = vld [vmem:[#allocation7 + $0x340] sm:$0xff]  ;;  %v335_v43 = vld [vmem:[#allocation7 + $0x368] sm:$0xff]  ;;  %v6522_v44 = vcombine.low %v322_v32, %v326_v33  ;;  %v8253_v32 = vmov 0  }
 0x111   :  { %v334_v41 = vld [vmem:[#allocation7 + $0x360] sm:$0xff]  ;;  %v6533_v47 = vcombine.high %v331_v42, %v335_v43  ;;  %v339_v50 = vld [vmem:[#allocation7 + $0x388] sm:$0xff]  ;;  %v6532_v54 = vcombine.low %v331_v42, %v335_v43  ;;  %7374 = vset.pattern.permute.xlu0 %v8253_v32 }
 0x112   :  { %2661 = vmatpush1.bf16.msra.mxu0 %v6474_v60  ;;  %2825 = vmatpush1.bf16.msra.mxu1 %v6476_v61  ;;  %v6531_v46 = vcombine.high %v330_v40, %v334_v41  ;;  %v338_v48 = vld [vmem:[#allocation7 + $0x380] sm:$0xff]  ;;  %v343_v51 = vld [vmem:[#allocation7 + $0x3a8] sm:$0xff]  ;;  %v6530_v52 = vcombine.low %v330_v40, %v334_v41 }
 0x113   :  { %2662 = vmatprep.subr.bf16.mxu0 %v6483_v62  ;;  %2826 = vmatprep.subr.bf16.mxu1 %v6485_v63  ;;  %v342_v49 = vld [vmem:[#allocation7 + $0x3a0] sm:$0xff]  ;;  %v6541_v56 = vcombine.high %v339_v50, %v343_v51  ;;  %v347_v60 = vld [vmem:[#allocation7 + $0x3c8] sm:$0xff]  ;;  %v6540_v63 = vcombine.low %v339_v50, %v343_v51 }
 0x114   :  { %v6539_v55 = vcombine.high %v338_v48, %v342_v49  ;;  %v346_v57 = vld [vmem:[#allocation7 + $0x3c0] sm:$0xff]  ;;  %v351_v61 = vld [vmem:[#allocation7 + $0x3e8] sm:$0xff]  ;;  %v6538_v62 = vcombine.low %v338_v48, %v342_v49 }
 0x115   :  { %v350_v58 = vld [vmem:[#allocation7 + $0x3e0] sm:$0xff]  ;;  %v6549_v1 = vcombine.high %v347_v60, %v351_v61 }
 0x116   :  { %2663 = vmatpush1.bf16.msra.mxu0 %v6482_v4  ;;  %2827 = vmatpush1.bf16.msra.mxu1 %v6484_v5  ;;  %v6547_v0 = vcombine.high %v346_v57, %v350_v58  ;;  %v354_v2 = vld [vmem:[#allocation7 + $0x400] sm:$0xff]  ;;  %v355_v4 = vld [vmem:[#allocation7 + $0x408] sm:$0xff] }
 0x117   :  { %2664 = vmatprep.subr.bf16.mxu0 %v6491_v6  ;;  %2828 = vmatprep.subr.bf16.mxu1 %v6493_v7  ;;  %v358_v3 = vld [vmem:[#allocation7 + $0x420] sm:$0xff]  ;;  %v359_v5 = vld [vmem:[#allocation7 + $0x428] sm:$0xff]  ;;  %v6546_v6 = vcombine.low %v346_v57, %v350_v58  ;;  %v6548_v7 = vcombine.low %v347_v60, %v351_v61 }
 0x118   :  { %v6555_v8 = vcombine.high %v354_v2, %v358_v3  ;;  %v6557_v9 = vcombine.high %v355_v4, %v359_v5  ;;  %v362_v10 = vld [vmem:[#allocation7 + $0x440] sm:$0xff]  ;;  %v6554_v16 = vcombine.low %v354_v2, %v358_v3  ;;  %v6556_v19 = vcombine.low %v355_v4, %v359_v5  ;;  %v407_v57 = vld [vmem:[#allocation7 + $0x5a8] sm:$0xff] }
 0x119   :  { %v366_v11 = vld [vmem:[#allocation7 + $0x460] sm:$0xff]  ;;  %v415_v2 = vld [vmem:[#allocation7 + $0x5e8] sm:$0xff] }
 0x11a   :  { %2665 = vmatpush1.bf16.msra.mxu0 %v6490_v12  ;;  %2829 = vmatpush1.bf16.msra.mxu1 %v6492_v13  ;;  %v8532_v12 = vcombine.low %v8522_v53, %v8522_v53  ;;  %v363_v13 = vld [vmem:[#allocation7 + $0x448] sm:$0xff]  ;;  %v370_v17 = vld [vmem:[#allocation7 + $0x480] sm:$0xff]  ;;  %v6562_v24 = vcombine.low %v362_v10, %v366_v11 }
 0x11b   :  { %2666 = vmatprep.subr.bf16.mxu0 %v6499_v14  ;;  %2830 = vmatprep.subr.bf16.mxu1 %v6501_v15  ;;  %v367_v14 = vld [vmem:[#allocation7 + $0x468] sm:$0xff]  ;;  %v374_v18 = vld [vmem:[#allocation7 + $0x4a0] sm:$0xff] }
 0x11c   :  { %v8534_v15 = vld [vmem:[#allocation2 + $0x8] sm:$0xff]  ;;  %v6564_v25 = vcombine.low %v363_v13, %v367_v14  ;;  %v6571_v26 = vcombine.high %v370_v17, %v374_v18  ;;  %v6570_v33 = vcombine.low %v370_v17, %v374_v18 }
 0x11d   :  { %v371_v53 = vld [vmem:[#allocation7 + $0x488] sm:$0xff]  ;;  %v386_v34 = vld [vmem:[#allocation7 + $0x500] sm:$0xff] }
 0x11e   :  { %2667 = vmatpush1.bf16.msra.mxu0 %v6498_v20  ;;  %2831 = vmatpush1.bf16.msra.mxu1 %v6500_v21  ;;  %v6563_v20 = vcombine.high %v362_v10, %v366_v11  ;;  %v6565_v21 = vcombine.high %v363_v13, %v367_v14  ;;  %v390_v35 = vld [vmem:[#allocation7 + $0x520] sm:$0xff]  ;;  %v423_v10 = vld [vmem:[#allocation7 + $0x628] sm:$0xff] }
 0x11f   :  { %2668 = vmatprep.subr.bf16.mxu0 %v6507_v22  ;;  %2832 = vmatprep.subr.bf16.mxu1 %v6509_v23  ;;  %v8538_v22 = vcombine.high %v8534_v15, %v8534_v15  ;;  %v375_v23 = vld [vmem:[#allocation7 + $0x4a8] sm:$0xff]  ;;  %v394_v42 = vld [vmem:[#allocation7 + $0x540] sm:$0xff]  ;;  %v6586_v49 = vcombine.low %v386_v34, %v390_v35 }
 0x120   :  { %v6573_v27 = vcombine.high %v371_v53, %v375_v23  ;;  %v398_v43 = vld [vmem:[#allocation7 + $0x560] sm:$0xff]  ;;  %v427_v18 = vld [vmem:[#allocation7 + $0x648] sm:$0xff] }
 0x121   :  { %v6595_v51 = vcombine.high %v394_v42, %v398_v43  ;;  %v6594_v58 = vcombine.low %v394_v42, %v398_v43  ;;  %v430_v17 = vld [vmem:[#allocation7 + $0x660] sm:$0xff]  ;;  %v451_v43 = vld [vmem:[#allocation7 + $0x708] sm:$0xff] }
 0x122   :  { %2669 = vmatpush1.bf16.msra.mxu0 %v6506_v28  ;;  %2833 = vmatpush1.bf16.msra.mxu1 %v6508_v29  ;;  %v378_v28 = vld [vmem:[#allocation7 + $0x4c0] sm:$0xff] }
 0x123   :  { %2670 = vmatprep.subr.bf16.mxu0 %v6515_v30  ;;  %2834 = vmatprep.subr.bf16.mxu1 %v6517_v31  ;;  %v382_v29 = vld [vmem:[#allocation7 + $0x4e0] sm:$0xff]  ;;  %v379_v30 = vld [vmem:[#allocation7 + $0x4c8] sm:$0xff] }
 0x124   :  { %v383_v31 = vld [vmem:[#allocation7 + $0x4e8] sm:$0xff]  ;;  %v6578_v41 = vcombine.low %v378_v28, %v382_v29  ;;  %v454_v42 = vld [vmem:[#allocation7 + $0x720] sm:$0xff] }
 0x125   :  { %v6581_v40 = vcombine.high %v379_v30, %v383_v31 }
 0x126   :  { %2671 = vmatpush1.bf16.msra.mxu0 %v6514_v36  ;;  %2835 = vmatpush1.bf16.msra.mxu1 %v6516_v37  ;;  %v6572_v36 = vcombine.low %v371_v53, %v375_v23  ;;  %v6579_v37 = vcombine.high %v378_v28, %v382_v29  ;;  %v439_v28 = vld [vmem:[#allocation7 + $0x6a8] sm:$0xff] }
 0x127   :  { %2672 = vmatprep.subr.bf16.mxu0 %v6523_v38  ;;  %2836 = vmatprep.subr.bf16.mxu1 %v6525_v39  ;;  %v387_v38 = vld [vmem:[#allocation7 + $0x508] sm:$0xff] }
 0x128   :  { %v391_v39 = vld [vmem:[#allocation7 + $0x528] sm:$0xff] }
 0x129   :  { %v6589_v48 = vcombine.high %v387_v38, %v391_v39  ;;  %v6588_v50 = vcombine.low %v387_v38, %v391_v39 }
 0x12a   :  { %2673 = vmatpush1.bf16.msra.mxu0 %v6522_v44  ;;  %2837 = vmatpush1.bf16.msra.mxu1 %v6524_v45  ;;  %v6580_v44 = vcombine.low %v379_v30, %v383_v31  ;;  %v6587_v45 = vcombine.high %v386_v34, %v390_v35  ;;  %v446_v34 = vld [vmem:[#allocation7 + $0x6e0] sm:$0xff]  ;;  %v443_v35 = vld [vmem:[#allocation7 + $0x6c8] sm:$0xff] }
 0x12b   :  { %2674 = vmatprep.subr.bf16.mxu0 %v6531_v46  ;;  %2838 = vmatprep.subr.bf16.mxu1 %v6533_v47  ;;  %v395_v46 = vld [vmem:[#allocation7 + $0x548] sm:$0xff] }
 0x12c   :  { %v399_v47 = vld [vmem:[#allocation7 + $0x568] sm:$0xff] }
 0x12d   :  { %v6596_v60 = vcombine.low %v395_v46, %v399_v47 }
 0x12e   :  { %2675 = vmatpush1.bf16.msra.mxu0 %v6530_v52  ;;  %2839 = vmatpush1.bf16.msra.mxu1 %v6532_v54  ;;  %v402_v52 = vld [vmem:[#allocation7 + $0x580] sm:$0xff] }
 0x12f   :  { %2676 = vmatprep.subr.bf16.mxu0 %v6539_v55  ;;  %2840 = vmatprep.subr.bf16.mxu1 %v6541_v56  ;;  %v406_v54 = vld [vmem:[#allocation7 + $0x5a0] sm:$0xff]  ;;  %v403_v55 = vld [vmem:[#allocation7 + $0x588] sm:$0xff]  ;;  %v6597_v56 = vcombine.high %v395_v46, %v399_v47 }
 0x130   :  { %v6603_v61 = vcombine.high %v402_v52, %v406_v54  ;;  %v6602_v3 = vcombine.low %v402_v52, %v406_v54  ;;  %v6604_v4 = vcombine.low %v403_v55, %v407_v57  ;;  %v463_v54 = vld [vmem:[#allocation7 + $0x768] sm:$0xff] }
 0x132   :  { %2677 = vmatpush1.bf16.msra.mxu0 %v6538_v62  ;;  %2841 = vmatpush1.bf16.msra.mxu1 %v6540_v63  ;;  %v410_v62 = vld [vmem:[#allocation7 + $0x5c0] sm:$0xff] }
 0x133   :  { %2678 = vmatprep.subr.bf16.mxu0 %v6547_v0  ;;  %2842 = vmatprep.subr.bf16.mxu1 %v6549_v1  ;;  %v414_v63 = vld [vmem:[#allocation7 + $0x5e0] sm:$0xff]  ;;  %v411_v0 = vld [vmem:[#allocation7 + $0x5c8] sm:$0xff]  ;;  %v6605_v1 = vcombine.high %v403_v55, %v407_v57 }
 0x134   :  { %v6611_v5 = vcombine.high %v410_v62, %v414_v63  ;;  %v6610_v11 = vcombine.low %v410_v62, %v414_v63  ;;  %v6612_v13 = vcombine.low %v411_v0, %v415_v2  ;;  %v471_v63 = vld [vmem:[#allocation7 + $0x7a8] sm:$0xff] }
 0x136   :  { %2679 = vmatpush1.bf16.msra.mxu0 %v6546_v6  ;;  %2843 = vmatpush1.bf16.msra.mxu1 %v6548_v7  ;;  %v418_v6 = vld [vmem:[#allocation7 + $0x600] sm:$0xff] }
 0x137   :  { %2689 = vmatprep.subr.bf16.mxu0 %v6555_v8  ;;  %2853 = vmatprep.subr.bf16.mxu1 %v6557_v9  ;;  %v422_v7 = vld [vmem:[#allocation7 + $0x620] sm:$0xff]  ;;  %v419_v8 = vld [vmem:[#allocation7 + $0x608] sm:$0xff]  ;;  %v6613_v9 = vcombine.high %v411_v0, %v415_v2 }
 0x138   :  { %v6619_v14 = vcombine.high %v418_v6, %v422_v7  ;;  %v6620_v53 = vcombine.low %v419_v8, %v423_v10 }
 0x139   :  { %2681 = vmatmul.mubr.bf16.vlgmr.msra.gmra.mrb[0].mxu0 %v8532_v12  ;;  %2845 = vmatmul.mubr.bf16.vlgmr.msra.gmra.mrb[0].mxu1 %v8532_v12 }
 0x13a   :  { %2690 = vmatpush1.bf16.msra.mxu0 %v6554_v16  ;;  %2854 = vmatpush1.bf16.msra.mxu1 %v6556_v19  ;;  %v426_v16 = vld [vmem:[#allocation7 + $0x640] sm:$0xff]  ;;  %v6621_v19 = vcombine.high %v419_v8, %v423_v10 }
 0x13b   :  { %2691 = vmatprep.subr.bf16.mxu0 %v6563_v20  ;;  %2855 = vmatprep.subr.bf16.mxu1 %v6565_v21  ;;  %v431_v20 = vld [vmem:[#allocation7 + $0x668] sm:$0xff]  ;;  %v6618_v21 = vcombine.low %v418_v6, %v422_v7  ;;  %v6627_v23 = vcombine.high %v426_v16, %v430_v17  ;;  %v6626_v29 = vcombine.low %v426_v16, %v430_v17 }
 0x13c   :  { %2721 = vmatprep.mubr.bf16.mxu0 %v8538_v22  ;;  %2885 = vmatprep.mubr.bf16.mxu1 %v8538_v22  ;;  %v6628_v30 = vcombine.low %v427_v18, %v431_v20  ;;  %v479_v7 = vld [vmem:[#allocation7 + $0x7e8] sm:$0xff] }
 0x13d   :  { %v487_v17 = vld [vmem:[#allocation7 + $0x828] sm:$0xff] }
 0x13e   :  { %2692 = vmatpush1.bf16.msra.mxu0 %v6562_v24  ;;  %2856 = vmatpush1.bf16.msra.mxu1 %v6564_v25  ;;  %v434_v24 = vld [vmem:[#allocation7 + $0x680] sm:$0xff] }
 0x13f   :  { %2693 = vmatprep.subr.bf16.mxu0 %v6571_v26  ;;  %2857 = vmatprep.subr.bf16.mxu1 %v6573_v27  ;;  %v438_v25 = vld [vmem:[#allocation7 + $0x6a0] sm:$0xff]  ;;  %v435_v26 = vld [vmem:[#allocation7 + $0x688] sm:$0xff]  ;;  %v6629_v27 = vcombine.high %v427_v18, %v431_v20 }
 0x140   :  { %v6635_v31 = vcombine.high %v434_v24, %v438_v25  ;;  %v6634_v38 = vcombine.low %v434_v24, %v438_v25  ;;  %v6636_v39 = vcombine.low %v435_v26, %v439_v28  ;;  %v495_v24 = vld [vmem:[#allocation7 + $0x868] sm:$0xff] }
 0x142   :  { %2694 = vmatpush1.bf16.msra.mxu0 %v6570_v33  ;;  %2858 = vmatpush1.bf16.msra.mxu1 %v6572_v36  ;;  %v442_v33 = vld [vmem:[#allocation7 + $0x6c0] sm:$0xff]  ;;  %v6637_v36 = vcombine.high %v435_v26, %v439_v28  ;;  %v8545_v26 = vld [vmem:[#allocation2 + $0x10] sm:$0xff] }
 0x143   :  { %2695 = vmatprep.subr.bf16.mxu0 %v6579_v37  ;;  %2859 = vmatprep.subr.bf16.mxu1 %v6581_v40  ;;  %v447_v37 = vld [vmem:[#allocation7 + $0x6e8] sm:$0xff]  ;;  %v6643_v40 = vcombine.high %v442_v33, %v446_v34  ;;  %v6642_v46 = vcombine.low %v442_v33, %v446_v34  ;;  %v502_v33 = vld [vmem:[#allocation7 + $0x8a0] sm:$0xff] }
 0x144   :  { %v6644_v47 = vcombine.low %v443_v35, %v447_v37  ;;  %v499_v34 = vld [vmem:[#allocation7 + $0x888] sm:$0xff] }
 0x146   :  { %2696 = vmatpush1.bf16.msra.mxu0 %v6578_v41  ;;  %2860 = vmatpush1.bf16.msra.mxu1 %v6580_v44  ;;  %v450_v41 = vld [vmem:[#allocation7 + $0x700] sm:$0xff]  ;;  %v6645_v44 = vcombine.high %v443_v35, %v447_v37  ;;  %v8553_v37 = vcombine.high %v8545_v26, %v8545_v26 }
 0x147   :  { %2697 = vmatprep.subr.bf16.mxu0 %v6587_v45  ;;  %2861 = vmatprep.subr.bf16.mxu1 %v6589_v48  ;;  %v455_v45 = vld [vmem:[#allocation7 + $0x728] sm:$0xff]  ;;  %v6651_v48 = vcombine.high %v450_v41, %v454_v42  ;;  %v6650_v55 = vcombine.low %v450_v41, %v454_v42  ;;  %v510_v41 = vld [vmem:[#allocation7 + $0x8e0] sm:$0xff] }
 0x148   :  { %v6653_v52 = vcombine.high %v451_v43, %v455_v45  ;;  %v507_v42 = vld [vmem:[#allocation7 + $0x8c8] sm:$0xff] }
 0x14a   :  { %2698 = vmatpush1.bf16.msra.mxu0 %v6586_v49  ;;  %2862 = vmatpush1.bf16.msra.mxu1 %v6588_v50  ;;  %v458_v49 = vld [vmem:[#allocation7 + $0x740] sm:$0xff] }
 0x14b   :  { %2699 = vmatprep.subr.bf16.mxu0 %v6595_v51  ;;  %2863 = vmatprep.subr.bf16.mxu1 %v6597_v56  ;;  %v462_v50 = vld [vmem:[#allocation7 + $0x760] sm:$0xff]  ;;  %v459_v51 = vld [vmem:[#allocation7 + $0x748] sm:$0xff]  ;;  %v6652_v56 = vcombine.low %v451_v43, %v455_v45 }
 0x14c   :  { %v6659_v57 = vcombine.high %v458_v49, %v462_v50  ;;  %v6661_v62 = vcombine.high %v459_v51, %v463_v54  ;;  %v6658_v0 = vcombine.low %v458_v49, %v462_v50  ;;  %v518_v49 = vld [vmem:[#allocation7 + $0x920] sm:$0xff]  ;;  %v515_v50 = vld [vmem:[#allocation7 + $0x908] sm:$0xff] }
 0x14e   :  { %2700 = vmatpush1.bf16.msra.mxu0 %v6594_v58  ;;  %2864 = vmatpush1.bf16.msra.mxu1 %v6596_v60  ;;  %v466_v58 = vld [vmem:[#allocation7 + $0x780] sm:$0xff] }
 0x14f   :  { %2701 = vmatprep.subr.bf16.mxu0 %v6603_v61  ;;  %2865 = vmatprep.subr.bf16.mxu1 %v6605_v1  ;;  %v470_v60 = vld [vmem:[#allocation7 + $0x7a0] sm:$0xff]  ;;  %v467_v61 = vld [vmem:[#allocation7 + $0x788] sm:$0xff]  ;;  %v6660_v1 = vcombine.low %v459_v51, %v463_v54 }
 0x150   :  { %v6667_v2 = vcombine.high %v466_v58, %v470_v60  ;;  %v6669_v6 = vcombine.high %v467_v61, %v471_v63  ;;  %v6666_v8 = vcombine.low %v466_v58, %v470_v60  ;;  %v526_v58 = vld [vmem:[#allocation7 + $0x960] sm:$0xff]  ;;  %v523_v60 = vld [vmem:[#allocation7 + $0x948] sm:$0xff] }
 0x152   :  { %2702 = vmatpush1.bf16.msra.mxu0 %v6602_v3  ;;  %2866 = vmatpush1.bf16.msra.mxu1 %v6604_v4  ;;  %v474_v3 = vld [vmem:[#allocation7 + $0x7c0] sm:$0xff] }
 0x153   :  { %2703 = vmatprep.subr.bf16.mxu0 %v6611_v5  ;;  %2867 = vmatprep.subr.bf16.mxu1 %v6613_v9  ;;  %v478_v4 = vld [vmem:[#allocation7 + $0x7e0] sm:$0xff]  ;;  %v475_v5 = vld [vmem:[#allocation7 + $0x7c8] sm:$0xff]  ;;  %v6668_v9 = vcombine.low %v467_v61, %v471_v63 }
 0x154   :  { %v6675_v10 = vcombine.high %v474_v3, %v478_v4  ;;  %v6677_v16 = vcombine.high %v475_v5, %v479_v7  ;;  %v6674_v18 = vcombine.low %v474_v3, %v478_v4  ;;  %v6676_v20 = vcombine.low %v475_v5, %v479_v7  ;;  %v534_v3 = vld [vmem:[#allocation7 + $0x9a0] sm:$0xff]  ;;  %v531_v4 = vld [vmem:[#allocation7 + $0x988] sm:$0xff] }
 0x156   :  { %2704 = vmatpush1.bf16.msra.mxu0 %v6610_v11  ;;  %2868 = vmatpush1.bf16.msra.mxu1 %v6612_v13  ;;  %v482_v11 = vld [vmem:[#allocation7 + $0x800] sm:$0xff] }
 0x157   :  { %2705 = vmatprep.subr.bf16.mxu0 %v6619_v14  ;;  %2869 = vmatprep.subr.bf16.mxu1 %v6621_v19  ;;  %v486_v13 = vld [vmem:[#allocation7 + $0x820] sm:$0xff]  ;;  %v483_v14 = vld [vmem:[#allocation7 + $0x808] sm:$0xff] }
 0x158   :  { %v490_v19 = vld [vmem:[#allocation7 + $0x840] sm:$0xff]  ;;  %v6685_v25 = vcombine.high %v483_v14, %v487_v17  ;;  %v6682_v28 = vcombine.low %v482_v11, %v486_v13 }
 0x15a   :  { %2706 = vmatpush1.bf16.msra.mxu0 %v6618_v21  ;;  %2870 = vmatpush1.bf16.msra.mxu1 %v6620_v53  ;;  %v6683_v21 = vcombine.high %v482_v11, %v486_v13  ;;  %v494_v53 = vld [vmem:[#allocation7 + $0x860] sm:$0xff]  ;;  %v539_v13 = vld [vmem:[#allocation7 + $0x9c8] sm:$0xff] }
 0x15b   :  { %2707 = vmatprep.subr.bf16.mxu0 %v6627_v23  ;;  %2871 = vmatprep.subr.bf16.mxu1 %v6629_v27  ;;  %v491_v23 = vld [vmem:[#allocation7 + $0x848] sm:$0xff]  ;;  %v8549_v27 = vcombine.low %v8534_v15, %v8534_v15  ;;  %v6690_v15 = vcombine.low %v490_v19, %v494_v53  ;;  %v542_v11 = vld [vmem:[#allocation7 + $0x9e0] sm:$0xff] }
 0x15c   :  { %v6693_v35 = vcombine.high %v491_v23, %v495_v24 }
 0x15e   :  { %2708 = vmatpush1.bf16.msra.mxu0 %v6626_v29  ;;  %2872 = vmatpush1.bf16.msra.mxu1 %v6628_v30  ;;  %v6684_v29 = vcombine.low %v483_v14, %v487_v17  ;;  %v6691_v30 = vcombine.high %v490_v19, %v494_v53  ;;  %v547_v53 = vld [vmem:[#allocation7 + $0xa08] sm:$0xff] }
 0x15f   :  { %2709 = vmatprep.subr.bf16.mxu0 %v6635_v31  ;;  %2873 = vmatprep.subr.bf16.mxu1 %v6637_v36  ;;  %v498_v31 = vld [vmem:[#allocation7 + $0x880] sm:$0xff]  ;;  %v503_v36 = vld [vmem:[#allocation7 + $0x8a8] sm:$0xff] }
 0x160   :  { %v6701_v43 = vcombine.high %v499_v34, %v503_v36  ;;  %v6698_v45 = vcombine.low %v498_v31, %v502_v33 }
 0x162   :  { %2710 = vmatpush1.bf16.msra.mxu0 %v6634_v38  ;;  %2874 = vmatpush1.bf16.msra.mxu1 %v6636_v39  ;;  %v6692_v38 = vcombine.low %v491_v23, %v495_v24  ;;  %v6699_v39 = vcombine.high %v498_v31, %v502_v33  ;;  %v551_v24 = vld [vmem:[#allocation7 + $0xa28] sm:$0xff]  ;;  %v558_v31 = vld [vmem:[#allocation7 + $0xa60] sm:$0xff] }
 0x163   :  { %2711 = vmatprep.subr.bf16.mxu0 %v6643_v40  ;;  %2875 = vmatprep.subr.bf16.mxu1 %v6645_v44  ;;  %v506_v40 = vld [vmem:[#allocation7 + $0x8c0] sm:$0xff]  ;;  %v511_v44 = vld [vmem:[#allocation7 + $0x8e8] sm:$0xff] }
 0x164   :  { %v6709_v51 = vcombine.high %v507_v42, %v511_v44  ;;  %v6706_v54 = vcombine.low %v506_v40, %v510_v41  ;;  %v555_v33 = vld [vmem:[#allocation7 + $0xa48] sm:$0xff] }
 0x166   :  { %2712 = vmatpush1.bf16.msra.mxu0 %v6642_v46  ;;  %2876 = vmatpush1.bf16.msra.mxu1 %v6644_v47  ;;  %v6700_v46 = vcombine.low %v499_v34, %v503_v36  ;;  %v6707_v47 = vcombine.high %v506_v40, %v510_v41  ;;  %v6749_v34 = vcombine.high %v547_v53, %v551_v24  ;;  %v566_v40 = vld [vmem:[#allocation7 + $0xaa0] sm:$0xff]  ;;  %v563_v41 = vld [vmem:[#allocation7 + $0xa88] sm:$0xff] }
 0x167   :  { %2713 = vmatprep.subr.bf16.mxu0 %v6651_v48  ;;  %2877 = vmatprep.subr.bf16.mxu1 %v6653_v52  ;;  %v514_v48 = vld [vmem:[#allocation7 + $0x900] sm:$0xff]  ;;  %v519_v52 = vld [vmem:[#allocation7 + $0x928] sm:$0xff] }
 0x168   :  { %v6717_v61 = vcombine.high %v515_v50, %v519_v52  ;;  %v6714_v63 = vcombine.low %v514_v48, %v518_v49 }
 0x16a   :  { %2714 = vmatpush1.bf16.msra.mxu0 %v6650_v55  ;;  %2878 = vmatpush1.bf16.msra.mxu1 %v6652_v56  ;;  %v6708_v55 = vcombine.low %v507_v42, %v511_v44  ;;  %v6715_v56 = vcombine.high %v514_v48, %v518_v49  ;;  %v574_v48 = vld [vmem:[#allocation7 + $0xae0] sm:$0xff]  ;;  %v571_v49 = vld [vmem:[#allocation7 + $0xac8] sm:$0xff] }
 0x16b   :  { %2715 = vmatprep.subr.bf16.mxu0 %v6659_v57  ;;  %2879 = vmatprep.subr.bf16.mxu1 %v6661_v62  ;;  %v522_v57 = vld [vmem:[#allocation7 + $0x940] sm:$0xff]  ;;  %v527_v62 = vld [vmem:[#allocation7 + $0x968] sm:$0xff] }
 0x16c   :  { %v6725_v5 = vcombine.high %v523_v60, %v527_v62  ;;  %v6722_v7 = vcombine.low %v522_v57, %v526_v58 }
 0x16e   :  { %2716 = vmatpush1.bf16.msra.mxu0 %v6658_v0  ;;  %2880 = vmatpush1.bf16.msra.mxu1 %v6660_v1  ;;  %v6716_v0 = vcombine.low %v515_v50, %v519_v52  ;;  %v6723_v1 = vcombine.high %v522_v57, %v526_v58  ;;  %v582_v57 = vld [vmem:[#allocation7 + $0xb20] sm:$0xff]  ;;  %v579_v58 = vld [vmem:[#allocation7 + $0xb08] sm:$0xff] }
 0x16f   :  { %2717 = vmatprep.subr.bf16.mxu0 %v6667_v2  ;;  %2881 = vmatprep.subr.bf16.mxu1 %v6669_v6  ;;  %v530_v2 = vld [vmem:[#allocation7 + $0x980] sm:$0xff]  ;;  %v535_v6 = vld [vmem:[#allocation7 + $0x9a8] sm:$0xff] }
 0x170   :  { %v6733_v14 = vcombine.high %v531_v4, %v535_v6  ;;  %v6730_v17 = vcombine.low %v530_v2, %v534_v3 }
 0x172   :  { %2718 = vmatpush1.bf16.msra.mxu0 %v6666_v8  ;;  %2882 = vmatpush1.bf16.msra.mxu1 %v6668_v9  ;;  %v6724_v8 = vcombine.low %v523_v60, %v527_v62  ;;  %v6731_v9 = vcombine.high %v530_v2, %v534_v3  ;;  %v590_v2 = vld [vmem:[#allocation7 + $0xb60] sm:$0xff]  ;;  %v587_v3 = vld [vmem:[#allocation7 + $0xb48] sm:$0xff] }
 0x173   :  { %2719 = vmatprep.subr.bf16.mxu0 %v6675_v10  ;;  %2883 = vmatprep.subr.bf16.mxu1 %v6677_v16  ;;  %v538_v10 = vld [vmem:[#allocation7 + $0x9c0] sm:$0xff]  ;;  %v543_v16 = vld [vmem:[#allocation7 + $0x9e8] sm:$0xff] }
 0x174   :  { %v6739_v19 = vcombine.high %v538_v10, %v542_v11  ;;  %v6741_v23 = vcombine.high %v539_v13, %v543_v16 }
 0x176   :  { %2720 = vmatpush1.bf16.msra.mxu0 %v6674_v18  ;;  %2884 = vmatpush1.bf16.msra.mxu1 %v6676_v20  ;;  %v6732_v18 = vcombine.low %v531_v4, %v535_v6  ;;  %v546_v20 = vld [vmem:[#allocation7 + $0xa00] sm:$0xff] }
 0x177   :  { %2730 = vmatprep.subr.bf16.mxu0 %v6683_v21  ;;  %2894 = vmatprep.subr.bf16.mxu1 %v6685_v25  ;;  %v550_v21 = vld [vmem:[#allocation7 + $0xa20] sm:$0xff]  ;;  %v6738_v25 = vcombine.low %v538_v10, %v542_v11  ;;  %v595_v11 = vld [vmem:[#allocation7 + $0xb88] sm:$0xff] }
 0x178   :  { %v6746_v36 = vcombine.low %v546_v20, %v550_v21  ;;  %v598_v10 = vld [vmem:[#allocation7 + $0xba0] sm:$0xff] }
 0x179   :  { %2722 = vmatmul.mubr.bf16.vlgmr.msra.gmra.mrb[0].mxu0 %v8549_v27  ;;  %2886 = vmatmul.mubr.bf16.vlgmr.msra.gmra.mrb[0].mxu1 %v8549_v27 }
 0x17a   :  { %2731 = vmatpush1.bf16.msra.mxu0 %v6682_v28  ;;  %2895 = vmatpush1.bf16.msra.mxu1 %v6684_v29  ;;  %v6740_v28 = vcombine.low %v539_v13, %v543_v16  ;;  %v6747_v29 = vcombine.high %v546_v20, %v550_v21  ;;  %v606_v20 = vld [vmem:[#allocation7 + $0xbe0] sm:$0xff]  ;;  %v603_v21 = vld [vmem:[#allocation7 + $0xbc8] sm:$0xff] }
 0x17b   :  { %2732 = vmatprep.subr.bf16.mxu0 %v6691_v30  ;;  %2896 = vmatprep.subr.bf16.mxu1 %v6693_v35  ;;  %v554_v30 = vld [vmem:[#allocation7 + $0xa40] sm:$0xff]  ;;  %v559_v35 = vld [vmem:[#allocation7 + $0xa68] sm:$0xff] }
 0x17c   :  { %2762 = vmatprep.mubr.bf16.mxu0 %v8553_v37  ;;  %2926 = vmatprep.mubr.bf16.mxu1 %v8553_v37  ;;  %v6757_v42 = vcombine.high %v555_v33, %v559_v35  ;;  %v6754_v44 = vcombine.low %v554_v30, %v558_v31 }
 0x17e   :  { %2733 = vmatpush1.bf16.msra.mxu0 %v6690_v15  ;;  %2897 = vmatpush1.bf16.msra.mxu1 %v6692_v38  ;;  %v6748_v15 = vcombine.low %v547_v53, %v551_v24  ;;  %v6755_v38 = vcombine.high %v554_v30, %v558_v31  ;;  %v614_v30 = vld [vmem:[#allocation7 + $0xc20] sm:$0xff]  ;;  %v611_v31 = vld [vmem:[#allocation7 + $0xc08] sm:$0xff] }
 0x17f   :  { %2734 = vmatprep.subr.bf16.mxu0 %v6699_v39  ;;  %2898 = vmatprep.subr.bf16.mxu1 %v6701_v43  ;;  %v562_v39 = vld [vmem:[#allocation7 + $0xa80] sm:$0xff]  ;;  %v567_v43 = vld [vmem:[#allocation7 + $0xaa8] sm:$0xff] }
 0x180   :  { %v6765_v50 = vcombine.high %v563_v41, %v567_v43  ;;  %v6762_v52 = vcombine.low %v562_v39, %v566_v40 }
 0x182   :  { %2735 = vmatpush1.bf16.msra.mxu0 %v6698_v45  ;;  %2899 = vmatpush1.bf16.msra.mxu1 %v6700_v46  ;;  %v6756_v45 = vcombine.low %v555_v33, %v559_v35  ;;  %v6763_v46 = vcombine.high %v562_v39, %v566_v40  ;;  %v232_v39 = vld [vmem:[#allocation7 + $0x30] sm:$0xff] }
 0x183   :  { %2736 = vmatprep.subr.bf16.mxu0 %v6707_v47  ;;  %2900 = vmatprep.subr.bf16.mxu1 %v6709_v51  ;;  %v570_v47 = vld [vmem:[#allocation7 + $0xac0] sm:$0xff]  ;;  %v575_v51 = vld [vmem:[#allocation7 + $0xae8] sm:$0xff] }
 0x184   :  { %v6773_v60 = vcombine.high %v571_v49, %v575_v51  ;;  %v6770_v62 = vcombine.low %v570_v47, %v574_v48 }
 0x186   :  { %2737 = vmatpush1.bf16.msra.mxu0 %v6706_v54  ;;  %2901 = vmatpush1.bf16.msra.mxu1 %v6708_v55  ;;  %v6764_v54 = vcombine.low %v563_v41, %v567_v43  ;;  %v6771_v55 = vcombine.high %v570_v47, %v574_v48  ;;  %v229_v41 = vld [vmem:[#allocation7 + $0x18] sm:$0xff]  ;;  %v8561_v43 = vcombine.low %v8545_v26, %v8545_v26  ;;  %v217_v26 = vld [vmem:[#allocation2 + $0x18] sm:$0xf] }
 0x187   :  { %2738 = vmatprep.subr.bf16.mxu0 %v6715_v56  ;;  %2902 = vmatprep.subr.bf16.mxu1 %v6717_v61  ;;  %v578_v56 = vld [vmem:[#allocation7 + $0xb00] sm:$0xff]  ;;  %v583_v61 = vld [vmem:[#allocation7 + $0xb28] sm:$0xff]  ;;  %v236_v48 = vld [vmem:[#allocation7 + $0x50] sm:$0xff] }
 0x188   :  { %v6781_v4 = vcombine.high %v579_v58, %v583_v61  ;;  %v6778_v6 = vcombine.low %v578_v56, %v582_v57 }
 0x18a   :  { %2739 = vmatpush1.bf16.msra.mxu0 %v6714_v63  ;;  %2903 = vmatpush1.bf16.msra.mxu1 %v6716_v0  ;;  %v6772_v63 = vcombine.low %v571_v49, %v575_v51  ;;  %v6779_v0 = vcombine.high %v578_v56, %v582_v57  ;;  %v240_v49 = vld [vmem:[#allocation7 + $0x70] sm:$0xff]  ;;  %v241_v51 = vld [vmem:[#allocation7 + $0x78] sm:$0xff] }
 0x18b   :  { %2740 = vmatprep.subr.bf16.mxu0 %v6723_v1  ;;  %2904 = vmatprep.subr.bf16.mxu1 %v6725_v5  ;;  %v586_v1 = vld [vmem:[#allocation7 + $0xb40] sm:$0xff]  ;;  %v591_v5 = vld [vmem:[#allocation7 + $0xb68] sm:$0xff]  ;;  %v6439_v56 = vcombine.high %v236_v48, %v240_v49  ;;  %v244_v57 = vld [vmem:[#allocation7 + $0x90] sm:$0xff] }
 0x18c   :  { %v6789_v13 = vcombine.high %v587_v3, %v591_v5  ;;  %v6786_v16 = vcombine.low %v586_v1, %v590_v2 }
 0x18e   :  { %2741 = vmatpush1.bf16.msra.mxu0 %v6722_v7  ;;  %2905 = vmatpush1.bf16.msra.mxu1 %v6724_v8  ;;  %v6780_v7 = vcombine.low %v579_v58, %v583_v61  ;;  %v6787_v8 = vcombine.high %v586_v1, %v590_v2  ;;  %v248_v58 = vld [vmem:[#allocation7 + $0xb0] sm:$0xff] }
 0x18f   :  { %2742 = vmatprep.subr.bf16.mxu0 %v6731_v9  ;;  %2906 = vmatprep.subr.bf16.mxu1 %v6733_v14  ;;  %v594_v9 = vld [vmem:[#allocation7 + $0xb80] sm:$0xff]  ;;  %v599_v14 = vld [vmem:[#allocation7 + $0xba8] sm:$0xff]  ;;  %v6447_v1 = vcombine.high %v244_v57, %v248_v58  ;;  %v252_v2 = vld [vmem:[#allocation7 + $0xd0] sm:$0xff] }
 0x190   :  { %v6797_v53 = vcombine.high %v595_v11, %v599_v14  ;;  %v6794_v24 = vcombine.low %v594_v9, %v598_v10 }
 0x192   :  { %2743 = vmatpush1.bf16.msra.mxu0 %v6730_v17  ;;  %2907 = vmatpush1.bf16.msra.mxu1 %v6732_v18  ;;  %v6788_v17 = vcombine.low %v587_v3, %v591_v5  ;;  %v6795_v18 = vcombine.high %v594_v9, %v598_v10  ;;  %v256_v3 = vld [vmem:[#allocation7 + $0xf0] sm:$0xff] }
 0x193   :  { %2744 = vmatprep.subr.bf16.mxu0 %v6739_v19  ;;  %2908 = vmatprep.subr.bf16.mxu1 %v6741_v23  ;;  %v602_v19 = vld [vmem:[#allocation7 + $0xbc0] sm:$0xff]  ;;  %v607_v23 = vld [vmem:[#allocation7 + $0xbe8] sm:$0xff]  ;;  %v6455_v9 = vcombine.high %v252_v2, %v256_v3  ;;  %v260_v10 = vld [vmem:[#allocation7 + $0x110] sm:$0xff] }
 0x194   :  { %v6805_v33 = vcombine.high %v603_v21, %v607_v23  ;;  %v6802_v35 = vcombine.low %v602_v19, %v606_v20 }
 0x196   :  { %2745 = vmatpush1.bf16.msra.mxu0 %v6738_v25  ;;  %2909 = vmatpush1.bf16.msra.mxu1 %v6740_v28  ;;  %v6796_v25 = vcombine.low %v595_v11, %v599_v14  ;;  %v6803_v28 = vcombine.high %v602_v19, %v606_v20  ;;  %v264_v11 = vld [vmem:[#allocation7 + $0x130] sm:$0xff] }
 0x197   :  { %2746 = vmatprep.subr.bf16.mxu0 %v6747_v29  ;;  %2910 = vmatprep.subr.bf16.mxu1 %v6749_v34  ;;  %v610_v29 = vld [vmem:[#allocation7 + $0xc00] sm:$0xff]  ;;  %v615_v34 = vld [vmem:[#allocation7 + $0xc28] sm:$0xff]  ;;  %v6463_v19 = vcombine.high %v260_v10, %v264_v11  ;;  %v268_v20 = vld [vmem:[#allocation7 + $0x150] sm:$0xff] }
 0x198   :  { %v6813_v40 = vcombine.high %v611_v31, %v615_v34 }
 0x19a   :  { %2747 = vmatpush1.bf16.msra.mxu0 %v6746_v36  ;;  %2911 = vmatpush1.bf16.msra.mxu1 %v6748_v15  ;;  %v6804_v36 = vcombine.low %v603_v21, %v607_v23  ;;  %v6811_v15 = vcombine.high %v610_v29, %v614_v30  ;;  %v269_v21 = vld [vmem:[#allocation7 + $0x158] sm:$0xff] }
 0x19b   :  { %2748 = vmatprep.subr.bf16.mxu0 %v6755_v38  ;;  %2912 = vmatprep.subr.bf16.mxu1 %v6757_v42  ;;  %v228_v38 = vld [vmem:[#allocation7 + $0x10] sm:$0xff]  ;;  %v233_v42 = vld [vmem:[#allocation7 + $0x38] sm:$0xff] }
 0x19c   :  { %v6433_v47 = vcombine.high %v229_v41, %v233_v42  ;;  %v273_v23 = vld [vmem:[#allocation7 + $0x178] sm:$0xff] }
 0x19e   :  { %2749 = vmatpush1.bf16.msra.mxu0 %v6754_v44  ;;  %2913 = vmatpush1.bf16.msra.mxu1 %v6756_v45  ;;  %v6810_v44 = vcombine.low %v610_v29, %v614_v30  ;;  %v6812_v45 = vcombine.low %v611_v31, %v615_v34  ;;  %v276_v29 = vld [vmem:[#allocation7 + $0x190] sm:$0xff]  ;;  %v277_v31 = vld [vmem:[#allocation7 + $0x198] sm:$0xff] }
 0x19f   :  { %2750 = vmatprep.subr.bf16.mxu0 %v6763_v46  ;;  %2914 = vmatprep.subr.bf16.mxu1 %v6765_v50  ;;  %v6431_v46 = vcombine.high %v228_v38, %v232_v39  ;;  %v237_v50 = vld [vmem:[#allocation7 + $0x58] sm:$0xff]  ;;  %v280_v30 = vld [vmem:[#allocation7 + $0x1b0] sm:$0xff] }
 0x1a0   :  { %v6441_v61 = vcombine.high %v237_v50, %v241_v51  ;;  %v281_v34 = vld [vmem:[#allocation7 + $0x1b8] sm:$0xff] }
 0x1a2   :  { %2751 = vmatpush1.bf16.msra.mxu0 %v6762_v52  ;;  %2915 = vmatpush1.bf16.msra.mxu1 %v6764_v54  ;;  %v8567_v52 = vcombine.low %v217_v26, %v217_v26  ;;  %v6430_v54 = vcombine.low %v228_v38, %v232_v39  ;;  %v284_v38 = vld [vmem:[#allocation7 + $0x1d0] sm:$0xff] }
 0x1a3   :  { %2752 = vmatprep.subr.bf16.mxu0 %v6771_v55  ;;  %2916 = vmatprep.subr.bf16.mxu1 %v6773_v60  ;;  %v6432_v55 = vcombine.low %v229_v41, %v233_v42  ;;  %v245_v60 = vld [vmem:[#allocation7 + $0x98] sm:$0xff]  ;;  %v288_v39 = vld [vmem:[#allocation7 + $0x1f0] sm:$0xff]  ;;  %v6481_v41 = vcombine.high %v277_v31, %v281_v34 }
 0x1a4   :  { %v289_v42 = vld [vmem:[#allocation7 + $0x1f8] sm:$0xff]  ;;  %v296_v26 = vld [vmem:[#allocation7 + $0x230] sm:$0xff] }
 0x1a6   :  { %2753 = vmatpush1.bf16.msra.mxu0 %v6770_v62  ;;  %2917 = vmatpush1.bf16.msra.mxu1 %v6772_v63  ;;  %v249_v62 = vld [vmem:[#allocation7 + $0xb8] sm:$0xff]  ;;  %v6438_v63 = vcombine.low %v236_v48, %v240_v49 }
 0x1a7   :  { %2754 = vmatprep.subr.bf16.mxu0 %v6779_v0  ;;  %2918 = vmatprep.subr.bf16.mxu1 %v6781_v4  ;;  %v6440_v0 = vcombine.low %v237_v50, %v241_v51  ;;  %v253_v4 = vld [vmem:[#allocation7 + $0xd8] sm:$0xff]  ;;  %v6449_v5 = vcombine.high %v245_v60, %v249_v62  ;;  %v6486_v51 = vcombine.low %v284_v38, %v288_v39 }
 0x1a8   :  { %v293_v48 = vld [vmem:[#allocation7 + $0x218] sm:$0xff] }
 0x1a9   :  { %v297_v50 = vld [vmem:[#allocation7 + $0x238] sm:$0xff] }
 0x1aa   :  { %2755 = vmatpush1.bf16.msra.mxu0 %v6778_v6  ;;  %2919 = vmatpush1.bf16.msra.mxu1 %v6780_v7  ;;  %v257_v6 = vld [vmem:[#allocation7 + $0xf8] sm:$0xff]  ;;  %v6446_v7 = vcombine.low %v244_v57, %v248_v58  ;;  %v304_v57 = vld [vmem:[#allocation7 + $0x270] sm:$0xff] }
 0x1ab   :  { %2756 = vmatprep.subr.bf16.mxu0 %v6787_v8  ;;  %2920 = vmatprep.subr.bf16.mxu1 %v6789_v13  ;;  %v6448_v8 = vcombine.low %v245_v60, %v249_v62  ;;  %v261_v13 = vld [vmem:[#allocation7 + $0x118] sm:$0xff]  ;;  %v6457_v14 = vcombine.high %v253_v4, %v257_v6  ;;  %v6497_v60 = vcombine.high %v293_v48, %v297_v50 }
 0x1ac   :  { %v301_v58 = vld [vmem:[#allocation7 + $0x258] sm:$0xff] }
 0x1ae   :  { %2757 = vmatpush1.bf16.msra.mxu0 %v6786_v16  ;;  %2921 = vmatpush1.bf16.msra.mxu1 %v6788_v17  ;;  %v265_v16 = vld [vmem:[#allocation7 + $0x138] sm:$0xff]  ;;  %v6454_v17 = vcombine.low %v252_v2, %v256_v3  ;;  %v312_v2 = vld [vmem:[#allocation7 + $0x2b0] sm:$0xff] }
 0x1af   :  { %2758 = vmatprep.subr.bf16.mxu0 %v6795_v18  ;;  %2922 = vmatprep.subr.bf16.mxu1 %v6797_v53  ;;  %v6456_v18 = vcombine.low %v253_v4, %v257_v6  ;;  %v6465_v53 = vcombine.high %v261_v13, %v265_v16  ;;  %v309_v3 = vld [vmem:[#allocation7 + $0x298] sm:$0xff] }
 0x1b2   :  { %2759 = vmatpush1.bf16.msra.mxu0 %v6794_v24  ;;  %2923 = vmatpush1.bf16.msra.mxu1 %v6796_v25  ;;  %v6462_v24 = vcombine.low %v260_v10, %v264_v11  ;;  %v6464_v25 = vcombine.low %v261_v13, %v265_v16  ;;  %v320_v10 = vld [vmem:[#allocation7 + $0x2f0] sm:$0xff]  ;;  %v317_v11 = vld [vmem:[#allocation7 + $0x2d8] sm:$0xff] }
 0x1b3   :  { %2760 = vmatprep.subr.bf16.mxu0 %v6803_v28  ;;  %2924 = vmatprep.subr.bf16.mxu1 %v6805_v33  ;;  %v6473_v33 = vcombine.high %v269_v21, %v273_v23 }
 0x1b6   :  { %2761 = vmatpush1.bf16.msra.mxu0 %v6802_v35  ;;  %2925 = vmatpush1.bf16.msra.mxu1 %v6804_v36  ;;  %v6472_v36 = vcombine.low %v269_v21, %v273_v23 }
 0x1b7   :  { %2771 = vmatprep.subr.bf16.mxu0 %v6811_v15  ;;  %2935 = vmatprep.subr.bf16.mxu1 %v6813_v40  ;;  %v6479_v15 = vcombine.high %v276_v29, %v280_v30  ;;  %v285_v40 = vld [vmem:[#allocation7 + $0x1d8] sm:$0xff] }
 0x1b8   :  { %v6489_v49 = vcombine.high %v285_v40, %v289_v42 }
 0x1b9   :  { %2763 = vmatmul.mubr.bf16.vlgmr.msra.gmra.mrb[0].mxu0 %v8561_v43  ;;  %2927 = vmatmul.mubr.bf16.vlgmr.msra.gmra.mrb[0].mxu1 %v8561_v43 }
 0x1ba   :  { %2772 = vmatpush1.bf16.msra.mxu0 %v6810_v44  ;;  %2936 = vmatpush1.bf16.msra.mxu1 %v6812_v45  ;;  %v6478_v44 = vcombine.low %v276_v29, %v280_v30  ;;  %v6480_v45 = vcombine.low %v277_v31, %v281_v34  ;;  %v336_v29 = vld [vmem:[#allocation7 + $0x370] sm:$0xff]  ;;  %v333_v30 = vld [vmem:[#allocation7 + $0x358] sm:$0xff] }
 0x1bb   :  { %2803 = vmatprep.mubr.bf16.mxu0 %v8253_v32  ;;  %2967 = vmatprep.mubr.bf16.mxu1 %v8253_v32 }
 0x1bc   :  { %2976 = vmatprep.subr.bf16.mxu0 %v6431_v46  ;;  %3140 = vmatprep.subr.bf16.mxu1 %v6433_v47  ;;  %v6487_v46 = vcombine.high %v284_v38, %v288_v39  ;;  %v292_v47 = vld [vmem:[#allocation7 + $0x210] sm:$0xff]  ;;  %v341_v39 = vld [vmem:[#allocation7 + $0x398] sm:$0xff] }
 0x1bd   :  { %v6494_v62 = vcombine.low %v292_v47, %v296_v26  ;;  %v344_v38 = vld [vmem:[#allocation7 + $0x3b0] sm:$0xff] }
 0x1c5   :  { %6818 = vmatmul.mubr.msk.bf16.vlgmr.msra.gmra.mrb[0].mxu0 %vm2644_vm0, %v8567_v52  ;;  %6819 = vmatmul.mubr.msk.bf16.vlgmr.msra.gmra.mrb[0].mxu1 %vm2644_vm0, %v8567_v52 }
 0x1c6   :  { %2977 = vmatpush1.bf16.msra.mxu0 %v6430_v54  ;;  %3141 = vmatpush1.bf16.msra.mxu1 %v6432_v55  ;;  %v6488_v54 = vcombine.low %v285_v40, %v289_v42  ;;  %v6495_v55 = vcombine.high %v292_v47, %v296_v26  ;;  %v348_v47 = vld [vmem:[#allocation7 + $0x3d0] sm:$0xff] }
 0x1c7   :  { %2978 = vmatprep.subr.bf16.mxu0 %v6439_v56  ;;  %3142 = vmatprep.subr.bf16.mxu1 %v6441_v61  ;;  %v300_v56 = vld [vmem:[#allocation7 + $0x250] sm:$0xff]  ;;  %v305_v61 = vld [vmem:[#allocation7 + $0x278] sm:$0xff] }
 0x1c8   :  { %3008 = vmatprep.mubr.bf16.mxu0 %v8526_v59  ;;  %3172 = vmatprep.mubr.bf16.mxu1 %v8526_v59  ;;  %v272_v59 = vld [vmem:[#allocation7 + $0x170] sm:$0xff]  ;;  %v6505_v4 = vcombine.high %v301_v58, %v305_v61  ;;  %v6502_v6 = vcombine.low %v300_v56, %v304_v57 }
 0x1c9   :  { %v6471_v28 = vcombine.high %v268_v20, %v272_v59  ;;  %v6470_v35 = vcombine.low %v268_v20, %v272_v59  ;;  %v328_v20 = vld [vmem:[#allocation7 + $0x330] sm:$0xff]  ;;  %v325_v59 = vld [vmem:[#allocation7 + $0x318] sm:$0xff] }
 0x1ca   :  { %2979 = vmatpush1.bf16.msra.mxu0 %v6438_v63  ;;  %3143 = vmatpush1.bf16.msra.mxu1 %v6440_v0  ;;  %v6496_v63 = vcombine.low %v293_v48, %v297_v50  ;;  %v6503_v0 = vcombine.high %v300_v56, %v304_v57  ;;  %v352_v26 = vld [vmem:[#allocation7 + $0x3f0] sm:$0xff]  ;;  %v349_v48 = vld [vmem:[#allocation7 + $0x3d8] sm:$0xff] }
 0x1cb   :  { %2980 = vmatprep.subr.bf16.mxu0 %v6447_v1  ;;  %3144 = vmatprep.subr.bf16.mxu1 %v6449_v5  ;;  %v308_v1 = vld [vmem:[#allocation7 + $0x290] sm:$0xff]  ;;  %v313_v5 = vld [vmem:[#allocation7 + $0x2b8] sm:$0xff] }
 0x1cc   :  { %v6513_v13 = vcombine.high %v309_v3, %v313_v5  ;;  %v6510_v16 = vcombine.low %v308_v1, %v312_v2  ;;  %v356_v56 = vld [vmem:[#allocation7 + $0x410] sm:$0xff] }
 0x1cd   :  { %v360_v57 = vld [vmem:[#allocation7 + $0x430] sm:$0xff] }
 0x1ce   :  { %2981 = vmatpush1.bf16.msra.mxu0 %v6446_v7  ;;  %3145 = vmatpush1.bf16.msra.mxu1 %v6448_v8  ;;  %v6504_v7 = vcombine.low %v301_v58, %v305_v61  ;;  %v6511_v8 = vcombine.high %v308_v1, %v312_v2  ;;  %v357_v58 = vld [vmem:[#allocation7 + $0x418] sm:$0xff]  ;;  %v6550_v61 = vcombine.low %v348_v47, %v352_v26  ;;  %v364_v1 = vld [vmem:[#allocation7 + $0x450] sm:$0xff] }
 0x1cf   :  { %2982 = vmatprep.subr.bf16.mxu0 %v6455_v9  ;;  %3146 = vmatprep.subr.bf16.mxu1 %v6457_v14  ;;  %v316_v9 = vld [vmem:[#allocation7 + $0x2d0] sm:$0xff]  ;;  %v321_v14 = vld [vmem:[#allocation7 + $0x2f8] sm:$0xff] }
 0x1d0   :  { %v6521_v21 = vcombine.high %v317_v11, %v321_v14  ;;  %v6518_v23 = vcombine.low %v316_v9, %v320_v10  ;;  %v368_v2 = vld [vmem:[#allocation7 + $0x470] sm:$0xff] }
 0x1d2   :  { %2983 = vmatpush1.bf16.msra.mxu0 %v6454_v17  ;;  %3147 = vmatpush1.bf16.msra.mxu1 %v6456_v18  ;;  %v6512_v17 = vcombine.low %v309_v3, %v313_v5  ;;  %v6519_v18 = vcombine.high %v316_v9, %v320_v10  ;;  %v365_v3 = vld [vmem:[#allocation7 + $0x458] sm:$0xff]  ;;  %v6558_v5 = vcombine.low %v356_v56, %v360_v57  ;;  %v372_v9 = vld [vmem:[#allocation7 + $0x490] sm:$0xff] }
 0x1d3   :  { %2984 = vmatprep.subr.bf16.mxu0 %v6463_v19  ;;  %3148 = vmatprep.subr.bf16.mxu1 %v6465_v53  ;;  %v324_v19 = vld [vmem:[#allocation7 + $0x310] sm:$0xff]  ;;  %v329_v53 = vld [vmem:[#allocation7 + $0x338] sm:$0xff] }
 0x1d4   :  { %v6529_v31 = vcombine.high %v325_v59, %v329_v53  ;;  %v6526_v34 = vcombine.low %v324_v19, %v328_v20  ;;  %v376_v10 = vld [vmem:[#allocation7 + $0x4b0] sm:$0xff] }
 0x1d6   :  { %2985 = vmatpush1.bf16.msra.mxu0 %v6462_v24  ;;  %3149 = vmatpush1.bf16.msra.mxu1 %v6464_v25  ;;  %v6520_v24 = vcombine.low %v317_v11, %v321_v14  ;;  %v6527_v25 = vcombine.high %v324_v19, %v328_v20  ;;  %v373_v11 = vld [vmem:[#allocation7 + $0x498] sm:$0xff]  ;;  %v6566_v14 = vcombine.low %v364_v1, %v368_v2  ;;  %v380_v19 = vld [vmem:[#allocation7 + $0x4d0] sm:$0xff] }
 0x1d7   :  { %2986 = vmatprep.subr.bf16.mxu0 %v6471_v28  ;;  %3150 = vmatprep.subr.bf16.mxu1 %v6473_v33  ;;  %v332_v28 = vld [vmem:[#allocation7 + $0x350] sm:$0xff]  ;;  %v337_v33 = vld [vmem:[#allocation7 + $0x378] sm:$0xff] }
 0x1d8   :  { %v6537_v40 = vcombine.high %v333_v30, %v337_v33  ;;  %v6534_v42 = vcombine.low %v332_v28, %v336_v29  ;;  %v384_v20 = vld [vmem:[#allocation7 + $0x4f0] sm:$0xff] }
 0x1da   :  { %2987 = vmatpush1.bf16.msra.mxu0 %v6470_v35  ;;  %3151 = vmatpush1.bf16.msra.mxu1 %v6472_v36  ;;  %v6528_v35 = vcombine.low %v325_v59, %v329_v53  ;;  %v6535_v36 = vcombine.high %v332_v28, %v336_v29  ;;  %v381_v59 = vld [vmem:[#allocation7 + $0x4d8] sm:$0xff]  ;;  %v6574_v53 = vcombine.low %v372_v9, %v376_v10  ;;  %v392_v28 = vld [vmem:[#allocation7 + $0x530] sm:$0xff] }
 0x1db   :  { %2988 = vmatprep.subr.bf16.mxu0 %v6479_v15  ;;  %3152 = vmatprep.subr.bf16.mxu1 %v6481_v41  ;;  %v340_v15 = vld [vmem:[#allocation7 + $0x390] sm:$0xff]  ;;  %v345_v41 = vld [vmem:[#allocation7 + $0x3b8] sm:$0xff] }
 0x1dc   :  { %v6542_v50 = vcombine.low %v340_v15, %v344_v38  ;;  %v389_v29 = vld [vmem:[#allocation7 + $0x518] sm:$0xff] }
 0x1de   :  { %2989 = vmatpush1.bf16.msra.mxu0 %v6478_v44  ;;  %3153 = vmatpush1.bf16.msra.mxu1 %v6480_v45  ;;  %v6536_v44 = vcombine.low %v333_v30, %v337_v33  ;;  %v6543_v45 = vcombine.high %v340_v15, %v344_v38  ;;  %v393_v30 = vld [vmem:[#allocation7 + $0x538] sm:$0xff] }
 0x1df   :  { %2990 = vmatprep.subr.bf16.mxu0 %v6487_v46  ;;  %3154 = vmatprep.subr.bf16.mxu1 %v6489_v49  ;;  %v6545_v46 = vcombine.high %v341_v39, %v345_v41  ;;  %v353_v49 = vld [vmem:[#allocation7 + $0x3f8] sm:$0xff] }
 0x1e0   :  { %v397_v15 = vld [vmem:[#allocation7 + $0x558] sm:$0xff] }
 0x1e1   :  { %v401_v38 = vld [vmem:[#allocation7 + $0x578] sm:$0xff] }
 0x1e2   :  { %2991 = vmatpush1.bf16.msra.mxu0 %v6486_v51  ;;  %3155 = vmatpush1.bf16.msra.mxu1 %v6488_v54  ;;  %v6544_v51 = vcombine.low %v341_v39, %v345_v41  ;;  %v6551_v54 = vcombine.high %v348_v47, %v352_v26  ;;  %v409_v47 = vld [vmem:[#allocation7 + $0x5b8] sm:$0xff] }
 0x1e3   :  { %2992 = vmatprep.subr.bf16.mxu0 %v6495_v55  ;;  %3156 = vmatprep.subr.bf16.mxu1 %v6497_v60  ;;  %v6553_v55 = vcombine.high %v349_v48, %v353_v49  ;;  %v361_v60 = vld [vmem:[#allocation7 + $0x438] sm:$0xff] }
 0x1e6   :  { %2993 = vmatpush1.bf16.msra.mxu0 %v6494_v62  ;;  %3157 = vmatpush1.bf16.msra.mxu1 %v6496_v63  ;;  %v6552_v62 = vcombine.low %v349_v48, %v353_v49  ;;  %v6559_v63 = vcombine.high %v356_v56, %v360_v57  ;;  %v6600_v48 = vcombine.low %v397_v15, %v401_v38  ;;  %v417_v56 = vld [vmem:[#allocation7 + $0x5f8] sm:$0xff] }
 0x1e7   :  { %2994 = vmatprep.subr.bf16.mxu0 %v6503_v0  ;;  %3158 = vmatprep.subr.bf16.mxu1 %v6505_v4  ;;  %v6561_v0 = vcombine.high %v357_v58, %v361_v60  ;;  %v369_v4 = vld [vmem:[#allocation7 + $0x478] sm:$0xff] }
 0x1ea   :  { %2995 = vmatpush1.bf16.msra.mxu0 %v6502_v6  ;;  %3159 = vmatpush1.bf16.msra.mxu1 %v6504_v7  ;;  %v6560_v6 = vcombine.low %v357_v58, %v361_v60  ;;  %v6567_v7 = vcombine.high %v364_v1, %v368_v2  ;;  %v425_v1 = vld [vmem:[#allocation7 + $0x638] sm:$0xff] }
 0x1eb   :  { %2996 = vmatprep.subr.bf16.mxu0 %v6511_v8  ;;  %3160 = vmatprep.subr.bf16.mxu1 %v6513_v13  ;;  %v6569_v8 = vcombine.high %v365_v3, %v369_v4  ;;  %v377_v13 = vld [vmem:[#allocation7 + $0x4b8] sm:$0xff] }
 0x1ee   :  { %2997 = vmatpush1.bf16.msra.mxu0 %v6510_v16  ;;  %3161 = vmatpush1.bf16.msra.mxu1 %v6512_v17  ;;  %v6568_v16 = vcombine.low %v365_v3, %v369_v4  ;;  %v6575_v17 = vcombine.high %v372_v9, %v376_v10  ;;  %v433_v9 = vld [vmem:[#allocation7 + $0x678] sm:$0xff] }
 0x1ef   :  { %2998 = vmatprep.subr.bf16.mxu0 %v6519_v18  ;;  %3162 = vmatprep.subr.bf16.mxu1 %v6521_v21  ;;  %v6577_v18 = vcombine.high %v373_v11, %v377_v13  ;;  %v385_v21 = vld [vmem:[#allocation7 + $0x4f8] sm:$0xff] }
 0x1f0   :  { %v6584_v33 = vcombine.low %v381_v59, %v385_v21 }
 0x1f2   :  { %2999 = vmatpush1.bf16.msra.mxu0 %v6518_v23  ;;  %3163 = vmatpush1.bf16.msra.mxu1 %v6520_v24  ;;  %v6583_v23 = vcombine.high %v380_v19, %v384_v20  ;;  %v6585_v24 = vcombine.high %v381_v59, %v385_v21 }
 0x1f3   :  { %3000 = vmatprep.subr.bf16.mxu0 %v6527_v25  ;;  %3164 = vmatprep.subr.bf16.mxu1 %v6529_v31  ;;  %v388_v25 = vld [vmem:[#allocation7 + $0x510] sm:$0xff]  ;;  %v6582_v31 = vcombine.low %v380_v19, %v384_v20  ;;  %v441_v19 = vld [vmem:[#allocation7 + $0x6b8] sm:$0xff] }
 0x1f4   :  { %v6590_v39 = vcombine.low %v388_v25, %v392_v28 }
 0x1f6   :  { %3001 = vmatpush1.bf16.msra.mxu0 %v6526_v34  ;;  %3165 = vmatpush1.bf16.msra.mxu1 %v6528_v35  ;;  %v6591_v34 = vcombine.high %v388_v25, %v392_v28  ;;  %v396_v35 = vld [vmem:[#allocation7 + $0x550] sm:$0xff]  ;;  %v449_v25 = vld [vmem:[#allocation7 + $0x6f8] sm:$0xff] }
 0x1f7   :  { %3002 = vmatprep.subr.bf16.mxu0 %v6535_v36  ;;  %3166 = vmatprep.subr.bf16.mxu1 %v6537_v40  ;;  %v400_v36 = vld [vmem:[#allocation7 + $0x570] sm:$0xff]  ;;  %v6592_v40 = vcombine.low %v389_v29, %v393_v30 }
 0x1f8   :  { %v6599_v41 = vcombine.high %v396_v35, %v400_v36  ;;  %v6598_v26 = vcombine.low %v396_v35, %v400_v36  ;;  %v457_v35 = vld [vmem:[#allocation7 + $0x738] sm:$0xff] }
 0x1fa   :  { %3003 = vmatpush1.bf16.msra.mxu0 %v6534_v42  ;;  %3167 = vmatpush1.bf16.msra.mxu1 %v6536_v44  ;;  %v6601_v42 = vcombine.high %v397_v15, %v401_v38  ;;  %v404_v44 = vld [vmem:[#allocation7 + $0x590] sm:$0xff] }
 0x1fb   :  { %3004 = vmatprep.subr.bf16.mxu0 %v6543_v45  ;;  %3168 = vmatprep.subr.bf16.mxu1 %v6545_v46  ;;  %v408_v45 = vld [vmem:[#allocation7 + $0x5b0] sm:$0xff]  ;;  %v405_v46 = vld [vmem:[#allocation7 + $0x598] sm:$0xff] }
 0x1fc   :  { %v6607_v49 = vcombine.high %v404_v44, %v408_v45  ;;  %v6606_v57 = vcombine.low %v404_v44, %v408_v45  ;;  %v6608_v58 = vcombine.low %v405_v46, %v409_v47  ;;  %v465_v44 = vld [vmem:[#allocation7 + $0x778] sm:$0xff] }
 0x1fe   :  { %3005 = vmatpush1.bf16.msra.mxu0 %v6542_v50  ;;  %3169 = vmatpush1.bf16.msra.mxu1 %v6544_v51  ;;  %v6609_v50 = vcombine.high %v405_v46, %v409_v47  ;;  %v412_v51 = vld [vmem:[#allocation7 + $0x5d0] sm:$0xff] }
 0x1ff   :  { %3006 = vmatprep.subr.bf16.mxu0 %v6551_v54  ;;  %3170 = vmatprep.subr.bf16.mxu1 %v6553_v55  ;;  %v416_v54 = vld [vmem:[#allocation7 + $0x5f0] sm:$0xff]  ;;  %v413_v55 = vld [vmem:[#allocation7 + $0x5d8] sm:$0xff] }
 0x200   :  { %v6615_v60 = vcombine.high %v412_v51, %v416_v54  ;;  %v6614_v2 = vcombine.low %v412_v51, %v416_v54  ;;  %v6616_v3 = vcombine.low %v413_v55, %v417_v56  ;;  %v473_v51 = vld [vmem:[#allocation7 + $0x7b8] sm:$0xff] }
 0x202   :  { %3007 = vmatpush1.bf16.msra.mxu0 %v6550_v61  ;;  %3171 = vmatpush1.bf16.msra.mxu1 %v6552_v62  ;;  %v6617_v61 = vcombine.high %v413_v55, %v417_v56  ;;  %v420_v62 = vld [vmem:[#allocation7 + $0x610] sm:$0xff] }
 0x203   :  { %3017 = vmatprep.subr.bf16.mxu0 %v6559_v63  ;;  %3181 = vmatprep.subr.bf16.mxu1 %v6561_v0  ;;  %v424_v63 = vld [vmem:[#allocation7 + $0x630] sm:$0xff]  ;;  %v421_v0 = vld [vmem:[#allocation7 + $0x618] sm:$0xff] }
 0x204   :  { %v6623_v4 = vcombine.high %v420_v62, %v424_v63  ;;  %v6622_v10 = vcombine.low %v420_v62, %v424_v63  ;;  %v481_v62 = vld [vmem:[#allocation7 + $0x7f8] sm:$0xff] }
 0x205   :  { %3009 = vmatmul.mubr.bf16.vlgmr.msra.gmra.mrb[4].mxu0 %v8532_v12  ;;  %3173 = vmatmul.mubr.bf16.vlgmr.msra.gmra.mrb[4].mxu1 %v8532_v12  ;;  %v6576_v12 = vcombine.low %v373_v11, %v377_v13  ;;  %v6624_v11 = vcombine.low %v421_v0, %v425_v1 }
 0x206   :  { %3018 = vmatpush1.bf16.msra.mxu0 %v6558_v5  ;;  %3182 = vmatpush1.bf16.msra.mxu1 %v6560_v6  ;;  %v6625_v5 = vcombine.high %v421_v0, %v425_v1  ;;  %v428_v6 = vld [vmem:[#allocation7 + $0x650] sm:$0xff] }
 0x207   :  { %3019 = vmatprep.subr.bf16.mxu0 %v6567_v7  ;;  %3183 = vmatprep.subr.bf16.mxu1 %v6569_v8  ;;  %v432_v7 = vld [vmem:[#allocation7 + $0x670] sm:$0xff]  ;;  %v429_v8 = vld [vmem:[#allocation7 + $0x658] sm:$0xff] }
 0x208   :  { %3049 = vmatprep.mubr.bf16.mxu0 %v8538_v22  ;;  %3213 = vmatprep.mubr.bf16.mxu1 %v8538_v22  ;;  %v6593_v22 = vcombine.high %v389_v29, %v393_v30  ;;  %v6631_v13 = vcombine.high %v428_v6, %v432_v7  ;;  %v6630_v20 = vcombine.low %v428_v6, %v432_v7  ;;  %v489_v6 = vld [vmem:[#allocation7 + $0x838] sm:$0xff] }
 0x209   :  { %v6632_v59 = vcombine.low %v429_v8, %v433_v9 }
 0x20a   :  { %3020 = vmatpush1.bf16.msra.mxu0 %v6566_v14  ;;  %3184 = vmatpush1.bf16.msra.mxu1 %v6568_v16  ;;  %v6633_v14 = vcombine.high %v429_v8, %v433_v9  ;;  %v436_v16 = vld [vmem:[#allocation7 + $0x690] sm:$0xff] }
 0x20b   :  { %3021 = vmatprep.subr.bf16.mxu0 %v6575_v17  ;;  %3185 = vmatprep.subr.bf16.mxu1 %v6577_v18  ;;  %v440_v17 = vld [vmem:[#allocation7 + $0x6b0] sm:$0xff]  ;;  %v437_v18 = vld [vmem:[#allocation7 + $0x698] sm:$0xff] }
 0x20c   :  { %v6639_v21 = vcombine.high %v436_v16, %v440_v17  ;;  %v6638_v28 = vcombine.low %v436_v16, %v440_v17  ;;  %v6640_v29 = vcombine.low %v437_v18, %v441_v19  ;;  %v497_v16 = vld [vmem:[#allocation7 + $0x878] sm:$0xff] }
 0x20e   :  { %3022 = vmatpush1.bf16.msra.mxu0 %v6574_v53  ;;  %3186 = vmatpush1.bf16.msra.mxu1 %v6576_v12  ;;  %v6641_v53 = vcombine.high %v437_v18, %v441_v19  ;;  %v444_v12 = vld [vmem:[#allocation7 + $0x6d0] sm:$0xff] }
 0x20f   :  { %3023 = vmatprep.subr.bf16.mxu0 %v6583_v23  ;;  %3187 = vmatprep.subr.bf16.mxu1 %v6585_v24  ;;  %v448_v23 = vld [vmem:[#allocation7 + $0x6f0] sm:$0xff]  ;;  %v445_v24 = vld [vmem:[#allocation7 + $0x6d8] sm:$0xff] }
 0x210   :  { %v6647_v30 = vcombine.high %v444_v12, %v448_v23  ;;  %v6646_v36 = vcombine.low %v444_v12, %v448_v23  ;;  %v6648_v15 = vcombine.low %v445_v24, %v449_v25  ;;  %v505_v12 = vld [vmem:[#allocation7 + $0x8b8] sm:$0xff] }
 0x212   :  { %3024 = vmatpush1.bf16.msra.mxu0 %v6582_v31  ;;  %3188 = vmatpush1.bf16.msra.mxu1 %v6584_v33  ;;  %v6649_v31 = vcombine.high %v445_v24, %v449_v25  ;;  %v452_v33 = vld [vmem:[#allocation7 + $0x710] sm:$0xff] }
 0x213   :  { %3025 = vmatprep.subr.bf16.mxu0 %v6591_v34  ;;  %3189 = vmatprep.subr.bf16.mxu1 %v6593_v22  ;;  %v456_v34 = vld [vmem:[#allocation7 + $0x730] sm:$0xff]  ;;  %v453_v22 = vld [vmem:[#allocation7 + $0x718] sm:$0xff] }
 0x214   :  { %v6655_v38 = vcombine.high %v452_v33, %v456_v34  ;;  %v6654_v45 = vcombine.low %v452_v33, %v456_v34  ;;  %v6656_v46 = vcombine.low %v453_v22, %v457_v35  ;;  %v513_v33 = vld [vmem:[#allocation7 + $0x8f8] sm:$0xff] }
 0x216   :  { %3026 = vmatpush1.bf16.msra.mxu0 %v6590_v39  ;;  %3190 = vmatpush1.bf16.msra.mxu1 %v6592_v40  ;;  %v6657_v39 = vcombine.high %v453_v22, %v457_v35  ;;  %v460_v40 = vld [vmem:[#allocation7 + $0x750] sm:$0xff] }
 0x217   :  { %3027 = vmatprep.subr.bf16.mxu0 %v6599_v41  ;;  %3191 = vmatprep.subr.bf16.mxu1 %v6601_v42  ;;  %v464_v41 = vld [vmem:[#allocation7 + $0x770] sm:$0xff]  ;;  %v461_v42 = vld [vmem:[#allocation7 + $0x758] sm:$0xff] }
 0x218   :  { %v6663_v47 = vcombine.high %v460_v40, %v464_v41  ;;  %v6662_v54 = vcombine.low %v460_v40, %v464_v41  ;;  %v6664_v55 = vcombine.low %v461_v42, %v465_v44 }
 0x21a   :  { %3028 = vmatpush1.bf16.msra.mxu0 %v6598_v26  ;;  %3192 = vmatpush1.bf16.msra.mxu1 %v6600_v48  ;;  %v6665_v26 = vcombine.high %v461_v42, %v465_v44  ;;  %v468_v48 = vld [vmem:[#allocation7 + $0x790] sm:$0xff] }
 0x21b   :  { %3029 = vmatprep.subr.bf16.mxu0 %v6607_v49  ;;  %3193 = vmatprep.subr.bf16.mxu1 %v6609_v50  ;;  %v472_v49 = vld [vmem:[#allocation7 + $0x7b0] sm:$0xff]  ;;  %v469_v50 = vld [vmem:[#allocation7 + $0x798] sm:$0xff] }
 0x21c   :  { %v6671_v56 = vcombine.high %v468_v48, %v472_v49  ;;  %v6670_v63 = vcombine.low %v468_v48, %v472_v49  ;;  %v6672_v0 = vcombine.low %v469_v50, %v473_v51  ;;  %v524_v44 = vld [vmem:[#allocation7 + $0x950] sm:$0xff]  ;;  %v225_v48 = vld [vmem:[#allocation5] sm:$0xff] }
 0x21d   :  { %4021 = vperm.xlu0 %7374, %v225_v48   ;;  %v592_v48 = vld [vmem:[#allocation7 + $0xb70] sm:$0xff] }
 0x21e   :  { %3030 = vmatpush1.bf16.msra.mxu0 %v6606_v57  ;;  %3194 = vmatpush1.bf16.msra.mxu1 %v6608_v58  ;;  %v6673_v57 = vcombine.high %v469_v50, %v473_v51  ;;  %v476_v58 = vld [vmem:[#allocation7 + $0x7d0] sm:$0xff] }
 0x21f   :  { %3031 = vmatprep.subr.bf16.mxu0 %v6615_v60  ;;  %3195 = vmatprep.subr.bf16.mxu1 %v6617_v61  ;;  %v480_v60 = vld [vmem:[#allocation7 + $0x7f0] sm:$0xff]  ;;  %v477_v61 = vld [vmem:[#allocation7 + $0x7d8] sm:$0xff] }
 0x220   :  { %v6679_v1 = vcombine.high %v476_v58, %v480_v60  ;;  %v6678_v7 = vcombine.low %v476_v58, %v480_v60  ;;  %v6680_v8 = vcombine.low %v477_v61, %v481_v62 }
 0x222   :  { %3032 = vmatpush1.bf16.msra.mxu0 %v6614_v2  ;;  %3196 = vmatpush1.bf16.msra.mxu1 %v6616_v3  ;;  %v6681_v2 = vcombine.high %v477_v61, %v481_v62  ;;  %v484_v3 = vld [vmem:[#allocation7 + $0x810] sm:$0xff] }
 0x223   :  { %3033 = vmatprep.subr.bf16.mxu0 %v6623_v4  ;;  %3197 = vmatprep.subr.bf16.mxu1 %v6625_v5  ;;  %v488_v4 = vld [vmem:[#allocation7 + $0x830] sm:$0xff]  ;;  %v485_v5 = vld [vmem:[#allocation7 + $0x818] sm:$0xff] }
 0x224   :  { %v6687_v9 = vcombine.high %v484_v3, %v488_v4  ;;  %v6686_v17 = vcombine.low %v484_v3, %v488_v4  ;;  %v6688_v18 = vcombine.low %v485_v5, %v489_v6 }
 0x226   :  { %3034 = vmatpush1.bf16.msra.mxu0 %v6622_v10  ;;  %3198 = vmatpush1.bf16.msra.mxu1 %v6624_v11  ;;  %v6689_v10 = vcombine.high %v485_v5, %v489_v6  ;;  %v492_v11 = vld [vmem:[#allocation7 + $0x850] sm:$0xff] }
 0x227   :  { %3035 = vmatprep.subr.bf16.mxu0 %v6631_v13  ;;  %3199 = vmatprep.subr.bf16.mxu1 %v6633_v14  ;;  %v496_v13 = vld [vmem:[#allocation7 + $0x870] sm:$0xff]  ;;  %v493_v14 = vld [vmem:[#allocation7 + $0x858] sm:$0xff] }
 0x228   :  { %v6695_v19 = vcombine.high %v492_v11, %v496_v13  ;;  %v6694_v23 = vcombine.low %v492_v11, %v496_v13  ;;  %v6696_v24 = vcombine.low %v493_v14, %v497_v16 }
 0x22a   :  { %3036 = vmatpush1.bf16.msra.mxu0 %v6630_v20  ;;  %3200 = vmatpush1.bf16.msra.mxu1 %v6632_v59  ;;  %v6697_v20 = vcombine.high %v493_v14, %v497_v16  ;;  %v500_v59 = vld [vmem:[#allocation7 + $0x890] sm:$0xff] }
 0x22b   :  { %3037 = vmatprep.subr.bf16.mxu0 %v6639_v21  ;;  %3201 = vmatprep.subr.bf16.mxu1 %v6641_v53  ;;  %v504_v21 = vld [vmem:[#allocation7 + $0x8b0] sm:$0xff]  ;;  %v501_v53 = vld [vmem:[#allocation7 + $0x898] sm:$0xff] }
 0x22c   :  { %v6703_v25 = vcombine.high %v500_v59, %v504_v21  ;;  %v6702_v34 = vcombine.low %v500_v59, %v504_v21 }
 0x22e   :  { %3038 = vmatpush1.bf16.msra.mxu0 %v6638_v28  ;;  %3202 = vmatpush1.bf16.msra.mxu1 %v6640_v29  ;;  %v6705_v28 = vcombine.high %v501_v53, %v505_v12  ;;  %v508_v29 = vld [vmem:[#allocation7 + $0x8d0] sm:$0xff] }
 0x22f   :  { %3039 = vmatprep.subr.bf16.mxu0 %v6647_v30  ;;  %3203 = vmatprep.subr.bf16.mxu1 %v6649_v31  ;;  %v512_v30 = vld [vmem:[#allocation7 + $0x8f0] sm:$0xff]  ;;  %v509_v31 = vld [vmem:[#allocation7 + $0x8d8] sm:$0xff] }
 0x230   :  { %v6711_v22 = vcombine.high %v508_v29, %v512_v30  ;;  %v6713_v35 = vcombine.high %v509_v31, %v513_v33  ;;  %v6710_v40 = vcombine.low %v508_v29, %v512_v30  ;;  %v6712_v41 = vcombine.low %v509_v31, %v513_v33 }
 0x232   :  { %3040 = vmatpush1.bf16.msra.mxu0 %v6646_v36  ;;  %3204 = vmatpush1.bf16.msra.mxu1 %v6648_v15  ;;  %v516_v36 = vld [vmem:[#allocation7 + $0x910] sm:$0xff] }
 0x233   :  { %3041 = vmatprep.subr.bf16.mxu0 %v6655_v38  ;;  %3205 = vmatprep.subr.bf16.mxu1 %v6657_v39  ;;  %v520_v15 = vld [vmem:[#allocation7 + $0x930] sm:$0xff]  ;;  %v517_v38 = vld [vmem:[#allocation7 + $0x918] sm:$0xff] }
 0x234   :  { %v521_v39 = vld [vmem:[#allocation7 + $0x938] sm:$0xff]  ;;  %v6719_v42 = vcombine.high %v516_v36, %v520_v15 }
 0x235   :  { %v6720_v49 = vcombine.low %v517_v38, %v521_v39 }
 0x236   :  { %3042 = vmatpush1.bf16.msra.mxu0 %v6654_v45  ;;  %3206 = vmatpush1.bf16.msra.mxu1 %v6656_v46  ;;  %v528_v45 = vld [vmem:[#allocation7 + $0x970] sm:$0xff]  ;;  %v525_v46 = vld [vmem:[#allocation7 + $0x958] sm:$0xff] }
 0x237   :  { %3043 = vmatprep.subr.bf16.mxu0 %v6663_v47  ;;  %3207 = vmatprep.subr.bf16.mxu1 %v6665_v26  ;;  %v529_v47 = vld [vmem:[#allocation7 + $0x978] sm:$0xff]  ;;  %v6718_v26 = vcombine.low %v516_v36, %v520_v15  ;;  %v6727_v50 = vcombine.high %v524_v44, %v528_v45  ;;  %v6726_v58 = vcombine.low %v524_v44, %v528_v45 }
 0x238   :  { %v6729_v51 = vcombine.high %v525_v46, %v529_v47  ;;  %v6728_v60 = vcombine.low %v525_v46, %v529_v47 }
 0x23a   :  { %3044 = vmatpush1.bf16.msra.mxu0 %v6662_v54  ;;  %3208 = vmatpush1.bf16.msra.mxu1 %v6664_v55  ;;  %v532_v54 = vld [vmem:[#allocation7 + $0x990] sm:$0xff] }
 0x23b   :  { %3045 = vmatprep.subr.bf16.mxu0 %v6671_v56  ;;  %3209 = vmatprep.subr.bf16.mxu1 %v6673_v57  ;;  %v536_v55 = vld [vmem:[#allocation7 + $0x9b0] sm:$0xff]  ;;  %v533_v56 = vld [vmem:[#allocation7 + $0x998] sm:$0xff] }
 0x23c   :  { %v537_v57 = vld [vmem:[#allocation7 + $0x9b8] sm:$0xff]  ;;  %v6735_v61 = vcombine.high %v532_v54, %v536_v55  ;;  %v6734_v3 = vcombine.low %v532_v54, %v536_v55 }
 0x23d   :  { %v6737_v62 = vcombine.high %v533_v56, %v537_v57  ;;  %v6736_v4 = vcombine.low %v533_v56, %v537_v57  ;;  %v596_v57 = vld [vmem:[#allocation7 + $0xb90] sm:$0xff] }
 0x23e   :  { %3046 = vmatpush1.bf16.msra.mxu0 %v6670_v63  ;;  %3210 = vmatpush1.bf16.msra.mxu1 %v6672_v0  ;;  %v540_v63 = vld [vmem:[#allocation7 + $0x9d0] sm:$0xff] }
 0x23f   :  { %3047 = vmatprep.subr.bf16.mxu0 %v6679_v1  ;;  %3211 = vmatprep.subr.bf16.mxu1 %v6681_v2  ;;  %v544_v0 = vld [vmem:[#allocation7 + $0x9f0] sm:$0xff]  ;;  %v541_v1 = vld [vmem:[#allocation7 + $0x9d8] sm:$0xff] }
 0x240   :  { %v545_v2 = vld [vmem:[#allocation7 + $0x9f8] sm:$0xff]  ;;  %v6743_v5 = vcombine.high %v540_v63, %v544_v0  ;;  %v6742_v11 = vcombine.low %v540_v63, %v544_v0 }
 0x241   :  { %v6745_v6 = vcombine.high %v541_v1, %v545_v2  ;;  %v6744_v13 = vcombine.low %v541_v1, %v545_v2  ;;  %v604_v2 = vld [vmem:[#allocation7 + $0xbd0] sm:$0xff] }
 0x242   :  { %3048 = vmatpush1.bf16.msra.mxu0 %v6678_v7  ;;  %3212 = vmatpush1.bf16.msra.mxu1 %v6680_v8  ;;  %v548_v7 = vld [vmem:[#allocation7 + $0xa10] sm:$0xff] }
 0x243   :  { %3058 = vmatprep.subr.bf16.mxu0 %v6687_v9  ;;  %3222 = vmatprep.subr.bf16.mxu1 %v6689_v10  ;;  %v552_v8 = vld [vmem:[#allocation7 + $0xa30] sm:$0xff]  ;;  %v549_v9 = vld [vmem:[#allocation7 + $0xa18] sm:$0xff] }
 0x244   :  { %v553_v10 = vld [vmem:[#allocation7 + $0xa38] sm:$0xff]  ;;  %v6751_v14 = vcombine.high %v548_v7, %v552_v8  ;;  %v6750_v59 = vcombine.low %v548_v7, %v552_v8 }
 0x245   :  { %3050 = vmatmul.mubr.bf16.vlgmr.msra.gmra.mrb[4].mxu0 %v8549_v27  ;;  %3214 = vmatmul.mubr.bf16.vlgmr.msra.gmra.mrb[4].mxu1 %v8549_v27  ;;  %v6704_v27 = vcombine.low %v501_v53, %v505_v12  ;;  %v6753_v16 = vcombine.high %v549_v9, %v553_v10  ;;  %v6752_v21 = vcombine.low %v549_v9, %v553_v10  ;;  %v612_v10 = vld [vmem:[#allocation7 + $0xc10] sm:$0xff] }
 0x246   :  { %3059 = vmatpush1.bf16.msra.mxu0 %v6686_v17  ;;  %3223 = vmatpush1.bf16.msra.mxu1 %v6688_v18  ;;  %v556_v17 = vld [vmem:[#allocation7 + $0xa50] sm:$0xff] }
 0x247   :  { %3060 = vmatprep.subr.bf16.mxu0 %v6695_v19  ;;  %3224 = vmatprep.subr.bf16.mxu1 %v6697_v20  ;;  %v560_v18 = vld [vmem:[#allocation7 + $0xa70] sm:$0xff]  ;;  %v557_v19 = vld [vmem:[#allocation7 + $0xa58] sm:$0xff] }
 0x248   :  { %3090 = vmatprep.mubr.bf16.mxu0 %v8553_v37  ;;  %3254 = vmatprep.mubr.bf16.mxu1 %v8553_v37  ;;  %v6721_v37 = vcombine.high %v517_v38, %v521_v39  ;;  %v561_v20 = vld [vmem:[#allocation7 + $0xa78] sm:$0xff]  ;;  %v6759_v53 = vcombine.high %v556_v17, %v560_v18  ;;  %v6758_v29 = vcombine.low %v556_v17, %v560_v18 }
 0x249   :  { %v6761_v12 = vcombine.high %v557_v19, %v561_v20  ;;  %v6760_v30 = vcombine.low %v557_v19, %v561_v20 }
 0x24a   :  { %3061 = vmatpush1.bf16.msra.mxu0 %v6694_v23  ;;  %3225 = vmatpush1.bf16.msra.mxu1 %v6696_v24  ;;  %v564_v23 = vld [vmem:[#allocation7 + $0xa90] sm:$0xff] }
 0x24b   :  { %3062 = vmatprep.subr.bf16.mxu0 %v6703_v25  ;;  %3226 = vmatprep.subr.bf16.mxu1 %v6705_v28  ;;  %v568_v24 = vld [vmem:[#allocation7 + $0xab0] sm:$0xff]  ;;  %v565_v25 = vld [vmem:[#allocation7 + $0xa98] sm:$0xff] }
 0x24c   :  { %v569_v28 = vld [vmem:[#allocation7 + $0xab8] sm:$0xff]  ;;  %v6767_v31 = vcombine.high %v564_v23, %v568_v24  ;;  %v6766_v36 = vcombine.low %v564_v23, %v568_v24  ;;  %v7416_v24 = vld [vmem:[#allocation13] sm:$0xff]  }
 0x24d   :  { %v6769_v33 = vcombine.high %v565_v25, %v569_v28  ;;  %v6768_v15 = vcombine.low %v565_v25, %v569_v28  ;;  %v7383_v25 = vld [vmem:[#allocation10] sm:$0xff]   ;;  %v7418_v28 = vld [vmem:[#allocation13 + $0x48] sm:$0xff]  }
 0x24e   :  { %3063 = vmatpush1.bf16.msra.mxu0 %v6702_v34  ;;  %3227 = vmatpush1.bf16.msra.mxu1 %v6704_v27  ;;  %v572_v34 = vld [vmem:[#allocation7 + $0xad0] sm:$0xff] }
 0x24f   :  { %3064 = vmatprep.subr.bf16.mxu0 %v6711_v22  ;;  %3228 = vmatprep.subr.bf16.mxu1 %v6713_v35  ;;  %v576_v27 = vld [vmem:[#allocation7 + $0xaf0] sm:$0xff]  ;;  %v573_v22 = vld [vmem:[#allocation7 + $0xad8] sm:$0xff] }
 0x250   :  { %v577_v35 = vld [vmem:[#allocation7 + $0xaf8] sm:$0xff]  ;;  %v6775_v38 = vcombine.high %v572_v34, %v576_v27  ;;  %v6774_v44 = vcombine.low %v572_v34, %v576_v27 }
 0x251   :  { %v6777_v39 = vcombine.high %v573_v22, %v577_v35  ;;  %v6776_v45 = vcombine.low %v573_v22, %v577_v35  ;;  %v7422_v34 = vld [vmem:[#allocation13 + $0x50] sm:$0xff]  }
 0x252   :  { %3065 = vmatpush1.bf16.msra.mxu0 %v6710_v40  ;;  %3229 = vmatpush1.bf16.msra.mxu1 %v6712_v41  ;;  %v580_v40 = vld [vmem:[#allocation7 + $0xb10] sm:$0xff]  ;;  %v7386_v27 = vld [vmem:[#allocation10 + $0x50] sm:$0xff]  }
 0x253   :  { %3066 = vmatprep.subr.bf16.mxu0 %v6719_v42  ;;  %3230 = vmatprep.subr.bf16.mxu1 %v6721_v37  ;;  %v584_v41 = vld [vmem:[#allocation7 + $0xb30] sm:$0xff]  ;;  %v581_v42 = vld [vmem:[#allocation7 + $0xb18] sm:$0xff] }
 0x254   :  { %v585_v37 = vld [vmem:[#allocation7 + $0xb38] sm:$0xff]  ;;  %v6783_v46 = vcombine.high %v580_v40, %v584_v41 }
 0x255   :  { %v6785_v47 = vcombine.high %v581_v42, %v585_v37  ;;  %v6784_v54 = vcombine.low %v581_v42, %v585_v37  ;;  %v7424_v35 = vld [vmem:[#allocation13 + $0x10] sm:$0xff]  }
 0x256   :  { %3067 = vmatpush1.bf16.msra.mxu0 %v6718_v26  ;;  %3231 = vmatpush1.bf16.msra.mxu1 %v6720_v49  ;;  %v588_v26 = vld [vmem:[#allocation7 + $0xb50] sm:$0xff]  ;;  %v589_v49 = vld [vmem:[#allocation7 + $0xb58] sm:$0xff] }
 0x257   :  { %3068 = vmatprep.subr.bf16.mxu0 %v6727_v50  ;;  %3232 = vmatprep.subr.bf16.mxu1 %v6729_v51  ;;  %v593_v50 = vld [vmem:[#allocation7 + $0xb78] sm:$0xff]  ;;  %v6782_v51 = vcombine.low %v580_v40, %v584_v41  ;;  %v6791_v55 = vcombine.high %v588_v26, %v592_v48 }
 0x258   :  { %v6793_v56 = vcombine.high %v589_v49, %v593_v50  ;;  %v6792_v63 = vcombine.low %v589_v49, %v593_v50  ;;  %v7390_v50 = vld [vmem:[#allocation10 + $0x60] sm:$0xff]  }
 0x25a   :  { %3069 = vmatpush1.bf16.msra.mxu0 %v6726_v58  ;;  %3233 = vmatpush1.bf16.msra.mxu1 %v6728_v60  ;;  %v600_v58 = vld [vmem:[#allocation7 + $0xbb0] sm:$0xff]  ;;  %v597_v60 = vld [vmem:[#allocation7 + $0xb98] sm:$0xff] }
 0x25b   :  { %3070 = vmatprep.subr.bf16.mxu0 %v6735_v61  ;;  %3234 = vmatprep.subr.bf16.mxu1 %v6737_v62  ;;  %v601_v61 = vld [vmem:[#allocation7 + $0xbb8] sm:$0xff]  ;;  %v6790_v62 = vcombine.low %v588_v26, %v592_v48  ;;  %v6799_v0 = vcombine.high %v596_v57, %v600_v58  ;;  %v7430_v26 = vld [vmem:[#allocation13 + $0x60] sm:$0xff]  }
 0x25c   :  { %v6801_v1 = vcombine.high %v597_v60, %v601_v61  ;;  %v6800_v7 = vcombine.low %v597_v60, %v601_v61  ;;  %v7436_v61 = vld [vmem:[#allocation13 + $0x28] sm:$0xff]  }
 0x25e   :  { %3071 = vmatpush1.bf16.msra.mxu0 %v6734_v3  ;;  %3235 = vmatpush1.bf16.msra.mxu1 %v6736_v4  ;;  %v608_v3 = vld [vmem:[#allocation7 + $0xbf0] sm:$0xff]  ;;  %v605_v4 = vld [vmem:[#allocation7 + $0xbd8] sm:$0xff] }
 0x25f   :  { %3072 = vmatprep.subr.bf16.mxu0 %v6743_v5  ;;  %3236 = vmatprep.subr.bf16.mxu1 %v6745_v6  ;;  %v609_v5 = vld [vmem:[#allocation7 + $0xbf8] sm:$0xff]  ;;  %v6798_v6 = vcombine.low %v596_v57, %v600_v58  ;;  %v6807_v8 = vcombine.high %v604_v2, %v608_v3  ;;  %v7392_v58 = vld [vmem:[#allocation10 + $0x68] sm:$0xff]  }
 0x260   :  { %v6809_v9 = vcombine.high %v605_v4, %v609_v5  ;;  %v6808_v17 = vcombine.low %v605_v4, %v609_v5  ;;  %v7396_v4 = vld [vmem:[#allocation10 + $0x78] sm:$0xff]  }
 0x262   :  { %3073 = vmatpush1.bf16.msra.mxu0 %v6742_v11  ;;  %3237 = vmatpush1.bf16.msra.mxu1 %v6744_v13  ;;  %v616_v11 = vld [vmem:[#allocation7 + $0xc30] sm:$0xff]  ;;  %v613_v13 = vld [vmem:[#allocation7 + $0xc18] sm:$0xff] }
 0x263   :  { %3074 = vmatprep.subr.bf16.mxu0 %v6751_v14  ;;  %3238 = vmatprep.subr.bf16.mxu1 %v6753_v16  ;;  %v617_v14 = vld [vmem:[#allocation7 + $0xc38] sm:$0xff]  ;;  %v6806_v16 = vcombine.low %v604_v2, %v608_v3  ;;  %v6815_v18 = vcombine.high %v612_v10, %v616_v11  ;;  %v6814_v20 = vcombine.low %v612_v10, %v616_v11  ;;  %v7399_v10 = vld [vmem:[#allocation10 + $0x80] sm:$0xff]  }
 0x264   :  { %v6817_v19 = vcombine.high %v613_v13, %v617_v14  ;;  %v7395_v2 = vld [vmem:[#allocation10 + $0x30] sm:$0xff]  }
 0x266   :  { %3075 = vmatpush1.bf16.msra.mxu0 %v6750_v59  ;;  %3239 = vmatpush1.bf16.msra.mxu1 %v6752_v21  ;;  %v6816_v59 = vcombine.low %v613_v13, %v617_v14  ;;  %v7382_v21 = vld [vmem:[#allocation10 + $0x40] sm:$0xff]   ;;  %v7400_v13 = vld [vmem:[#allocation10 + $0xc8] sm:$0xff]  }
 0x267   :  { %3076 = vmatprep.subr.bf16.mxu0 %v6759_v53  ;;  %3240 = vmatprep.subr.bf16.mxu1 %v6761_v12  ;;  %v7414_v53 = vld [vmem:[#allocation13 + $0x40] sm:$0xff]   ;;  %v620_v12 = vlaneseq }
 0x269   :  { %v8588_v23 = vshrl.u32 %v620_v12, 7 }
 0x26a   :  { %3077 = vmatpush1.bf16.msra.mxu0 %v6758_v29  ;;  %3241 = vmatpush1.bf16.msra.mxu1 %v6760_v30  ;;  %v7384_v29 = vld [vmem:[#allocation10 + $0x48] sm:$0xff]  }
 0x26b   :  { %3078 = vmatprep.subr.bf16.mxu0 %v6767_v31  ;;  %3242 = vmatprep.subr.bf16.mxu1 %v6769_v33  ;;  %v7420_v30 = vld [vmem:[#allocation13 + $0x8] sm:$0xff]   ;;  %v8597_v33 = vld [vmem:[#allocation8] sm:$0xff]  ;;  %v8604_v57 = vsub.s32 0, %v8588_v23  ;;  %v8607_v60 = vsub.s32 3, %v8588_v23 }
 0x26c   :  { %v7385_v31 = vld [vmem:[#allocation10 + $0x8] sm:$0xff]  }
 0x26e   :  { %3079 = vmatpush1.bf16.msra.mxu0 %v6766_v36  ;;  %3243 = vmatpush1.bf16.msra.mxu1 %v6768_v15  ;;  %v7426_v36 = vld [vmem:[#allocation13 + $0x58] sm:$0xff]  }
 0x26f   :  { %3080 = vmatprep.subr.bf16.mxu0 %v6775_v38  ;;  %3244 = vmatprep.subr.bf16.mxu1 %v6777_v39  ;;  %v7388_v38 = vld [vmem:[#allocation10 + $0x58] sm:$0xff]  }
 0x272   :  { %3081 = vmatpush1.bf16.msra.mxu0 %v6774_v44  ;;  %3245 = vmatpush1.bf16.msra.mxu1 %v6776_v45  ;;  %v7428_v44 = vld [vmem:[#allocation13 + $0x18] sm:$0xff]  }
 0x273   :  { %3082 = vmatprep.subr.bf16.mxu0 %v6783_v46  ;;  %3246 = vmatprep.subr.bf16.mxu1 %v6785_v47  ;;  %v7389_v47 = vld [vmem:[#allocation10 + $0x18] sm:$0xff]  }
 0x276   :  { %3083 = vmatpush1.bf16.msra.mxu0 %v6782_v51  ;;  %3247 = vmatpush1.bf16.msra.mxu1 %v6784_v54  ;;  %v7432_v54 = vld [vmem:[#allocation13 + $0x20] sm:$0xff]  }
 0x277   :  { %3084 = vmatprep.subr.bf16.mxu0 %v6791_v55  ;;  %3248 = vmatprep.subr.bf16.mxu1 %v6793_v56  ;;  %v7391_v55 = vld [vmem:[#allocation10 + $0x20] sm:$0xff]   ;;  %v7434_v56 = vld [vmem:[#allocation13 + $0x68] sm:$0xff]  }
 0x27a   :  { %3085 = vmatpush1.bf16.msra.mxu0 %v6790_v62  ;;  %3249 = vmatpush1.bf16.msra.mxu1 %v6792_v63  ;;  %v7393_v62 = vld [vmem:[#allocation10 + $0x28] sm:$0xff]   ;;  %v623_v63 = vrot.slane %v8597_v33, %v8604_v57 }
 0x27b   :  { %3086 = vmatprep.subr.bf16.mxu0 %v6799_v0  ;;  %3250 = vmatprep.subr.bf16.mxu1 %v6801_v1  ;;  %v7394_v0 = vld [vmem:[#allocation10 + $0x70] sm:$0xff]   ;;  %v635_v1 = vrot.slane %v8597_v33, %v8607_v60 }
 0x27e   :  { %3087 = vmatpush1.bf16.msra.mxu0 %v6798_v6  ;;  %3251 = vmatpush1.bf16.msra.mxu1 %v6800_v7  ;;  %v7397_v6 = vld [vmem:[#allocation10 + $0x38] sm:$0xff]  }
 0x27f   :  { %3088 = vmatprep.subr.bf16.mxu0 %v6807_v8  ;;  %3252 = vmatprep.subr.bf16.mxu1 %v6809_v9  ;;  %v7398_v8 = vld [vmem:[#allocation10 + $0xc0] sm:$0xff]  }
 0x282   :  { %3089 = vmatpush1.bf16.msra.mxu0 %v6806_v16  ;;  %3253 = vmatpush1.bf16.msra.mxu1 %v6808_v17  ;;  %v7401_v16 = vld [vmem:[#allocation10 + $0x88] sm:$0xff]   ;;  %v7402_v17 = vld [vmem:[#allocation10 + $0xd0] sm:$0xff]  }
 0x283   :  { %3099 = vmatprep.subr.bf16.mxu0 %v6815_v18  ;;  %3263 = vmatprep.subr.bf16.mxu1 %v6817_v19  ;;  %v7403_v18 = vld [vmem:[#allocation10 + $0x90] sm:$0xff]   ;;  %v7404_v19 = vld [vmem:[#allocation10 + $0xd8] sm:$0xff]  }
 0x285   :  { %3091 = vmatmul.mubr.bf16.vlgmr.msra.gmra.mrb[4].mxu0 %v8561_v43  ;;  %3255 = vmatmul.mubr.bf16.vlgmr.msra.gmra.mrb[4].mxu1 %v8561_v43  ;;  %v8595_v43 = vsub.s32 1, %v8588_v23 }
 0x286   :  { %3100 = vmatpush1.bf16.msra.mxu0 %v6814_v20  ;;  %3264 = vmatpush1.bf16.msra.mxu1 %v6816_v59  ;;  %v7405_v20 = vld [vmem:[#allocation10 + $0x98] sm:$0xff]   ;;  %v7406_v59 = vld [vmem:[#allocation10 + $0xe0] sm:$0xff]  }
 0x287   :  { %3131 = vmatprep.mubr.bf16.mxu0 %v8253_v32  ;;  %3295 = vmatprep.mubr.bf16.mxu1 %v8253_v32  ;;  %v627_v22 = vrot.slane %v8597_v33, %v8595_v43 }
 0x288   :  { %7133 = vmatprep.subr.bf16.mxu1 %v7382_v21  ;;  %7177 = vmatprep.subr.bf16.mxu0 %v7414_v53  ;;  %v7407_v21 = vld [vmem:[#allocation10 + $0xa0] sm:$0xff]   ;;  %v8614_v53 = vsub.s32 2, %v8588_v23 }
 0x291   :  { %6820 = vmatmul.mubr.msk.bf16.vlgmr.msra.gmra.mrb[4].mxu0 %vm2644_vm0, %v8567_v52  ;;  %6821 = vmatmul.mubr.msk.bf16.vlgmr.msra.gmra.mrb[4].mxu1 %vm2644_vm0, %v8567_v52  ;;  %v7387_v52 = vld [vmem:[#allocation10 + $0x10] sm:$0xff]  }
 0x292   :  { %7178 = vmatpush3.bf16.msra.mxu0 %v7416_v24  ;;  %7134 = vmatpush3.bf16.msra.mxu1 %v7383_v25  ;;  %v7408_v24 = vld [vmem:[#allocation10 + $0xe8] sm:$0xff]  }
 0x293   :  { %7179 = vmatprep.subr.bf16.mxu0 %v7418_v28  ;;  %7135 = vmatprep.subr.bf16.mxu1 %v7384_v29  ;;  %v7409_v25 = vld [vmem:[#allocation10 + $0xa8] sm:$0xff]   ;;  %v631_v28 = vrot.slane %v8597_v33, %v8614_v53  ;;  %v7410_v29 = vld [vmem:[#allocation10 + $0xf0] sm:$0xff]  }
 0x296   :  { %7180 = vmatpush3.bf16.msra.mxu0 %v7420_v30  ;;  %7136 = vmatpush3.bf16.msra.mxu1 %v7385_v31  ;;  %v7411_v30 = vld [vmem:[#allocation10 + $0xb0] sm:$0xff]  }
 0x297   :  { %7181 = vmatprep.subr.bf16.mxu0 %v7422_v34  ;;  %7137 = vmatprep.subr.bf16.mxu1 %v7386_v27  ;;  %v7412_v34 = vld [vmem:[#allocation10 + $0xf8] sm:$0xff]  }
 0x298   :  { %v2805_v15 = vpop.f32.mrb[0].mxu0  ;;  %v8601_v39 = vpop.f32.mrb[0].mxu1  ;;  %v7413_v27 = vld [vmem:[#allocation10 + $0xb8] sm:$0xff]  }
 0x299   :  { %v2807_v40 = vpop.f32.mrb[1].mxu0  ;;  %v2971_v42 = vpop.f32.mrb[1].mxu1  ;;  %v7265_v3 = vadd.f32 %v2805_v15, %v623_v63  ;;  %v7267_v31 = vadd.f32 %v8601_v39, %v631_v28  ;;  %v7419_v15 = vld [vmem:[#allocation13 + $0xc8] sm:$0xff]   ;;  %v7427_v39 = vld [vmem:[#allocation13 + $0xd8] sm:$0xff]   ;;  %v642_v63 = vsub.s32 5, %v8588_v23 }
 0x29a   :  { %v7266_v41 = vadd.f32 %v2807_v40, %v627_v22  ;;  %v2809_v37 = vpop.f32.mrb[2].mxu0  ;;  %7182 = vmatpush3.bf16.msra.mxu0 %v7424_v35  ;;  %7138 = vmatpush3.bf16.msra.mxu1 %v7387_v52  ;;  %v2973_v45 = vpop.f32.mrb[2].mxu1  ;;  %v7268_v5 = vadd.f32 %v2971_v42, %v635_v1  ;;  %v7415_v35 = vld [vmem:[#allocation13 + $0xc0] sm:$0xff]   ;;  %v7423_v40 = vld [vmem:[#allocation13 + $0xd0] sm:$0xff]   ;;  %v7429_v42 = vld [vmem:[#allocation13 + $0x98] sm:$0xff]  }
 0x29b   :  { %v2810_v46 = vpop.f32.mrb[3].mxu0  ;;  %7183 = vmatprep.subr.bf16.mxu0 %v7426_v36  ;;  %v2974_v49 = vpop.f32.mrb[3].mxu1  ;;  %7139 = vmatprep.subr.bf16.mxu1 %v7388_v38  ;;  %v3304_v7 = vmax.f32 %v7265_v3, 0.0  ;;  %v3306_v22 = vmax.f32 %v7267_v31, 0.0  ;;  %v7417_v52 = vld [vmem:[#allocation13 + $0x80] sm:$0xff]   ;;  %v7421_v38 = vld [vmem:[#allocation13 + $0x88] sm:$0xff]   ;;  %v643_v3 = vrot.slane %v8597_v33, %v642_v63 }
 0x29c   :  { %v3305_v48 = vmax.f32 %v7266_v41, 0.0  ;;  %v3307_v9 = vmax.f32 %v7268_v5, 0.0  ;;  %v7425_v41 = vld [vmem:[#allocation13 + $0x90] sm:$0xff]   ;;  %v7431_v37 = vld [vmem:[#allocation13 + $0xe0] sm:$0xff]   ;;  %v7435_v45 = vld [vmem:[#allocation13 + $0xe8] sm:$0xff]  }
 0x29d   :  { %v3312_v11 = vpack.c.bf16 %v3304_v7, %v3304_v7  ;;  %v3314_v36 = vpack.c.bf16 %v3306_v22, %v3306_v22  ;;  %v7437_v46 = vld [vmem:[#allocation13 + $0xa8] sm:$0xff]   ;;  %v7441_v49 = vld [vmem:[#allocation13 + $0xb0] sm:$0xff]  }
 0x29e   :  { %v3313_v51 = vpack.c.bf16 %v3305_v48, %v3305_v48  ;;  %7184 = vmatpush3.bf16.msra.mxu0 %v7428_v44  ;;  %7140 = vmatpush3.bf16.msra.mxu1 %v7389_v47  ;;  %v3315_v14 = vpack.c.bf16 %v3307_v9, %v3307_v9  ;;  %v7433_v44 = vld [vmem:[#allocation13 + $0xa0] sm:$0xff]   ;;  %v7438_v47 = vld [vmem:[#allocation13 + $0x70] sm:$0xff]  }
 0x29f   :  { %7185 = vmatprep.subr.bf16.mxu0 %v7430_v26  ;;  %7141 = vmatprep.subr.bf16.mxu1 %v7390_v50  ;;  %v7439_v26 = vld [vmem:[#allocation13 + $0xf0] sm:$0xff]   ;;  %v7442_v50 = vld [vmem:[#allocation13 + $0x78] sm:$0xff]  }
 0x2a0   :  { %3615 = vmatprep.mubr.bf16.mxu1 %v3313_v51  ;;  %v7440_v48 = vld [vmem:[#allocation13 + $0x30] sm:$0xff]   ;;  %v7443_v51 = vld [vmem:[#allocation13 + $0xf8] sm:$0xff]  }
 0x2a1   :  { %v7454_v22 = vld [vmem:[#allocation16 + $0x4] ss:$16 sps:$4 sm:$0xff]  }
 0x2a2   :  { %7186 = vmatpush3.bf16.msra.mxu0 %v7432_v54  ;;  %7142 = vmatpush3.bf16.msra.mxu1 %v7391_v55  ;;  %v7444_v54 = vld [vmem:[#allocation13 + $0x38] sm:$0xff]  }
 0x2a3   :  { %7187 = vmatprep.subr.bf16.mxu0 %v7434_v56  ;;  %7143 = vmatprep.subr.bf16.mxu1 %v7392_v58  ;;  %v7445_v55 = vld [vmem:[#allocation13 + $0xb8] sm:$0xff]  }
 0x2a4   :  { %v7446_v56 = vld [vmem:[#allocation17 + $0x4] ss:$16 sps:$4 sm:$0x1f]   ;;  %v7448_v58 = vld [vmem:[#allocation17 + $0xc] ss:$16 sps:$4 sm:$0x1f]  }
 0x2a6   :  { %7188 = vmatpush3.bf16.msra.mxu0 %v7436_v61  ;;  %7144 = vmatpush3.bf16.msra.mxu1 %v7393_v62  ;;  %v638_v61 = vsub.s32 4, %v8588_v23  ;;  %v646_v62 = vsub.s32 6, %v8588_v23 }
 0x2a7   :  { %7145 = vmatprep.subr.bf16.mxu1 %v7394_v0  ;;  %7189 = vmatprep.subr.bf16.mxu0 %v7438_v47  ;;  %v650_v0 = vsub.s32 7, %v8588_v23 }
 0x2a8   :  { %v639_v1 = vrot.slane %v8597_v33, %v638_v61 }
 0x2aa   :  { %7146 = vmatpush3.bf16.msra.mxu1 %v7395_v2  ;;  %7190 = vmatpush3.bf16.msra.mxu0 %v7440_v48  ;;  %v647_v2 = vrot.slane %v8597_v33, %v646_v62 }
 0x2ab   :  { %7147 = vmatprep.subr.bf16.mxu1 %v7396_v4  ;;  %7191 = vmatprep.subr.bf16.mxu0 %v7442_v50  ;;  %v651_v4 = vrot.slane %v8597_v33, %v650_v0  ;;  %v7451_v33 = vld [vmem:[#allocation17 + $0x8] ss:$16 sps:$4 sm:$0x1f]  }
 0x2ae   :  { %7148 = vmatpush3.bf16.msra.mxu1 %v7397_v6  ;;  %7192 = vmatpush3.bf16.msra.mxu0 %v7444_v54  ;;  %v6822_v54 = vld [vmem:[#allocation11] ss:$0 sm:$0xff] }
 0x2af   :  { %7155 = vmatprep.subr.bf16.mxu1 %v7398_v8  ;;  %6893 = vmatprep.subr.msk.bf16.mxu0 %vm4057_vm1, %v7446_v56 }
 0x2b1   :  { %3616 = vmatmul.mubr.bf16.vlgmr.msra.gmra.mrb[8].mxu1 %v3312_v11 }
 0x2b2   :  { %7156 = vmatpush3.bf16.msra.mxu1 %v7399_v10  ;;  %3655 = vmatprep.mubr.bf16.mxu1 %v3315_v14  ;;  %v4019_v14 = vand.u32 127, %v620_v12  ;;  %v4065_v12 = vsel %vm4057_vm1, %v7451_v33, 0  ;;  %v7489_v33 = vld [vmem:[#allocation20 + $0xe8] ss:$28 sps:$4 sm:$0xff]  }
 0x2b3   :  { %7157 = vmatprep.subr.bf16.mxu1 %v7400_v13 }
 0x2b6   :  { %7158 = vmatpush3.bf16.msra.mxu1 %v7401_v16 }
 0x2b7   :  { %7159 = vmatprep.subr.bf16.mxu1 %v7402_v17 }
 0x2ba   :  { %7160 = vmatpush3.bf16.msra.mxu1 %v7403_v18 }
 0x2bb   :  { %7161 = vmatprep.subr.bf16.mxu1 %v7404_v19 }
 0x2be   :  { %7162 = vmatpush3.bf16.msra.mxu1 %v7405_v20  ;;  %v7450_v20 = vld [vmem:[#allocation17] ss:$16 sps:$4 sm:$0x1f]  }
 0x2bf   :  { %7163 = vmatprep.subr.bf16.mxu1 %v7406_v59 }
 0x2c2   :  { %7164 = vmatpush3.bf16.msra.mxu1 %v7407_v21 }
 0x2c3   :  { %7165 = vmatprep.subr.bf16.mxu1 %v7408_v24 }
 0x2c6   :  { %7166 = vmatpush3.bf16.msra.mxu1 %v7409_v25  ;;  %v4022_v25 = vpop.permute.xlu0 %4021 }
 0x2c7   :  { %7167 = vmatprep.subr.bf16.mxu1 %v7410_v29  ;;  %vm4023_vm2 = vcmp.eq.s32.totalorder %v4019_v14, %v4022_v25  ;;  %v7479_v14 = vld [vmem:[#allocation20 + $0x7c] ss:$28 sps:$4 sm:$0xff]  }
 0x2c8   :  { %v7486_v25 = vld [vmem:[#allocation20 + $0xe0] ss:$28 sps:$4 sm:$0xff]  }
 0x2ca   :  { %7168 = vmatpush3.bf16.msra.mxu1 %v7411_v30 }
 0x2cb   :  { %7169 = vmatprep.subr.bf16.mxu1 %v7412_v34  ;;  %v4059_v34 = vsel %vm4057_vm1, %v7450_v20, 0  ;;  %v7480_v20 = vld [vmem:[#allocation20 + $0xa8] ss:$28 sps:$4 sm:$0xff]  }
 0x2ce   :  { %7170 = vmatpush3.bf16.msra.mxu1 %v7413_v27 }
 0x2cf   :  { %7199 = vmatprep.subr.bf16.mxu1 %v7415_v35  ;;  %v7457_v35 = vld [vmem:[#allocation16 + $0xc] ss:$16 sps:$4 sm:$0xff]  }
 0x2d1   :  { %3656 = vmatmul.mubr.bf16.vlgmr.msra.gmra.mrb[12].mxu1 %v3314_v36 }
 0x2d2   :  { %7200 = vmatpush3.bf16.msra.mxu1 %v7417_v52  ;;  %v8254_v52 = vmov 0.0  }
 0x2d3   :  { %7201 = vmatprep.subr.bf16.mxu1 %v7419_v15  ;;  %v8638_v36 = vsel %vm4023_vm2, 1.0, %v8254_v52  ;;  %v4031_v15 = vld [vmem:[#allocation16 + $0x20] sm:$0x33] }
 0x2d4   :  { %v7509_v52 = vld [vmem:[#allocation20 + $0x194] ss:$28 sps:$4 sm:$0xff]  }
 0x2d6   :  { %7202 = vmatpush3.bf16.msra.mxu1 %v7421_v38  ;;  %v4033_v38 = vpack.c.bf16 %v8638_v36, %v8638_v36 }
 0x2d7   :  { %7203 = vmatprep.subr.bf16.mxu1 %v7423_v40  ;;  %v4032_v40 = vld [vmem:[#allocation16 + $0x28] sm:$0x33] }
 0x2da   :  { %7204 = vmatpush3.bf16.msra.mxu1 %v7425_v41  ;;  %v7452_v41 = vld [vmem:[#allocation16] ss:$16 sps:$4 sm:$0xff]  }
 0x2db   :  { %7205 = vmatprep.subr.bf16.mxu1 %v7427_v39  ;;  %v7455_v39 = vld [vmem:[#allocation16 + $0x8] ss:$16 sps:$4 sm:$0xff]  }
 0x2de   :  { %7206 = vmatpush3.bf16.msra.mxu1 %v7429_v42  ;;  %v6902_v42 = vcombine.high %v4031_v15, %v4031_v15 }
 0x2df   :  { %7207 = vmatprep.subr.bf16.mxu1 %v7431_v37  ;;  %v6901_v37 = vcombine.low %v4031_v15, %v4031_v15  ;;  %v7504_v15 = vld [vmem:[#allocation20 + $0x188] ss:$28 sps:$4 sm:$0xff]  }
 0x2e2   :  { %7208 = vmatpush3.bf16.msra.mxu1 %v7433_v44  ;;  %v6904_v44 = vcombine.high %v4032_v40, %v4032_v40 }
 0x2e3   :  { %7209 = vmatprep.subr.bf16.mxu1 %v7435_v45  ;;  %v6903_v45 = vcombine.low %v4032_v40, %v4032_v40  ;;  %v7512_v40 = vld [vmem:[#allocation20 + $0x1c4] ss:$28 sps:$4 sm:$0xff]  }
 0x2e5   :  { %v4194_v47 = vsel %vm4186_vm4, %v6903_v45, 0  ;;  %v7516_v45 = vld [vmem:[#allocation20 + $0x1f8] ss:$28 sps:$4 sm:$0xff]  }
 0x2e6   :  { %7210 = vmatpush3.bf16.msra.mxu1 %v7437_v46  ;;  %v4188_v46 = vsel %vm4186_vm4, %v6901_v37, 0  ;;  %v7518_v37 = vld [vmem:[#allocation20 + $0x1fc] ss:$28 sps:$4 sm:$0xff]  }
 0x2e7   :  { %7211 = vmatprep.subr.bf16.mxu1 %v7439_v26 }
 0x2ea   :  { %7212 = vmatpush3.bf16.msra.mxu1 %v7441_v49 }
 0x2eb   :  { %7213 = vmatprep.subr.bf16.mxu1 %v7443_v51 }
 0x2ee   :  { %7214 = vmatpush3.bf16.msra.mxu1 %v7445_v55 }
 0x2ef   :  { %6895 = vmatprep.subr.msk.bf16.mxu1 %vm4057_vm1, %v7448_v58 }
 0x364   :  { %v3133_v5 = vpop.f32.mrb[4].mxu0  ;;  %v3297_v7 = vpop.f32.mrb[4].mxu1 }
 0x365   :  { %v7269_v6 = vadd.f32 %v3133_v5, %v639_v1  ;;  %v3135_v8 = vpop.f32.mrb[5].mxu0  ;;  %v7271_v9 = vadd.f32 %v3297_v7, %v647_v2  ;;  %v3299_v11 = vpop.f32.mrb[5].mxu1  ;;  %v7464_v5 = vld [vmem:[#allocation20 + $0x4] ss:$28 sps:$4 sm:$0xff]   ;;  %v7467_v7 = vld [vmem:[#allocation20 + $0xc] ss:$28 sps:$4 sm:$0xff]  }
 0x366   :  { %v7270_v10 = vadd.f32 %v3135_v8, %v643_v3  ;;  %v3137_v13 = vpop.f32.mrb[6].mxu0  ;;  %v7272_v17 = vadd.f32 %v3299_v11, %v651_v4  ;;  %v3301_v18 = vpop.f32.mrb[6].mxu1  ;;  %v7462_v4 = vld [vmem:[#allocation20] ss:$28 sps:$4 sm:$0xff]   ;;  %v7468_v8 = vld [vmem:[#allocation20 + $0x38] ss:$28 sps:$4 sm:$0xff]  }
 0x367   :  { %v3308_v16 = vmax.f32 %v7269_v6, 0.0  ;;  %v3138_v19 = vpop.f32.mrb[7].mxu0  ;;  %v3310_v59 = vmax.f32 %v7271_v9, 0.0  ;;  %v3302_v24 = vpop.f32.mrb[7].mxu1  ;;  %v7465_v6 = vld [vmem:[#allocation20 + $0x8] ss:$28 sps:$4 sm:$0xff]  }
 0x368   :  { %v3309_v21 = vmax.f32 %v7270_v10, 0.0  ;;  %v3311_v28 = vmax.f32 %v7272_v17, 0.0  ;;  %v7470_v9 = vld [vmem:[#allocation20 + $0x3c] ss:$28 sps:$4 sm:$0xff]   ;;  %v7473_v11 = vld [vmem:[#allocation20 + $0x44] ss:$28 sps:$4 sm:$0xff]  }
 0x369   :  { %v3316_v30 = vpack.c.bf16 %v3308_v16, %v3308_v16  ;;  %v3318_v27 = vpack.c.bf16 %v3310_v59, %v3310_v59  ;;  %v7471_v10 = vld [vmem:[#allocation20 + $0x40] ss:$28 sps:$4 sm:$0xff]   ;;  %v7476_v13 = vld [vmem:[#allocation20 + $0x74] ss:$28 sps:$4 sm:$0xff]   ;;  %v7482_v18 = vld [vmem:[#allocation20 + $0xac] ss:$28 sps:$4 sm:$0xff]  }
 0x36a   :  { %v3317_v29 = vpack.c.bf16 %v3309_v21, %v3309_v21  ;;  %v3319_v31 = vpack.c.bf16 %v3311_v28, %v3311_v28  ;;  %v7474_v16 = vld [vmem:[#allocation20 + $0x70] ss:$28 sps:$4 sm:$0xff]   ;;  %v7477_v17 = vld [vmem:[#allocation20 + $0x78] ss:$28 sps:$4 sm:$0xff]   ;;  %v7488_v21 = vld [vmem:[#allocation20 + $0xe4] ss:$28 sps:$4 sm:$0xff]  }
 0x36b   :  { %v7485_v19 = vld [vmem:[#allocation20 + $0xb4] ss:$28 sps:$4 sm:$0xff]   ;;  %v7491_v24 = vld [vmem:[#allocation20 + $0xec] ss:$28 sps:$4 sm:$0xff]   ;;  %v7494_v28 = vld [vmem:[#allocation20 + $0x11c] ss:$28 sps:$4 sm:$0xff]  }
 0x36c   :  { %3958 = vmatprep.mubr.bf16.mxu0 %v3317_v29  ;;  %3998 = vmatprep.mubr.bf16.mxu1 %v3319_v31  ;;  %v7483_v59 = vld [vmem:[#allocation20 + $0xb0] ss:$28 sps:$4 sm:$0xff]   ;;  %v7497_v29 = vld [vmem:[#allocation20 + $0x124] ss:$28 sps:$4 sm:$0xff]  }
 0x36d   :  { %3959 = vmatmul.mubr.bf16.vlgmr.msra.gmra.mrb[8].mxu0 %v3316_v30  ;;  %3999 = vmatmul.mubr.bf16.vlgmr.msra.gmra.mrb[16].mxu1 %v3318_v27  ;;  %v7492_v30 = vld [vmem:[#allocation20 + $0x118] ss:$28 sps:$4 sm:$0xff]   ;;  %v7495_v31 = vld [vmem:[#allocation20 + $0x120] ss:$28 sps:$4 sm:$0xff]  }
 0x36e   :  { %4071 = vmatpush1.bf16.msra.mxu0 %v4059_v34  ;;  %4112 = vmatpush1.bf16.msra.mxu1 %v4065_v12  ;;  %v7500_v34 = vld [vmem:[#allocation20 + $0x154] ss:$28 sps:$4 sm:$0xff]   ;;  %v7503_v27 = vld [vmem:[#allocation20 + $0x15c] ss:$28 sps:$4 sm:$0xff]  }
 0x36f   :  { %4102 = vmatprep.mubr.bf16.mxu0 %v8253_v32  ;;  %4143 = vmatprep.mubr.bf16.mxu1 %v8253_v32  ;;  %v7498_v12 = vld [vmem:[#allocation20 + $0x150] ss:$28 sps:$4 sm:$0xff]  }
 0x370   :  { %4199 = vmatprep.subr.bf16.mxu0 %v7454_v22  ;;  %4240 = vmatprep.subr.bf16.mxu1 %v7457_v35  ;;  %v7501_v22 = vld [vmem:[#allocation20 + $0x158] ss:$28 sps:$4 sm:$0xff]   ;;  %v7506_v35 = vld [vmem:[#allocation20 + $0x18c] ss:$28 sps:$4 sm:$0xff]  }
 0x375   :  { %6894 = vmatmul.mubr.msk.bf16.vlgmr.msra.gmra.mrb[12].mxu0 %vm4006_vm3, %v4033_v38  ;;  %6896 = vmatmul.mubr.msk.bf16.vlgmr.msra.gmra.mrb[20].mxu1 %vm4006_vm3, %v4033_v38  ;;  %v7507_v38 = vld [vmem:[#allocation20 + $0x190] ss:$28 sps:$4 sm:$0xff]  }
 0x376   :  { %4200 = vmatpush1.bf16.msra.mxu0 %v7452_v41  ;;  %4241 = vmatpush1.bf16.msra.mxu1 %v7455_v39  ;;  %v7515_v41 = vld [vmem:[#allocation20 + $0x1cc] ss:$28 sps:$4 sm:$0xff]   ;;  %v7510_v39 = vld [vmem:[#allocation20 + $0x1c0] ss:$28 sps:$4 sm:$0xff]  }
 0x377   :  { %6905 = vmatprep.subr.msk.bf16.mxu0 %vm4186_vm4, %v6902_v42  ;;  %6907 = vmatprep.subr.msk.bf16.mxu1 %vm4186_vm4, %v6904_v44  ;;  %v7513_v42 = vld [vmem:[#allocation20 + $0x1c8] ss:$28 sps:$4 sm:$0xff]  }
 0x378   :  { %4231 = vmatprep.mubr.bf16.mxu0 %v8253_v32  ;;  %4272 = vmatprep.mubr.bf16.mxu1 %v8253_v32  ;;  %v7521_v44 = vld [vmem:[#allocation20 + $0x204] ss:$28 sps:$4 sm:$0xff]  }
 0x37a   :  { %4202 = vmatpush1.bf16.msra.mxu0 %v4188_v46  ;;  %4243 = vmatpush1.bf16.msra.mxu1 %v4194_v47  ;;  %v7519_v46 = vld [vmem:[#allocation20 + $0x200] ss:$28 sps:$4 sm:$0xff]   ;;  %v7524_v47 = vld [vmem:[#allocation20 + $0x234] ss:$28 sps:$4 sm:$0xff]  }
 0x37b   :  { %5760 = vmatprep.subr.bf16.mxu0 %v7464_v5  ;;  %5842 = vmatprep.subr.bf16.mxu1 %v7467_v7  ;;  %v7543_v5 = vld [vmem:[#allocation20 + $0x2e0] ss:$28 sps:$4 sm:$0xff]  }
 0x37c   :  { %v7551_v7 = vld [vmem:[#allocation20 + $0x31c] ss:$28 sps:$4 sm:$0xff]  }
 0x384   :  { %v7149_v26 = vpop.f32.mrb[8].mxu1 }
 0x385   :  { %v7150_v48 = vpop.f32.mrb[9].mxu1 }
 0x386   :  { %v7151_v49 = vadd.f32 %v7150_v48, %v7149_v26  ;;  %v7152_v50 = vpop.f32.mrb[10].mxu1  ;;  %v7527_v26 = vld [vmem:[#allocation20 + $0x23c] ss:$28 sps:$4 sm:$0xff]   ;;  %v7522_v48 = vld [vmem:[#allocation20 + $0x230] ss:$28 sps:$4 sm:$0xff]  }
 0x387   :  { %v7153_v51 = vpop.f32.mrb[11].mxu1  ;;  %v7530_v50 = vld [vmem:[#allocation20 + $0x26c] ss:$28 sps:$4 sm:$0xff]  }
 0x388   :  { %v3618_v58 = vadd.f32 %v7151_v49, %v6822_v54  ;;  %v7525_v49 = vld [vmem:[#allocation20 + $0x238] ss:$28 sps:$4 sm:$0xff]   ;;  %v7528_v54 = vld [vmem:[#allocation20 + $0x268] ss:$28 sps:$4 sm:$0xff]  }
 0x389   :  { %v7533_v51 = vld [vmem:[#allocation20 + $0x274] ss:$28 sps:$4 sm:$0xff]  }
 0x3a4   :  { %v7171_v55 = vpop.f32.mrb[12].mxu1 }
 0x3a5   :  { %v7172_v56 = vpop.f32.mrb[13].mxu1 }
 0x3a6   :  { %v7173_v0 = vadd.f32 %v7172_v56, %v7171_v55  ;;  %v7174_v1 = vpop.f32.mrb[14].mxu1  ;;  %v7531_v55 = vld [vmem:[#allocation20 + $0x270] ss:$28 sps:$4 sm:$0xff]   ;;  %v7536_v56 = vld [vmem:[#allocation20 + $0x2a4] ss:$28 sps:$4 sm:$0xff]  }
 0x3a7   :  { %v7175_v2 = vpop.f32.mrb[15].mxu1  ;;  %v7537_v1 = vld [vmem:[#allocation20 + $0x2a8] ss:$28 sps:$4 sm:$0xff]  }
 0x3a8   :  { %v8648_v3 = vadd.f32 %v7173_v0, %v3618_v58  ;;  %v7539_v58 = vld [vmem:[#allocation20 + $0x2ac] ss:$28 sps:$4 sm:$0xff]   ;;  %v7534_v0 = vld [vmem:[#allocation20 + $0x2a0] ss:$28 sps:$4 sm:$0xff]  }
 0x3a9   :  { %v7542_v2 = vld [vmem:[#allocation20 + $0x2dc] ss:$28 sps:$4 sm:$0xff]  }
 0x3aa   :  { %v4026_v32 = vpack.c.bf16 %v8648_v3, %v8648_v3  ;;  %6354 = vst.msk [vmem:[#allocation26] sm:$0xff] %vm6353_vm5, %v8648_v3 }
 0x3ac   :  { %6906 = vmatmul.mubr.msk.bf16.vlgmr.msra.gmra.mrb[16].mxu0 %vm4182_vm6, %v4026_v32  ;;  %6908 = vmatmul.mubr.msk.bf16.vlgmr.msra.gmra.mrb[24].mxu1 %vm4182_vm6, %v4026_v32  ;;  %v7545_v32 = vld [vmem:[#allocation20 + $0x2e4] ss:$28 sps:$4 sm:$0xff]  }
 0x3ad   :  { %5761 = vmatpush1.bf16.msra.mxu0 %v7462_v4  ;;  %5843 = vmatpush1.bf16.msra.mxu1 %v7465_v6  ;;  %v7540_v4 = vld [vmem:[#allocation20 + $0x2d8] ss:$28 sps:$4 sm:$0xff]  }
 0x3ae   :  { %5762 = vmatprep.subr.bf16.mxu0 %v7470_v9  ;;  %5844 = vmatprep.subr.bf16.mxu1 %v7473_v11  ;;  %v7548_v6 = vld [vmem:[#allocation20 + $0x314] ss:$28 sps:$4 sm:$0xff]  }
 0x3af   :  { %v7549_v9 = vld [vmem:[#allocation20 + $0x318] ss:$28 sps:$4 sm:$0xff]  }
 0x3b0   :  { %v7557_v11 = vld [vmem:[#allocation20 + $0x354] ss:$28 sps:$4 sm:$0xff]  }
 0x3b1   :  { %5763 = vmatpush1.bf16.msra.mxu0 %v7468_v8  ;;  %5845 = vmatpush1.bf16.msra.mxu1 %v7471_v10  ;;  %v7546_v8 = vld [vmem:[#allocation20 + $0x310] ss:$28 sps:$4 sm:$0xff]  }
 0x3b2   :  { %5764 = vmatprep.subr.bf16.mxu0 %v7476_v13  ;;  %5846 = vmatprep.subr.bf16.mxu1 %v7479_v14  ;;  %v7554_v10 = vld [vmem:[#allocation20 + $0x34c] ss:$28 sps:$4 sm:$0xff]  }
 0x3b3   :  { %v7552_v13 = vld [vmem:[#allocation20 + $0x348] ss:$28 sps:$4 sm:$0xff]   ;;  %v7555_v14 = vld [vmem:[#allocation20 + $0x350] ss:$28 sps:$4 sm:$0xff]  }
 0x3b5   :  { %5765 = vmatpush1.bf16.msra.mxu0 %v7474_v16  ;;  %5847 = vmatpush1.bf16.msra.mxu1 %v7477_v17  ;;  %v7560_v16 = vld [vmem:[#allocation20 + $0x384] ss:$28 sps:$4 sm:$0xff]   ;;  %v7563_v17 = vld [vmem:[#allocation20 + $0x38c] ss:$28 sps:$4 sm:$0xff]  }
 0x3b6   :  { %5766 = vmatprep.subr.bf16.mxu0 %v7482_v18  ;;  %5848 = vmatprep.subr.bf16.mxu1 %v7485_v19 }
 0x3b9   :  { %5767 = vmatpush1.bf16.msra.mxu0 %v7480_v20  ;;  %5849 = vmatpush1.bf16.msra.mxu1 %v7483_v59  ;;  %v6855_v20 = vld [vmem:[#allocation14] ss:$0 sm:$0xff] }
 0x3ba   :  { %5768 = vmatprep.subr.bf16.mxu0 %v7488_v21  ;;  %5850 = vmatprep.subr.bf16.mxu1 %v7491_v24 }
 0x3bd   :  { %5769 = vmatpush1.bf16.msra.mxu0 %v7486_v25  ;;  %5851 = vmatpush1.bf16.msra.mxu1 %v7489_v33 }
 0x3be   :  { %5770 = vmatprep.subr.bf16.mxu0 %v7494_v28  ;;  %5852 = vmatprep.subr.bf16.mxu1 %v7497_v29 }
 0x3c1   :  { %5771 = vmatpush1.bf16.msra.mxu0 %v7492_v30  ;;  %5853 = vmatpush1.bf16.msra.mxu1 %v7495_v31 }
 0x3c2   :  { %5772 = vmatprep.subr.bf16.mxu0 %v7500_v34  ;;  %5854 = vmatprep.subr.bf16.mxu1 %v7503_v27 }
 0x3c5   :  { %5773 = vmatpush1.bf16.msra.mxu0 %v7498_v12  ;;  %5855 = vmatpush1.bf16.msra.mxu1 %v7501_v22 }
 0x3c6   :  { %5774 = vmatprep.subr.bf16.mxu0 %v7506_v35  ;;  %5856 = vmatprep.subr.bf16.mxu1 %v7509_v52 }
 0x3c9   :  { %5775 = vmatpush1.bf16.msra.mxu0 %v7504_v15  ;;  %5857 = vmatpush1.bf16.msra.mxu1 %v7507_v38 }
 0x3ca   :  { %5776 = vmatprep.subr.bf16.mxu0 %v7512_v40  ;;  %5858 = vmatprep.subr.bf16.mxu1 %v7515_v41 }
 0x3cd   :  { %5777 = vmatpush1.bf16.msra.mxu0 %v7510_v39  ;;  %5859 = vmatpush1.bf16.msra.mxu1 %v7513_v42  ;;  %v4281_v39 = vld [vmem:[#allocation19] sm:$0xf] }
 0x3ce   :  { %5778 = vmatprep.subr.bf16.mxu0 %v7518_v37  ;;  %5860 = vmatprep.subr.bf16.mxu1 %v7521_v44  ;;  %v4286_v42 = vrot.slane %v4281_v39, %v8604_v57  ;;  %v4294_v37 = vrot.slane %v4281_v39, %v8614_v53 }
 0x3d1   :  { %5779 = vmatpush1.bf16.msra.mxu0 %v7516_v45  ;;  %5861 = vmatpush1.bf16.msra.mxu1 %v7519_v46  ;;  %v4290_v46 = vrot.slane %v4281_v39, %v8595_v43 }
 0x3d2   :  { %5780 = vmatprep.subr.bf16.mxu0 %v7524_v47  ;;  %5862 = vmatprep.subr.bf16.mxu1 %v7527_v26  ;;  %v4298_v47 = vrot.slane %v4281_v39, %v8607_v60  ;;  %v7602_v39 = vld [vmem:[#allocation20 + $0x50c] ss:$28 sps:$4 sm:$0xff]  }
 0x3d5   :  { %5781 = vmatpush1.bf16.msra.mxu0 %v7522_v48  ;;  %5863 = vmatpush1.bf16.msra.mxu1 %v7525_v49 }
 0x3d6   :  { %5782 = vmatprep.subr.bf16.mxu0 %v7530_v50  ;;  %5864 = vmatprep.subr.bf16.mxu1 %v7533_v51 }
 0x3d9   :  { %5783 = vmatpush1.bf16.msra.mxu0 %v7528_v54  ;;  %5865 = vmatpush1.bf16.msra.mxu1 %v7531_v55 }
 0x3da   :  { %5784 = vmatprep.subr.bf16.mxu0 %v7536_v56  ;;  %5866 = vmatprep.subr.bf16.mxu1 %v7539_v58 }
 0x3dd   :  { %5785 = vmatpush1.bf16.msra.mxu0 %v7534_v0  ;;  %5867 = vmatpush1.bf16.msra.mxu1 %v7537_v1 }
 0x3de   :  { %5786 = vmatprep.subr.bf16.mxu0 %v7542_v2  ;;  %5868 = vmatprep.subr.bf16.mxu1 %v7545_v32 }
 0x3e1   :  { %5787 = vmatpush1.bf16.msra.mxu0 %v7540_v4  ;;  %5869 = vmatpush1.bf16.msra.mxu1 %v7543_v5 }
 0x3e2   :  { %5788 = vmatprep.subr.bf16.mxu0 %v7548_v6  ;;  %5870 = vmatprep.subr.bf16.mxu1 %v7551_v7 }
 0x3e5   :  { %5789 = vmatpush1.bf16.msra.mxu0 %v7546_v8  ;;  %5871 = vmatpush1.bf16.msra.mxu1 %v7549_v9  ;;  %v7558_v9 = vld [vmem:[#allocation20 + $0x380] ss:$28 sps:$4 sm:$0xff]  }
 0x3e6   :  { %5790 = vmatprep.subr.bf16.mxu0 %v7554_v10  ;;  %5872 = vmatprep.subr.bf16.mxu1 %v7557_v11  ;;  %v7561_v10 = vld [vmem:[#allocation20 + $0x388] ss:$28 sps:$4 sm:$0xff]  }
 0x3e9   :  { %5791 = vmatpush1.bf16.msra.mxu0 %v7552_v13  ;;  %5873 = vmatpush1.bf16.msra.mxu1 %v7555_v14  ;;  %v7566_v13 = vld [vmem:[#allocation20 + $0x3bc] ss:$28 sps:$4 sm:$0xff]   ;;  %v7569_v14 = vld [vmem:[#allocation20 + $0x3c4] ss:$28 sps:$4 sm:$0xff]  }
 0x3ea   :  { %5801 = vmatprep.subr.bf16.mxu0 %v7560_v16  ;;  %5883 = vmatprep.subr.bf16.mxu1 %v7563_v17  ;;  %v7564_v17 = vld [vmem:[#allocation20 + $0x3b8] ss:$28 sps:$4 sm:$0xff]  }
 0x440   :  { %v7193_v18 = vpop.f32.mrb[8].mxu0  ;;  %v7215_v19 = vpop.f32.mrb[16].mxu1 }
 0x441   :  { %v7194_v59 = vpop.f32.mrb[9].mxu0  ;;  %v7216_v24 = vpop.f32.mrb[17].mxu1 }
 0x442   :  { %v7195_v21 = vadd.f32 %v7194_v59, %v7193_v18  ;;  %v7196_v25 = vpop.f32.mrb[10].mxu0  ;;  %v7217_v33 = vadd.f32 %v7216_v24, %v7215_v19  ;;  %v7218_v28 = vpop.f32.mrb[18].mxu1  ;;  %v7567_v18 = vld [vmem:[#allocation20 + $0x3c0] ss:$28 sps:$4 sm:$0xff]   ;;  %v7572_v19 = vld [vmem:[#allocation20 + $0x3f4] ss:$28 sps:$4 sm:$0xff]  }
 0x443   :  { %v7197_v29 = vpop.f32.mrb[11].mxu0  ;;  %v7219_v31 = vpop.f32.mrb[19].mxu1  ;;  %v7570_v59 = vld [vmem:[#allocation20 + $0x3f0] ss:$28 sps:$4 sm:$0xff]  }
 0x444   :  { %v3961_v30 = vadd.f32 %v7195_v21, %v6855_v20  ;;  %v7575_v20 = vld [vmem:[#allocation20 + $0x3fc] ss:$28 sps:$4 sm:$0xff]   ;;  %v7578_v24 = vld [vmem:[#allocation20 + $0x42c] ss:$28 sps:$4 sm:$0xff]   ;;  %v7581_v25 = vld [vmem:[#allocation20 + $0x434] ss:$28 sps:$4 sm:$0xff]  }
 0x445   :  { %v7573_v21 = vld [vmem:[#allocation20 + $0x3f8] ss:$28 sps:$4 sm:$0xff]   ;;  %v7579_v28 = vld [vmem:[#allocation20 + $0x430] ss:$28 sps:$4 sm:$0xff]   ;;  %v7584_v29 = vld [vmem:[#allocation20 + $0x464] ss:$28 sps:$4 sm:$0xff]  }
 0x446   :  { %v8655_v34 = vadd.f32 %v7217_v33, %v3961_v30  ;;  %v7576_v33 = vld [vmem:[#allocation20 + $0x428] ss:$28 sps:$4 sm:$0xff]   ;;  %v7582_v31 = vld [vmem:[#allocation20 + $0x460] ss:$28 sps:$4 sm:$0xff]  }
 0x447   :  { %v7587_v30 = vld [vmem:[#allocation20 + $0x46c] ss:$28 sps:$4 sm:$0xff]  }
 0x448   :  { %v4007_v27 = vsel %vm4006_vm3, %v8655_v34, -inf  ;;  %v4104_v12 = vpop.f32.mrb[12].mxu0  ;;  %v4145_v22 = vpop.f32.mrb[20].mxu1 }
 0x449   :  { %4008 = vmax.xlane.f32.xlu0 %v4007_v27  ;;  %v4106_v35 = vpop.f32.mrb[13].mxu0  ;;  %v4147_v52 = vpop.f32.mrb[21].mxu1  ;;  %v7585_v27 = vld [vmem:[#allocation20 + $0x468] ss:$28 sps:$4 sm:$0xff]  }
 0x44a   :  { %v4108_v15 = vpop.f32.mrb[14].mxu0  ;;  %v4149_v38 = vpop.f32.mrb[22].mxu1 }
 0x44b   :  { %v4109_v40 = vpop.f32.mrb[15].mxu0  ;;  %v4150_v41 = vpop.f32.mrb[23].mxu1  ;;  %v7596_v15 = vld [vmem:[#allocation20 + $0x4d4] ss:$28 sps:$4 sm:$0xff]   ;;  %v7599_v38 = vld [vmem:[#allocation20 + $0x4dc] ss:$28 sps:$4 sm:$0xff]  }
 0x44c   :  { %v7594_v40 = vld [vmem:[#allocation20 + $0x4d0] ss:$28 sps:$4 sm:$0xff]   ;;  %v7597_v41 = vld [vmem:[#allocation20 + $0x4d8] ss:$28 sps:$4 sm:$0xff]  }
 0x47f   :  { %v4233_v44 = vpop.f32.mrb[16].mxu0  ;;  %v4274_v45 = vpop.f32.mrb[24].mxu1 }
 0x480   :  { %v4234_v26 = vadd.f32 %v4233_v44, %v4104_v12  ;;  %v4275_v48 = vadd.f32 %v4274_v45, %v4145_v22  ;;  %v4235_v49 = vpop.f32.mrb[17].mxu0  ;;  %v4276_v50 = vpop.f32.mrb[25].mxu1  ;;  %v7590_v12 = vld [vmem:[#allocation20 + $0x49c] ss:$28 sps:$4 sm:$0xff]   ;;  %v7593_v22 = vld [vmem:[#allocation20 + $0x4a4] ss:$28 sps:$4 sm:$0xff]  }
 0x481   :  { %v4236_v51 = vadd.f32 %v4235_v49, %v4106_v35  ;;  %v4277_v54 = vadd.f32 %v4276_v50, %v4147_v52  ;;  %v4237_v55 = vpop.f32.mrb[18].mxu0  ;;  %v4278_v56 = vpop.f32.mrb[26].mxu1  ;;  %v7588_v35 = vld [vmem:[#allocation20 + $0x498] ss:$28 sps:$4 sm:$0xff]   ;;  %v7591_v52 = vld [vmem:[#allocation20 + $0x4a0] ss:$28 sps:$4 sm:$0xff]  }
 0x482   :  { %v4303_v58 = vadd.f32 %v4286_v42, %v4234_v26  ;;  %v8663_v0 = vadd.f32 %v4294_v37, %v4275_v48  ;;  %v4238_v1 = vpop.f32.mrb[19].mxu0  ;;  %v4279_v2 = vpop.f32.mrb[27].mxu1  ;;  %v7605_v42 = vld [vmem:[#allocation20 + $0x514] ss:$28 sps:$4 sm:$0xff]   ;;  %v7600_v37 = vld [vmem:[#allocation20 + $0x508] ss:$28 sps:$4 sm:$0xff]  }
 0x483   :  { %v4304_v32 = vadd.f32 %v4290_v46, %v4236_v51  ;;  %v4306_v4 = vadd.f32 %v4298_v47, %v4277_v54  ;;  %v7603_v44 = vld [vmem:[#allocation20 + $0x510] ss:$28 sps:$4 sm:$0xff]   ;;  %v7608_v45 = vld [vmem:[#allocation20 + $0x544] ss:$28 sps:$4 sm:$0xff]   ;;  %v7614_v48 = vld [vmem:[#allocation20 + $0x57c] ss:$28 sps:$4 sm:$0xff]  }
 0x484   :  { %v4307_v5 = vmax.f32 %v4303_v58, 0.0  ;;  %v7611_v46 = vld [vmem:[#allocation20 + $0x54c] ss:$28 sps:$4 sm:$0xff]   ;;  %v7606_v47 = vld [vmem:[#allocation20 + $0x540] ss:$28 sps:$4 sm:$0xff]  }
 0x485   :  { %v4308_v6 = vmax.f32 %v4304_v32, 0.0  ;;  %v4310_v7 = vmax.f32 %v4306_v4, 0.0  ;;  %v7609_v26 = vld [vmem:[#allocation20 + $0x548] ss:$28 sps:$4 sm:$0xff]   ;;  %v7612_v50 = vld [vmem:[#allocation20 + $0x578] ss:$28 sps:$4 sm:$0xff]  }
 0x486   :  { %v8667_v11 = vpack.c.bf16 %v4307_v5, %v4307_v5  ;;  %v7617_v49 = vld [vmem:[#allocation20 + $0x584] ss:$28 sps:$4 sm:$0xff]   ;;  %v7620_v54 = vld [vmem:[#allocation20 + $0x5b4] ss:$28 sps:$4 sm:$0xff]   ;;  %v7623_v55 = vld [vmem:[#allocation20 + $0x5bc] ss:$28 sps:$4 sm:$0xff]  }
 0x487   :  { %v8665_v8 = vpack.c.bf16 %v4308_v6, %v4308_v6  ;;  %v8671_v16 = vpack.c.bf16 %v4310_v7, %v4310_v7  ;;  %v7615_v51 = vld [vmem:[#allocation20 + $0x580] ss:$28 sps:$4 sm:$0xff]   ;;  %v7618_v56 = vld [vmem:[#allocation20 + $0x5b0] ss:$28 sps:$4 sm:$0xff]   ;;  %v7621_v58 = vld [vmem:[#allocation20 + $0x5b8] ss:$28 sps:$4 sm:$0xff]  }
 0x488   :  { %v7626_v1 = vld [vmem:[#allocation20 + $0x5ec] ss:$28 sps:$4 sm:$0xff]   ;;  %v7629_v2 = vld [vmem:[#allocation20 + $0x5f4] ss:$28 sps:$4 sm:$0xff]   ;;  %v7632_v5 = vld [vmem:[#allocation20 + $0x624] ss:$28 sps:$4 sm:$0xff]  }
 0x489   :  { %5792 = vmatprep.mubr.bf16.mxu0 %v8665_v8  ;;  %5874 = vmatprep.mubr.bf16.mxu1 %v8665_v8  ;;  %v7624_v32 = vld [vmem:[#allocation20 + $0x5e8] ss:$28 sps:$4 sm:$0xff]   ;;  %v7627_v4 = vld [vmem:[#allocation20 + $0x5f0] ss:$28 sps:$4 sm:$0xff]   ;;  %v7630_v7 = vld [vmem:[#allocation20 + $0x620] ss:$28 sps:$4 sm:$0xff]  }
 0x48a   :  { %5793 = vmatmul.mubr.bf16.vlgmr.msra.gmra.mrb[20].mxu0 %v8667_v11  ;;  %5875 = vmatmul.mubr.bf16.vlgmr.msra.gmra.mrb[28].mxu1 %v8667_v11  ;;  %v7635_v6 = vld [vmem:[#allocation20 + $0x62c] ss:$28 sps:$4 sm:$0xff]  }
 0x48b   :  { %5802 = vmatpush1.bf16.msra.mxu0 %v7558_v9  ;;  %5884 = vmatpush1.bf16.msra.mxu1 %v7561_v10  ;;  %v7633_v9 = vld [vmem:[#allocation20 + $0x628] ss:$28 sps:$4 sm:$0xff]   ;;  %v7638_v10 = vld [vmem:[#allocation20 + $0x65c] ss:$28 sps:$4 sm:$0xff]  }
 0x48c   :  { %5833 = vmatprep.mubr.bf16.mxu0 %v8671_v16  ;;  %5915 = vmatprep.mubr.bf16.mxu1 %v8671_v16 }
 0x48d   :  { %5803 = vmatprep.subr.bf16.mxu0 %v7566_v13  ;;  %5885 = vmatprep.subr.bf16.mxu1 %v7569_v14  ;;  %v7641_v13 = vld [vmem:[#allocation20 + $0x664] ss:$28 sps:$4 sm:$0xff]   ;;  %v7636_v14 = vld [vmem:[#allocation20 + $0x658] ss:$28 sps:$4 sm:$0xff]  }
 0x48f   :  { %5804 = vmatpush1.bf16.msra.mxu0 %v7564_v17  ;;  %5886 = vmatpush1.bf16.msra.mxu1 %v7567_v18  ;;  %v7639_v17 = vld [vmem:[#allocation20 + $0x660] ss:$28 sps:$4 sm:$0xff]   ;;  %v7644_v18 = vld [vmem:[#allocation20 + $0x694] ss:$28 sps:$4 sm:$0xff]  }
 0x490   :  { %5805 = vmatprep.subr.bf16.mxu0 %v7572_v19  ;;  %5887 = vmatprep.subr.bf16.mxu1 %v7575_v20  ;;  %v7647_v19 = vld [vmem:[#allocation20 + $0x69c] ss:$28 sps:$4 sm:$0xff]   ;;  %v7642_v20 = vld [vmem:[#allocation20 + $0x690] ss:$28 sps:$4 sm:$0xff]  }
 0x493   :  { %5806 = vmatpush1.bf16.msra.mxu0 %v7570_v59  ;;  %5888 = vmatpush1.bf16.msra.mxu1 %v7573_v21  ;;  %v7645_v59 = vld [vmem:[#allocation20 + $0x698] ss:$28 sps:$4 sm:$0xff]   ;;  %v7650_v21 = vld [vmem:[#allocation20 + $0x6cc] ss:$28 sps:$4 sm:$0xff]  }
 0x494   :  { %5807 = vmatprep.subr.bf16.mxu0 %v7578_v24  ;;  %5889 = vmatprep.subr.bf16.mxu1 %v7581_v25  ;;  %v7653_v24 = vld [vmem:[#allocation20 + $0x6d4] ss:$28 sps:$4 sm:$0xff]   ;;  %v7648_v25 = vld [vmem:[#allocation20 + $0x6c8] ss:$28 sps:$4 sm:$0xff]  }
 0x497   :  { %5808 = vmatpush1.bf16.msra.mxu0 %v7576_v33  ;;  %5890 = vmatpush1.bf16.msra.mxu1 %v7579_v28  ;;  %v7651_v33 = vld [vmem:[#allocation20 + $0x6d0] ss:$28 sps:$4 sm:$0xff]   ;;  %v4309_v28 = vmax.f32 %v8663_v0, 0.0  ;;  %v7659_v0 = vld [vmem:[#allocation20 + $0x48] ss:$28 sps:$4 sm:$0xff]  }
 0x498   :  { %5809 = vmatprep.subr.bf16.mxu0 %v7584_v29  ;;  %5891 = vmatprep.subr.bf16.mxu1 %v7587_v30  ;;  %v7656_v29 = vld [vmem:[#allocation20 + $0x14] ss:$28 sps:$4 sm:$0xff]  }
 0x499   :  { %v7657_v30 = vld [vmem:[#allocation20 + $0x1d8] ss:$28 sps:$4 sm:$0xff]  }
 0x49b   :  { %5810 = vmatpush1.bf16.msra.mxu0 %v7582_v31  ;;  %5892 = vmatpush1.bf16.msra.mxu1 %v7585_v27  ;;  %v7654_v31 = vld [vmem:[#allocation20 + $0x10] ss:$28 sps:$4 sm:$0xff]   ;;  %v8678_v27 = vpack.c.bf16 %v4309_v28, %v4309_v28  ;;  %v7712_v28 = vld [vmem:[#allocation20 + $0x600] ss:$28 sps:$4 sm:$0xff]  }
 0x49c   :  { %5811 = vmatprep.subr.bf16.mxu0 %v7590_v12  ;;  %5893 = vmatprep.subr.bf16.mxu1 %v7593_v22  ;;  %v7658_v12 = vld [vmem:[#allocation20 + $0x18] ss:$28 sps:$4 sm:$0xff]   ;;  %v7661_v22 = vld [vmem:[#allocation20 + $0x4c] ss:$28 sps:$4 sm:$0xff]  }
 0x49f   :  { %5812 = vmatpush1.bf16.msra.mxu0 %v7588_v35  ;;  %5894 = vmatpush1.bf16.msra.mxu1 %v7591_v52  ;;  %v7662_v35 = vld [vmem:[#allocation20 + $0x210] ss:$28 sps:$4 sm:$0xff]  }
 0x4a0   :  { %5813 = vmatprep.subr.bf16.mxu0 %v7596_v15  ;;  %5895 = vmatprep.subr.bf16.mxu1 %v7599_v38  ;;  %v7663_v52 = vld [vmem:[#allocation20 + $0x50] ss:$28 sps:$4 sm:$0xff]   ;;  %v7666_v15 = vld [vmem:[#allocation20 + $0x84] ss:$28 sps:$4 sm:$0xff]  }
 0x4a1   :  { %v7667_v38 = vld [vmem:[#allocation20 + $0x248] ss:$28 sps:$4 sm:$0xff]  }
 0x4a3   :  { %5814 = vmatpush1.bf16.msra.mxu0 %v7594_v40  ;;  %5896 = vmatpush1.bf16.msra.mxu1 %v7597_v41  ;;  %v7664_v40 = vld [vmem:[#allocation20 + $0x80] ss:$28 sps:$4 sm:$0xff]   ;;  %v7668_v41 = vld [vmem:[#allocation20 + $0x88] ss:$28 sps:$4 sm:$0xff]  }
 0x4a4   :  { %5815 = vmatprep.subr.bf16.mxu0 %v7602_v39  ;;  %5897 = vmatprep.subr.bf16.mxu1 %v7605_v42  ;;  %v7671_v39 = vld [vmem:[#allocation20 + $0xbc] ss:$28 sps:$4 sm:$0xff]  }
 0x4a5   :  { %v7672_v42 = vld [vmem:[#allocation20 + $0x280] ss:$28 sps:$4 sm:$0xff]  }
 0x4a7   :  { %5816 = vmatpush1.bf16.msra.mxu0 %v7600_v37  ;;  %5898 = vmatpush1.bf16.msra.mxu1 %v7603_v44  ;;  %v7669_v37 = vld [vmem:[#allocation20 + $0xb8] ss:$28 sps:$4 sm:$0xff]   ;;  %v7673_v44 = vld [vmem:[#allocation20 + $0xc0] ss:$28 sps:$4 sm:$0xff]  }
 0x4a8   :  { %5817 = vmatprep.subr.bf16.mxu0 %v7608_v45  ;;  %5899 = vmatprep.subr.bf16.mxu1 %v7611_v46  ;;  %v7676_v45 = vld [vmem:[#allocation20 + $0xf4] ss:$28 sps:$4 sm:$0xff]  }
 0x4a9   :  { %v7677_v46 = vld [vmem:[#allocation20 + $0x2b8] ss:$28 sps:$4 sm:$0xff]  }
 0x4ab   :  { %5818 = vmatpush1.bf16.msra.mxu0 %v7606_v47  ;;  %5900 = vmatpush1.bf16.msra.mxu1 %v7609_v26  ;;  %v7674_v26 = vld [vmem:[#allocation20 + $0xf0] ss:$28 sps:$4 sm:$0xff]  }
 0x4ac   :  { %5819 = vmatprep.subr.bf16.mxu0 %v7614_v48  ;;  %5901 = vmatprep.subr.bf16.mxu1 %v7617_v49  ;;  %v7678_v49 = vld [vmem:[#allocation20 + $0xf8] ss:$28 sps:$4 sm:$0xff]  }
 0x4af   :  { %5820 = vmatpush1.bf16.msra.mxu0 %v7612_v50  ;;  %5902 = vmatpush1.bf16.msra.mxu1 %v7615_v51  ;;  %v7681_v50 = vld [vmem:[#allocation20 + $0x12c] ss:$28 sps:$4 sm:$0xff]  }
 0x4b0   :  { %5821 = vmatprep.subr.bf16.mxu0 %v7620_v54  ;;  %5903 = vmatprep.subr.bf16.mxu1 %v7623_v55  ;;  %v7682_v51 = vld [vmem:[#allocation20 + $0x2f0] ss:$28 sps:$4 sm:$0xff]   ;;  %v7679_v54 = vld [vmem:[#allocation20 + $0x128] ss:$28 sps:$4 sm:$0xff]  }
 0x4b1   :  { %v7683_v55 = vld [vmem:[#allocation20 + $0x130] ss:$28 sps:$4 sm:$0xff]  }
 0x4b3   :  { %5822 = vmatpush1.bf16.msra.mxu0 %v7618_v56  ;;  %5904 = vmatpush1.bf16.msra.mxu1 %v7621_v58  ;;  %v7686_v56 = vld [vmem:[#allocation20 + $0x164] ss:$28 sps:$4 sm:$0xff]  }
 0x4b4   :  { %5823 = vmatprep.subr.bf16.mxu0 %v7626_v1  ;;  %5905 = vmatprep.subr.bf16.mxu1 %v7629_v2  ;;  %v7687_v58 = vld [vmem:[#allocation20 + $0x328] ss:$28 sps:$4 sm:$0xff]   ;;  %v7691_v2 = vld [vmem:[#allocation20 + $0x19c] ss:$28 sps:$4 sm:$0xff]  }
 0x4b5   :  { %v7688_v1 = vld [vmem:[#allocation20 + $0x168] ss:$28 sps:$4 sm:$0xff]  }
 0x4b7   :  { %5824 = vmatpush1.bf16.msra.mxu0 %v7624_v32  ;;  %5906 = vmatpush1.bf16.msra.mxu1 %v7627_v4  ;;  %v7692_v32 = vld [vmem:[#allocation20 + $0x360] ss:$28 sps:$4 sm:$0xff]   ;;  %v7689_v4 = vld [vmem:[#allocation20 + $0x198] ss:$28 sps:$4 sm:$0xff]  }
 0x4b8   :  { %5825 = vmatprep.subr.bf16.mxu0 %v7632_v5  ;;  %5907 = vmatprep.subr.bf16.mxu1 %v7635_v6  ;;  %v7693_v6 = vld [vmem:[#allocation20 + $0x1a0] ss:$28 sps:$4 sm:$0xff]  }
 0x4bb   :  { %5826 = vmatpush1.bf16.msra.mxu0 %v7630_v7  ;;  %5908 = vmatpush1.bf16.msra.mxu1 %v7633_v9  ;;  %v7696_v7 = vld [vmem:[#allocation20 + $0x1d4] ss:$28 sps:$4 sm:$0xff]  }
 0x4bc   :  { %5827 = vmatprep.subr.bf16.mxu0 %v7638_v10  ;;  %5909 = vmatprep.subr.bf16.mxu1 %v7641_v13  ;;  %v7697_v10 = vld [vmem:[#allocation20 + $0x558] ss:$28 sps:$4 sm:$0xff]   ;;  %v7694_v13 = vld [vmem:[#allocation20 + $0x1d0] ss:$28 sps:$4 sm:$0xff]  }
 0x4bf   :  { %5828 = vmatpush1.bf16.msra.mxu0 %v7636_v14  ;;  %5910 = vmatpush1.bf16.msra.mxu1 %v7639_v17  ;;  %v7698_v14 = vld [vmem:[#allocation20 + $0x398] ss:$28 sps:$4 sm:$0xff]   ;;  %v7701_v17 = vld [vmem:[#allocation20 + $0x20c] ss:$28 sps:$4 sm:$0xff]  }
 0x4c0   :  { %5829 = vmatprep.subr.bf16.mxu0 %v7644_v18  ;;  %5911 = vmatprep.subr.bf16.mxu1 %v7647_v19  ;;  %v7702_v18 = vld [vmem:[#allocation20 + $0x590] ss:$28 sps:$4 sm:$0xff]   ;;  %v7699_v19 = vld [vmem:[#allocation20 + $0x208] ss:$28 sps:$4 sm:$0xff]  }
 0x4c3   :  { %5830 = vmatpush1.bf16.msra.mxu0 %v7642_v20  ;;  %5912 = vmatpush1.bf16.msra.mxu1 %v7645_v59  ;;  %v7703_v20 = vld [vmem:[#allocation20 + $0x3d0] ss:$28 sps:$4 sm:$0xff]   ;;  %v7706_v59 = vld [vmem:[#allocation20 + $0x244] ss:$28 sps:$4 sm:$0xff]  }
 0x4c4   :  { %5831 = vmatprep.subr.bf16.mxu0 %v7650_v21  ;;  %5913 = vmatprep.subr.bf16.mxu1 %v7653_v24  ;;  %v7707_v21 = vld [vmem:[#allocation20 + $0x5c8] ss:$28 sps:$4 sm:$0xff]   ;;  %v7704_v24 = vld [vmem:[#allocation20 + $0x240] ss:$28 sps:$4 sm:$0xff]  }
 0x4c7   :  { %5832 = vmatpush1.bf16.msra.mxu0 %v7648_v25  ;;  %5914 = vmatpush1.bf16.msra.mxu1 %v7651_v33  ;;  %v7708_v25 = vld [vmem:[#allocation20 + $0x408] ss:$28 sps:$4 sm:$0xff]   ;;  %v7711_v33 = vld [vmem:[#allocation20 + $0x27c] ss:$28 sps:$4 sm:$0xff]  }
 0x4c8   :  { %5924 = vmatprep.subr.bf16.mxu0 %v7656_v29  ;;  %7221 = vmatprep.subr.bf16.mxu1 %v7657_v30  ;;  %v7709_v29 = vld [vmem:[#allocation20 + $0x278] ss:$28 sps:$4 sm:$0xff]   ;;  %v7713_v30 = vld [vmem:[#allocation20 + $0x440] ss:$28 sps:$4 sm:$0xff]  }
 0x4ca   :  { %5834 = vmatmul.mubr.bf16.vlgmr.msra.gmra.mrb[20].mxu0 %v8678_v27  ;;  %5916 = vmatmul.mubr.bf16.vlgmr.msra.gmra.mrb[28].mxu1 %v8678_v27 }
 0x4cb   :  { %5925 = vmatpush1.bf16.msra.mxu0 %v7654_v31  ;;  %5956 = vmatprep.mubr.bf16.mxu0 %v8665_v8  ;;  %v7716_v31 = vld [vmem:[#allocation20 + $0x2b4] ss:$28 sps:$4 sm:$0xff]  }
 0x4cc   :  { %7222 = vmatpush3.bf16.msra.mxu1 %v7658_v12  ;;  %6038 = vmatprep.mubr.bf16.mxu1 %v8665_v8  ;;  %v7717_v12 = vld [vmem:[#allocation20 + $0x638] ss:$28 sps:$4 sm:$0xff]  }
 0x4cd   :  { %5926 = vmatprep.subr.bf16.mxu0 %v7661_v22  ;;  %7223 = vmatprep.subr.bf16.mxu1 %v7662_v35  ;;  %v7714_v22 = vld [vmem:[#allocation20 + $0x2b0] ss:$28 sps:$4 sm:$0xff]   ;;  %v7718_v35 = vld [vmem:[#allocation20 + $0x478] ss:$28 sps:$4 sm:$0xff]  }
 0x4cf   :  { %5927 = vmatpush1.bf16.msra.mxu0 %v7659_v0  ;;  %v7721_v0 = vld [vmem:[#allocation20 + $0x2ec] ss:$28 sps:$4 sm:$0xff]  }
 0x4d0   :  { %7224 = vmatpush3.bf16.msra.mxu1 %v7663_v52  ;;  %5928 = vmatprep.subr.bf16.mxu0 %v7666_v15  ;;  %v7722_v52 = vld [vmem:[#allocation20 + $0x670] ss:$28 sps:$4 sm:$0xff]   ;;  %v7719_v15 = vld [vmem:[#allocation20 + $0x2e8] ss:$28 sps:$4 sm:$0xff]  }
 0x4d1   :  { %7225 = vmatprep.subr.bf16.mxu1 %v7667_v38  ;;  %v7723_v38 = vld [vmem:[#allocation20 + $0x4b0] ss:$28 sps:$4 sm:$0xff]  }
 0x4d3   :  { %5929 = vmatpush1.bf16.msra.mxu0 %v7664_v40  ;;  %v7726_v40 = vld [vmem:[#allocation20 + $0x324] ss:$28 sps:$4 sm:$0xff]  }
 0x4d4   :  { %7226 = vmatpush3.bf16.msra.mxu1 %v7668_v41  ;;  %5930 = vmatprep.subr.bf16.mxu0 %v7671_v39  ;;  %v7727_v41 = vld [vmem:[#allocation20 + $0x6a8] ss:$28 sps:$4 sm:$0xff]   ;;  %v7724_v39 = vld [vmem:[#allocation20 + $0x320] ss:$28 sps:$4 sm:$0xff]  }
 0x4d5   :  { %7227 = vmatprep.subr.bf16.mxu1 %v7672_v42  ;;  %v7728_v42 = vld [vmem:[#allocation20 + $0x4e8] ss:$28 sps:$4 sm:$0xff]  }
 0x4d6   :  { %v4009_v8 = vpop.xlane.xlu0 %4008 }
 0x4d7   :  { %v4010_v47 = vsub.f32 %v8655_v34, %v4009_v8  ;;  %5931 = vmatpush1.bf16.msra.mxu0 %v7669_v37  ;;  %v7684_v34 = vld [vmem:[#allocation20 + $0x160] ss:$28 sps:$4 sm:$0xff]  }
 0x4d8   :  { %7228 = vmatpush3.bf16.msra.mxu1 %v7673_v44  ;;  %5932 = vmatprep.subr.bf16.mxu0 %v7676_v45  ;;  %v7731_v37 = vld [vmem:[#allocation20 + $0x35c] ss:$28 sps:$4 sm:$0xff]  }
 0x4d9   :  { %v4011_v48 = vmul.f32 1.442695, %v4010_v47  ;;  %7229 = vmatprep.subr.bf16.mxu1 %v7677_v46  ;;  %v7732_v44 = vld [vmem:[#allocation20 + $0x6e0] ss:$28 sps:$4 sm:$0xff]   ;;  %v7729_v45 = vld [vmem:[#allocation20 + $0x358] ss:$28 sps:$4 sm:$0xff]  }
 0x4da   :  { %v7733_v8 = vld [vmem:[#allocation20 + $0x520] ss:$28 sps:$4 sm:$0xff]   ;;  %v7736_v46 = vld [vmem:[#allocation20 + $0x394] ss:$28 sps:$4 sm:$0xff]  }
 0x4db   :  { %7782 = vpow2.f32 %v4011_v48  ;;  %5933 = vmatpush1.bf16.msra.mxu0 %v7674_v26  ;;  %v7734_v47 = vld [vmem:[#allocation20 + $0x390] ss:$28 sps:$4 sm:$0xff]   ;;  %v7737_v48 = vld [vmem:[#allocation20 + $0x3c8] ss:$28 sps:$4 sm:$0xff]  }
 0x4dc   :  { %7230 = vmatpush3.bf16.msra.mxu1 %v7678_v49  ;;  %5934 = vmatprep.subr.bf16.mxu0 %v7681_v50  ;;  %v7739_v26 = vld [vmem:[#allocation20 + $0x3cc] ss:$28 sps:$4 sm:$0xff]   ;;  %v7742_v49 = vld [vmem:[#allocation20 + $0x404] ss:$28 sps:$4 sm:$0xff]  }
 0x4dd   :  { %7231 = vmatprep.subr.bf16.mxu1 %v7682_v51  ;;  %v7740_v50 = vld [vmem:[#allocation20 + $0x400] ss:$28 sps:$4 sm:$0xff]  }
 0x4de   :  { %v7745_v51 = vld [vmem:[#allocation20 + $0x43c] ss:$28 sps:$4 sm:$0xff]  }
 0x4df   :  { %5935 = vmatpush1.bf16.msra.mxu0 %v7679_v54  ;;  %v7743_v54 = vld [vmem:[#allocation20 + $0x438] ss:$28 sps:$4 sm:$0xff]  }
 0x4e0   :  { %7232 = vmatpush3.bf16.msra.mxu1 %v7683_v55  ;;  %5936 = vmatprep.subr.bf16.mxu0 %v7686_v56  ;;  %v7748_v55 = vld [vmem:[#allocation20 + $0x474] ss:$28 sps:$4 sm:$0xff]  }
 0x4e1   :  { %7233 = vmatprep.subr.bf16.mxu1 %v7687_v58  ;;  %v7746_v56 = vld [vmem:[#allocation20 + $0x470] ss:$28 sps:$4 sm:$0xff]   ;;  %v7749_v58 = vld [vmem:[#allocation20 + $0x4a8] ss:$28 sps:$4 sm:$0xff]  }
 0x4e3   :  { %5937 = vmatpush1.bf16.msra.mxu0 %v7684_v34  ;;  %v7754_v34 = vld [vmem:[#allocation20 + $0x4e4] ss:$28 sps:$4 sm:$0xff]  }
 0x4e4   :  { %7234 = vmatpush3.bf16.msra.mxu1 %v7688_v1  ;;  %5938 = vmatprep.subr.bf16.mxu0 %v7691_v2  ;;  %v7757_v1 = vld [vmem:[#allocation20 + $0x51c] ss:$28 sps:$4 sm:$0xff]  }
 0x4e5   :  { %v8685_v5 = vpop.eup %7782  ;;  %7235 = vmatprep.subr.bf16.mxu1 %v7692_v32  ;;  %v7755_v2 = vld [vmem:[#allocation20 + $0x518] ss:$28 sps:$4 sm:$0xff]  }
 0x4e6   :  { %v4013_v9 = vsel %vm4006_vm3, %v8685_v5, 0.0  ;;  %v7760_v32 = vld [vmem:[#allocation20 + $0x554] ss:$28 sps:$4 sm:$0xff]  }
 0x4e7   :  { %4014 = vadd.xlane.f32.xlu1 %v4013_v9  ;;  %5939 = vmatpush1.bf16.msra.mxu0 %v7689_v4  ;;  %v7758_v4 = vld [vmem:[#allocation20 + $0x550] ss:$28 sps:$4 sm:$0xff]   ;;  %v7766_v9 = vld [vmem:[#allocation20 + $0x5c4] ss:$28 sps:$4 sm:$0xff]  }
 0x4e8   :  { %7236 = vmatpush3.bf16.msra.mxu1 %v7693_v6  ;;  %5940 = vmatprep.subr.bf16.mxu0 %v7696_v7  ;;  %v7763_v6 = vld [vmem:[#allocation20 + $0x58c] ss:$28 sps:$4 sm:$0xff]  }
 0x4e9   :  { %7243 = vmatprep.subr.bf16.mxu1 %v7697_v10  ;;  %v7761_v7 = vld [vmem:[#allocation20 + $0x588] ss:$28 sps:$4 sm:$0xff]   ;;  %v7764_v10 = vld [vmem:[#allocation20 + $0x5c0] ss:$28 sps:$4 sm:$0xff]  }
 0x4eb   :  { %6039 = vmatmul.mubr.bf16.vlgmr.msra.gmra.mrb[32].mxu1 %v8667_v11  ;;  %5941 = vmatpush1.bf16.msra.mxu0 %v7694_v13  ;;  %v7769_v13 = vld [vmem:[#allocation20 + $0x5fc] ss:$28 sps:$4 sm:$0xff]  }
 0x4ec   :  { %7244 = vmatpush3.bf16.msra.mxu1 %v7698_v14  ;;  %6078 = vmatprep.mubr.bf16.mxu1 %v8671_v16  ;;  %v7767_v14 = vld [vmem:[#allocation20 + $0x5f8] ss:$28 sps:$4 sm:$0xff]  }
 0x4ed   :  { %5942 = vmatprep.subr.bf16.mxu0 %v7701_v17  ;;  %7245 = vmatprep.subr.bf16.mxu1 %v7702_v18  ;;  %v7772_v17 = vld [vmem:[#allocation20 + $0x634] ss:$28 sps:$4 sm:$0xff]  }
 0x4ee   :  { %v7770_v18 = vld [vmem:[#allocation20 + $0x630] ss:$28 sps:$4 sm:$0xff]  }
 0x4ef   :  { %5943 = vmatpush1.bf16.msra.mxu0 %v7699_v19  ;;  %v7775_v19 = vld [vmem:[#allocation20 + $0x66c] ss:$28 sps:$4 sm:$0xff]  }
 0x4f0   :  { %7246 = vmatpush3.bf16.msra.mxu1 %v7703_v20  ;;  %5944 = vmatprep.subr.bf16.mxu0 %v7706_v59  ;;  %v7773_v20 = vld [vmem:[#allocation20 + $0x668] ss:$28 sps:$4 sm:$0xff]  }
 0x4f1   :  { %7247 = vmatprep.subr.bf16.mxu1 %v7707_v21  ;;  %v7778_v59 = vld [vmem:[#allocation20 + $0x6a4] ss:$28 sps:$4 sm:$0xff]  }
 0x4f2   :  { %v7776_v21 = vld [vmem:[#allocation20 + $0x6a0] ss:$28 sps:$4 sm:$0xff]  }
 0x4f3   :  { %5945 = vmatpush1.bf16.msra.mxu0 %v7704_v24  ;;  %v7781_v24 = vld [vmem:[#allocation20 + $0x6dc] ss:$28 sps:$4 sm:$0xff]  }
 0x4f4   :  { %7248 = vmatpush3.bf16.msra.mxu1 %v7708_v25  ;;  %5946 = vmatprep.subr.bf16.mxu0 %v7711_v33  ;;  %v7779_v25 = vld [vmem:[#allocation20 + $0x6d8] ss:$28 sps:$4 sm:$0xff]  }
 0x4f5   :  { %7249 = vmatprep.subr.bf16.mxu1 %v7712_v28 }
 0x4f7   :  { %5947 = vmatpush1.bf16.msra.mxu0 %v7709_v29 }
 0x4f8   :  { %7250 = vmatpush3.bf16.msra.mxu1 %v7713_v30  ;;  %5948 = vmatprep.subr.bf16.mxu0 %v7716_v31  ;;  %v6287_v31 = vmul.f32 %v8648_v3, %v8648_v3 }
 0x4f9   :  { %7251 = vmatprep.subr.bf16.mxu1 %v7717_v12  ;;  %v8704_v12 = vld [vmem:[#allocation22] sm:$0x7f] }
 0x4fb   :  { %5949 = vmatpush1.bf16.msra.mxu0 %v7714_v22  ;;  %v4580_v22 = vrot.slane %v8704_v12, %v8595_v43 }
 0x4fc   :  { %7252 = vmatpush3.bf16.msra.mxu1 %v7718_v35  ;;  %5950 = vmatprep.subr.bf16.mxu0 %v7721_v0  ;;  %v4588_v35 = vrot.slane %v8704_v12, %v8607_v60 }
 0x4fd   :  { %7253 = vmatprep.subr.bf16.mxu1 %v7722_v52 }
 0x4ff   :  { %5951 = vmatpush1.bf16.msra.mxu0 %v7719_v15 }
 0x500   :  { %7254 = vmatpush3.bf16.msra.mxu1 %v7723_v38  ;;  %5952 = vmatprep.subr.bf16.mxu0 %v7726_v40 }
 0x501   :  { %7255 = vmatprep.subr.bf16.mxu1 %v7727_v41 }
 0x503   :  { %5953 = vmatpush1.bf16.msra.mxu0 %v7724_v39 }
 0x504   :  { %7256 = vmatpush3.bf16.msra.mxu1 %v7728_v42  ;;  %5954 = vmatprep.subr.bf16.mxu0 %v7731_v37 }
 0x505   :  { %7257 = vmatprep.subr.bf16.mxu1 %v7732_v44 }
 0x507   :  { %5955 = vmatpush1.bf16.msra.mxu0 %v7729_v45 }
 0x508   :  { %7258 = vmatpush3.bf16.msra.mxu1 %v7733_v8  ;;  %5965 = vmatprep.subr.bf16.mxu0 %v7736_v46 }
 0x50a   :  { %5957 = vmatmul.mubr.bf16.vlgmr.msra.gmra.mrb[24].mxu0 %v8667_v11  ;;  %v7751_v11 = vld [vmem:[#allocation20 + $0x4ac] ss:$28 sps:$4 sm:$0xff]  }
 0x50b   :  { %6079 = vmatmul.mubr.bf16.vlgmr.msra.gmra.mrb[36].mxu1 %v8678_v27  ;;  %5966 = vmatpush1.bf16.msra.mxu0 %v7734_v47 }
 0x50c   :  { %5997 = vmatprep.mubr.bf16.mxu0 %v8671_v16  ;;  %5967 = vmatprep.subr.bf16.mxu0 %v7739_v26  ;;  %v7752_v16 = vld [vmem:[#allocation20 + $0x4e0] ss:$28 sps:$4 sm:$0xff]  }
 0x50f   :  { %5968 = vmatpush1.bf16.msra.mxu0 %v7737_v48 }
 0x510   :  { %5969 = vmatprep.subr.bf16.mxu0 %v7742_v49 }
 0x513   :  { %5970 = vmatpush1.bf16.msra.mxu0 %v7740_v50 }
 0x514   :  { %5971 = vmatprep.subr.bf16.mxu0 %v7745_v51 }
 0x517   :  { %5972 = vmatpush1.bf16.msra.mxu0 %v7743_v54 }
 0x518   :  { %5973 = vmatprep.subr.bf16.mxu0 %v7748_v55 }
 0x51b   :  { %5974 = vmatpush1.bf16.msra.mxu0 %v7746_v56 }
 0x51c   :  { %5975 = vmatprep.subr.bf16.mxu0 %v7751_v11 }
 0x51f   :  { %5976 = vmatpush1.bf16.msra.mxu0 %v7749_v58 }
 0x520   :  { %5977 = vmatprep.subr.bf16.mxu0 %v7754_v34 }
 0x523   :  { %5978 = vmatpush1.bf16.msra.mxu0 %v7752_v16 }
 0x524   :  { %5979 = vmatprep.subr.bf16.mxu0 %v7757_v1 }
 0x527   :  { %5980 = vmatpush1.bf16.msra.mxu0 %v7755_v2 }
 0x528   :  { %5981 = vmatprep.subr.bf16.mxu0 %v7760_v32  ;;  %v8729_v32 = vld [vmem:[#allocation2] sm:$0xff] }
 0x52b   :  { %5982 = vmatpush1.bf16.msra.mxu0 %v7758_v4  ;;  %v218_v4 = vunpack.c.l.bf16 %v8729_v32 }
 0x52c   :  { %5983 = vmatprep.subr.bf16.mxu0 %v7763_v6  ;;  %v219_v6 = vunpack.c.h.bf16 %v8729_v32  ;;  %v4600_v32 = vrot.slane %v8704_v12, %v646_v62 }
 0x52f   :  { %5984 = vmatpush1.bf16.msra.mxu0 %v7761_v7  ;;  %v8733_v7 = vld [vmem:[#allocation2 + $0x8] sm:$0xff] }
 0x530   :  { %5985 = vmatprep.subr.bf16.mxu0 %v7766_v9  ;;  %v220_v9 = vunpack.c.l.bf16 %v8733_v7 }
 0x533   :  { %5986 = vmatpush1.bf16.msra.mxu0 %v7764_v10 }
 0x534   :  { %5987 = vmatprep.subr.bf16.mxu0 %v7769_v13 }
 0x537   :  { %5988 = vmatpush1.bf16.msra.mxu0 %v7767_v14  ;;  %v6241_v14 = vsub.f32 1.0, %v218_v4 }
 0x538   :  { %5989 = vmatprep.subr.bf16.mxu0 %v7772_v17  ;;  %v8742_v17 = vsub.f32 1.0, %v219_v6 }
 0x53b   :  { %5990 = vmatpush1.bf16.msra.mxu0 %v7770_v18  ;;  %v221_v18 = vunpack.c.h.bf16 %v8733_v7 }
 0x53c   :  { %5991 = vmatprep.subr.bf16.mxu0 %v7775_v19  ;;  %v8747_v19 = vsub.f32 1.0, %v220_v9 }
 0x53f   :  { %5992 = vmatpush1.bf16.msra.mxu0 %v7773_v20 }
 0x540   :  { %5993 = vmatprep.subr.bf16.mxu0 %v7778_v59 }
 0x543   :  { %5994 = vmatpush1.bf16.msra.mxu0 %v7776_v21 }
 0x544   :  { %5995 = vmatprep.subr.bf16.mxu0 %v7781_v24 }
 0x547   :  { %5996 = vmatpush1.bf16.msra.mxu0 %v7779_v25 }
 0x54a   :  { %5998 = vmatmul.mubr.bf16.vlgmr.msra.gmra.mrb[24].mxu0 %v8678_v27  ;;  %v4576_v27 = vrot.slane %v8704_v12, %v8604_v57 }
 0x574   :  { %v4015_v33 = vpop.xlane.xlu1 %4014 }
 0x575   :  { %7784 = vrcp.f32 %v4015_v33 }
 0x57f   :  { %v7785_v28 = vpop.eup %7784 }
 0x580   :  { %v8696_v29 = vmul.f32 %v7785_v28, %v8685_v5  ;;  %v4584_v5 = vrot.slane %v8704_v12, %v8614_v53 }
 0x582   :  { %v6312_v30 = vsel %vm4006_vm3, %v8696_v29, -inf  ;;  %6352 = vst.msk [vmem:[#allocation24] sm:$0xff] %vm4006_vm3, %v8696_v29 }
 0x583   :  { %6313 = vmax.xlane.f32.xlu1 %v6312_v30 }
 0x594   :  { %6289 = vrot.lane.b32.xlu1 %v6287_v31, %s8255_s12 }
 0x59d   :  { %v5835_v0 = vpop.f32.mrb[20].mxu0  ;;  %v5917_v52 = vpop.f32.mrb[28].mxu1 }
 0x59e   :  { %v8714_v15 = vadd.f32 %v5835_v0, %v4576_v27  ;;  %v8716_v38 = vadd.f32 %v5917_v52, %v4584_v5  ;;  %v5837_v40 = vpop.f32.mrb[21].mxu0  ;;  %v5919_v41 = vpop.f32.mrb[29].mxu1 }
 0x59f   :  { %v8718_v39 = vadd.f32 %v5837_v40, %v4580_v22  ;;  %v5839_v57 = vpop.f32.mrb[22].mxu0  ;;  %v5921_v42 = vpop.f32.mrb[30].mxu1  ;;  %v8721_v37 = vadd.f32 %v5919_v41, %v4588_v35 }
 0x5a0   :  { %v6086_v53 = vand.u32 2147483647, %v8714_v15  ;;  %v5840_v43 = vpop.f32.mrb[23].mxu0  ;;  %v6088_v44 = vand.u32 2147483647, %v8716_v38  ;;  %v5922_v60 = vpop.f32.mrb[31].mxu1 }
 0x5a1   :  { %v6087_v8 = vand.u32 2147483647, %v8718_v39  ;;  %v6089_v48 = vand.u32 2147483647, %v8721_v37  ;;  %v6135_v10 = vsub.f32 0.0, %v8714_v15  ;;  %v6137_v13 = vsub.f32 0.0, %v8716_v38 }
 0x5a2   :  { %v6093_v45 = vsub.f32 0.0, %v6086_v53  ;;  %v6095_v46 = vsub.f32 0.0, %v6088_v44  ;;  %v6170_v59 = vmax.f32 %v8714_v15, 0.0  ;;  %vm6205_vm7 = vcmp.ge.f32.partialorder %v8714_v15, 0.0 }
 0x5a3   :  { %v6094_v26 = vsub.f32 0.0, %v6087_v8  ;;  %v6096_v51 = vsub.f32 0.0, %v6089_v48  ;;  %v6172_v21 = vmax.f32 %v8716_v38, 0.0  ;;  %v6136_v24 = vsub.f32 0.0, %v8718_v39 }
 0x5a4   :  { %v6100_v47 = vmul.f32 1.442695, %v6093_v45  ;;  %v6104_v49 = vmul.f32 1.442695, %v6095_v46  ;;  %v6142_v28 = vmax.f32 %v6135_v10, 0.0  ;;  %v6144_v30 = vmax.f32 %v6137_v13, 0.0 }
 0x5a5   :  { %v6102_v50 = vmul.f32 1.442695, %v6094_v26  ;;  %v6106_v54 = vmul.f32 1.442695, %v6096_v51  ;;  %vm6207_vm8 = vcmp.ge.f32.partialorder %v8716_v38, 0.0  ;;  %v6171_v22 = vmax.f32 %v8718_v39, 0.0 }
 0x5a6   :  { %7786 = vpow2.f32 %v6100_v47  ;;  %vm6206_vm9 = vcmp.ge.f32.partialorder %v8718_v39, 0.0  ;;  %v6138_v35 = vsub.f32 0.0, %v8721_v37  ;;  %v6143_v45 = vmax.f32 %v6136_v24, 0.0 }
 0x5a7   :  { %7788 = vpow2.f32 %v6104_v49  ;;  %v6173_v8 = vmax.f32 %v8721_v37, 0.0  ;;  %vm6208_vm10 = vcmp.ge.f32.partialorder %v8721_v37, 0.0 }
 0x5a8   :  { %7790 = vpow2.f32 %v6102_v50 }
 0x5a9   :  { %7792 = vpow2.f32 %v6106_v54 }
 0x5b0   :  { %v7787_v55 = vpop.eup %7786 }
 0x5b1   :  { %v7789_v56 = vpop.eup %7788  ;;  %v6114_v11 = vadd.f32 1.0, %v7787_v55 }
 0x5b2   :  { %v7791_v58 = vpop.eup %7790  ;;  %v6116_v34 = vadd.f32 1.0, %v7789_v56 }
 0x5b3   :  { %7794 = vlog2.f32 %v6114_v11  ;;  %v6115_v16 = vadd.f32 1.0, %v7791_v58  ;;  %v8726_v1 = vpop.eup %7792 }
 0x5b4   :  { %7796 = vrcp.f32 %v6114_v11  ;;  %v6117_v2 = vadd.f32 1.0, %v8726_v1 }
 0x5b5   :  { %7798 = vlog2.f32 %v6116_v34 }
 0x5b6   :  { %7800 = vrcp.f32 %v6116_v34  ;;  %v6145_v34 = vmax.f32 %v6138_v35, 0.0 }
 0x5b7   :  { %7802 = vlog2.f32 %v6115_v16 }
 0x5b8   :  { %7804 = vrcp.f32 %v6115_v16 }
 0x5b9   :  { %7806 = vlog2.f32 %v6117_v2 }
 0x5ba   :  { %7808 = vrcp.f32 %v6117_v2 }
 0x5bd   :  { %v7795_v20 = vpop.eup %7794 }
 0x5be   :  { %v7797_v25 = vpop.eup %7796  ;;  %v6122_v33 = vmul.f32 0.6931472, %v7795_v20  ;;  %v7237_v31 = vpop.f32.mrb[32].mxu1 }
 0x5bf   :  { %v7799_v27 = vpop.eup %7798  ;;  %v6212_v5 = vmul.f32 %v7797_v25, %v7787_v55  ;;  %v7238_v0 = vpop.f32.mrb[33].mxu1 }
 0x5c0   :  { %v7801_v52 = vpop.eup %7800  ;;  %v6149_v40 = vadd.f32 %v6142_v28, %v6122_v33  ;;  %v6177_v41 = vadd.f32 %v6170_v59, %v6122_v33  ;;  %v6126_v57 = vmul.f32 0.6931472, %v7799_v27  ;;  %v8757_v42 = vadd.f32 %v7238_v0, %v7237_v31  ;;  %v7240_v53 = vpop.f32.mrb[34].mxu1 }
 0x5c1   :  { %v7803_v43 = vpop.eup %7802  ;;  %v6219_v44 = vsel %vm6205_vm7, %v7797_v25, %v6212_v5  ;;  %v6214_v60 = vmul.f32 %v7801_v52, %v7789_v56  ;;  %v7241_v46 = vpop.f32.mrb[35].mxu1  ;;  %v6244_v5 = vsub.f32 1.0, %v221_v18 }
 0x5c2   :  { %v7805_v47 = vpop.eup %7804  ;;  %v6156_v26 = vsub.f32 0.0, %v6149_v40  ;;  %v6184_v48 = vsub.f32 0.0, %v6177_v41  ;;  %6345 = vst [vmem:[#allocation23] sm:$0xff] %v6219_v44  ;;  %v6151_v49 = vadd.f32 %v6144_v30, %v6126_v57  ;;  %v6179_v50 = vadd.f32 %v6172_v21, %v6126_v57 }
 0x5c3   :  { %v7807_v51 = vpop.eup %7806  ;;  %v6221_v54 = vsel %vm6207_vm8, %v7801_v52, %v6214_v60  ;;  %v6124_v55 = vmul.f32 0.6931472, %v7803_v43  ;;  %v6213_v11 = vmul.f32 %v7805_v47, %v7791_v58 }
 0x5c4   :  { %v6163_v15 = vmax.f32 %v6156_v26, -100.0  ;;  %v6191_v16 = vmax.f32 %v6184_v48, -100.0  ;;  %v6158_v56 = vsub.f32 0.0, %v6151_v49  ;;  %v6186_v2 = vsub.f32 0.0, %v6179_v50  ;;  %6347 = vst [vmem:[#allocation23 + $0x10] sm:$0xff] %v6221_v54  ;;  %v7809_v10 = vpop.eup %7808 }
 0x5c5   :  { %v6150_v13 = vadd.f32 %v6143_v45, %v6124_v55  ;;  %v6178_v20 = vadd.f32 %v6171_v22, %v6124_v55  ;;  %v6220_v59 = vsel %vm6206_vm9, %v7805_v47, %v6213_v11  ;;  %v6128_v24 = vmul.f32 0.6931472, %v7807_v51 }
 0x5c6   :  { %v6234_v21 = vmul.f32 %v6163_v15, %v218_v4  ;;  %v6248_v38 = vmul.f32 %v6241_v14, %v6191_v16  ;;  %v6165_v25 = vmax.f32 %v6158_v56, -100.0  ;;  %v6193_v33 = vmax.f32 %v6186_v2, -100.0  ;;  %6346 = vst [vmem:[#allocation23 + $0x8] sm:$0xff] %v6220_v59  ;;  %v7836_v15 = vld [vmem:[#allocation2 + $0x18] sm:$0xf] }
 0x5c7   :  { %v6157_v58 = vsub.f32 0.0, %v6150_v13  ;;  %v6185_v28 = vsub.f32 0.0, %v6178_v20  ;;  %v6152_v30 = vadd.f32 %v6145_v34, %v6128_v24  ;;  %v6180_v31 = vadd.f32 %v6173_v8, %v6128_v24 }
 0x5c8   :  { %v6215_v27 = vmul.f32 %v7809_v10, %v8726_v1  ;;  %v6236_v39 = vmul.f32 %v6165_v25, %v220_v9  ;;  %v6250_v52 = vmul.f32 %v8747_v19, %v6193_v33  ;;  %v6255_v57 = vadd.f32 %v6248_v38, %v6234_v21 }
 0x5c9   :  { %v6164_v22 = vmax.f32 %v6157_v58, -100.0  ;;  %v6192_v4 = vmax.f32 %v6185_v28, -100.0  ;;  %v6159_v14 = vsub.f32 0.0, %v6152_v30  ;;  %v6187_v35 = vsub.f32 0.0, %v6180_v31 }
 0x5ca   :  { %v6222_v0 = vsel %vm6208_vm10, %v7809_v10, %v6215_v27  ;;  %v6257_v9 = vadd.f32 %v6250_v52, %v6236_v39  ;;  %v6041_v19 = vadd.f32 %v8757_v42, %v4600_v32  ;;  %v224_v16 = vunpack.c.l.bf16 %v7836_v15 }
 0x5cb   :  { %v6235_v40 = vmul.f32 %v6164_v22, %v219_v6  ;;  %v6249_v37 = vmul.f32 %v8742_v17, %v6192_v4  ;;  %v6166_v41 = vmax.f32 %v6159_v14, -100.0  ;;  %v6194_v1 = vmax.f32 %v6187_v35, -100.0  ;;  %6348 = vst [vmem:[#allocation23 + $0x18] sm:$0xff] %v6222_v0 }
 0x5cc   :  { %v6293_v59 = vmul.f32 1.442695, %v8648_v3  ;;  %v6247_v38 = vsub.f32 1.0, %v224_v16  ;;  %v4592_v0 = vrot.slane %v8704_v12, %v638_v61  ;;  %v4596_v52 = vrot.slane %v8704_v12, %v642_v63 }
 0x5cd   :  { %v6237_v53 = vmul.f32 %v6166_v41, %v221_v18  ;;  %v6251_v43 = vmul.f32 %v6244_v5, %v6194_v1  ;;  %v6256_v44 = vadd.f32 %v6249_v37, %v6235_v40  ;;  %v6286_v5 = vadd.f32 1.0, %v8648_v3 }
 0x5cf   :  { %v6258_v60 = vadd.f32 %v6251_v43, %v6237_v53  ;;  %v6269_v45 = vadd.f32 %v6256_v44, %v6255_v57 }
 0x5d1   :  { %v6270_v8 = vadd.f32 %v6269_v45, %v6257_v9 }
 0x5d3   :  { %v8780_v46 = vadd.f32 %v6270_v8, %v6258_v60 }
 0x5de   :  { %v7259_v6 = vpop.f32.mrb[36].mxu1 }
 0x5df   :  { %v7260_v17 = vpop.f32.mrb[37].mxu1 }
 0x5e0   :  { %v7261_v47 = vadd.f32 %v7260_v17, %v7259_v6  ;;  %v7262_v26 = vpop.f32.mrb[38].mxu1 }
 0x5e1   :  { %v7263_v48 = vpop.f32.mrb[39].mxu1 }
 0x5e2   :  { %v6081_v7 = vadd.f32 %v7261_v47, %v6041_v19 }
 0x5e4   :  { %v6092_v18 = vand.u32 2147483647, %v6081_v7  ;;  %v6141_v55 = vsub.f32 0.0, %v6081_v7  ;;  %v6176_v42 = vmax.f32 %v6081_v7, 0.0  ;;  %vm6211_vm11 = vcmp.ge.f32.partialorder %v6081_v7, 0.0 }
 0x5e6   :  { %v6099_v49 = vsub.f32 0.0, %v6092_v18  ;;  %v6148_v56 = vmax.f32 %v6141_v55, 0.0  ;;  %v7837_v18 = vld [vmem:[#allocation2 + $0x10] sm:$0xff] }
 0x5e8   :  { %v6112_v50 = vmul.f32 1.442695, %v6099_v49  ;;  %v222_v49 = vunpack.c.l.bf16 %v7837_v18 }
 0x5ea   :  { %7810 = vpow2.f32 %v6112_v50 }
 0x5f4   :  { %v7811_v51 = vpop.eup %7810 }
 0x5f5   :  { %v6120_v54 = vadd.f32 1.0, %v7811_v51 }
 0x5f7   :  { %7812 = vrcp.f32 %v6120_v54 }
 0x5f8   :  { %7814 = vlog2.f32 %v6120_v54  ;;  %v223_v54 = vunpack.c.h.bf16 %v7837_v18 }
 0x5f9   :  { %7816 = vpow2.f32 %v6293_v59 }
 0x601   :  { %v7813_v11 = vpop.eup %7812 }
 0x602   :  { %v7815_v34 = vpop.eup %7814  ;;  %v6218_v62 = vmul.f32 %v7813_v11, %v7811_v51 }
 0x603   :  { %v6134_v2 = vmul.f32 0.6931472, %v7815_v34  ;;  %v7817_v14 = vpop.eup %7816 }
 0x604   :  { %v6225_v10 = vsel %vm6211_vm11, %v7813_v11, %v6218_v62 }
 0x605   :  { %6351 = vst.msk [vmem:[#allocation23 + $0x30] sm:$0xff] %vm2644_vm0, %v6225_v10  ;;  %v6155_v13 = vadd.f32 %v6148_v56, %v6134_v2  ;;  %v6183_v20 = vadd.f32 %v6176_v42, %v6134_v2 }
 0x607   :  { %v6162_v24 = vsub.f32 0.0, %v6155_v13  ;;  %v6190_v21 = vsub.f32 0.0, %v6183_v20  ;;  %v6245_v20 = vsub.f32 1.0, %v222_v49 }
 0x609   :  { %v6169_v25 = vmax.f32 %v6162_v24, -100.0  ;;  %v6197_v33 = vmax.f32 %v6190_v21, -100.0 }
 0x60b   :  { %v6240_v58 = vmul.f32 %v6169_v25, %v224_v16  ;;  %v6254_v28 = vmul.f32 %v6247_v38, %v6197_v33 }
 0x60d   :  { %v8788_v30 = vadd.f32 %v6254_v28, %v6240_v58  ;;  %v6246_v58 = vsub.f32 1.0, %v223_v54 }
 0x610   :  { %v8790_v31 = vpop.xlane.xlu1 %6313 }
 0x611   :  { %v6315_v27 = vsub.f32 %v8696_v29, %v8790_v31 }
 0x613   :  { %v6316_v39 = vmul.f32 1.442695, %v6315_v27 }
 0x614   :  { %v6290_v22 = vpop.permute.xlu1 %6289 }
 0x615   :  { %7818 = vpow2.f32 %v6316_v39  ;;  %v6292_v4 = vsub.f32 %v6286_v5, %v6290_v22 }
 0x617   :  { %v6295_v35 = vsub.f32 %v6292_v4, %v7817_v14 }
 0x619   :  { %6298 = vrot.lane.b32.xlu0 %v6295_v35, %s8256_s2 }
 0x61d   :  { %v5999_v40 = vpop.f32.mrb[24].mxu0 }
 0x61e   :  { %v7277_v41 = vadd.f32 %v5999_v40, %v4592_v0  ;;  %v6001_v1 = vpop.f32.mrb[25].mxu0  ;;  %v6274_v40 = vsel %vm2644_vm0, %v8788_v30, 0.0 }
 0x61f   :  { %v7819_v37 = vpop.eup %7818  ;;  %v7278_v3 = vadd.f32 %v6001_v1, %v4596_v52  ;;  %v6003_v57 = vpop.f32.mrb[26].mxu0 }
 0x620   :  { %v6318_v9 = vsel %vm4006_vm3, %v7819_v37, 0.0  ;;  %v6090_v53 = vand.u32 2147483647, %v7277_v41  ;;  %v6004_v43 = vpop.f32.mrb[27].mxu0  ;;  %v6139_v6 = vsub.f32 0.0, %v7277_v41  ;;  %v6174_v7 = vmax.f32 %v7277_v41, 0.0 }
 0x621   :  { %6319 = vadd.xlane.f32.xlu1 %v6318_v9  ;;  %v6091_v44 = vand.u32 2147483647, %v7278_v3  ;;  %v6140_v19 = vsub.f32 0.0, %v7278_v3  ;;  %vm6209_vm12 = vcmp.ge.f32.partialorder %v7277_v41, 0.0  ;;  %v6175_v62 = vmax.f32 %v7278_v3, 0.0 }
 0x622   :  { %v6097_v60 = vsub.f32 0.0, %v6090_v53  ;;  %v6146_v48 = vmax.f32 %v6139_v6, 0.0  ;;  %vm6210_vm13 = vcmp.ge.f32.partialorder %v7278_v3, 0.0 }
 0x623   :  { %v6098_v45 = vsub.f32 0.0, %v6091_v44  ;;  %v6147_v56 = vmax.f32 %v6140_v19, 0.0 }
 0x624   :  { %v6108_v8 = vmul.f32 1.442695, %v6097_v60 }
 0x625   :  { %v6110_v61 = vmul.f32 1.442695, %v6098_v45 }
 0x626   :  { %7820 = vpow2.f32 %v6108_v8 }
 0x627   :  { %7822 = vpow2.f32 %v6110_v61 }
 0x630   :  { %v7821_v23 = vpop.eup %7820 }
 0x631   :  { %v7823_v63 = vpop.eup %7822  ;;  %v6118_v12 = vadd.f32 1.0, %v7821_v23 }
 0x632   :  { %v6119_v32 = vadd.f32 1.0, %v7823_v63 }
 0x633   :  { %7824 = vlog2.f32 %v6118_v12 }
 0x634   :  { %7826 = vrcp.f32 %v6118_v12 }
 0x635   :  { %7828 = vrcp.f32 %v6119_v32 }
 0x636   :  { %7830 = vlog2.f32 %v6119_v32 }
 0x63d   :  { %v7825_v17 = vpop.eup %7824 }
 0x63e   :  { %v7827_v47 = vpop.eup %7826  ;;  %v6130_v26 = vmul.f32 0.6931472, %v7825_v17 }
 0x63f   :  { %v7829_v50 = vpop.eup %7828  ;;  %v6216_v51 = vmul.f32 %v7827_v47, %v7821_v23 }
 0x640   :  { %v7831_v55 = vpop.eup %7830  ;;  %v6153_v11 = vadd.f32 %v6146_v48, %v6130_v26  ;;  %v6181_v34 = vadd.f32 %v6174_v7, %v6130_v26  ;;  %v6217_v15 = vmul.f32 %v7829_v50, %v7823_v63 }
 0x641   :  { %v6223_v16 = vsel %vm6209_vm12, %v7827_v47, %v6216_v51  ;;  %v6132_v42 = vmul.f32 0.6931472, %v7831_v55 }
 0x642   :  { %v6160_v2 = vsub.f32 0.0, %v6153_v11  ;;  %v6188_v10 = vsub.f32 0.0, %v6181_v34  ;;  %6349 = vst [vmem:[#allocation23 + $0x20] sm:$0xff] %v6223_v16  ;;  %v6224_v13 = vsel %vm6210_vm13, %v7829_v50, %v6217_v15 }
 0x643   :  { %6350 = vst [vmem:[#allocation23 + $0x28] sm:$0xff] %v6224_v13  ;;  %v6154_v59 = vadd.f32 %v6147_v56, %v6132_v42  ;;  %v6182_v24 = vadd.f32 %v6175_v62, %v6132_v42 }
 0x644   :  { %v6167_v21 = vmax.f32 %v6160_v2, -100.0  ;;  %v6195_v38 = vmax.f32 %v6188_v10, -100.0 }
 0x645   :  { %v6161_v25 = vsub.f32 0.0, %v6154_v59  ;;  %v6189_v33 = vsub.f32 0.0, %v6182_v24 }
 0x646   :  { %v6238_v28 = vmul.f32 %v6167_v21, %v222_v49  ;;  %v6252_v27 = vmul.f32 %v6245_v20, %v6195_v38 }
 0x647   :  { %v6168_v39 = vmax.f32 %v6161_v25, -100.0  ;;  %v6196_v5 = vmax.f32 %v6189_v33, -100.0 }
 0x648   :  { %v6259_v22 = vadd.f32 %v6252_v27, %v6238_v28 }
 0x649   :  { %v6239_v4 = vmul.f32 %v6168_v39, %v223_v54  ;;  %v6253_v14 = vmul.f32 %v6246_v58, %v6196_v5 }
 0x64a   :  { %v6272_v35 = vadd.f32 %v8780_v46, %v6259_v22 }
 0x64b   :  { %v6260_v0 = vadd.f32 %v6253_v14, %v6239_v4 }
 0x64d   :  { %v6273_v52 = vadd.f32 %v6272_v35, %v6260_v0 }
 0x64f   :  { %v6275_v37 = vadd.f32 %v6274_v40, %v6273_v52 }
 0x651   :  { %6276 = vadd.xlane.f32.xlu0 %v6275_v37 }
 0x68b   :  { %v6299_v41 = vpop.permute.xlu0 %6298 }
 0x68c   :  { %v6301_v1 = vsel %vm4182_vm6, %v6299_v41, 0.0 }
 0x68d   :  { %6302 = vadd.xlane.f32.xlu1 %v6301_v1 }
 0x6ae   :  { %v6320_v3 = vpop.xlane.xlu1 %6319 }
 0x6af   :  { %7832 = vlog2.f32 %v6320_v3 }
 0x6b9   :  { %v7833_v57 = vpop.eup %7832 }
 0x6ba   :  { %v6322_v9 = vmul.f32 0.6931472, %v7833_v57 }
 0x6bc   :  { %v6323_v53 = vadd.f32 %v6322_v9, %v8790_v31 }
 0x6be   :  { %v6325_v43 = vsub.f32 %v8696_v29, %v6323_v53 }
 0x6c0   :  { %v6326_v46 = vmul.f32 %v8638_v36, %v6325_v43 }
 0x6c2   :  { %v6327_v44 = vsel %vm4006_vm3, %v6326_v46, 0.0 }
 0x6c3   :  { %6328 = vadd.xlane.f32.xlu1 %v6327_v44 }
 0x6de   :  { %v6277_v30 = vpop.xlane.xlu0 %6276 }
 0x6df   :  { %v6278_v60 = vrot.slane %v6277_v30, 4 }
 0x6e1   :  { %v6279_v45 = vadd.f32 %v6278_v60, %v6277_v30 }
 0x6e3   :  { %v6280_v8 = vrot.slane %v6279_v45, 2 }
 0x6e5   :  { %v6281_v61 = vadd.f32 %v6280_v8, %v6279_v45 }
 0x6e7   :  { %v6282_v23 = vrot.slane %v6281_v61, 1 }
 0x6e9   :  { %v6283_v63 = vadd.f32 %v6282_v23, %v6281_v61 }
 0x6eb   :  { %7339 = vpush %v6283_v63 }
 0x6ec   :  { %8135 = shalt.err (!%p8132_p10)
}
 0x6ed   :  { %s8136_s1 = scalar_lea.hbm %s8872_s14, 128 }
 0x6ee   :  { %p8137_p11 = scmp.ne.s32.totalorder %s8872_s14, %s8136_s1  ;;  %p8140_p12 = scmp.lt.u32.totalorder %s8136_s1, %s8872_s14 }
 0x6f0   :  { %p8142_p13 = pnand %p8140_p12, %p8137_p11 }
 0x6f2   :  { %8145 = shalt.err (!%p8142_p13)
}
 0x6f3   :  { %6376 = dma.vmem_to_hbm [thread:$0]  %s6374_s25, 128, %s8872_s14, [#allocation25]  }
 0x6f4   :  { %s8146_s5 = scalar_lea.vmem %s6364_s3, 896  ;;  %p8151_p1 = scmp.lt.s32.totalorder %s6364_s3, %s6364_s3 }
 0x6f5   :  { %p8147_p0 = scmp.ne.s32.totalorder %s6364_s3, %s8146_s5  ;;  %p8152_p2 = scmp.lt.s32.totalorder %s8146_s5, %s8146_s5 }
 0x6f7   :  { %p8153_p3 = por %p8152_p2, %p8151_p1 }
 0x6f9   :  { %p8154_p4 = pnand %p8153_p3, %p8147_p0 }
 0x6fb   :  { %8157 = shalt.err (!%p8154_p4)
}
 0x6fc   :  { %s8158_s30 = scalar_lea.hbm %s8871_s13, 896 }
 0x6fd   :  { %p8159_p5 = scmp.ne.s32.totalorder %s8871_s13, %s8158_s30  ;;  %p8162_p6 = scmp.lt.u32.totalorder %s8158_s30, %s8871_s13 }
 0x6ff   :  { %p8164_p7 = pnand %p8162_p6, %p8159_p5 }
 0x701   :  { %8167 = shalt.err (!%p8164_p7)
}
 0x702   :  { %6366 = dma.vmem_to_hbm [thread:$0]  %s6364_s3, 896, %s8871_s13, [#allocation4]  }
 0x703   :  { %s8259_s10 = smov [#allocation26]  }
 0x704   :  { %s6383_s6 = sshll.u32 %s8259_s10, 4  ;;  %s6384_s6 = int_to_ptr.vmem [resolvable:$true] %s6383_s6 }
 0x705   :  { %s8168_s12 = scalar_lea.vmem %s6384_s6, 128  ;;  %p8173_p9 = scmp.lt.s32.totalorder %s6384_s6, %s6384_s6 }
 0x706   :  { %p8169_p8 = scmp.ne.s32.totalorder %s6384_s6, %s8168_s12  ;;  %p8174_p10 = scmp.lt.s32.totalorder %s8168_s12, %s8168_s12 }
 0x708   :  { %p8175_p11 = por %p8174_p10, %p8173_p9 }
 0x70a   :  { %p8176_p12 = pnand %p8175_p11, %p8169_p8 }
 0x71a   :  { %v6303_v36 = vpop.xlane.xlu1 %6302 }
 0x71b   :  { %v6304_v29 = vrot.slane %v6303_v36, 4 }
 0x71d   :  { %v6305_v31 = vadd.f32 %v6304_v29, %v6303_v36 }
 0x71f   :  { %v6306_v12 = vrot.slane %v6305_v31, 2 }
 0x720   :  { %8179 = shalt.err (!%p8176_p12)
}
 0x721   :  { %s8180_s25 = scalar_lea.hbm %s8873_s15, 128 }
 0x722   :  { %p8181_p13 = scmp.ne.s32.totalorder %s8873_s15, %s8180_s25  ;;  %p8184_p0 = scmp.lt.u32.totalorder %s8180_s25, %s8873_s15 }
 0x724   :  { %p8186_p1 = pnand %p8184_p0, %p8181_p13 }
 0x726   :  { %8189 = shalt.err (!%p8186_p1)
}
 0x727   :  { %6386 = dma.vmem_to_hbm [thread:$0]  %s6384_s6, 128, %s8873_s15, [#allocation25]   ;;  %v6307_v32 = vadd.f32 %v6306_v12, %v6305_v31 }
 0x728   :  { %s7340_s1 = spop %7339  ;;  %s8260_s22 = smov [#allocation27]  }
 0x729   :  { %v6308_v6 = vrot.slane %v6307_v32, 1  ;;  %s6285_s9 = ssub.f32 0.0, %s7340_s1  ;;  %s6393_s30 = sshll.u32 %s8260_s22, 4  ;;  %s6394_s30 = int_to_ptr.vmem [resolvable:$true] %s6393_s30 }
 0x72a   :  { %s8190_s7 = scalar_lea.vmem %s6394_s30, 128  ;;  %p8195_p3 = scmp.lt.s32.totalorder %s6394_s30, %s6394_s30 }
 0x72b   :  { %v6309_v17 = vadd.f32 %v6308_v6, %v6307_v32  ;;  %p8191_p2 = scmp.ne.s32.totalorder %s6394_s30, %s8190_s7  ;;  %p8196_p4 = scmp.lt.s32.totalorder %s8190_s7, %s8190_s7 }
 0x72d   :  { %7341 = vpush %v6309_v17  ;;  %p8197_p5 = por %p8196_p4, %p8195_p3 }
 0x72f   :  { %p8198_p6 = pnand %p8197_p5, %p8191_p2 }
 0x750   :  { %v6329_v19 = vpop.xlane.xlu1 %6328 }
 0x751   :  { %v6330_v47 = vrot.slane %v6329_v19, 4 }
 0x753   :  { %v6331_v26 = vadd.f32 %v6330_v47, %v6329_v19 }
 0x755   :  { %v6332_v48 = vrot.slane %v6331_v26, 2 }
 0x757   :  { %v6333_v7 = vadd.f32 %v6332_v48, %v6331_v26 }
 0x759   :  { %v6334_v18 = vrot.slane %v6333_v7, 1 }
 0x75b   :  { %v6335_v49 = vadd.f32 %v6334_v18, %v6333_v7 }
 0x75d   :  { %7343 = vpush %v6335_v49 }
 0x75e   :  { %s7342_s4 = spop %7341 }
 0x75f   :  { %s6311_s28 = smul.f32 -0.5, %s7342_s4 }
 0x761   :  { %s6341_s8 = sadd.f32 %s6311_s28, %s6285_s9 }
 0x763   :  { %s6342_s5 = smul.f32 0.9, %s6341_s8 }
 0x78e   :  { %s7344_s18 = spop %7343 }
 0x78f   :  { %s6337_s20 = ssub.f32 0.0, %s7344_s18 }
 0x791   :  { %s6340_s15 = smul.f32 0.125, %s6337_s20 }
 0x793   :  { %s6343_s27 = smul.f32 0.1, %s6340_s15 }
 0x795   :  { %s6344_s17 = sadd.f32 %s6343_s27, %s6342_s5 }
 0x797   :  { %v6355_v50 = vstv %s6344_s17 }
 0x798   :  { %6356 = vst [vmem:[#allocation27] sm:$0xff] %v6355_v50 }
 0x799   :  { %8201 = shalt.err (!%p8198_p6)
}
 0x79a   :  { %s8202_s14 = scalar_lea.hbm %s8874_s16, 128 }
 0x79b   :  { %p8203_p7 = scmp.ne.s32.totalorder %s8874_s16, %s8202_s14  ;;  %p8206_p8 = scmp.lt.u32.totalorder %s8202_s14, %s8874_s16 }
 0x79d   :  { %p8208_p9 = pnand %p8206_p8, %p8203_p7 }
 0x79f   :  { %8211 = shalt.err (!%p8208_p9)
}
 0x7a0   :  { %6396 = dma.vmem_to_hbm [thread:$0]  %s6394_s30, 128, %s8874_s16, [#allocation28]  }
 0x7a1   :  { %8226 = dma.done.wait [#allocation4], 896  }
 0x7a2   :  { %8227 = vsyncadd [#allocation4], 4294966400 }
 0x7a3   :  { %8228 = dma.done.wait [#allocation25], 256  }
 0x7a4   :  { %8229 = vsyncadd [#allocation25], 4294967040 }
 0x7a5   :  { %8230 = dma.done.wait [#allocation28], 128  }
 0x7a6   :  { %8231 = vsyncadd [#allocation28], 4294967168 }
 0x7a7   :  { %6409 = vsyncpa [#allocation3], 1 }
 0x7a8   :  { %6410 = vsyncpa [#allocation6], 1 }
 0x7a9   :  { %6411 = vsyncpa [#allocation9], 1 }
 0x7aa   :  { %6412 = vsyncpa [#allocation12], 1 }
 0x7ab   :  { %6413 = vsyncpa [#allocation15], 1 }
 0x7ac   :  { %6414 = vsyncpa [#allocation18], 1 }
 0x7ad   :  { %6415 = vsyncpa [#allocation21], 1 }
 0x7ae   :  { %6416 = vsyncpa [#allocation4], 1 }
 0x7af   :  { %6417 = vsyncpa [#allocation25], 1 }
 0x7b0   :  { %6418 = vsyncpa [#allocation28], 1 }

</bundles_post_ra>
